<compile_context>
chip_gen: v7x
topology: tpu7x:2x2x1
jax: 0.10.0
libtpu: 0.0.40
codegen_flags: <defaults>
</compile_context>

<pallas_src>
import jax
import jax.numpy as jnp
from jax.experimental import pallas as pl
from jax.experimental.pallas import tpu as pltpu

EPS = 1e-5
HIDDEN = 800
LANE = 128


def _round_up(n, m):
    return (n + m - 1) // m * m


def mlp_kernel(x_ref,
               w1_ref, b1_ref, g1_ref, be1_ref,
               w2_ref, b2_ref, g2_ref, be2_ref,
               w3_ref, b3_ref, g3_ref, be3_ref,
               w4_ref, b4_ref,
               out_ref):
    """One grid step = one full BatchNorm batch.
    Fused: 3 x (Linear -> BatchNorm(batch stats) -> ReLU) -> Linear."""

    inv_n = 1.0 / x_ref.shape[0]

    def linear(h, w_ref, b_ref):
        # bf16 x bf16 on the MXU, f32 accumulation, f32 bias add.
        return jnp.dot(h.astype(jnp.bfloat16), w_ref[...],
                       preferred_element_type=jnp.float32) + b_ref[...]

    def bn_relu(h, g_ref, be_ref):
        # Single-pass batch norm: sum and sum-of-squares, then fold
        # gamma * rsqrt(var + eps) and (beta - mean * scale) into one scale/shift.
        s1 = jnp.sum(h, axis=0, keepdims=True)
        s2 = jnp.sum(h * h, axis=0, keepdims=True)
        mean = s1 * inv_n
        var = jnp.maximum(s2 * inv_n - mean * mean, 0.0)
        scale = g_ref[...] * jax.lax.rsqrt(var + EPS)
        shift = be_ref[...] - mean * scale
        return jnp.maximum(h * scale + shift, 0.0)

    h = x_ref[...]
    h = bn_relu(linear(h, w1_ref, b1_ref), g1_ref, be1_ref)
    h = bn_relu(linear(h, w2_ref, b2_ref), g2_ref, be2_ref)
    h = bn_relu(linear(h, w3_ref, b3_ref), g3_ref, be3_ref)
    out_ref[...] = linear(h, w4_ref, b4_ref).astype(out_ref.dtype)


def _pad_params(params, in_features):
    """Lane-align feature dims and cast weight matrices to bf16.
    Padded weight rows/cols are zero, padded beta is zero, padded gamma is one,
    so padded hidden columns stay exactly 0 through BN + ReLU."""
    f_pad = _round_up(in_features, LANE)
    h_pad = _round_up(HIDDEN, LANE)
    o_pad = _round_up(params["w4"].shape[1], LANE)

    def pad_w(w, rows, cols):
        return jnp.pad(w, ((0, rows - w.shape[0]),
                           (0, cols - w.shape[1]))).astype(jnp.bfloat16)

    def pad_v(v, cols, fill=0.0):
        return jnp.pad(v, ((0, 0), (0, cols - v.shape[1])),
                       constant_values=fill).astype(jnp.float32)

    padded = dict(
        w1=pad_w(params["w1"], f_pad, h_pad),
        b1=pad_v(params["b1"], h_pad),
        g1=pad_v(params["g1"], h_pad, 1.0),
        be1=pad_v(params["be1"], h_pad),
        w2=pad_w(params["w2"], h_pad, h_pad),
        b2=pad_v(params["b2"], h_pad),
        g2=pad_v(params["g2"], h_pad, 1.0),
        be2=pad_v(params["be2"], h_pad),
        w3=pad_w(params["w3"], h_pad, h_pad),
        b3=pad_v(params["b3"], h_pad),
        g3=pad_v(params["g3"], h_pad, 1.0),
        be3=pad_v(params["be3"], h_pad),
        w4=pad_w(params["w4"], h_pad, o_pad),
        b4=pad_v(params["b4"], o_pad),
    )
    return padded, f_pad, h_pad, o_pad


_PARAM_ORDER = ("w1", "b1", "g1", "be1",
                "w2", "b2", "g2", "be2",
                "w3", "b3", "g3", "be3",
                "w4", "b4")


def mlp_forward(x_nchw, params, *, bn_batch=None):
    """x_nchw: [B, C, H, W] float32.  Returns logits [B, out_classes] float32.

    bn_batch: rows per BatchNorm batch.  Default (None) = whole input batch in one
    grid step, which matches a single nn.Module forward().  If B is a multiple of
    bn_batch, each group of bn_batch rows is an independent forward pass (the groups
    are sharded across TensorCores on v7x)."""
    B = x_nchw.shape[0]
    x_flat = x_nchw.reshape(B, -1).astype(jnp.float32)   # nn.Flatten (row-major)
    in_features = x_flat.shape[1]
    out_classes = params["w4"].shape[1]

    if bn_batch is None:
        bn_batch = B
    assert bn_batch >= 2 and B % bn_batch == 0, "BatchNorm needs >=2 rows per group"
    num_groups = B // bn_batch

    padded, f_pad, h_pad, o_pad = _pad_params(params, in_features)
    if f_pad != in_features:
        x_flat = jnp.pad(x_flat, ((0, 0), (0, f_pad - in_features)))

    def resident(arr):
        # Full-array block, constant index across the (parallel) group axis:
        # weights / BN params stay resident in VMEM, never re-DMA'd per group.
        return pl.BlockSpec(arr.shape, lambda g: (0, 0))

    in_specs = [pl.BlockSpec((bn_batch, f_pad), lambda g: (g, 0))]
    in_specs += [resident(padded[k]) for k in _PARAM_ORDER]

    out = pl.pallas_call(
        mlp_kernel,
        out_shape=jax.ShapeDtypeStruct((B, o_pad), jnp.float32),
        grid_spec=pltpu.PrefetchScalarGridSpec(
            num_scalar_prefetch=0,
            grid=(num_groups,),
            in_specs=in_specs,
            out_specs=pl.BlockSpec((bn_batch, o_pad), lambda g: (g, 0)),
        ),
        compiler_params=pltpu.CompilerParams(
            dimension_semantics=("parallel",),   # shards groups over v7x's 2 TCs
            vmem_limit_bytes=32 << 20,           # working set ~10 MiB; safe on v7x
        ),
    )(x_flat, *[padded[k] for k in _PARAM_ORDER])

    return out[:, :out_classes]


def mlp_reference(x_nchw, params):
    """Pure-JAX reference with identical bf16 weight / activation casts."""
    B = x_nchw.shape[0]
    h = x_nchw.reshape(B, -1).astype(jnp.float32)

    def lin(h, w, b):
        return jnp.dot(h.astype(jnp.bfloat16), w.astype(jnp.bfloat16),
                       preferred_element_type=jnp.float32) + b

    def bn_relu(h, g, be):
        mean = jnp.mean(h, axis=0, keepdims=True)
        var = jnp.mean((h - mean) ** 2, axis=0, keepdims=True)
        return jnp.maximum((h - mean) * jax.lax.rsqrt(var + EPS) * g + be, 0.0)

    h = bn_relu(lin(h, params["w1"], params["b1"]), params["g1"], params["be1"])
    h = bn_relu(lin(h, params["w2"], params["b2"]), params["g2"], params["be2"])
    h = bn_relu(lin(h, params["w3"], params["b3"]), params["g3"], params["be3"])
    return lin(h, params["w4"], params["b4"])


def init_params(key, input_features, out_classes):
    """Deterministic synthetic init.  Linear weights stored as [in, out]
    (i.e. torch weight [out, in] transposed), f32; cast/pad happens in the wrapper."""
    ks = jax.random.split(key, 16)

    def lin(kw, kb, fan_in, fan_out):
        w = jax.random.normal(kw, (fan_in, fan_out), jnp.float32) * 0.02
        b = jax.random.normal(kb, (1, fan_out), jnp.float32) * 0.01
        return w, b

    def bn(kg, kb, feat):
        g = 1.0 + 0.1 * jax.random.normal(kg, (1, feat), jnp.float32)
        be = 0.1 * jax.random.normal(kb, (1, feat), jnp.float32)
        return g, be

    w1, b1 = lin(ks[0], ks[1], input_features, HIDDEN)
    g1, be1 = bn(ks[2], ks[3], HIDDEN)
    w2, b2 = lin(ks[4], ks[5], HIDDEN, HIDDEN)
    g2, be2 = bn(ks[6], ks[7], HIDDEN)
    w3, b3 = lin(ks[8], ks[9], HIDDEN, HIDDEN)
    g3, be3 = bn(ks[10], ks[11], HIDDEN)
    w4, b4 = lin(ks[12], ks[13], HIDDEN, out_classes)

    return dict(w1=w1, b1=b1, g1=g1, be1=be1,
                w2=w2, b2=b2, g2=g2, be2=be2,
                w3=w3, b3=b3, g3=g3, be3=be3,
                w4=w4, b4=b4)


if __name__ == "__main__":
    key = jax.random.PRNGKey(0)
    k_x, k_p = jax.random.split(key)

    B, C, H, W = 8, 4, 16, 16           # batch >= 2 required for batch-norm stats
    input_features = C * H * W           # 1024
    out_classes = 10

    x = jax.random.normal(k_x, (B, C, H, W), jnp.float32)
    params = init_params(k_p, input_features, out_classes)

    out = mlp_forward(x, params)
    jax.block_until_ready(out)

    assert out.shape == (B, out_classes), out.shape
    assert out.dtype == jnp.float32
    assert bool(jnp.all(jnp.isfinite(out)))

    # Loose tolerance: bf16 weights/activations on MXU vs XLA reference.
    ref = mlp_reference(x, params)
    assert bool(jnp.allclose(out, ref, atol=5e-2, rtol=5e-2)), (
        float(jnp.max(jnp.abs(out - ref))))

    print("KERNEL_OK")
</pallas_src>

<mosaic_0001>
module attributes {stable_mosaic.version = 11 : i64} {
  func.func @mlp_kernel(%arg0: i32, %arg1: memref<8x1024xf32, #tpu.memory_space<vmem>>, %arg2: memref<1024x896xbf16, #tpu.memory_space<vmem>>, %arg3: memref<1x896xf32, #tpu.memory_space<vmem>>, %arg4: memref<1x896xf32, #tpu.memory_space<vmem>>, %arg5: memref<1x896xf32, #tpu.memory_space<vmem>>, %arg6: memref<896x896xbf16, #tpu.memory_space<vmem>>, %arg7: memref<1x896xf32, #tpu.memory_space<vmem>>, %arg8: memref<1x896xf32, #tpu.memory_space<vmem>>, %arg9: memref<1x896xf32, #tpu.memory_space<vmem>>, %arg10: memref<896x896xbf16, #tpu.memory_space<vmem>>, %arg11: memref<1x896xf32, #tpu.memory_space<vmem>>, %arg12: memref<1x896xf32, #tpu.memory_space<vmem>>, %arg13: memref<1x896xf32, #tpu.memory_space<vmem>>, %arg14: memref<896x128xbf16, #tpu.memory_space<vmem>>, %arg15: memref<1x128xf32, #tpu.memory_space<vmem>>, %arg16: memref<8x128xf32, #tpu.memory_space<vmem>>) attributes {dimension_semantics = [#tpu.dimension_semantics<parallel>], iteration_bounds = array<i64: 1>, scalar_prefetch = 0 : i64, scratch_operands = 0 : i64, tpu.core_type = #tpu.core_type<tc>, window_params = [{transform_indices = @transform_0, window_bounds = array<i64: 8, 1024>}, {pipeline_mode = #tpu.pipeline_mode<synchronous>, transform_indices = @transform_1, window_bounds = array<i64: 1024, 896>}, {pipeline_mode = #tpu.pipeline_mode<synchronous>, transform_indices = @transform_2, window_bounds = array<i64: 1, 896>}, {pipeline_mode = #tpu.pipeline_mode<synchronous>, transform_indices = @transform_3, window_bounds = array<i64: 1, 896>}, {pipeline_mode = #tpu.pipeline_mode<synchronous>, transform_indices = @transform_4, window_bounds = array<i64: 1, 896>}, {pipeline_mode = #tpu.pipeline_mode<synchronous>, transform_indices = @transform_5, window_bounds = array<i64: 896, 896>}, {pipeline_mode = #tpu.pipeline_mode<synchronous>, transform_indices = @transform_6, window_bounds = array<i64: 1, 896>}, {pipeline_mode = #tpu.pipeline_mode<synchronous>, transform_indices = @transform_7, window_bounds = array<i64: 1, 896>}, {pipeline_mode = #tpu.pipeline_mode<synchronous>, transform_indices = @transform_8, window_bounds = array<i64: 1, 896>}, {pipeline_mode = #tpu.pipeline_mode<synchronous>, transform_indices = @transform_9, window_bounds = array<i64: 896, 896>}, {pipeline_mode = #tpu.pipeline_mode<synchronous>, transform_indices = @transform_10, window_bounds = array<i64: 1, 896>}, {pipeline_mode = #tpu.pipeline_mode<synchronous>, transform_indices = @transform_11, window_bounds = array<i64: 1, 896>}, {pipeline_mode = #tpu.pipeline_mode<synchronous>, transform_indices = @transform_12, window_bounds = array<i64: 1, 896>}, {pipeline_mode = #tpu.pipeline_mode<synchronous>, transform_indices = @transform_13, window_bounds = array<i64: 896, 128>}, {pipeline_mode = #tpu.pipeline_mode<synchronous>, transform_indices = @transform_14, window_bounds = array<i64: 1, 128>}, {transform_indices = @transform_15, window_bounds = array<i64: 8, 128>}]} {
    %c0 = arith.constant 0 : index
    %c0_0 = arith.constant 0 : index
    %0 = vector.load %arg1[%c0, %c0_0] : memref<8x1024xf32, #tpu.memory_space<vmem>>, vector<8x1024xf32>
    %1 = arith.truncf %0 : vector<8x1024xf32> to vector<8x1024xbf16>
    %c0_1 = arith.constant 0 : index
    %c0_2 = arith.constant 0 : index
    %2 = vector.load %arg2[%c0_1, %c0_2] : memref<1024x896xbf16, #tpu.memory_space<vmem>>, vector<1024x896xbf16>
    %cst = arith.constant dense<0.000000e+00> : vector<8x896xf32>
    %3 = tpu.matmul %1, %2, %cst {dimension_numbers = #tpu.dot_dimension_numbers<[1], [0], [0], [1], [0, 0, 1, 1], [], []>} : vector<8x1024xbf16>, vector<1024x896xbf16>, vector<8x896xf32> -> vector<8x896xf32>
    %c0_3 = arith.constant 0 : index
    %c0_4 = arith.constant 0 : index
    %4 = vector.load %arg3[%c0_3, %c0_4] : memref<1x896xf32, #tpu.memory_space<vmem>>, vector<1x896xf32>
    %5 = vector.broadcast %4 : vector<1x896xf32> to vector<8x896xf32>
    %6 = arith.addf %3, %5 : vector<8x896xf32>
    %cst_5 = arith.constant dense<0.000000e+00> : vector<896xf32>
    %7 = vector.multi_reduction <add>, %6, %cst_5 [0] : vector<8x896xf32> to vector<896xf32>
    %8 = vector.shape_cast %7 : vector<896xf32> to vector<1x896xf32>
    %9 = arith.mulf %6, %6 : vector<8x896xf32>
    %cst_6 = arith.constant dense<0.000000e+00> : vector<896xf32>
    %10 = vector.multi_reduction <add>, %9, %cst_6 [0] : vector<8x896xf32> to vector<896xf32>
    %11 = vector.shape_cast %10 : vector<896xf32> to vector<1x896xf32>
    %cst_7 = arith.constant 1.250000e-01 : f32
    %12 = vector.broadcast %cst_7 : f32 to vector<1x896xf32>
    %13 = arith.mulf %8, %12 : vector<1x896xf32>
    %cst_8 = arith.constant 1.250000e-01 : f32
    %14 = vector.broadcast %cst_8 : f32 to vector<1x896xf32>
    %15 = arith.mulf %11, %14 : vector<1x896xf32>
    %16 = arith.mulf %13, %13 : vector<1x896xf32>
    %17 = arith.subf %15, %16 : vector<1x896xf32>
    %cst_9 = arith.constant 0.000000e+00 : f32
    %18 = vector.broadcast %cst_9 : f32 to vector<1x896xf32>
    %19 = arith.maximumf %17, %18 : vector<1x896xf32>
    %c0_10 = arith.constant 0 : index
    %c0_11 = arith.constant 0 : index
    %20 = vector.load %arg4[%c0_10, %c0_11] : memref<1x896xf32, #tpu.memory_space<vmem>>, vector<1x896xf32>
    %cst_12 = arith.constant 9.99999974E-6 : f32
    %21 = vector.broadcast %cst_12 : f32 to vector<1x896xf32>
    %22 = arith.addf %19, %21 : vector<1x896xf32>
    %23 = math.rsqrt %22 : vector<1x896xf32>
    %24 = arith.mulf %20, %23 : vector<1x896xf32>
    %c0_13 = arith.constant 0 : index
    %c0_14 = arith.constant 0 : index
    %25 = vector.load %arg5[%c0_13, %c0_14] : memref<1x896xf32, #tpu.memory_space<vmem>>, vector<1x896xf32>
    %26 = arith.mulf %13, %24 : vector<1x896xf32>
    %27 = arith.subf %25, %26 : vector<1x896xf32>
    %28 = vector.broadcast %24 : vector<1x896xf32> to vector<8x896xf32>
    %29 = arith.mulf %6, %28 : vector<8x896xf32>
    %30 = vector.broadcast %27 : vector<1x896xf32> to vector<8x896xf32>
    %31 = arith.addf %29, %30 : vector<8x896xf32>
    %cst_15 = arith.constant 0.000000e+00 : f32
    %32 = vector.broadcast %cst_15 : f32 to vector<8x896xf32>
    %33 = arith.maximumf %31, %32 : vector<8x896xf32>
    %34 = arith.truncf %33 : vector<8x896xf32> to vector<8x896xbf16>
    %c0_16 = arith.constant 0 : index
    %c0_17 = arith.constant 0 : index
    %35 = vector.load %arg6[%c0_16, %c0_17] : memref<896x896xbf16, #tpu.memory_space<vmem>>, vector<896x896xbf16>
    %cst_18 = arith.constant dense<0.000000e+00> : vector<8x896xf32>
    %36 = tpu.matmul %34, %35, %cst_18 {dimension_numbers = #tpu.dot_dimension_numbers<[1], [0], [0], [1], [0, 0, 1, 1], [], []>} : vector<8x896xbf16>, vector<896x896xbf16>, vector<8x896xf32> -> vector<8x896xf32>
    %c0_19 = arith.constant 0 : index
    %c0_20 = arith.constant 0 : index
    %37 = vector.load %arg7[%c0_19, %c0_20] : memref<1x896xf32, #tpu.memory_space<vmem>>, vector<1x896xf32>
    %38 = vector.broadcast %37 : vector<1x896xf32> to vector<8x896xf32>
    %39 = arith.addf %36, %38 : vector<8x896xf32>
    %cst_21 = arith.constant dense<0.000000e+00> : vector<896xf32>
    %40 = vector.multi_reduction <add>, %39, %cst_21 [0] : vector<8x896xf32> to vector<896xf32>
    %41 = vector.shape_cast %40 : vector<896xf32> to vector<1x896xf32>
    %42 = arith.mulf %39, %39 : vector<8x896xf32>
    %cst_22 = arith.constant dense<0.000000e+00> : vector<896xf32>
    %43 = vector.multi_reduction <add>, %42, %cst_22 [0] : vector<8x896xf32> to vector<896xf32>
    %44 = vector.shape_cast %43 : vector<896xf32> to vector<1x896xf32>
    %cst_23 = arith.constant 1.250000e-01 : f32
    %45 = vector.broadcast %cst_23 : f32 to vector<1x896xf32>
    %46 = arith.mulf %41, %45 : vector<1x896xf32>
    %cst_24 = arith.constant 1.250000e-01 : f32
    %47 = vector.broadcast %cst_24 : f32 to vector<1x896xf32>
    %48 = arith.mulf %44, %47 : vector<1x896xf32>
    %49 = arith.mulf %46, %46 : vector<1x896xf32>
    %50 = arith.subf %48, %49 : vector<1x896xf32>
    %cst_25 = arith.constant 0.000000e+00 : f32
    %51 = vector.broadcast %cst_25 : f32 to vector<1x896xf32>
    %52 = arith.maximumf %50, %51 : vector<1x896xf32>
    %c0_26 = arith.constant 0 : index
    %c0_27 = arith.constant 0 : index
    %53 = vector.load %arg8[%c0_26, %c0_27] : memref<1x896xf32, #tpu.memory_space<vmem>>, vector<1x896xf32>
    %cst_28 = arith.constant 9.99999974E-6 : f32
    %54 = vector.broadcast %cst_28 : f32 to vector<1x896xf32>
    %55 = arith.addf %52, %54 : vector<1x896xf32>
    %56 = math.rsqrt %55 : vector<1x896xf32>
    %57 = arith.mulf %53, %56 : vector<1x896xf32>
    %c0_29 = arith.constant 0 : index
    %c0_30 = arith.constant 0 : index
    %58 = vector.load %arg9[%c0_29, %c0_30] : memref<1x896xf32, #tpu.memory_space<vmem>>, vector<1x896xf32>
    %59 = arith.mulf %46, %57 : vector<1x896xf32>
    %60 = arith.subf %58, %59 : vector<1x896xf32>
    %61 = vector.broadcast %57 : vector<1x896xf32> to vector<8x896xf32>
    %62 = arith.mulf %39, %61 : vector<8x896xf32>
    %63 = vector.broadcast %60 : vector<1x896xf32> to vector<8x896xf32>
    %64 = arith.addf %62, %63 : vector<8x896xf32>
    %cst_31 = arith.constant 0.000000e+00 : f32
    %65 = vector.broadcast %cst_31 : f32 to vector<8x896xf32>
    %66 = arith.maximumf %64, %65 : vector<8x896xf32>
    %67 = arith.truncf %66 : vector<8x896xf32> to vector<8x896xbf16>
    %c0_32 = arith.constant 0 : index
    %c0_33 = arith.constant 0 : index
    %68 = vector.load %arg10[%c0_32, %c0_33] : memref<896x896xbf16, #tpu.memory_space<vmem>>, vector<896x896xbf16>
    %cst_34 = arith.constant dense<0.000000e+00> : vector<8x896xf32>
    %69 = tpu.matmul %67, %68, %cst_34 {dimension_numbers = #tpu.dot_dimension_numbers<[1], [0], [0], [1], [0, 0, 1, 1], [], []>} : vector<8x896xbf16>, vector<896x896xbf16>, vector<8x896xf32> -> vector<8x896xf32>
    %c0_35 = arith.constant 0 : index
    %c0_36 = arith.constant 0 : index
    %70 = vector.load %arg11[%c0_35, %c0_36] : memref<1x896xf32, #tpu.memory_space<vmem>>, vector<1x896xf32>
    %71 = vector.broadcast %70 : vector<1x896xf32> to vector<8x896xf32>
    %72 = arith.addf %69, %71 : vector<8x896xf32>
    %cst_37 = arith.constant dense<0.000000e+00> : vector<896xf32>
    %73 = vector.multi_reduction <add>, %72, %cst_37 [0] : vector<8x896xf32> to vector<896xf32>
    %74 = vector.shape_cast %73 : vector<896xf32> to vector<1x896xf32>
    %75 = arith.mulf %72, %72 : vector<8x896xf32>
    %cst_38 = arith.constant dense<0.000000e+00> : vector<896xf32>
    %76 = vector.multi_reduction <add>, %75, %cst_38 [0] : vector<8x896xf32> to vector<896xf32>
    %77 = vector.shape_cast %76 : vector<896xf32> to vector<1x896xf32>
    %cst_39 = arith.constant 1.250000e-01 : f32
    %78 = vector.broadcast %cst_39 : f32 to vector<1x896xf32>
    %79 = arith.mulf %74, %78 : vector<1x896xf32>
    %cst_40 = arith.constant 1.250000e-01 : f32
    %80 = vector.broadcast %cst_40 : f32 to vector<1x896xf32>
    %81 = arith.mulf %77, %80 : vector<1x896xf32>
    %82 = arith.mulf %79, %79 : vector<1x896xf32>
    %83 = arith.subf %81, %82 : vector<1x896xf32>
    %cst_41 = arith.constant 0.000000e+00 : f32
    %84 = vector.broadcast %cst_41 : f32 to vector<1x896xf32>
    %85 = arith.maximumf %83, %84 : vector<1x896xf32>
    %c0_42 = arith.constant 0 : index
    %c0_43 = arith.constant 0 : index
    %86 = vector.load %arg12[%c0_42, %c0_43] : memref<1x896xf32, #tpu.memory_space<vmem>>, vector<1x896xf32>
    %cst_44 = arith.constant 9.99999974E-6 : f32
    %87 = vector.broadcast %cst_44 : f32 to vector<1x896xf32>
    %88 = arith.addf %85, %87 : vector<1x896xf32>
    %89 = math.rsqrt %88 : vector<1x896xf32>
    %90 = arith.mulf %86, %89 : vector<1x896xf32>
    %c0_45 = arith.constant 0 : index
    %c0_46 = arith.constant 0 : index
    %91 = vector.load %arg13[%c0_45, %c0_46] : memref<1x896xf32, #tpu.memory_space<vmem>>, vector<1x896xf32>
    %92 = arith.mulf %79, %90 : vector<1x896xf32>
    %93 = arith.subf %91, %92 : vector<1x896xf32>
    %94 = vector.broadcast %90 : vector<1x896xf32> to vector<8x896xf32>
    %95 = arith.mulf %72, %94 : vector<8x896xf32>
    %96 = vector.broadcast %93 : vector<1x896xf32> to vector<8x896xf32>
    %97 = arith.addf %95, %96 : vector<8x896xf32>
    %cst_47 = arith.constant 0.000000e+00 : f32
    %98 = vector.broadcast %cst_47 : f32 to vector<8x896xf32>
    %99 = arith.maximumf %97, %98 : vector<8x896xf32>
    %100 = arith.truncf %99 : vector<8x896xf32> to vector<8x896xbf16>
    %c0_48 = arith.constant 0 : index
    %c0_49 = arith.constant 0 : index
    %101 = vector.load %arg14[%c0_48, %c0_49] : memref<896x128xbf16, #tpu.memory_space<vmem>>, vector<896x128xbf16>
    %cst_50 = arith.constant dense<0.000000e+00> : vector<8x128xf32>
    %102 = tpu.matmul %100, %101, %cst_50 {dimension_numbers = #tpu.dot_dimension_numbers<[1], [0], [0], [1], [0, 0, 1, 1], [], []>} : vector<8x896xbf16>, vector<896x128xbf16>, vector<8x128xf32> -> vector<8x128xf32>
    %c0_51 = arith.constant 0 : index
    %c0_52 = arith.constant 0 : index
    %103 = vector.load %arg15[%c0_51, %c0_52] : memref<1x128xf32, #tpu.memory_space<vmem>>, vector<1x128xf32>
    %104 = vector.broadcast %103 : vector<1x128xf32> to vector<8x128xf32>
    %105 = arith.addf %102, %104 : vector<8x128xf32>
    %c0_53 = arith.constant 0 : index
    %c0_54 = arith.constant 0 : index
    %106 = vector.load %arg16[%c0_53, %c0_54] : memref<8x128xf32, #tpu.memory_space<vmem>>, vector<8x128xf32>
    tpu.vector_store %arg16[%c0_53, %c0_54], %105 {strides = array<i32>} : memref<8x128xf32, #tpu.memory_space<vmem>>, vector<8x128xf32>,
    return
  }
  func.func @transform_0(%arg0: i32) -> (i32, i32) {
    %c0_i32 = arith.constant 0 : i32
    %c0_i32_0 = arith.constant 0 : i32
    return %arg0, %c0_i32 : i32, i32
  }
  func.func @transform_1(%arg0: i32) -> (i32, i32) {
    %c0_i32 = arith.constant 0 : i32
    %c0_i32_0 = arith.constant 0 : i32
    %c0_i32_1 = arith.constant 0 : i32
    return %c0_i32, %c0_i32_0 : i32, i32
  }
  func.func @transform_2(%arg0: i32) -> (i32, i32) {
    %c0_i32 = arith.constant 0 : i32
    %c0_i32_0 = arith.constant 0 : i32
    %c0_i32_1 = arith.constant 0 : i32
    return %c0_i32, %c0_i32_0 : i32, i32
  }
  func.func @transform_3(%arg0: i32) -> (i32, i32) {
    %c0_i32 = arith.constant 0 : i32
    %c0_i32_0 = arith.constant 0 : i32
    %c0_i32_1 = arith.constant 0 : i32
    return %c0_i32, %c0_i32_0 : i32, i32
  }
  func.func @transform_4(%arg0: i32) -> (i32, i32) {
    %c0_i32 = arith.constant 0 : i32
    %c0_i32_0 = arith.constant 0 : i32
    %c0_i32_1 = arith.constant 0 : i32
    return %c0_i32, %c0_i32_0 : i32, i32
  }
  func.func @transform_5(%arg0: i32) -> (i32, i32) {
    %c0_i32 = arith.constant 0 : i32
    %c0_i32_0 = arith.constant 0 : i32
    %c0_i32_1 = arith.constant 0 : i32
    return %c0_i32, %c0_i32_0 : i32, i32
  }
  func.func @transform_6(%arg0: i32) -> (i32, i32) {
    %c0_i32 = arith.constant 0 : i32
    %c0_i32_0 = arith.constant 0 : i32
    %c0_i32_1 = arith.constant 0 : i32
    return %c0_i32, %c0_i32_0 : i32, i32
  }
  func.func @transform_7(%arg0: i32) -> (i32, i32) {
    %c0_i32 = arith.constant 0 : i32
    %c0_i32_0 = arith.constant 0 : i32
    %c0_i32_1 = arith.constant 0 : i32
    return %c0_i32, %c0_i32_0 : i32, i32
  }
  func.func @transform_8(%arg0: i32) -> (i32, i32) {
    %c0_i32 = arith.constant 0 : i32
    %c0_i32_0 = arith.constant 0 : i32
    %c0_i32_1 = arith.constant 0 : i32
    return %c0_i32, %c0_i32_0 : i32, i32
  }
  func.func @transform_9(%arg0: i32) -> (i32, i32) {
    %c0_i32 = arith.constant 0 : i32
    %c0_i32_0 = arith.constant 0 : i32
    %c0_i32_1 = arith.constant 0 : i32
    return %c0_i32, %c0_i32_0 : i32, i32
  }
  func.func @transform_10(%arg0: i32) -> (i32, i32) {
    %c0_i32 = arith.constant 0 : i32
    %c0_i32_0 = arith.constant 0 : i32
    %c0_i32_1 = arith.constant 0 : i32
    return %c0_i32, %c0_i32_0 : i32, i32
  }
  func.func @transform_11(%arg0: i32) -> (i32, i32) {
    %c0_i32 = arith.constant 0 : i32
    %c0_i32_0 = arith.constant 0 : i32
    %c0_i32_1 = arith.constant 0 : i32
    return %c0_i32, %c0_i32_0 : i32, i32
  }
  func.func @transform_12(%arg0: i32) -> (i32, i32) {
    %c0_i32 = arith.constant 0 : i32
    %c0_i32_0 = arith.constant 0 : i32
    %c0_i32_1 = arith.constant 0 : i32
    return %c0_i32, %c0_i32_0 : i32, i32
  }
  func.func @transform_13(%arg0: i32) -> (i32, i32) {
    %c0_i32 = arith.constant 0 : i32
    %c0_i32_0 = arith.constant 0 : i32
    %c0_i32_1 = arith.constant 0 : i32
    return %c0_i32, %c0_i32_0 : i32, i32
  }
  func.func @transform_14(%arg0: i32) -> (i32, i32) {
    %c0_i32 = arith.constant 0 : i32
    %c0_i32_0 = arith.constant 0 : i32
    %c0_i32_1 = arith.constant 0 : i32
    return %c0_i32, %c0_i32_0 : i32, i32
  }
  func.func @transform_15(%arg0: i32) -> (i32, i32) {
    %c0_i32 = arith.constant 0 : i32
    %c0_i32_0 = arith.constant 0 : i32
    return %arg0, %c0_i32 : i32, i32
  }
}

</mosaic_0001>

<bundles_post_ra>
// kernel: tpu_custom_call.1
= control target key start
LH: loop header
LB: loop body
LE: loop exit
PB: predicated region body
PF: predicated region fallthrough
CT: control target
= control target key end

     0   :  { %s16727_s0 = inlined_call_operand.hbm [shape: f32[8,1024], index: 0, kind: input, shape index: {}]   ;;  %s16728_s1 = inlined_call_operand.hbm [shape: bf16[1024,896], index: 1, kind: input, shape index: {}]   ;;  %s16729_s2 = inlined_call_operand.hbm [shape: f32[1,896], index: 2, kind: input, shape index: {}]   ;;  %s16730_s3 = inlined_call_operand.hbm [shape: f32[1,896], index: 3, kind: input, shape index: {}]   ;;  %s16731_s4 = inlined_call_operand.hbm [shape: f32[1,896], index: 4, kind: input, shape index: {}]   ;;  %s16732_s5 = inlined_call_operand.hbm [shape: bf16[896,896], index: 5, kind: input, shape index: {}]   ;;  %s16733_s6 = inlined_call_operand.hbm [shape: f32[1,896], index: 6, kind: input, shape index: {}]   ;;  %s16734_s7 = inlined_call_operand.hbm [shape: f32[1,896], index: 7, kind: input, shape index: {}]   ;;  %s16735_s8 = inlined_call_operand.hbm [shape: f32[1,896], index: 8, kind: input, shape index: {}]   ;;  %s16736_s9 = inlined_call_operand.hbm [shape: bf16[896,896], index: 9, kind: input, shape index: {}]   ;;  %s16737_s10 = inlined_call_operand.hbm [shape: f32[1,896], index: 10, kind: input, shape index: {}]   ;;  %s16738_s11 = inlined_call_operand.hbm [shape: f32[1,896], index: 11, kind: input, shape index: {}]   ;;  %s16739_s12 = inlined_call_operand.hbm [shape: f32[1,896], index: 12, kind: input, shape index: {}]   ;;  %s16740_s13 = inlined_call_operand.hbm [shape: bf16[896,128], index: 13, kind: input, shape index: {}]   ;;  %s16741_s14 = inlined_call_operand.hbm [shape: f32[1,128], index: 14, kind: input, shape index: {}]   ;;  %s16742_s15 = inlined_call_operand.hbm [shape: f32[8,128], index: 15, kind: output, shape index: {}]  }
   0x1   :  { %16744 = sst [smem:[#allocation36_spill]] %s16742_s15 }
   0x2   :  { %20 = vsyncpa [#allocation3], 0 }
   0x3   :  { %21 = vsyncpa [#allocation6], 0 }
   0x4   :  { %22 = vsyncpa [#allocation9], 0 }
   0x5   :  { %23 = vsyncpa [#allocation12], 0 }
   0x6   :  { %24 = vsyncpa [#allocation15], 0 }
   0x7   :  { %25 = vsyncpa [#allocation18], 0 }
   0x8   :  { %26 = vsyncpa [#allocation21], 0 }
   0x9   :  { %27 = vsyncpa [#allocation24], 0 }
   0xa   :  { %28 = vsyncpa [#allocation4], 0  ;;  %s15828_s18 = smov [#allocation5]   ;;  %s15458_s22 = scalar_lea.hbm %s16728_s1, 57344 }
   0xb   :  { %s44_s19 = sshll.u32 %s15828_s18, 4  ;;  %p15459_p0 = scmp.ne.s32.totalorder %s16728_s1, %s15458_s22  ;;  %s45_s19 = int_to_ptr.vmem [resolvable:$true] %s44_s19 }
   0xc   :  { %p15462_p1 = scmp.lt.u32.totalorder %s15458_s22, %s16728_s1 }
   0xe   :  { %p15464_p2 = pnand %p15462_p1, %p15459_p0 }
  0x10   :  { %15467 = shalt.err (!%p15464_p2)
}
  0x11   :  { %s15468_s27 = scalar_lea.vmem %s45_s19, 57344  ;;  %p15473_p4 = scmp.lt.s32.totalorder %s45_s19, %s45_s19 }
  0x12   :  { %p15469_p3 = scmp.ne.s32.totalorder %s45_s19, %s15468_s27  ;;  %p15474_p5 = scmp.lt.s32.totalorder %s15468_s27, %s15468_s27 }
  0x14   :  { %p15475_p6 = por %p15474_p5, %p15473_p4 }
  0x16   :  { %p15476_p7 = pnand %p15475_p6, %p15469_p3 }
  0x18   :  { %15479 = shalt.err (!%p15476_p7)
}
  0x19   :  { %s15829_s28 = smov 448   ;;  %s15830_s29 = smov 28  }
  0x1a   :  { %50 = dma.hbm_to_vmem [thread:$0]  %s16728_s1, 57344, %s45_s19, [#allocation6], %s15829_s28, %s15829_s28, %s15830_s29  }
  0x1b   :  { %s15831_s17 = smov [#allocation8]   ;;  %s15832_s20 = smov [#allocation11]  }
  0x1c   :  { %s67_s18 = sshll.u32 %s15831_s17, 4  ;;  %s86_s21 = sshll.u32 %s15832_s20, 4  ;;  %s68_s18 = int_to_ptr.vmem [resolvable:$true] %s67_s18  ;;  %s87_s21 = int_to_ptr.vmem [resolvable:$true] %s86_s21 }
  0x1d   :  { %s15480_s24 = scalar_lea.hbm %s16730_s3, 112 }
  0x1e   :  { %p15481_p8 = scmp.ne.s32.totalorder %s16730_s3, %s15480_s24  ;;  %p15484_p9 = scmp.lt.u32.totalorder %s15480_s24, %s16730_s3 }
  0x20   :  { %p15486_p10 = pnand %p15484_p9, %p15481_p8 }
  0x22   :  { %15489 = shalt.err (!%p15486_p10)
}
  0x23   :  { %s15490_s1 = scalar_lea.vmem %s68_s18, 112  ;;  %s15494_s19 = scalar_lea.vmem %s68_s18, 128 }
  0x24   :  { %p15491_p11 = scmp.ne.s32.totalorder %s68_s18, %s15490_s1  ;;  %p15495_p12 = scmp.lt.s32.totalorder %s68_s18, %s68_s18 }
  0x25   :  { %p15496_p13 = scmp.lt.s32.totalorder %s15494_s19, %s15490_s1 }
  0x27   :  { %p15497_p0 = por %p15496_p13, %p15495_p12 }
  0x29   :  { %p15498_p1 = pnand %p15497_p0, %p15491_p11 }
  0x2b   :  { %15501 = shalt.err (!%p15498_p1)
}
  0x2c   :  { %70 = dma.hbm_to_vmem [thread:$0]  %s16730_s3, 112, %s68_s18, [#allocation9]  }
  0x2d   :  { %s15502_s15 = scalar_lea.hbm %s16732_s5, 50176 }
  0x2e   :  { %p15503_p2 = scmp.ne.s32.totalorder %s16732_s5, %s15502_s15  ;;  %p15506_p3 = scmp.lt.u32.totalorder %s15502_s15, %s16732_s5 }
  0x30   :  { %p15508_p4 = pnand %p15506_p3, %p15503_p2 }
  0x32   :  { %15511 = shalt.err (!%p15508_p4)
}
  0x33   :  { %s15512_s26 = scalar_lea.vmem %s87_s21, 50176  ;;  %p15517_p6 = scmp.lt.s32.totalorder %s87_s21, %s87_s21 }
  0x34   :  { %p15513_p5 = scmp.ne.s32.totalorder %s87_s21, %s15512_s26  ;;  %p15518_p7 = scmp.lt.s32.totalorder %s15512_s26, %s15512_s26 }
  0x36   :  { %p15519_p8 = por %p15518_p7, %p15517_p6 }
  0x38   :  { %p15520_p9 = pnand %p15519_p8, %p15513_p5 }
  0x3a   :  { %15523 = shalt.err (!%p15520_p9)
}
  0x3b   :  { %92 = dma.hbm_to_vmem [thread:$0]  %s16732_s5, 50176, %s87_s21, [#allocation12], %s15829_s28, %s15829_s28, %s15830_s29  }
  0x3c   :  { %s15833_s27 = smov [#allocation14]   ;;  %s15834_s19 = smov [#allocation17]  }
  0x3d   :  { %s109_s1 = sshll.u32 %s15833_s27, 4  ;;  %s128_s30 = sshll.u32 %s15834_s19, 4  ;;  %s110_s1 = int_to_ptr.vmem [resolvable:$true] %s109_s1  ;;  %s129_s30 = int_to_ptr.vmem [resolvable:$true] %s128_s30 }
  0x3e   :  { %s15524_s20 = scalar_lea.hbm %s16734_s7, 112 }
  0x3f   :  { %p15525_p10 = scmp.ne.s32.totalorder %s16734_s7, %s15524_s20  ;;  %p15528_p11 = scmp.lt.u32.totalorder %s15524_s20, %s16734_s7 }
  0x41   :  { %p15530_p12 = pnand %p15528_p11, %p15525_p10 }
  0x43   :  { %15533 = shalt.err (!%p15530_p12)
}
  0x44   :  { %s15534_s5 = scalar_lea.vmem %s110_s1, 112  ;;  %s15538_s21 = scalar_lea.vmem %s110_s1, 128 }
  0x45   :  { %p15535_p13 = scmp.ne.s32.totalorder %s110_s1, %s15534_s5  ;;  %p15539_p0 = scmp.lt.s32.totalorder %s110_s1, %s110_s1 }
  0x46   :  { %p15540_p1 = scmp.lt.s32.totalorder %s15538_s21, %s15534_s5 }
  0x48   :  { %p15541_p2 = por %p15540_p1, %p15539_p0 }
  0x4a   :  { %p15542_p3 = pnand %p15541_p2, %p15535_p13 }
  0x4c   :  { %15545 = shalt.err (!%p15542_p3)
}
  0x4d   :  { %112 = dma.hbm_to_vmem [thread:$0]  %s16734_s7, 112, %s110_s1, [#allocation15]  }
  0x4e   :  { %s15546_s27 = scalar_lea.hbm %s16736_s9, 50176 }
  0x4f   :  { %p15547_p4 = scmp.ne.s32.totalorder %s16736_s9, %s15546_s27  ;;  %p15550_p5 = scmp.lt.u32.totalorder %s15546_s27, %s16736_s9 }
  0x51   :  { %p15552_p6 = pnand %p15550_p5, %p15547_p4 }
  0x53   :  { %15555 = shalt.err (!%p15552_p6)
}
  0x54   :  { %s15556_s15 = scalar_lea.vmem %s129_s30, 50176  ;;  %p15561_p8 = scmp.lt.s32.totalorder %s129_s30, %s129_s30 }
  0x55   :  { %p15557_p7 = scmp.ne.s32.totalorder %s129_s30, %s15556_s15  ;;  %p15562_p9 = scmp.lt.s32.totalorder %s15556_s15, %s15556_s15 }
  0x57   :  { %p15563_p10 = por %p15562_p9, %p15561_p8 }
  0x59   :  { %p15564_p11 = pnand %p15563_p10, %p15557_p7 }
  0x5b   :  { %15567 = shalt.err (!%p15564_p11)
}
  0x5c   :  { %134 = dma.hbm_to_vmem [thread:$0]  %s16736_s9, 50176, %s129_s30, [#allocation18], %s15829_s28, %s15829_s28, %s15830_s29  }
  0x5d   :  { %s15835_s22 = smov [#allocation20]   ;;  %s15836_s24 = smov [#allocation23]  }
  0x5e   :  { %s151_s23 = sshll.u32 %s15835_s22, 4  ;;  %s170_s5 = sshll.u32 %s15836_s24, 4  ;;  %s152_s23 = int_to_ptr.vmem [resolvable:$true] %s151_s23  ;;  %s171_s5 = int_to_ptr.vmem [resolvable:$true] %s170_s5 }
  0x5f   :  { %s15568_s26 = scalar_lea.hbm %s16738_s11, 112 }
  0x60   :  { %p15569_p12 = scmp.ne.s32.totalorder %s16738_s11, %s15568_s26  ;;  %p15572_p13 = scmp.lt.u32.totalorder %s15568_s26, %s16738_s11 }
  0x62   :  { %p15574_p0 = pnand %p15572_p13, %p15569_p12 }
  0x64   :  { %15577 = shalt.err (!%p15574_p0)
}
  0x65   :  { %s15578_s9 = scalar_lea.vmem %s152_s23, 112  ;;  %s15582_s28 = scalar_lea.vmem %s152_s23, 128 }
  0x66   :  { %p15579_p1 = scmp.ne.s32.totalorder %s152_s23, %s15578_s9  ;;  %p15583_p2 = scmp.lt.s32.totalorder %s152_s23, %s152_s23 }
  0x67   :  { %p15584_p3 = scmp.lt.s32.totalorder %s15582_s28, %s15578_s9 }
  0x69   :  { %p15585_p4 = por %p15584_p3, %p15583_p2 }
  0x6b   :  { %p15586_p5 = pnand %p15585_p4, %p15579_p1 }
  0x6d   :  { %15589 = shalt.err (!%p15586_p5)
}
  0x6e   :  { %154 = dma.hbm_to_vmem [thread:$0]  %s16738_s11, 112, %s152_s23, [#allocation21]  }
  0x6f   :  { %s15590_s20 = scalar_lea.hbm %s16740_s13, 7168 }
  0x70   :  { %p15591_p6 = scmp.ne.s32.totalorder %s16740_s13, %s15590_s20  ;;  %p15594_p7 = scmp.lt.u32.totalorder %s15590_s20, %s16740_s13 }
  0x72   :  { %p15596_p8 = pnand %p15594_p7, %p15591_p6 }
  0x74   :  { %15599 = shalt.err (!%p15596_p8)
}
  0x75   :  { %s15600_s24 = scalar_lea.vmem %s171_s5, 7168  ;;  %p15605_p10 = scmp.lt.s32.totalorder %s171_s5, %s171_s5 }
  0x76   :  { %p15601_p9 = scmp.ne.s32.totalorder %s171_s5, %s15600_s24  ;;  %p15606_p11 = scmp.lt.s32.totalorder %s15600_s24, %s15600_s24 }
  0x78   :  { %p15607_p12 = por %p15606_p11, %p15605_p10 }
  0x7a   :  { %p15608_p13 = pnand %p15607_p12, %p15601_p9 }
  0x7c   :  { %15611 = shalt.err (!%p15608_p13)
}
  0x7d   :  { %s15837_s11 = smov 64   ;;  %s15838_s23 = smov 4  }
  0x7e   :  { %176 = dma.hbm_to_vmem [thread:$0]  %s16740_s13, 7168, %s171_s5, [#allocation24], %s15837_s11, %s15837_s11, %s15838_s23  }
  0x7f   :  { %s15839_s26 = smov [#allocation2]   ;;  %s15840_s18 = smov [#allocation7]  }
  0x80   :  { %s35_s3 = sshll.u32 %s15839_s26, 4  ;;  %s57_s27 = sshll.u32 %s15840_s18, 4  ;;  %s36_s3 = int_to_ptr.vmem [resolvable:$true] %s35_s3  ;;  %s58_s27 = int_to_ptr.vmem [resolvable:$true] %s57_s27 }
  0x81   :  { %s15612_s28 = scalar_lea.hbm %s16727_s0, 1024 }
  0x82   :  { %p15613_p0 = scmp.ne.s32.totalorder %s16727_s0, %s15612_s28  ;;  %p15616_p1 = scmp.lt.u32.totalorder %s15612_s28, %s16727_s0 }
  0x84   :  { %p15618_p2 = pnand %p15616_p1, %p15613_p0 }
  0x86   :  { %15621 = shalt.err (!%p15618_p2)
}
  0x87   :  { %s15622_s13 = scalar_lea.vmem %s36_s3, 1024  ;;  %p15627_p4 = scmp.lt.s32.totalorder %s36_s3, %s36_s3 }
  0x88   :  { %p15623_p3 = scmp.ne.s32.totalorder %s36_s3, %s15622_s13  ;;  %p15628_p5 = scmp.lt.s32.totalorder %s15622_s13, %s15622_s13 }
  0x8a   :  { %p15629_p6 = por %p15628_p5, %p15627_p4 }
  0x8c   :  { %p15630_p7 = pnand %p15629_p6, %p15623_p3 }
  0x8e   :  { %15633 = shalt.err (!%p15630_p7)
}
  0x8f   :  { %38 = dma.hbm_to_vmem [thread:$0]  %s16727_s0, 1024, %s36_s3, [#allocation3]  }
  0x90   :  { %s15634_s1 = scalar_lea.hbm %s16729_s2, 112 }
  0x91   :  { %p15635_p8 = scmp.ne.s32.totalorder %s16729_s2, %s15634_s1  ;;  %p15638_p9 = scmp.lt.u32.totalorder %s15634_s1, %s16729_s2 }
  0x93   :  { %p15640_p10 = pnand %p15638_p9, %p15635_p8 }
  0x95   :  { %15643 = shalt.err (!%p15640_p10)
}
  0x96   :  { %s15644_s21 = scalar_lea.vmem %s58_s27, 112  ;;  %s15648_s25 = scalar_lea.vmem %s58_s27, 128 }
  0x97   :  { %p15645_p11 = scmp.ne.s32.totalorder %s58_s27, %s15644_s21  ;;  %p15649_p12 = scmp.lt.s32.totalorder %s58_s27, %s58_s27 }
  0x98   :  { %p15650_p13 = scmp.lt.s32.totalorder %s15648_s25, %s15644_s21 }
  0x9a   :  { %p15651_p0 = por %p15650_p13, %p15649_p12 }
  0x9c   :  { %p15652_p1 = pnand %p15651_p0, %p15645_p11 }
  0x9e   :  { %15655 = shalt.err (!%p15652_p1)
}
  0x9f   :  { %60 = dma.hbm_to_vmem [thread:$0]  %s16729_s2, 112, %s58_s27, [#allocation6]  }
  0xa0   :  { %s15841_s3 = smov [#allocation10]   ;;  %s15842_s19 = smov [#allocation13]  }
  0xa1   :  { %s77_s18 = sshll.u32 %s15841_s3, 4  ;;  %s99_s9 = sshll.u32 %s15842_s19, 4  ;;  %s78_s18 = int_to_ptr.vmem [resolvable:$true] %s77_s18  ;;  %s100_s9 = int_to_ptr.vmem [resolvable:$true] %s99_s9 }
  0xa2   :  { %s15656_s30 = scalar_lea.hbm %s16731_s4, 112 }
  0xa3   :  { %p15657_p2 = scmp.ne.s32.totalorder %s16731_s4, %s15656_s30  ;;  %p15660_p3 = scmp.lt.u32.totalorder %s15656_s30, %s16731_s4 }
  0xa5   :  { %p15662_p4 = pnand %p15660_p3, %p15657_p2 }
  0xa7   :  { %15665 = shalt.err (!%p15662_p4)
}
  0xa8   :  { %s15666_s2 = scalar_lea.vmem %s78_s18, 112  ;;  %s15670_s27 = scalar_lea.vmem %s78_s18, 128 }
  0xa9   :  { %p15667_p5 = scmp.ne.s32.totalorder %s78_s18, %s15666_s2  ;;  %p15671_p6 = scmp.lt.s32.totalorder %s78_s18, %s78_s18 }
  0xaa   :  { %p15672_p7 = scmp.lt.s32.totalorder %s15670_s27, %s15666_s2 }
  0xac   :  { %p15673_p8 = por %p15672_p7, %p15671_p6 }
  0xae   :  { %p15674_p9 = pnand %p15673_p8, %p15667_p5 }
  0xb0   :  { %15677 = shalt.err (!%p15674_p9)
}
  0xb1   :  { %80 = dma.hbm_to_vmem [thread:$0]  %s16731_s4, 112, %s78_s18, [#allocation9]  }
  0xb2   :  { %s15678_s22 = scalar_lea.hbm %s16733_s6, 112 }
  0xb3   :  { %p15679_p10 = scmp.ne.s32.totalorder %s16733_s6, %s15678_s22  ;;  %p15682_p11 = scmp.lt.u32.totalorder %s15678_s22, %s16733_s6 }
  0xb5   :  { %p15684_p12 = pnand %p15682_p11, %p15679_p10 }
  0xb7   :  { %15687 = shalt.err (!%p15684_p12)
}
  0xb8   :  { %s15688_s25 = scalar_lea.vmem %s100_s9, 112  ;;  %s15692_s0 = scalar_lea.vmem %s100_s9, 128 }
  0xb9   :  { %p15689_p13 = scmp.ne.s32.totalorder %s100_s9, %s15688_s25  ;;  %p15693_p0 = scmp.lt.s32.totalorder %s100_s9, %s100_s9 }
  0xba   :  { %p15694_p1 = scmp.lt.s32.totalorder %s15692_s0, %s15688_s25 }
  0xbc   :  { %p15695_p2 = por %p15694_p1, %p15693_p0 }
  0xbe   :  { %p15696_p3 = pnand %p15695_p2, %p15689_p13 }
  0xc0   :  { %15699 = shalt.err (!%p15696_p3)
}
  0xc1   :  { %102 = dma.hbm_to_vmem [thread:$0]  %s16733_s6, 112, %s100_s9, [#allocation12]  }
  0xc2   :  { %s15843_s3 = smov [#allocation16]   ;;  %s15844_s19 = smov [#allocation19]  }
  0xc3   :  { %s119_s18 = sshll.u32 %s15843_s3, 4  ;;  %s141_s28 = sshll.u32 %s15844_s19, 4  ;;  %s120_s18 = int_to_ptr.vmem [resolvable:$true] %s119_s18  ;;  %s142_s28 = int_to_ptr.vmem [resolvable:$true] %s141_s28 }
  0xc4   :  { %s15700_s16 = scalar_lea.hbm %s16735_s8, 112 }
  0xc5   :  { %p15701_p4 = scmp.ne.s32.totalorder %s16735_s8, %s15700_s16  ;;  %p15704_p5 = scmp.lt.u32.totalorder %s15700_s16, %s16735_s8 }
  0xc7   :  { %p15706_p6 = pnand %p15704_p5, %p15701_p4 }
  0xc9   :  { %15709 = shalt.err (!%p15706_p6)
}
  0xca   :  { %s15710_s6 = scalar_lea.vmem %s120_s18, 112  ;;  %s15714_s9 = scalar_lea.vmem %s120_s18, 128 }
  0xcb   :  { %p15711_p7 = scmp.ne.s32.totalorder %s120_s18, %s15710_s6  ;;  %p15715_p8 = scmp.lt.s32.totalorder %s120_s18, %s120_s18 }
  0xcc   :  { %p15716_p9 = scmp.lt.s32.totalorder %s15714_s9, %s15710_s6 }
  0xce   :  { %p15717_p10 = por %p15716_p9, %p15715_p8 }
  0xd0   :  { %p15718_p11 = pnand %p15717_p10, %p15711_p7 }
  0xd2   :  { %15721 = shalt.err (!%p15718_p11)
}
  0xd3   :  { %122 = dma.hbm_to_vmem [thread:$0]  %s16735_s8, 112, %s120_s18, [#allocation15]  }
  0xd4   :  { %s15722_s1 = scalar_lea.hbm %s16737_s10, 112 }
  0xd5   :  { %p15723_p12 = scmp.ne.s32.totalorder %s16737_s10, %s15722_s1  ;;  %p15726_p13 = scmp.lt.u32.totalorder %s15722_s1, %s16737_s10 }
  0xd7   :  { %p15728_p0 = pnand %p15726_p13, %p15723_p12 }
  0xd9   :  { %15731 = shalt.err (!%p15728_p0)
}
  0xda   :  { %s15732_s21 = scalar_lea.vmem %s142_s28, 112  ;;  %s15736_s25 = scalar_lea.vmem %s142_s28, 128 }
  0xdb   :  { %p15733_p1 = scmp.ne.s32.totalorder %s142_s28, %s15732_s21  ;;  %p15737_p2 = scmp.lt.s32.totalorder %s142_s28, %s142_s28 }
  0xdc   :  { %p15738_p3 = scmp.lt.s32.totalorder %s15736_s25, %s15732_s21 }
  0xde   :  { %p15739_p4 = por %p15738_p3, %p15737_p2 }
  0xe0   :  { %p15740_p5 = pnand %p15739_p4, %p15733_p1 }
  0xe2   :  { %15743 = shalt.err (!%p15740_p5)
}
  0xe3   :  { %144 = dma.hbm_to_vmem [thread:$0]  %s16737_s10, 112, %s142_s28, [#allocation18]  }
  0xe4   :  { %s15845_s4 = smov [#allocation22]   ;;  %s15846_s3 = smov [#allocation25]  }
  0xe5   :  { %s161_s26 = sshll.u32 %s15845_s4, 4  ;;  %s183_s18 = sshll.u32 %s15846_s3, 4  ;;  %s162_s26 = int_to_ptr.vmem [resolvable:$true] %s161_s26  ;;  %s184_s18 = int_to_ptr.vmem [resolvable:$true] %s183_s18 }
  0xe6   :  { %s15744_s30 = scalar_lea.hbm %s16739_s12, 112 }
  0xe7   :  { %p15745_p6 = scmp.ne.s32.totalorder %s16739_s12, %s15744_s30  ;;  %p15748_p7 = scmp.lt.u32.totalorder %s15744_s30, %s16739_s12 }
  0xe9   :  { %p15750_p8 = pnand %p15748_p7, %p15745_p6 }
  0xeb   :  { %15753 = shalt.err (!%p15750_p8)
}
  0xec   :  { %s15754_s10 = scalar_lea.vmem %s162_s26, 112  ;;  %s15758_s28 = scalar_lea.vmem %s162_s26, 128 }
  0xed   :  { %p15755_p9 = scmp.ne.s32.totalorder %s162_s26, %s15754_s10  ;;  %p15759_p10 = scmp.lt.s32.totalorder %s162_s26, %s162_s26 }
  0xee   :  { %p15760_p11 = scmp.lt.s32.totalorder %s15758_s28, %s15754_s10 }
  0xf0   :  { %p15761_p12 = por %p15760_p11, %p15759_p10 }
  0xf2   :  { %p15762_p13 = pnand %p15761_p12, %p15755_p9 }
  0xf4   :  { %15765 = shalt.err (!%p15762_p13)
}
  0xf5   :  { %164 = dma.hbm_to_vmem [thread:$0]  %s16739_s12, 112, %s162_s26, [#allocation21]  }
  0xf6   :  { %s15766_s20 = scalar_lea.hbm %s16741_s14, 16 }
  0xf7   :  { %p15767_p0 = scmp.ne.s32.totalorder %s16741_s14, %s15766_s20  ;;  %p15770_p1 = scmp.lt.u32.totalorder %s15766_s20, %s16741_s14 }
  0xf9   :  { %p15772_p2 = pnand %p15770_p1, %p15767_p0 }
  0xfb   :  { %15775 = shalt.err (!%p15772_p2)
}
  0xfc   :  { %s15776_s24 = scalar_lea.vmem %s184_s18, 16  ;;  %s15780_s11 = scalar_lea.vmem %s184_s18, 32 }
  0xfd   :  { %p15777_p3 = scmp.ne.s32.totalorder %s184_s18, %s15776_s24  ;;  %p15781_p4 = scmp.lt.s32.totalorder %s184_s18, %s184_s18 }
  0xfe   :  { %p15782_p5 = scmp.lt.s32.totalorder %s15780_s11, %s15776_s24 }
 0x100   :  { %p15783_p6 = por %p15782_p5, %p15781_p4 }
 0x102   :  { %p15784_p7 = pnand %p15783_p6, %p15777_p3 }
 0x104   :  { %15787 = shalt.err (!%p15784_p7)
}
 0x105   :  { %186 = dma.hbm_to_vmem [thread:$0]  %s16741_s14, 16, %s184_s18, [#allocation24]  }
 0x106   :  { %15810 = dma.done.wait [#allocation3], 1024  }
 0x107   :  { %15811 = vsyncadd [#allocation3], 4294966272 }
 0x108   :  { %15812 = dma.done.wait [#allocation6], 57456  }
 0x109   :  { %15813 = vsyncadd [#allocation6], 4294909840 }
 0x10a   :  { %15814 = dma.done.wait [#allocation9], 224  }
 0x10b   :  { %15815 = vsyncadd [#allocation9], 4294967072 }
 0x10c   :  { %15816 = dma.done.wait [#allocation12], 50288  }
 0x10d   :  { %15817 = vsyncadd [#allocation12], 4294917008 }
 0x10e   :  { %15818 = dma.done.wait [#allocation15], 224  }
 0x10f   :  { %15819 = vsyncadd [#allocation15], 4294967072 }
 0x110   :  { %15820 = dma.done.wait [#allocation18], 50288  }
 0x111   :  { %15821 = vsyncadd [#allocation18], 4294917008 }
 0x112   :  { %15822 = dma.done.wait [#allocation21], 224  }
 0x113   :  { %15823 = vsyncadd [#allocation21], 4294967072 }
 0x114   :  { %15824 = dma.done.wait [#allocation24], 7184  }
 0x115   :  { %15825 = vsyncadd [#allocation24], 4294960112  ;;  %v13599_v0 = vld [vmem:[#allocation5 + $0x4] ss:$28 sps:$4 sm:$0xff]   ;;  %v13601_v1 = vld [vmem:[#allocation5 + $0xc] ss:$28 sps:$4 sm:$0xff]  }
 0x116   :  { %3102 = vmatprep.subr.bf16.mxu0 %v13599_v0  ;;  %v13603_v2 = vld [vmem:[#allocation5] ss:$28 sps:$4 sm:$0xff]   ;;  %v13604_v3 = vld [vmem:[#allocation5 + $0x8] ss:$28 sps:$4 sm:$0xff]   ;;  %3266 = vmatprep.subr.bf16.mxu1 %v13601_v1  ;;  %v13609_v6 = vld [vmem:[#allocation5 + $0x38] ss:$28 sps:$4 sm:$0xff]  }
 0x117   :  { %v13605_v4 = vld [vmem:[#allocation5 + $0x3c] ss:$28 sps:$4 sm:$0xff]   ;;  %3103 = vmatpush1.bf16.msra.mxu0 %v13603_v2  ;;  %3267 = vmatpush1.bf16.msra.mxu1 %v13604_v3  ;;  %v13607_v5 = vld [vmem:[#allocation5 + $0x44] ss:$28 sps:$4 sm:$0xff]   ;;  %v13611_v8 = vld [vmem:[#allocation5 + $0x74] ss:$28 sps:$4 sm:$0xff]  }
 0x118   :  { %3104 = vmatprep.subr.bf16.mxu0 %v13605_v4  ;;  %v13610_v7 = vld [vmem:[#allocation5 + $0x40] ss:$28 sps:$4 sm:$0xff]   ;;  %3268 = vmatprep.subr.bf16.mxu1 %v13607_v5  ;;  %v13615_v10 = vld [vmem:[#allocation5 + $0x70] ss:$28 sps:$4 sm:$0xff]   ;;  %v13616_v11 = vld [vmem:[#allocation5 + $0x78] ss:$28 sps:$4 sm:$0xff]  }
 0x119   :  { %v13613_v9 = vld [vmem:[#allocation5 + $0x7c] ss:$28 sps:$4 sm:$0xff]   ;;  %v13617_v12 = vld [vmem:[#allocation5 + $0xac] ss:$28 sps:$4 sm:$0xff]   ;;  %v13619_v13 = vld [vmem:[#allocation5 + $0xb4] ss:$28 sps:$4 sm:$0xff]  }
 0x11a   :  { %v13621_v14 = vld [vmem:[#allocation5 + $0xa8] ss:$28 sps:$4 sm:$0xff]   ;;  %v13622_v15 = vld [vmem:[#allocation5 + $0xb0] ss:$28 sps:$4 sm:$0xff]   ;;  %v13627_v18 = vld [vmem:[#allocation5 + $0xe0] ss:$28 sps:$4 sm:$0xff]  }
 0x11b   :  { %3105 = vmatpush1.bf16.msra.mxu0 %v13609_v6  ;;  %3269 = vmatpush1.bf16.msra.mxu1 %v13610_v7  ;;  %v13623_v16 = vld [vmem:[#allocation5 + $0xe4] ss:$28 sps:$4 sm:$0xff]   ;;  %v13625_v17 = vld [vmem:[#allocation5 + $0xec] ss:$28 sps:$4 sm:$0xff]   ;;  %v13629_v20 = vld [vmem:[#allocation5 + $0x11c] ss:$28 sps:$4 sm:$0xff]  }
 0x11c   :  { %3106 = vmatprep.subr.bf16.mxu0 %v13611_v8  ;;  %3270 = vmatprep.subr.bf16.mxu1 %v13613_v9  ;;  %v13628_v19 = vld [vmem:[#allocation5 + $0xe8] ss:$28 sps:$4 sm:$0xff]   ;;  %v13633_v22 = vld [vmem:[#allocation5 + $0x118] ss:$28 sps:$4 sm:$0xff]   ;;  %v13634_v23 = vld [vmem:[#allocation5 + $0x120] ss:$28 sps:$4 sm:$0xff]  }
 0x11d   :  { %v13631_v21 = vld [vmem:[#allocation5 + $0x124] ss:$28 sps:$4 sm:$0xff]   ;;  %v13635_v24 = vld [vmem:[#allocation5 + $0x154] ss:$28 sps:$4 sm:$0xff]   ;;  %v13637_v25 = vld [vmem:[#allocation5 + $0x15c] ss:$28 sps:$4 sm:$0xff]  }
 0x11e   :  { %v13639_v26 = vld [vmem:[#allocation5 + $0x150] ss:$28 sps:$4 sm:$0xff]   ;;  %v13640_v27 = vld [vmem:[#allocation5 + $0x158] ss:$28 sps:$4 sm:$0xff]   ;;  %v13645_v30 = vld [vmem:[#allocation5 + $0x188] ss:$28 sps:$4 sm:$0xff]  }
 0x11f   :  { %3107 = vmatpush1.bf16.msra.mxu0 %v13615_v10  ;;  %3271 = vmatpush1.bf16.msra.mxu1 %v13616_v11  ;;  %v13641_v28 = vld [vmem:[#allocation5 + $0x18c] ss:$28 sps:$4 sm:$0xff]   ;;  %v13643_v29 = vld [vmem:[#allocation5 + $0x194] ss:$28 sps:$4 sm:$0xff]   ;;  %v13647_v32 = vld [vmem:[#allocation5 + $0x1c4] ss:$28 sps:$4 sm:$0xff]  }
 0x120   :  { %3108 = vmatprep.subr.bf16.mxu0 %v13617_v12  ;;  %3272 = vmatprep.subr.bf16.mxu1 %v13619_v13  ;;  %v13646_v31 = vld [vmem:[#allocation5 + $0x190] ss:$28 sps:$4 sm:$0xff]   ;;  %v13651_v34 = vld [vmem:[#allocation5 + $0x1c0] ss:$28 sps:$4 sm:$0xff]   ;;  %v13652_v35 = vld [vmem:[#allocation5 + $0x1c8] ss:$28 sps:$4 sm:$0xff]  }
 0x121   :  { %v13649_v33 = vld [vmem:[#allocation5 + $0x1cc] ss:$28 sps:$4 sm:$0xff]   ;;  %v13653_v36 = vld [vmem:[#allocation5 + $0x1fc] ss:$28 sps:$4 sm:$0xff]   ;;  %v13655_v37 = vld [vmem:[#allocation5 + $0x204] ss:$28 sps:$4 sm:$0xff]  }
 0x122   :  { %v13657_v38 = vld [vmem:[#allocation5 + $0x1f8] ss:$28 sps:$4 sm:$0xff]   ;;  %v13658_v39 = vld [vmem:[#allocation5 + $0x200] ss:$28 sps:$4 sm:$0xff]   ;;  %v13663_v42 = vld [vmem:[#allocation5 + $0x230] ss:$28 sps:$4 sm:$0xff]  }
 0x123   :  { %3109 = vmatpush1.bf16.msra.mxu0 %v13621_v14  ;;  %3273 = vmatpush1.bf16.msra.mxu1 %v13622_v15  ;;  %v13659_v40 = vld [vmem:[#allocation5 + $0x234] ss:$28 sps:$4 sm:$0xff]   ;;  %v13661_v41 = vld [vmem:[#allocation5 + $0x23c] ss:$28 sps:$4 sm:$0xff]   ;;  %v13665_v44 = vld [vmem:[#allocation5 + $0x26c] ss:$28 sps:$4 sm:$0xff]  }
 0x124   :  { %3110 = vmatprep.subr.bf16.mxu0 %v13623_v16  ;;  %3274 = vmatprep.subr.bf16.mxu1 %v13625_v17  ;;  %v13664_v43 = vld [vmem:[#allocation5 + $0x238] ss:$28 sps:$4 sm:$0xff]   ;;  %v234_v46 = vld [vmem:[#allocation2 + $0x8] sm:$0xff]  ;;  %v13671_v50 = vld [vmem:[#allocation5 + $0x2a4] ss:$28 sps:$4 sm:$0xff]   ;;  %vm15850_vm0 = vmmov 0  }
 0x125   :  { %v13667_v45 = vld [vmem:[#allocation5 + $0x274] ss:$28 sps:$4 sm:$0xff]   ;;  %v13669_v47 = vld [vmem:[#allocation5 + $0x268] ss:$28 sps:$4 sm:$0xff]   ;;  %v16121_v48 = vpack.c.bf16 %v234_v46, %v234_v46  ;;  %v13675_v52 = vld [vmem:[#allocation5 + $0x2a0] ss:$28 sps:$4 sm:$0xff]  }
 0x126   :  { %v13670_v49 = vld [vmem:[#allocation5 + $0x270] ss:$28 sps:$4 sm:$0xff]   ;;  %v13676_v53 = vld [vmem:[#allocation5 + $0x2a8] ss:$28 sps:$4 sm:$0xff]   ;;  %v13677_v54 = vld [vmem:[#allocation5 + $0x2dc] ss:$28 sps:$4 sm:$0xff]  }
 0x127   :  { %3111 = vmatpush1.bf16.msra.mxu0 %v13627_v18  ;;  %3275 = vmatpush1.bf16.msra.mxu1 %v13628_v19  ;;  %v13673_v51 = vld [vmem:[#allocation5 + $0x2ac] ss:$28 sps:$4 sm:$0xff]   ;;  %v13679_v55 = vld [vmem:[#allocation5 + $0x2e4] ss:$28 sps:$4 sm:$0xff]   ;;  %v13681_v56 = vld [vmem:[#allocation5 + $0x2d8] ss:$28 sps:$4 sm:$0xff]  }
 0x128   :  { %3112 = vmatprep.subr.bf16.mxu0 %v13629_v20  ;;  %3276 = vmatprep.subr.bf16.mxu1 %v13631_v21  ;;  %v13682_v57 = vld [vmem:[#allocation5 + $0x2e0] ss:$28 sps:$4 sm:$0xff]   ;;  %v13683_v58 = vld [vmem:[#allocation5 + $0x314] ss:$28 sps:$4 sm:$0xff]   ;;  %v13689_v62 = vld [vmem:[#allocation5 + $0x34c] ss:$28 sps:$4 sm:$0xff]  }
 0x129   :  { %3134 = vmatprep.mubr.bf16.mxu0 %v16121_v48  ;;  %3298 = vmatprep.mubr.bf16.mxu1 %v16121_v48  ;;  %v13685_v59 = vld [vmem:[#allocation5 + $0x31c] ss:$28 sps:$4 sm:$0xff]   ;;  %v13687_v60 = vld [vmem:[#allocation5 + $0x310] ss:$28 sps:$4 sm:$0xff]   ;;  %v13693_v0 = vld [vmem:[#allocation5 + $0x348] ss:$28 sps:$4 sm:$0xff]  }
 0x12a   :  { %v13688_v61 = vld [vmem:[#allocation5 + $0x318] ss:$28 sps:$4 sm:$0xff]   ;;  %v13694_v1 = vld [vmem:[#allocation5 + $0x350] ss:$28 sps:$4 sm:$0xff]   ;;  %v233_v2 = vld [vmem:[#allocation2] sm:$0xff]  ;;  %s15851_s14 = smov [#allocation26]  }
 0x12b   :  { %3113 = vmatpush1.bf16.msra.mxu0 %v13633_v22  ;;  %3277 = vmatpush1.bf16.msra.mxu1 %v13634_v23  ;;  %v13691_v63 = vld [vmem:[#allocation5 + $0x354] ss:$28 sps:$4 sm:$0xff]   ;;  %v13697_v3 = vld [vmem:[#allocation5 + $0x384] ss:$28 sps:$4 sm:$0xff]   ;;  %v13700_v4 = vld [vmem:[#allocation5 + $0x38c] ss:$28 sps:$4 sm:$0xff]   ;;  %v16125_v5 = vpack.c.bf16 %v233_v2, %v233_v2 }
 0x12c   :  { %3114 = vmatprep.subr.bf16.mxu0 %v13635_v24  ;;  %3278 = vmatprep.subr.bf16.mxu1 %v13637_v25  ;;  %v13695_v6 = vld [vmem:[#allocation5 + $0x380] ss:$28 sps:$4 sm:$0xff]   ;;  %v13698_v7 = vld [vmem:[#allocation5 + $0x388] ss:$28 sps:$4 sm:$0xff]   ;;  %v13701_v10 = vld [vmem:[#allocation5 + $0x3b8] ss:$28 sps:$4 sm:$0xff]  }
 0x12d   :  { %v13703_v8 = vld [vmem:[#allocation5 + $0x3bc] ss:$28 sps:$4 sm:$0xff]   ;;  %v13706_v9 = vld [vmem:[#allocation5 + $0x3c4] ss:$28 sps:$4 sm:$0xff]   ;;  %v13709_v12 = vld [vmem:[#allocation5 + $0x3f4] ss:$28 sps:$4 sm:$0xff]  }
 0x12e   :  { %v13704_v11 = vld [vmem:[#allocation5 + $0x3c0] ss:$28 sps:$4 sm:$0xff]   ;;  %v13707_v14 = vld [vmem:[#allocation5 + $0x3f0] ss:$28 sps:$4 sm:$0xff]   ;;  %v13710_v15 = vld [vmem:[#allocation5 + $0x3f8] ss:$28 sps:$4 sm:$0xff]  }
 0x12f   :  { %3115 = vmatpush1.bf16.msra.mxu0 %v13639_v26  ;;  %3279 = vmatpush1.bf16.msra.mxu1 %v13640_v27  ;;  %v13712_v13 = vld [vmem:[#allocation5 + $0x3fc] ss:$28 sps:$4 sm:$0xff]   ;;  %v13715_v16 = vld [vmem:[#allocation5 + $0x42c] ss:$28 sps:$4 sm:$0xff]   ;;  %v13718_v17 = vld [vmem:[#allocation5 + $0x434] ss:$28 sps:$4 sm:$0xff]  }
 0x130   :  { %3116 = vmatprep.subr.bf16.mxu0 %v13641_v28  ;;  %3280 = vmatprep.subr.bf16.mxu1 %v13643_v29  ;;  %v13713_v18 = vld [vmem:[#allocation5 + $0x428] ss:$28 sps:$4 sm:$0xff]   ;;  %v13716_v19 = vld [vmem:[#allocation5 + $0x430] ss:$28 sps:$4 sm:$0xff]   ;;  %v13719_v22 = vld [vmem:[#allocation5 + $0x460] ss:$28 sps:$4 sm:$0xff]  }
 0x131   :  { %v13721_v20 = vld [vmem:[#allocation5 + $0x464] ss:$28 sps:$4 sm:$0xff]   ;;  %v13724_v21 = vld [vmem:[#allocation5 + $0x46c] ss:$28 sps:$4 sm:$0xff]   ;;  %v13727_v24 = vld [vmem:[#allocation5 + $0x49c] ss:$28 sps:$4 sm:$0xff]  }
 0x132   :  { %v13722_v23 = vld [vmem:[#allocation5 + $0x468] ss:$28 sps:$4 sm:$0xff]   ;;  %v13725_v26 = vld [vmem:[#allocation5 + $0x498] ss:$28 sps:$4 sm:$0xff]   ;;  %v13728_v27 = vld [vmem:[#allocation5 + $0x4a0] ss:$28 sps:$4 sm:$0xff]  }
 0x133   :  { %3117 = vmatpush1.bf16.msra.mxu0 %v13645_v30  ;;  %3281 = vmatpush1.bf16.msra.mxu1 %v13646_v31  ;;  %v13730_v25 = vld [vmem:[#allocation5 + $0x4a4] ss:$28 sps:$4 sm:$0xff]   ;;  %v13733_v28 = vld [vmem:[#allocation5 + $0x4d4] ss:$28 sps:$4 sm:$0xff]   ;;  %v13736_v29 = vld [vmem:[#allocation5 + $0x4dc] ss:$28 sps:$4 sm:$0xff]  }
 0x134   :  { %3118 = vmatprep.subr.bf16.mxu0 %v13647_v32  ;;  %3282 = vmatprep.subr.bf16.mxu1 %v13649_v33  ;;  %v236_v30 = vld [vmem:[#allocation2 + $0x18] sm:$0xff]  ;;  %v13731_v31 = vld [vmem:[#allocation5 + $0x4d0] ss:$28 sps:$4 sm:$0xff]   ;;  %s11771_s21 = sshll.u32 %s15851_s14, 4  ;;  %s11772_s21 = int_to_ptr.vmem [resolvable:$true] %s11771_s21 }
 0x135   :  { %v16129_v32 = vpack.c.bf16 %v236_v30, %v236_v30  ;;  %v13734_v33 = vld [vmem:[#allocation5 + $0x4d8] ss:$28 sps:$4 sm:$0xff]   ;;  %v13815_v30 = vld [vmem:[#allocation5 + $0x7e0] ss:$28 sps:$4 sm:$0xff]   ;;  %s15788_s25 = scalar_lea.vmem %s11772_s21, 128  ;;  %p15793_p9 = scmp.lt.s32.totalorder %s11772_s21, %s11772_s21 }
 0x136   :  { %v13757_v46 = vld [vmem:[#allocation5 + $0x5b4] ss:$28 sps:$4 sm:$0xff]   ;;  %p15789_p8 = scmp.ne.s32.totalorder %s11772_s21, %s15788_s25  ;;  %p15794_p10 = scmp.lt.s32.totalorder %s15788_s25, %s15788_s25 }
 0x137   :  { %3119 = vmatpush1.bf16.msra.mxu0 %v13651_v34  ;;  %3283 = vmatpush1.bf16.msra.mxu1 %v13652_v35  ;;  %v13739_v34 = vld [vmem:[#allocation5 + $0x50c] ss:$28 sps:$4 sm:$0xff]   ;;  %v13742_v35 = vld [vmem:[#allocation5 + $0x514] ss:$28 sps:$4 sm:$0xff]  }
 0x138   :  { %3120 = vmatprep.subr.bf16.mxu0 %v13653_v36  ;;  %3284 = vmatprep.subr.bf16.mxu1 %v13655_v37  ;;  %v13737_v36 = vld [vmem:[#allocation5 + $0x508] ss:$28 sps:$4 sm:$0xff]   ;;  %v13740_v37 = vld [vmem:[#allocation5 + $0x510] ss:$28 sps:$4 sm:$0xff]   ;;  %v13782_v2 = vld [vmem:[#allocation5 + $0x698] ss:$28 sps:$4 sm:$0xff]   ;;  %p15795_p11 = por %p15794_p10, %p15793_p9 }
 0x13a   :  { %p15796_p12 = pnand %p15795_p11, %p15789_p8 }
 0x13b   :  { %3121 = vmatpush1.bf16.msra.mxu0 %v13657_v38  ;;  %3285 = vmatpush1.bf16.msra.mxu1 %v13658_v39  ;;  %v13745_v38 = vld [vmem:[#allocation5 + $0x544] ss:$28 sps:$4 sm:$0xff]   ;;  %v13748_v39 = vld [vmem:[#allocation5 + $0x54c] ss:$28 sps:$4 sm:$0xff]  }
 0x13c   :  { %3122 = vmatprep.subr.bf16.mxu0 %v13659_v40  ;;  %3286 = vmatprep.subr.bf16.mxu1 %v13661_v41  ;;  %v13743_v40 = vld [vmem:[#allocation5 + $0x540] ss:$28 sps:$4 sm:$0xff]   ;;  %v13746_v41 = vld [vmem:[#allocation5 + $0x548] ss:$28 sps:$4 sm:$0xff]  }
 0x13f   :  { %3123 = vmatpush1.bf16.msra.mxu0 %v13663_v42  ;;  %3287 = vmatpush1.bf16.msra.mxu1 %v13664_v43  ;;  %v13751_v42 = vld [vmem:[#allocation5 + $0x57c] ss:$28 sps:$4 sm:$0xff]   ;;  %v13754_v43 = vld [vmem:[#allocation5 + $0x584] ss:$28 sps:$4 sm:$0xff]  }
 0x140   :  { %3124 = vmatprep.subr.bf16.mxu0 %v13665_v44  ;;  %3288 = vmatprep.subr.bf16.mxu1 %v13667_v45  ;;  %v13749_v44 = vld [vmem:[#allocation5 + $0x578] ss:$28 sps:$4 sm:$0xff]   ;;  %v13752_v45 = vld [vmem:[#allocation5 + $0x580] ss:$28 sps:$4 sm:$0xff]  }
 0x143   :  { %3125 = vmatpush1.bf16.msra.mxu0 %v13669_v47  ;;  %3289 = vmatpush1.bf16.msra.mxu1 %v13670_v49  ;;  %v13760_v47 = vld [vmem:[#allocation5 + $0x5bc] ss:$28 sps:$4 sm:$0xff]   ;;  %v13755_v49 = vld [vmem:[#allocation5 + $0x5b0] ss:$28 sps:$4 sm:$0xff]  }
 0x144   :  { %3126 = vmatprep.subr.bf16.mxu0 %v13671_v50  ;;  %3290 = vmatprep.subr.bf16.mxu1 %v13673_v51  ;;  %v13758_v50 = vld [vmem:[#allocation5 + $0x5b8] ss:$28 sps:$4 sm:$0xff]   ;;  %v13763_v51 = vld [vmem:[#allocation5 + $0x5ec] ss:$28 sps:$4 sm:$0xff]  }
 0x147   :  { %3127 = vmatpush1.bf16.msra.mxu0 %v13675_v52  ;;  %3291 = vmatpush1.bf16.msra.mxu1 %v13676_v53  ;;  %v13766_v52 = vld [vmem:[#allocation5 + $0x5f4] ss:$28 sps:$4 sm:$0xff]   ;;  %v13761_v53 = vld [vmem:[#allocation5 + $0x5e8] ss:$28 sps:$4 sm:$0xff]  }
 0x148   :  { %3128 = vmatprep.subr.bf16.mxu0 %v13677_v54  ;;  %3292 = vmatprep.subr.bf16.mxu1 %v13679_v55  ;;  %v13764_v54 = vld [vmem:[#allocation5 + $0x5f0] ss:$28 sps:$4 sm:$0xff]   ;;  %v13769_v55 = vld [vmem:[#allocation5 + $0x624] ss:$28 sps:$4 sm:$0xff]  }
 0x14b   :  { %3129 = vmatpush1.bf16.msra.mxu0 %v13681_v56  ;;  %3293 = vmatpush1.bf16.msra.mxu1 %v13682_v57  ;;  %v13772_v56 = vld [vmem:[#allocation5 + $0x62c] ss:$28 sps:$4 sm:$0xff]   ;;  %v13767_v57 = vld [vmem:[#allocation5 + $0x620] ss:$28 sps:$4 sm:$0xff]  }
 0x14c   :  { %3130 = vmatprep.subr.bf16.mxu0 %v13683_v58  ;;  %3294 = vmatprep.subr.bf16.mxu1 %v13685_v59  ;;  %v13770_v58 = vld [vmem:[#allocation5 + $0x628] ss:$28 sps:$4 sm:$0xff]   ;;  %v13775_v59 = vld [vmem:[#allocation5 + $0x65c] ss:$28 sps:$4 sm:$0xff]  }
 0x14f   :  { %3131 = vmatpush1.bf16.msra.mxu0 %v13687_v60  ;;  %3295 = vmatpush1.bf16.msra.mxu1 %v13688_v61  ;;  %v13778_v60 = vld [vmem:[#allocation5 + $0x664] ss:$28 sps:$4 sm:$0xff]   ;;  %v13773_v61 = vld [vmem:[#allocation5 + $0x658] ss:$28 sps:$4 sm:$0xff]  }
 0x150   :  { %3132 = vmatprep.subr.bf16.mxu0 %v13689_v62  ;;  %3296 = vmatprep.subr.bf16.mxu1 %v13691_v63  ;;  %v13776_v62 = vld [vmem:[#allocation5 + $0x660] ss:$28 sps:$4 sm:$0xff]   ;;  %v13781_v63 = vld [vmem:[#allocation5 + $0x694] ss:$28 sps:$4 sm:$0xff]  }
 0x153   :  { %3133 = vmatpush1.bf16.msra.mxu0 %v13693_v0  ;;  %3297 = vmatpush1.bf16.msra.mxu1 %v13694_v1  ;;  %v13784_v0 = vld [vmem:[#allocation5 + $0x69c] ss:$28 sps:$4 sm:$0xff]   ;;  %v13779_v1 = vld [vmem:[#allocation5 + $0x690] ss:$28 sps:$4 sm:$0xff]  }
 0x154   :  { %3143 = vmatprep.subr.bf16.mxu0 %v13697_v3  ;;  %3307 = vmatprep.subr.bf16.mxu1 %v13700_v4  ;;  %v13787_v3 = vld [vmem:[#allocation5 + $0x6cc] ss:$28 sps:$4 sm:$0xff]   ;;  %v13790_v4 = vld [vmem:[#allocation5 + $0x6d4] ss:$28 sps:$4 sm:$0xff]  }
 0x156   :  { %3135 = vmatmul.mubr.bf16.vlgmr.msra.gmra.mrb[0].mxu0 %v16125_v5  ;;  %3299 = vmatmul.mubr.bf16.vlgmr.msra.gmra.mrb[0].mxu1 %v16125_v5 }
 0x157   :  { %3144 = vmatpush1.bf16.msra.mxu0 %v13695_v6  ;;  %3308 = vmatpush1.bf16.msra.mxu1 %v13698_v7  ;;  %v13785_v6 = vld [vmem:[#allocation5 + $0x6c8] ss:$28 sps:$4 sm:$0xff]   ;;  %v13788_v7 = vld [vmem:[#allocation5 + $0x6d0] ss:$28 sps:$4 sm:$0xff]  }
 0x158   :  { %3145 = vmatprep.subr.bf16.mxu0 %v13703_v8  ;;  %3309 = vmatprep.subr.bf16.mxu1 %v13706_v9  ;;  %v13793_v8 = vld [vmem:[#allocation5 + $0x704] ss:$28 sps:$4 sm:$0xff]   ;;  %v235_v9 = vld [vmem:[#allocation2 + $0x10] sm:$0xff] }
 0x159   :  { %3175 = vmatprep.mubr.bf16.mxu0 %v16129_v32  ;;  %3339 = vmatprep.mubr.bf16.mxu1 %v16129_v32 }
 0x15b   :  { %3146 = vmatpush1.bf16.msra.mxu0 %v13701_v10  ;;  %3310 = vmatpush1.bf16.msra.mxu1 %v13704_v11  ;;  %v13796_v10 = vld [vmem:[#allocation5 + $0x70c] ss:$28 sps:$4 sm:$0xff]   ;;  %v13791_v11 = vld [vmem:[#allocation5 + $0x700] ss:$28 sps:$4 sm:$0xff]  }
 0x15c   :  { %3147 = vmatprep.subr.bf16.mxu0 %v13709_v12  ;;  %3311 = vmatprep.subr.bf16.mxu1 %v13712_v13  ;;  %v13794_v12 = vld [vmem:[#allocation5 + $0x708] ss:$28 sps:$4 sm:$0xff]   ;;  %v16133_v13 = vpack.c.bf16 %v235_v9, %v235_v9  ;;  %v13875_v9 = vld [vmem:[#allocation5 + $0xa10] ss:$28 sps:$4 sm:$0xff]  }
 0x15f   :  { %3148 = vmatpush1.bf16.msra.mxu0 %v13707_v14  ;;  %3312 = vmatpush1.bf16.msra.mxu1 %v13710_v15  ;;  %v13799_v14 = vld [vmem:[#allocation5 + $0x73c] ss:$28 sps:$4 sm:$0xff]   ;;  %v13802_v15 = vld [vmem:[#allocation5 + $0x744] ss:$28 sps:$4 sm:$0xff]  }
 0x160   :  { %3149 = vmatprep.subr.bf16.mxu0 %v13715_v16  ;;  %3313 = vmatprep.subr.bf16.mxu1 %v13718_v17  ;;  %v238_v16 = vld [vmem:[#allocation2 + $0x28] sm:$0xff] }
 0x161   :  { %v16135_v17 = vpack.c.bf16 %v238_v16, %v238_v16  ;;  %v13889_v16 = vld [vmem:[#allocation5 + $0xa84] ss:$28 sps:$4 sm:$0xff]  }
 0x163   :  { %3150 = vmatpush1.bf16.msra.mxu0 %v13713_v18  ;;  %3314 = vmatpush1.bf16.msra.mxu1 %v13716_v19  ;;  %v13797_v18 = vld [vmem:[#allocation5 + $0x738] ss:$28 sps:$4 sm:$0xff]   ;;  %v13800_v19 = vld [vmem:[#allocation5 + $0x740] ss:$28 sps:$4 sm:$0xff]  }
 0x164   :  { %3151 = vmatprep.subr.bf16.mxu0 %v13721_v20  ;;  %3315 = vmatprep.subr.bf16.mxu1 %v13724_v21  ;;  %v13805_v20 = vld [vmem:[#allocation5 + $0x774] ss:$28 sps:$4 sm:$0xff]   ;;  %v13808_v21 = vld [vmem:[#allocation5 + $0x77c] ss:$28 sps:$4 sm:$0xff]  }
 0x167   :  { %3152 = vmatpush1.bf16.msra.mxu0 %v13719_v22  ;;  %3316 = vmatpush1.bf16.msra.mxu1 %v13722_v23  ;;  %v13803_v22 = vld [vmem:[#allocation5 + $0x770] ss:$28 sps:$4 sm:$0xff]   ;;  %v13806_v23 = vld [vmem:[#allocation5 + $0x778] ss:$28 sps:$4 sm:$0xff]  }
 0x168   :  { %3153 = vmatprep.subr.bf16.mxu0 %v13727_v24  ;;  %3317 = vmatprep.subr.bf16.mxu1 %v13730_v25  ;;  %v13811_v24 = vld [vmem:[#allocation5 + $0x7ac] ss:$28 sps:$4 sm:$0xff]   ;;  %v13814_v25 = vld [vmem:[#allocation5 + $0x7b4] ss:$28 sps:$4 sm:$0xff]  }
 0x16b   :  { %3154 = vmatpush1.bf16.msra.mxu0 %v13725_v26  ;;  %3318 = vmatpush1.bf16.msra.mxu1 %v13728_v27  ;;  %v13809_v26 = vld [vmem:[#allocation5 + $0x7a8] ss:$28 sps:$4 sm:$0xff]   ;;  %v13812_v27 = vld [vmem:[#allocation5 + $0x7b0] ss:$28 sps:$4 sm:$0xff]  }
 0x16c   :  { %3155 = vmatprep.subr.bf16.mxu0 %v13733_v28  ;;  %3319 = vmatprep.subr.bf16.mxu1 %v13736_v29  ;;  %v13817_v28 = vld [vmem:[#allocation5 + $0x7e4] ss:$28 sps:$4 sm:$0xff]   ;;  %v13820_v29 = vld [vmem:[#allocation5 + $0x7ec] ss:$28 sps:$4 sm:$0xff]  }
 0x16f   :  { %3156 = vmatpush1.bf16.msra.mxu0 %v13731_v31  ;;  %3320 = vmatpush1.bf16.msra.mxu1 %v13734_v33  ;;  %v13818_v31 = vld [vmem:[#allocation5 + $0x7e8] ss:$28 sps:$4 sm:$0xff]   ;;  %v13823_v33 = vld [vmem:[#allocation5 + $0x81c] ss:$28 sps:$4 sm:$0xff]  }
 0x170   :  { %3157 = vmatprep.subr.bf16.mxu0 %v13739_v34  ;;  %3321 = vmatprep.subr.bf16.mxu1 %v13742_v35  ;;  %v13826_v34 = vld [vmem:[#allocation5 + $0x824] ss:$28 sps:$4 sm:$0xff]   ;;  %v13821_v35 = vld [vmem:[#allocation5 + $0x818] ss:$28 sps:$4 sm:$0xff]  }
 0x173   :  { %3158 = vmatpush1.bf16.msra.mxu0 %v13737_v36  ;;  %3322 = vmatpush1.bf16.msra.mxu1 %v13740_v37  ;;  %v13824_v36 = vld [vmem:[#allocation5 + $0x820] ss:$28 sps:$4 sm:$0xff]   ;;  %v13829_v37 = vld [vmem:[#allocation5 + $0x854] ss:$28 sps:$4 sm:$0xff]  }
 0x174   :  { %3159 = vmatprep.subr.bf16.mxu0 %v13745_v38  ;;  %3323 = vmatprep.subr.bf16.mxu1 %v13748_v39  ;;  %v13832_v38 = vld [vmem:[#allocation5 + $0x85c] ss:$28 sps:$4 sm:$0xff]   ;;  %v13827_v39 = vld [vmem:[#allocation5 + $0x850] ss:$28 sps:$4 sm:$0xff]  }
 0x177   :  { %3160 = vmatpush1.bf16.msra.mxu0 %v13743_v40  ;;  %3324 = vmatpush1.bf16.msra.mxu1 %v13746_v41  ;;  %v13830_v40 = vld [vmem:[#allocation5 + $0x858] ss:$28 sps:$4 sm:$0xff]   ;;  %v13835_v41 = vld [vmem:[#allocation5 + $0x88c] ss:$28 sps:$4 sm:$0xff]  }
 0x178   :  { %3161 = vmatprep.subr.bf16.mxu0 %v13751_v42  ;;  %3325 = vmatprep.subr.bf16.mxu1 %v13754_v43  ;;  %v13838_v42 = vld [vmem:[#allocation5 + $0x894] ss:$28 sps:$4 sm:$0xff]   ;;  %v13833_v43 = vld [vmem:[#allocation5 + $0x888] ss:$28 sps:$4 sm:$0xff]  }
 0x17b   :  { %3162 = vmatpush1.bf16.msra.mxu0 %v13749_v44  ;;  %3326 = vmatpush1.bf16.msra.mxu1 %v13752_v45  ;;  %v13836_v44 = vld [vmem:[#allocation5 + $0x890] ss:$28 sps:$4 sm:$0xff]   ;;  %v13841_v45 = vld [vmem:[#allocation5 + $0x8c4] ss:$28 sps:$4 sm:$0xff]  }
 0x17c   :  { %3163 = vmatprep.subr.bf16.mxu0 %v13757_v46  ;;  %3327 = vmatprep.subr.bf16.mxu1 %v13760_v47  ;;  %v13844_v46 = vld [vmem:[#allocation5 + $0x8cc] ss:$28 sps:$4 sm:$0xff]   ;;  %v13839_v47 = vld [vmem:[#allocation5 + $0x8c0] ss:$28 sps:$4 sm:$0xff]  }
 0x17f   :  { %3164 = vmatpush1.bf16.msra.mxu0 %v13755_v49  ;;  %3328 = vmatpush1.bf16.msra.mxu1 %v13758_v50  ;;  %v13842_v49 = vld [vmem:[#allocation5 + $0x8c8] ss:$28 sps:$4 sm:$0xff]   ;;  %v13847_v50 = vld [vmem:[#allocation5 + $0x8fc] ss:$28 sps:$4 sm:$0xff]  }
 0x180   :  { %3165 = vmatprep.subr.bf16.mxu0 %v13763_v51  ;;  %3329 = vmatprep.subr.bf16.mxu1 %v13766_v52  ;;  %v13850_v51 = vld [vmem:[#allocation5 + $0x904] ss:$28 sps:$4 sm:$0xff]   ;;  %v13845_v52 = vld [vmem:[#allocation5 + $0x8f8] ss:$28 sps:$4 sm:$0xff]  }
 0x183   :  { %3166 = vmatpush1.bf16.msra.mxu0 %v13761_v53  ;;  %3330 = vmatpush1.bf16.msra.mxu1 %v13764_v54  ;;  %v13848_v53 = vld [vmem:[#allocation5 + $0x900] ss:$28 sps:$4 sm:$0xff]   ;;  %v13853_v54 = vld [vmem:[#allocation5 + $0x934] ss:$28 sps:$4 sm:$0xff]  }
 0x184   :  { %3167 = vmatprep.subr.bf16.mxu0 %v13769_v55  ;;  %3331 = vmatprep.subr.bf16.mxu1 %v13772_v56  ;;  %v13856_v55 = vld [vmem:[#allocation5 + $0x93c] ss:$28 sps:$4 sm:$0xff]   ;;  %v13851_v56 = vld [vmem:[#allocation5 + $0x930] ss:$28 sps:$4 sm:$0xff]  }
 0x187   :  { %3168 = vmatpush1.bf16.msra.mxu0 %v13767_v57  ;;  %3332 = vmatpush1.bf16.msra.mxu1 %v13770_v58  ;;  %v13854_v57 = vld [vmem:[#allocation5 + $0x938] ss:$28 sps:$4 sm:$0xff]   ;;  %v13859_v58 = vld [vmem:[#allocation5 + $0x96c] ss:$28 sps:$4 sm:$0xff]  }
 0x188   :  { %3169 = vmatprep.subr.bf16.mxu0 %v13775_v59  ;;  %3333 = vmatprep.subr.bf16.mxu1 %v13778_v60  ;;  %v13862_v59 = vld [vmem:[#allocation5 + $0x974] ss:$28 sps:$4 sm:$0xff]   ;;  %v13857_v60 = vld [vmem:[#allocation5 + $0x968] ss:$28 sps:$4 sm:$0xff]  }
 0x18b   :  { %3170 = vmatpush1.bf16.msra.mxu0 %v13773_v61  ;;  %3334 = vmatpush1.bf16.msra.mxu1 %v13776_v62  ;;  %v13860_v61 = vld [vmem:[#allocation5 + $0x970] ss:$28 sps:$4 sm:$0xff]   ;;  %v13865_v62 = vld [vmem:[#allocation5 + $0x9a4] ss:$28 sps:$4 sm:$0xff]  }
 0x18c   :  { %3171 = vmatprep.subr.bf16.mxu0 %v13781_v63  ;;  %3335 = vmatprep.subr.bf16.mxu1 %v13784_v0  ;;  %v13868_v63 = vld [vmem:[#allocation5 + $0x9ac] ss:$28 sps:$4 sm:$0xff]   ;;  %v13863_v0 = vld [vmem:[#allocation5 + $0x9a0] ss:$28 sps:$4 sm:$0xff]  }
 0x18f   :  { %3172 = vmatpush1.bf16.msra.mxu0 %v13779_v1  ;;  %3336 = vmatpush1.bf16.msra.mxu1 %v13782_v2  ;;  %v13866_v1 = vld [vmem:[#allocation5 + $0x9a8] ss:$28 sps:$4 sm:$0xff]   ;;  %v13871_v2 = vld [vmem:[#allocation5 + $0x9dc] ss:$28 sps:$4 sm:$0xff]  }
 0x190   :  { %3173 = vmatprep.subr.bf16.mxu0 %v13787_v3  ;;  %3337 = vmatprep.subr.bf16.mxu1 %v13790_v4  ;;  %v13874_v3 = vld [vmem:[#allocation5 + $0x9e4] ss:$28 sps:$4 sm:$0xff]   ;;  %v13869_v4 = vld [vmem:[#allocation5 + $0x9d8] ss:$28 sps:$4 sm:$0xff]  }
 0x193   :  { %3174 = vmatpush1.bf16.msra.mxu0 %v13785_v6  ;;  %3338 = vmatpush1.bf16.msra.mxu1 %v13788_v7  ;;  %v13872_v6 = vld [vmem:[#allocation5 + $0x9e0] ss:$28 sps:$4 sm:$0xff]   ;;  %v13877_v7 = vld [vmem:[#allocation5 + $0xa14] ss:$28 sps:$4 sm:$0xff]  }
 0x194   :  { %3184 = vmatprep.subr.bf16.mxu0 %v13793_v8  ;;  %3348 = vmatprep.subr.bf16.mxu1 %v13796_v10  ;;  %v13880_v8 = vld [vmem:[#allocation5 + $0xa1c] ss:$28 sps:$4 sm:$0xff]  }
 0x195   :  { %v13878_v10 = vld [vmem:[#allocation5 + $0xa18] ss:$28 sps:$4 sm:$0xff]  }
 0x196   :  { %3176 = vmatmul.mubr.bf16.vlgmr.msra.gmra.mrb[0].mxu0 %v16133_v13  ;;  %3340 = vmatmul.mubr.bf16.vlgmr.msra.gmra.mrb[0].mxu1 %v16133_v13 }
 0x197   :  { %3185 = vmatpush1.bf16.msra.mxu0 %v13791_v11  ;;  %3349 = vmatpush1.bf16.msra.mxu1 %v13794_v12  ;;  %v13883_v11 = vld [vmem:[#allocation5 + $0xa4c] ss:$28 sps:$4 sm:$0xff]   ;;  %v13886_v12 = vld [vmem:[#allocation5 + $0xa54] ss:$28 sps:$4 sm:$0xff]  }
 0x198   :  { %3186 = vmatprep.subr.bf16.mxu0 %v13799_v14  ;;  %3350 = vmatprep.subr.bf16.mxu1 %v13802_v15  ;;  %v13881_v14 = vld [vmem:[#allocation5 + $0xa48] ss:$28 sps:$4 sm:$0xff]   ;;  %v13884_v15 = vld [vmem:[#allocation5 + $0xa50] ss:$28 sps:$4 sm:$0xff]  }
 0x199   :  { %3216 = vmatprep.mubr.bf16.mxu0 %v16135_v17  ;;  %3380 = vmatprep.mubr.bf16.mxu1 %v16135_v17 }
 0x19b   :  { %3187 = vmatpush1.bf16.msra.mxu0 %v13797_v18  ;;  %3351 = vmatpush1.bf16.msra.mxu1 %v13800_v19  ;;  %v237_v18 = vld [vmem:[#allocation2 + $0x20] sm:$0xff]  ;;  %v13892_v19 = vld [vmem:[#allocation5 + $0xa8c] ss:$28 sps:$4 sm:$0xff]  }
 0x19c   :  { %3188 = vmatprep.subr.bf16.mxu0 %v13805_v20  ;;  %3352 = vmatprep.subr.bf16.mxu1 %v13808_v21  ;;  %v13887_v20 = vld [vmem:[#allocation5 + $0xa80] ss:$28 sps:$4 sm:$0xff]   ;;  %v13890_v21 = vld [vmem:[#allocation5 + $0xa88] ss:$28 sps:$4 sm:$0xff]  }
 0x19f   :  { %3189 = vmatpush1.bf16.msra.mxu0 %v13803_v22  ;;  %3353 = vmatpush1.bf16.msra.mxu1 %v13806_v23  ;;  %v16141_v22 = vpack.c.bf16 %v237_v18, %v237_v18  ;;  %v240_v23 = vld [vmem:[#allocation2 + $0x38] sm:$0xff]  ;;  %v13973_v18 = vld [vmem:[#allocation5 + $0xd94] ss:$28 sps:$4 sm:$0xff]  }
 0x1a0   :  { %3190 = vmatprep.subr.bf16.mxu0 %v13811_v24  ;;  %3354 = vmatprep.subr.bf16.mxu1 %v13814_v25  ;;  %v13895_v24 = vld [vmem:[#allocation5 + $0xabc] ss:$28 sps:$4 sm:$0xff]   ;;  %v13898_v25 = vld [vmem:[#allocation5 + $0xac4] ss:$28 sps:$4 sm:$0xff]  }
 0x1a3   :  { %3191 = vmatpush1.bf16.msra.mxu0 %v13809_v26  ;;  %3355 = vmatpush1.bf16.msra.mxu1 %v13812_v27  ;;  %v13893_v26 = vld [vmem:[#allocation5 + $0xab8] ss:$28 sps:$4 sm:$0xff]   ;;  %v16143_v27 = vpack.c.bf16 %v240_v23, %v240_v23  ;;  %v13979_v23 = vld [vmem:[#allocation5 + $0xdcc] ss:$28 sps:$4 sm:$0xff]  }
 0x1a4   :  { %3192 = vmatprep.subr.bf16.mxu0 %v13817_v28  ;;  %3356 = vmatprep.subr.bf16.mxu1 %v13820_v29  ;;  %v13896_v28 = vld [vmem:[#allocation5 + $0xac0] ss:$28 sps:$4 sm:$0xff]   ;;  %v13901_v29 = vld [vmem:[#allocation5 + $0xaf4] ss:$28 sps:$4 sm:$0xff]  }
 0x1a7   :  { %3193 = vmatpush1.bf16.msra.mxu0 %v13815_v30  ;;  %3357 = vmatpush1.bf16.msra.mxu1 %v13818_v31  ;;  %v13904_v30 = vld [vmem:[#allocation5 + $0xafc] ss:$28 sps:$4 sm:$0xff]   ;;  %v13899_v31 = vld [vmem:[#allocation5 + $0xaf0] ss:$28 sps:$4 sm:$0xff]  }
 0x1a8   :  { %3194 = vmatprep.subr.bf16.mxu0 %v13823_v33  ;;  %3358 = vmatprep.subr.bf16.mxu1 %v13826_v34  ;;  %v13902_v33 = vld [vmem:[#allocation5 + $0xaf8] ss:$28 sps:$4 sm:$0xff]   ;;  %v13907_v34 = vld [vmem:[#allocation5 + $0xb2c] ss:$28 sps:$4 sm:$0xff]  }
 0x1ab   :  { %3195 = vmatpush1.bf16.msra.mxu0 %v13821_v35  ;;  %3359 = vmatpush1.bf16.msra.mxu1 %v13824_v36  ;;  %v13910_v35 = vld [vmem:[#allocation5 + $0xb34] ss:$28 sps:$4 sm:$0xff]   ;;  %v13905_v36 = vld [vmem:[#allocation5 + $0xb28] ss:$28 sps:$4 sm:$0xff]  }
 0x1ac   :  { %3196 = vmatprep.subr.bf16.mxu0 %v13829_v37  ;;  %3360 = vmatprep.subr.bf16.mxu1 %v13832_v38  ;;  %v13908_v37 = vld [vmem:[#allocation5 + $0xb30] ss:$28 sps:$4 sm:$0xff]   ;;  %v13913_v38 = vld [vmem:[#allocation5 + $0xb64] ss:$28 sps:$4 sm:$0xff]  }
 0x1af   :  { %3197 = vmatpush1.bf16.msra.mxu0 %v13827_v39  ;;  %3361 = vmatpush1.bf16.msra.mxu1 %v13830_v40  ;;  %v13916_v39 = vld [vmem:[#allocation5 + $0xb6c] ss:$28 sps:$4 sm:$0xff]   ;;  %v13911_v40 = vld [vmem:[#allocation5 + $0xb60] ss:$28 sps:$4 sm:$0xff]  }
 0x1b0   :  { %3198 = vmatprep.subr.bf16.mxu0 %v13835_v41  ;;  %3362 = vmatprep.subr.bf16.mxu1 %v13838_v42  ;;  %v13914_v41 = vld [vmem:[#allocation5 + $0xb68] ss:$28 sps:$4 sm:$0xff]   ;;  %v13919_v42 = vld [vmem:[#allocation5 + $0xb9c] ss:$28 sps:$4 sm:$0xff]  }
 0x1b3   :  { %3199 = vmatpush1.bf16.msra.mxu0 %v13833_v43  ;;  %3363 = vmatpush1.bf16.msra.mxu1 %v13836_v44  ;;  %v13922_v43 = vld [vmem:[#allocation5 + $0xba4] ss:$28 sps:$4 sm:$0xff]   ;;  %v13917_v44 = vld [vmem:[#allocation5 + $0xb98] ss:$28 sps:$4 sm:$0xff]  }
 0x1b4   :  { %3200 = vmatprep.subr.bf16.mxu0 %v13841_v45  ;;  %3364 = vmatprep.subr.bf16.mxu1 %v13844_v46  ;;  %v13920_v45 = vld [vmem:[#allocation5 + $0xba0] ss:$28 sps:$4 sm:$0xff]   ;;  %v13925_v46 = vld [vmem:[#allocation5 + $0xbd4] ss:$28 sps:$4 sm:$0xff]  }
 0x1b7   :  { %3201 = vmatpush1.bf16.msra.mxu0 %v13839_v47  ;;  %3365 = vmatpush1.bf16.msra.mxu1 %v13842_v49  ;;  %v13928_v47 = vld [vmem:[#allocation5 + $0xbdc] ss:$28 sps:$4 sm:$0xff]   ;;  %v13923_v49 = vld [vmem:[#allocation5 + $0xbd0] ss:$28 sps:$4 sm:$0xff]  }
 0x1b8   :  { %3202 = vmatprep.subr.bf16.mxu0 %v13847_v50  ;;  %3366 = vmatprep.subr.bf16.mxu1 %v13850_v51  ;;  %v13926_v50 = vld [vmem:[#allocation5 + $0xbd8] ss:$28 sps:$4 sm:$0xff]   ;;  %v13931_v51 = vld [vmem:[#allocation5 + $0xc0c] ss:$28 sps:$4 sm:$0xff]  }
 0x1bb   :  { %3203 = vmatpush1.bf16.msra.mxu0 %v13845_v52  ;;  %3367 = vmatpush1.bf16.msra.mxu1 %v13848_v53  ;;  %v13934_v52 = vld [vmem:[#allocation5 + $0xc14] ss:$28 sps:$4 sm:$0xff]   ;;  %v13929_v53 = vld [vmem:[#allocation5 + $0xc08] ss:$28 sps:$4 sm:$0xff]  }
 0x1bc   :  { %3204 = vmatprep.subr.bf16.mxu0 %v13853_v54  ;;  %3368 = vmatprep.subr.bf16.mxu1 %v13856_v55  ;;  %v13932_v54 = vld [vmem:[#allocation5 + $0xc10] ss:$28 sps:$4 sm:$0xff]   ;;  %v13937_v55 = vld [vmem:[#allocation5 + $0xc44] ss:$28 sps:$4 sm:$0xff]  }
 0x1bf   :  { %3205 = vmatpush1.bf16.msra.mxu0 %v13851_v56  ;;  %3369 = vmatpush1.bf16.msra.mxu1 %v13854_v57  ;;  %v13940_v56 = vld [vmem:[#allocation5 + $0xc4c] ss:$28 sps:$4 sm:$0xff]   ;;  %v13935_v57 = vld [vmem:[#allocation5 + $0xc40] ss:$28 sps:$4 sm:$0xff]  }
 0x1c0   :  { %3206 = vmatprep.subr.bf16.mxu0 %v13859_v58  ;;  %3370 = vmatprep.subr.bf16.mxu1 %v13862_v59  ;;  %v13938_v58 = vld [vmem:[#allocation5 + $0xc48] ss:$28 sps:$4 sm:$0xff]   ;;  %v13943_v59 = vld [vmem:[#allocation5 + $0xc7c] ss:$28 sps:$4 sm:$0xff]  }
 0x1c3   :  { %3207 = vmatpush1.bf16.msra.mxu0 %v13857_v60  ;;  %3371 = vmatpush1.bf16.msra.mxu1 %v13860_v61  ;;  %v13946_v60 = vld [vmem:[#allocation5 + $0xc84] ss:$28 sps:$4 sm:$0xff]   ;;  %v13941_v61 = vld [vmem:[#allocation5 + $0xc78] ss:$28 sps:$4 sm:$0xff]  }
 0x1c4   :  { %3208 = vmatprep.subr.bf16.mxu0 %v13865_v62  ;;  %3372 = vmatprep.subr.bf16.mxu1 %v13868_v63  ;;  %v13944_v62 = vld [vmem:[#allocation5 + $0xc80] ss:$28 sps:$4 sm:$0xff]   ;;  %v13949_v63 = vld [vmem:[#allocation5 + $0xcb4] ss:$28 sps:$4 sm:$0xff]  }
 0x1c7   :  { %3209 = vmatpush1.bf16.msra.mxu0 %v13863_v0  ;;  %3373 = vmatpush1.bf16.msra.mxu1 %v13866_v1  ;;  %v13952_v0 = vld [vmem:[#allocation5 + $0xcbc] ss:$28 sps:$4 sm:$0xff]   ;;  %v13947_v1 = vld [vmem:[#allocation5 + $0xcb0] ss:$28 sps:$4 sm:$0xff]  }
 0x1c8   :  { %3210 = vmatprep.subr.bf16.mxu0 %v13871_v2  ;;  %3374 = vmatprep.subr.bf16.mxu1 %v13874_v3  ;;  %v13950_v2 = vld [vmem:[#allocation5 + $0xcb8] ss:$28 sps:$4 sm:$0xff]   ;;  %v13955_v3 = vld [vmem:[#allocation5 + $0xcec] ss:$28 sps:$4 sm:$0xff]  }
 0x1cb   :  { %3211 = vmatpush1.bf16.msra.mxu0 %v13869_v4  ;;  %3375 = vmatpush1.bf16.msra.mxu1 %v13872_v6  ;;  %v13958_v4 = vld [vmem:[#allocation5 + $0xcf4] ss:$28 sps:$4 sm:$0xff]   ;;  %v13953_v6 = vld [vmem:[#allocation5 + $0xce8] ss:$28 sps:$4 sm:$0xff]  }
 0x1cc   :  { %3212 = vmatprep.subr.bf16.mxu0 %v13877_v7  ;;  %3376 = vmatprep.subr.bf16.mxu1 %v13880_v8  ;;  %v13956_v7 = vld [vmem:[#allocation5 + $0xcf0] ss:$28 sps:$4 sm:$0xff]   ;;  %v13961_v8 = vld [vmem:[#allocation5 + $0xd24] ss:$28 sps:$4 sm:$0xff]  }
 0x1cf   :  { %3213 = vmatpush1.bf16.msra.mxu0 %v13875_v9  ;;  %3377 = vmatpush1.bf16.msra.mxu1 %v13878_v10  ;;  %v13964_v9 = vld [vmem:[#allocation5 + $0xd2c] ss:$28 sps:$4 sm:$0xff]   ;;  %v13959_v10 = vld [vmem:[#allocation5 + $0xd20] ss:$28 sps:$4 sm:$0xff]  }
 0x1d0   :  { %3214 = vmatprep.subr.bf16.mxu0 %v13883_v11  ;;  %3378 = vmatprep.subr.bf16.mxu1 %v13886_v12  ;;  %v13962_v11 = vld [vmem:[#allocation5 + $0xd28] ss:$28 sps:$4 sm:$0xff]   ;;  %v13967_v12 = vld [vmem:[#allocation5 + $0xd5c] ss:$28 sps:$4 sm:$0xff]  }
 0x1d3   :  { %3215 = vmatpush1.bf16.msra.mxu0 %v13881_v14  ;;  %3379 = vmatpush1.bf16.msra.mxu1 %v13884_v15  ;;  %v13970_v14 = vld [vmem:[#allocation5 + $0xd64] ss:$28 sps:$4 sm:$0xff]   ;;  %v13965_v15 = vld [vmem:[#allocation5 + $0xd58] ss:$28 sps:$4 sm:$0xff]  }
 0x1d4   :  { %3225 = vmatprep.subr.bf16.mxu0 %v13889_v16  ;;  %3389 = vmatprep.subr.bf16.mxu1 %v13892_v19  ;;  %v13968_v16 = vld [vmem:[#allocation5 + $0xd60] ss:$28 sps:$4 sm:$0xff]  }
 0x1d5   :  { %v13976_v19 = vld [vmem:[#allocation5 + $0xd9c] ss:$28 sps:$4 sm:$0xff]  }
 0x1d6   :  { %3217 = vmatmul.mubr.bf16.vlgmr.msra.gmra.mrb[0].mxu0 %v16141_v22  ;;  %3381 = vmatmul.mubr.bf16.vlgmr.msra.gmra.mrb[0].mxu1 %v16141_v22 }
 0x1d7   :  { %3226 = vmatpush1.bf16.msra.mxu0 %v13887_v20  ;;  %3390 = vmatpush1.bf16.msra.mxu1 %v13890_v21  ;;  %v13971_v20 = vld [vmem:[#allocation5 + $0xd90] ss:$28 sps:$4 sm:$0xff]   ;;  %v13974_v21 = vld [vmem:[#allocation5 + $0xd98] ss:$28 sps:$4 sm:$0xff]  }
 0x1d8   :  { %3227 = vmatprep.subr.bf16.mxu0 %v13895_v24  ;;  %3391 = vmatprep.subr.bf16.mxu1 %v13898_v25  ;;  %v13982_v24 = vld [vmem:[#allocation5 + $0xdd4] ss:$28 sps:$4 sm:$0xff]   ;;  %v13977_v25 = vld [vmem:[#allocation5 + $0xdc8] ss:$28 sps:$4 sm:$0xff]  }
 0x1d9   :  { %3257 = vmatprep.mubr.bf16.mxu0 %v16143_v27  ;;  %3421 = vmatprep.mubr.bf16.mxu1 %v16143_v27 }
 0x1db   :  { %3228 = vmatpush1.bf16.msra.mxu0 %v13893_v26  ;;  %3392 = vmatpush1.bf16.msra.mxu1 %v13896_v28  ;;  %v13980_v26 = vld [vmem:[#allocation5 + $0xdd0] ss:$28 sps:$4 sm:$0xff]  }
 0x1dc   :  { %3229 = vmatprep.subr.bf16.mxu0 %v13901_v29  ;;  %3393 = vmatprep.subr.bf16.mxu1 %v13904_v30  ;;  %v239_v28 = vld [vmem:[#allocation2 + $0x30] sm:$0xff] }
 0x1dd   :  { %v13985_v29 = vld [vmem:[#allocation5 + $0x14] ss:$28 sps:$4 sm:$0xff]  }
 0x1de   :  { %v14010_v30 = vld [vmem:[#allocation5 + $0x1d8] ss:$28 sps:$4 sm:$0xff]  }
 0x1df   :  { %3230 = vmatpush1.bf16.msra.mxu0 %v13899_v31  ;;  %3394 = vmatpush1.bf16.msra.mxu1 %v13902_v33  ;;  %v13983_v31 = vld [vmem:[#allocation5 + $0x10] ss:$28 sps:$4 sm:$0xff]   ;;  %v16149_v33 = vpack.c.bf16 %v239_v28, %v239_v28 }
 0x1e0   :  { %3231 = vmatprep.subr.bf16.mxu0 %v13907_v34  ;;  %3395 = vmatprep.subr.bf16.mxu1 %v13910_v35  ;;  %v13988_v34 = vld [vmem:[#allocation5 + $0x4c] ss:$28 sps:$4 sm:$0xff]   ;;  %v14011_v35 = vld [vmem:[#allocation5 + $0x18] ss:$28 sps:$4 sm:$0xff]  }
 0x1e1   :  { %v14076_v28 = vld [vmem:[#allocation5 + $0x4b0] ss:$28 sps:$4 sm:$0xff]  }
 0x1e3   :  { %3232 = vmatpush1.bf16.msra.mxu0 %v13905_v36  ;;  %3396 = vmatpush1.bf16.msra.mxu1 %v13908_v37  ;;  %v14015_v36 = vld [vmem:[#allocation5 + $0x210] ss:$28 sps:$4 sm:$0xff]   ;;  %v13986_v37 = vld [vmem:[#allocation5 + $0x48] ss:$28 sps:$4 sm:$0xff]  }
 0x1e4   :  { %3233 = vmatprep.subr.bf16.mxu0 %v13913_v38  ;;  %3397 = vmatprep.subr.bf16.mxu1 %v13916_v39  ;;  %v14016_v38 = vld [vmem:[#allocation5 + $0x50] ss:$28 sps:$4 sm:$0xff]   ;;  %v13991_v39 = vld [vmem:[#allocation5 + $0x84] ss:$28 sps:$4 sm:$0xff]  }
 0x1e7   :  { %3234 = vmatpush1.bf16.msra.mxu0 %v13911_v40  ;;  %3398 = vmatpush1.bf16.msra.mxu1 %v13914_v41  ;;  %v14020_v40 = vld [vmem:[#allocation5 + $0x248] ss:$28 sps:$4 sm:$0xff]   ;;  %v13989_v41 = vld [vmem:[#allocation5 + $0x80] ss:$28 sps:$4 sm:$0xff]  }
 0x1e8   :  { %3235 = vmatprep.subr.bf16.mxu0 %v13919_v42  ;;  %3399 = vmatprep.subr.bf16.mxu1 %v13922_v43  ;;  %v13994_v42 = vld [vmem:[#allocation5 + $0xbc] ss:$28 sps:$4 sm:$0xff]   ;;  %v14021_v43 = vld [vmem:[#allocation5 + $0x88] ss:$28 sps:$4 sm:$0xff]  }
 0x1eb   :  { %3236 = vmatpush1.bf16.msra.mxu0 %v13917_v44  ;;  %3400 = vmatpush1.bf16.msra.mxu1 %v13920_v45  ;;  %v14025_v44 = vld [vmem:[#allocation5 + $0x280] ss:$28 sps:$4 sm:$0xff]   ;;  %v13992_v45 = vld [vmem:[#allocation5 + $0xb8] ss:$28 sps:$4 sm:$0xff]  }
 0x1ec   :  { %3237 = vmatprep.subr.bf16.mxu0 %v13925_v46  ;;  %3401 = vmatprep.subr.bf16.mxu1 %v13928_v47  ;;  %v13997_v46 = vld [vmem:[#allocation5 + $0xf4] ss:$28 sps:$4 sm:$0xff]   ;;  %v14026_v47 = vld [vmem:[#allocation5 + $0xc0] ss:$28 sps:$4 sm:$0xff]  }
 0x1ef   :  { %3238 = vmatpush1.bf16.msra.mxu0 %v13923_v49  ;;  %3402 = vmatpush1.bf16.msra.mxu1 %v13926_v50  ;;  %v14030_v49 = vld [vmem:[#allocation5 + $0x2b8] ss:$28 sps:$4 sm:$0xff]   ;;  %v13995_v50 = vld [vmem:[#allocation5 + $0xf0] ss:$28 sps:$4 sm:$0xff]  }
 0x1f0   :  { %3239 = vmatprep.subr.bf16.mxu0 %v13931_v51  ;;  %3403 = vmatprep.subr.bf16.mxu1 %v13934_v52  ;;  %v14000_v51 = vld [vmem:[#allocation5 + $0x12c] ss:$28 sps:$4 sm:$0xff]  }
 0x1f1   :  { %v14035_v52 = vld [vmem:[#allocation5 + $0x2f0] ss:$28 sps:$4 sm:$0xff]  }
 0x1f3   :  { %3240 = vmatpush1.bf16.msra.mxu0 %v13929_v53  ;;  %3404 = vmatpush1.bf16.msra.mxu1 %v13932_v54  ;;  %v13998_v53 = vld [vmem:[#allocation5 + $0x128] ss:$28 sps:$4 sm:$0xff]  }
 0x1f4   :  { %3241 = vmatprep.subr.bf16.mxu0 %v13937_v55  ;;  %3405 = vmatprep.subr.bf16.mxu1 %v13940_v56  ;;  %v14003_v54 = vld [vmem:[#allocation5 + $0x164] ss:$28 sps:$4 sm:$0xff]   ;;  %v14036_v55 = vld [vmem:[#allocation5 + $0x130] ss:$28 sps:$4 sm:$0xff]  }
 0x1f5   :  { %v14040_v56 = vld [vmem:[#allocation5 + $0x328] ss:$28 sps:$4 sm:$0xff]  }
 0x1f7   :  { %3242 = vmatpush1.bf16.msra.mxu0 %v13935_v57  ;;  %3406 = vmatpush1.bf16.msra.mxu1 %v13938_v58  ;;  %v14001_v57 = vld [vmem:[#allocation5 + $0x160] ss:$28 sps:$4 sm:$0xff]   ;;  %v14041_v58 = vld [vmem:[#allocation5 + $0x168] ss:$28 sps:$4 sm:$0xff]  }
 0x1f8   :  { %3243 = vmatprep.subr.bf16.mxu0 %v13943_v59  ;;  %3407 = vmatprep.subr.bf16.mxu1 %v13946_v60  ;;  %v14006_v59 = vld [vmem:[#allocation5 + $0x19c] ss:$28 sps:$4 sm:$0xff]  }
 0x1f9   :  { %v14045_v60 = vld [vmem:[#allocation5 + $0x360] ss:$28 sps:$4 sm:$0xff]  }
 0x1fb   :  { %3244 = vmatpush1.bf16.msra.mxu0 %v13941_v61  ;;  %3408 = vmatpush1.bf16.msra.mxu1 %v13944_v62  ;;  %v14004_v61 = vld [vmem:[#allocation5 + $0x198] ss:$28 sps:$4 sm:$0xff]  }
 0x1fc   :  { %3245 = vmatprep.subr.bf16.mxu0 %v13949_v63  ;;  %3409 = vmatprep.subr.bf16.mxu1 %v13952_v0  ;;  %v14009_v62 = vld [vmem:[#allocation5 + $0x1d4] ss:$28 sps:$4 sm:$0xff]   ;;  %v14046_v63 = vld [vmem:[#allocation5 + $0x1a0] ss:$28 sps:$4 sm:$0xff]  }
 0x1fd   :  { %v14050_v0 = vld [vmem:[#allocation5 + $0x558] ss:$28 sps:$4 sm:$0xff]  }
 0x1ff   :  { %3246 = vmatpush1.bf16.msra.mxu0 %v13947_v1  ;;  %3410 = vmatpush1.bf16.msra.mxu1 %v13950_v2  ;;  %v14007_v1 = vld [vmem:[#allocation5 + $0x1d0] ss:$28 sps:$4 sm:$0xff]  }
 0x200   :  { %3247 = vmatprep.subr.bf16.mxu0 %v13955_v3  ;;  %3411 = vmatprep.subr.bf16.mxu1 %v13958_v4  ;;  %v14014_v2 = vld [vmem:[#allocation5 + $0x20c] ss:$28 sps:$4 sm:$0xff]   ;;  %v14051_v3 = vld [vmem:[#allocation5 + $0x398] ss:$28 sps:$4 sm:$0xff]  }
 0x201   :  { %v14055_v4 = vld [vmem:[#allocation5 + $0x590] ss:$28 sps:$4 sm:$0xff]  }
 0x203   :  { %3248 = vmatpush1.bf16.msra.mxu0 %v13953_v6  ;;  %3412 = vmatpush1.bf16.msra.mxu1 %v13956_v7  ;;  %v14012_v6 = vld [vmem:[#allocation5 + $0x208] ss:$28 sps:$4 sm:$0xff]  }
 0x204   :  { %3249 = vmatprep.subr.bf16.mxu0 %v13961_v8  ;;  %3413 = vmatprep.subr.bf16.mxu1 %v13964_v9  ;;  %v14019_v7 = vld [vmem:[#allocation5 + $0x244] ss:$28 sps:$4 sm:$0xff]   ;;  %v14056_v8 = vld [vmem:[#allocation5 + $0x3d0] ss:$28 sps:$4 sm:$0xff]  }
 0x205   :  { %v14060_v9 = vld [vmem:[#allocation5 + $0x5c8] ss:$28 sps:$4 sm:$0xff]  }
 0x207   :  { %3250 = vmatpush1.bf16.msra.mxu0 %v13959_v10  ;;  %3414 = vmatpush1.bf16.msra.mxu1 %v13962_v11  ;;  %v14017_v10 = vld [vmem:[#allocation5 + $0x240] ss:$28 sps:$4 sm:$0xff]  }
 0x208   :  { %3251 = vmatprep.subr.bf16.mxu0 %v13967_v12  ;;  %3415 = vmatprep.subr.bf16.mxu1 %v13970_v14  ;;  %v14024_v11 = vld [vmem:[#allocation5 + $0x27c] ss:$28 sps:$4 sm:$0xff]   ;;  %v14061_v12 = vld [vmem:[#allocation5 + $0x408] ss:$28 sps:$4 sm:$0xff]  }
 0x209   :  { %v14065_v14 = vld [vmem:[#allocation5 + $0x600] ss:$28 sps:$4 sm:$0xff]  }
 0x20b   :  { %3252 = vmatpush1.bf16.msra.mxu0 %v13965_v15  ;;  %3416 = vmatpush1.bf16.msra.mxu1 %v13968_v16  ;;  %v14022_v15 = vld [vmem:[#allocation5 + $0x278] ss:$28 sps:$4 sm:$0xff]  }
 0x20c   :  { %3253 = vmatprep.subr.bf16.mxu0 %v13973_v18  ;;  %3417 = vmatprep.subr.bf16.mxu1 %v13976_v19  ;;  %v14029_v16 = vld [vmem:[#allocation5 + $0x2b4] ss:$28 sps:$4 sm:$0xff]   ;;  %v14066_v18 = vld [vmem:[#allocation5 + $0x440] ss:$28 sps:$4 sm:$0xff]  }
 0x20d   :  { %v14070_v19 = vld [vmem:[#allocation5 + $0x638] ss:$28 sps:$4 sm:$0xff]  }
 0x20f   :  { %3254 = vmatpush1.bf16.msra.mxu0 %v13971_v20  ;;  %3418 = vmatpush1.bf16.msra.mxu1 %v13974_v21  ;;  %v14027_v20 = vld [vmem:[#allocation5 + $0x2b0] ss:$28 sps:$4 sm:$0xff]  }
 0x210   :  { %3255 = vmatprep.subr.bf16.mxu0 %v13979_v23  ;;  %3419 = vmatprep.subr.bf16.mxu1 %v13982_v24  ;;  %v14034_v21 = vld [vmem:[#allocation5 + $0x2ec] ss:$28 sps:$4 sm:$0xff]   ;;  %v14071_v23 = vld [vmem:[#allocation5 + $0x478] ss:$28 sps:$4 sm:$0xff]  }
 0x211   :  { %v14075_v24 = vld [vmem:[#allocation5 + $0x670] ss:$28 sps:$4 sm:$0xff]  }
 0x213   :  { %3256 = vmatpush1.bf16.msra.mxu0 %v13977_v25  ;;  %3420 = vmatpush1.bf16.msra.mxu1 %v13980_v26  ;;  %v14032_v25 = vld [vmem:[#allocation5 + $0x2e8] ss:$28 sps:$4 sm:$0xff]  }
 0x214   :  { %3430 = vmatprep.subr.bf16.mxu0 %v13985_v29  ;;  %13076 = vmatprep.subr.bf16.mxu1 %v14010_v30  ;;  %v14039_v26 = vld [vmem:[#allocation5 + $0x324] ss:$28 sps:$4 sm:$0xff]  }
 0x215   :  { %v14080_v29 = vld [vmem:[#allocation5 + $0x6a8] ss:$28 sps:$4 sm:$0xff]   ;;  %v14037_v30 = vld [vmem:[#allocation5 + $0x320] ss:$28 sps:$4 sm:$0xff]  }
 0x216   :  { %3258 = vmatmul.mubr.bf16.vlgmr.msra.gmra.mrb[0].mxu0 %v16149_v33  ;;  %3422 = vmatmul.mubr.bf16.vlgmr.msra.gmra.mrb[0].mxu1 %v16149_v33 }
 0x217   :  { %3431 = vmatpush1.bf16.msra.mxu0 %v13983_v31  ;;  %13077 = vmatpush3.bf16.msra.mxu1 %v14011_v35  ;;  %v14044_v31 = vld [vmem:[#allocation5 + $0x35c] ss:$28 sps:$4 sm:$0xff]  }
 0x218   :  { %3432 = vmatprep.subr.bf16.mxu0 %v13988_v34  ;;  %13078 = vmatprep.subr.bf16.mxu1 %v14015_v36  ;;  %v14081_v34 = vld [vmem:[#allocation5 + $0x4e8] ss:$28 sps:$4 sm:$0xff]   ;;  %v14085_v35 = vld [vmem:[#allocation5 + $0x6e0] ss:$28 sps:$4 sm:$0xff]   ;;  %v14042_v36 = vld [vmem:[#allocation5 + $0x358] ss:$28 sps:$4 sm:$0xff]  }
 0x219   :  { %3462 = vmatprep.mubr.bf16.mxu0 %v16121_v48  ;;  %3626 = vmatprep.mubr.bf16.mxu1 %v16121_v48  ;;  %v14031_v48 = vld [vmem:[#allocation5 + $0xf8] ss:$28 sps:$4 sm:$0xff]  }
 0x21b   :  { %3433 = vmatpush1.bf16.msra.mxu0 %v13986_v37  ;;  %13079 = vmatpush3.bf16.msra.mxu1 %v14016_v38  ;;  %v14049_v37 = vld [vmem:[#allocation5 + $0x394] ss:$28 sps:$4 sm:$0xff]   ;;  %v14086_v38 = vld [vmem:[#allocation5 + $0x520] ss:$28 sps:$4 sm:$0xff]  }
 0x21c   :  { %3434 = vmatprep.subr.bf16.mxu0 %v13991_v39  ;;  %13080 = vmatprep.subr.bf16.mxu1 %v14020_v40  ;;  %v14090_v39 = vld [vmem:[#allocation5 + $0x8d8] ss:$28 sps:$4 sm:$0xff]   ;;  %v14047_v40 = vld [vmem:[#allocation5 + $0x390] ss:$28 sps:$4 sm:$0xff]  }
 0x21f   :  { %3435 = vmatpush1.bf16.msra.mxu0 %v13989_v41  ;;  %13081 = vmatpush3.bf16.msra.mxu1 %v14021_v43  ;;  %v14054_v41 = vld [vmem:[#allocation5 + $0x3cc] ss:$28 sps:$4 sm:$0xff]  }
 0x220   :  { %3436 = vmatprep.subr.bf16.mxu0 %v13994_v42  ;;  %13082 = vmatprep.subr.bf16.mxu1 %v14025_v44  ;;  %v14091_v42 = vld [vmem:[#allocation5 + $0x718] ss:$28 sps:$4 sm:$0xff]   ;;  %v14095_v43 = vld [vmem:[#allocation5 + $0x910] ss:$28 sps:$4 sm:$0xff]   ;;  %v14052_v44 = vld [vmem:[#allocation5 + $0x3c8] ss:$28 sps:$4 sm:$0xff]  }
 0x223   :  { %3437 = vmatpush1.bf16.msra.mxu0 %v13992_v45  ;;  %13083 = vmatpush3.bf16.msra.mxu1 %v14026_v47  ;;  %v14059_v45 = vld [vmem:[#allocation5 + $0x404] ss:$28 sps:$4 sm:$0xff]  }
 0x224   :  { %3438 = vmatprep.subr.bf16.mxu0 %v13997_v46  ;;  %13084 = vmatprep.subr.bf16.mxu1 %v14030_v49  ;;  %v14096_v46 = vld [vmem:[#allocation5 + $0x750] ss:$28 sps:$4 sm:$0xff]   ;;  %v14100_v47 = vld [vmem:[#allocation5 + $0x948] ss:$28 sps:$4 sm:$0xff]   ;;  %v14057_v49 = vld [vmem:[#allocation5 + $0x400] ss:$28 sps:$4 sm:$0xff]  }
 0x227   :  { %3439 = vmatpush1.bf16.msra.mxu0 %v13995_v50  ;;  %13085 = vmatpush3.bf16.msra.mxu1 %v14031_v48  ;;  %v14064_v50 = vld [vmem:[#allocation5 + $0x43c] ss:$28 sps:$4 sm:$0xff]  }
 0x228   :  { %3440 = vmatprep.subr.bf16.mxu0 %v14000_v51  ;;  %13086 = vmatprep.subr.bf16.mxu1 %v14035_v52  ;;  %v14101_v51 = vld [vmem:[#allocation5 + $0x788] ss:$28 sps:$4 sm:$0xff]   ;;  %v14105_v48 = vld [vmem:[#allocation5 + $0x980] ss:$28 sps:$4 sm:$0xff]   ;;  %v14069_v52 = vld [vmem:[#allocation5 + $0x474] ss:$28 sps:$4 sm:$0xff]  }
 0x22b   :  { %3441 = vmatpush1.bf16.msra.mxu0 %v13998_v53  ;;  %13087 = vmatpush3.bf16.msra.mxu1 %v14036_v55  ;;  %v14106_v53 = vld [vmem:[#allocation5 + $0x7c0] ss:$28 sps:$4 sm:$0xff]   ;;  %v14067_v55 = vld [vmem:[#allocation5 + $0x470] ss:$28 sps:$4 sm:$0xff]  }
 0x22c   :  { %3442 = vmatprep.subr.bf16.mxu0 %v14003_v54  ;;  %13088 = vmatprep.subr.bf16.mxu1 %v14040_v56  ;;  %v14110_v54 = vld [vmem:[#allocation5 + $0x9b8] ss:$28 sps:$4 sm:$0xff]   ;;  %v14074_v56 = vld [vmem:[#allocation5 + $0x4ac] ss:$28 sps:$4 sm:$0xff]  }
 0x22f   :  { %3443 = vmatpush1.bf16.msra.mxu0 %v14001_v57  ;;  %13089 = vmatpush3.bf16.msra.mxu1 %v14041_v58  ;;  %v14115_v57 = vld [vmem:[#allocation5 + $0x9f0] ss:$28 sps:$4 sm:$0xff]   ;;  %v14072_v58 = vld [vmem:[#allocation5 + $0x4a8] ss:$28 sps:$4 sm:$0xff]  }
 0x230   :  { %3444 = vmatprep.subr.bf16.mxu0 %v14006_v59  ;;  %13090 = vmatprep.subr.bf16.mxu1 %v14045_v60  ;;  %v14116_v59 = vld [vmem:[#allocation5 + $0x830] ss:$28 sps:$4 sm:$0xff]   ;;  %v14079_v60 = vld [vmem:[#allocation5 + $0x4e4] ss:$28 sps:$4 sm:$0xff]  }
 0x233   :  { %3445 = vmatpush1.bf16.msra.mxu0 %v14004_v61  ;;  %13091 = vmatpush3.bf16.msra.mxu1 %v14046_v63  ;;  %v14120_v61 = vld [vmem:[#allocation5 + $0xa28] ss:$28 sps:$4 sm:$0xff]   ;;  %v14084_v63 = vld [vmem:[#allocation5 + $0x51c] ss:$28 sps:$4 sm:$0xff]  }
 0x234   :  { %3446 = vmatprep.subr.bf16.mxu0 %v14009_v62  ;;  %13098 = vmatprep.subr.bf16.mxu1 %v14050_v0  ;;  %v14077_v62 = vld [vmem:[#allocation5 + $0x4e0] ss:$28 sps:$4 sm:$0xff]   ;;  %v14121_v0 = vld [vmem:[#allocation5 + $0x868] ss:$28 sps:$4 sm:$0xff]  }
 0x236   :  { %3627 = vmatmul.mubr.bf16.vlgmr.msra.gmra.mrb[4].mxu1 %v16125_v5 }
 0x237   :  { %3447 = vmatpush1.bf16.msra.mxu0 %v14007_v1  ;;  %13099 = vmatpush3.bf16.msra.mxu1 %v14051_v3  ;;  %v14125_v1 = vld [vmem:[#allocation5 + $0xa60] ss:$28 sps:$4 sm:$0xff]   ;;  %v14089_v3 = vld [vmem:[#allocation5 + $0x554] ss:$28 sps:$4 sm:$0xff]  }
 0x238   :  { %3448 = vmatprep.subr.bf16.mxu0 %v14014_v2  ;;  %13100 = vmatprep.subr.bf16.mxu1 %v14055_v4  ;;  %v14082_v2 = vld [vmem:[#allocation5 + $0x518] ss:$28 sps:$4 sm:$0xff]   ;;  %v14126_v4 = vld [vmem:[#allocation5 + $0x8a0] ss:$28 sps:$4 sm:$0xff]  }
 0x239   :  { %3666 = vmatprep.mubr.bf16.mxu1 %v16129_v32 }
 0x23b   :  { %3449 = vmatpush1.bf16.msra.mxu0 %v14012_v6  ;;  %13101 = vmatpush3.bf16.msra.mxu1 %v14056_v8  ;;  %v14130_v6 = vld [vmem:[#allocation5 + $0xc58] ss:$28 sps:$4 sm:$0xff]   ;;  %v14094_v8 = vld [vmem:[#allocation5 + $0x58c] ss:$28 sps:$4 sm:$0xff]  }
 0x23c   :  { %3450 = vmatprep.subr.bf16.mxu0 %v14019_v7  ;;  %13102 = vmatprep.subr.bf16.mxu1 %v14060_v9  ;;  %v14087_v7 = vld [vmem:[#allocation5 + $0x550] ss:$28 sps:$4 sm:$0xff]   ;;  %v14131_v9 = vld [vmem:[#allocation5 + $0xa98] ss:$28 sps:$4 sm:$0xff]  }
 0x23f   :  { %3451 = vmatpush1.bf16.msra.mxu0 %v14017_v10  ;;  %13103 = vmatpush3.bf16.msra.mxu1 %v14061_v12  ;;  %v14135_v10 = vld [vmem:[#allocation5 + $0xc90] ss:$28 sps:$4 sm:$0xff]   ;;  %v14099_v12 = vld [vmem:[#allocation5 + $0x5c4] ss:$28 sps:$4 sm:$0xff]  }
 0x240   :  { %3452 = vmatprep.subr.bf16.mxu0 %v14024_v11  ;;  %13104 = vmatprep.subr.bf16.mxu1 %v14065_v14  ;;  %v14092_v11 = vld [vmem:[#allocation5 + $0x588] ss:$28 sps:$4 sm:$0xff]   ;;  %v14136_v14 = vld [vmem:[#allocation5 + $0xad0] ss:$28 sps:$4 sm:$0xff]  }
 0x243   :  { %3453 = vmatpush1.bf16.msra.mxu0 %v14022_v15  ;;  %13105 = vmatpush3.bf16.msra.mxu1 %v14066_v18  ;;  %v14140_v15 = vld [vmem:[#allocation5 + $0xcc8] ss:$28 sps:$4 sm:$0xff]   ;;  %v14104_v18 = vld [vmem:[#allocation5 + $0x5fc] ss:$28 sps:$4 sm:$0xff]  }
 0x244   :  { %3454 = vmatprep.subr.bf16.mxu0 %v14029_v16  ;;  %13106 = vmatprep.subr.bf16.mxu1 %v14070_v19  ;;  %v14097_v16 = vld [vmem:[#allocation5 + $0x5c0] ss:$28 sps:$4 sm:$0xff]   ;;  %v14141_v19 = vld [vmem:[#allocation5 + $0xb08] ss:$28 sps:$4 sm:$0xff]  }
 0x247   :  { %3455 = vmatpush1.bf16.msra.mxu0 %v14027_v20  ;;  %13107 = vmatpush3.bf16.msra.mxu1 %v14071_v23  ;;  %v14145_v20 = vld [vmem:[#allocation5 + $0xd00] ss:$28 sps:$4 sm:$0xff]   ;;  %v14109_v23 = vld [vmem:[#allocation5 + $0x634] ss:$28 sps:$4 sm:$0xff]  }
 0x248   :  { %3456 = vmatprep.subr.bf16.mxu0 %v14034_v21  ;;  %13108 = vmatprep.subr.bf16.mxu1 %v14075_v24  ;;  %v14102_v21 = vld [vmem:[#allocation5 + $0x5f8] ss:$28 sps:$4 sm:$0xff]   ;;  %v14146_v24 = vld [vmem:[#allocation5 + $0xb40] ss:$28 sps:$4 sm:$0xff]  }
 0x24b   :  { %3457 = vmatpush1.bf16.msra.mxu0 %v14032_v25  ;;  %13109 = vmatpush3.bf16.msra.mxu1 %v14076_v28  ;;  %v14150_v25 = vld [vmem:[#allocation5 + $0xd38] ss:$28 sps:$4 sm:$0xff]   ;;  %v14114_v28 = vld [vmem:[#allocation5 + $0x66c] ss:$28 sps:$4 sm:$0xff]  }
 0x24c   :  { %3458 = vmatprep.subr.bf16.mxu0 %v14039_v26  ;;  %13110 = vmatprep.subr.bf16.mxu1 %v14080_v29  ;;  %v14107_v26 = vld [vmem:[#allocation5 + $0x630] ss:$28 sps:$4 sm:$0xff]   ;;  %v14151_v29 = vld [vmem:[#allocation5 + $0xb78] ss:$28 sps:$4 sm:$0xff]  }
 0x24f   :  { %3459 = vmatpush1.bf16.msra.mxu0 %v14037_v30  ;;  %13111 = vmatpush3.bf16.msra.mxu1 %v14081_v34  ;;  %v14155_v30 = vld [vmem:[#allocation5 + $0xd70] ss:$28 sps:$4 sm:$0xff]   ;;  %v14119_v34 = vld [vmem:[#allocation5 + $0x6a4] ss:$28 sps:$4 sm:$0xff]  }
 0x250   :  { %3460 = vmatprep.subr.bf16.mxu0 %v14044_v31  ;;  %13112 = vmatprep.subr.bf16.mxu1 %v14085_v35  ;;  %v14112_v31 = vld [vmem:[#allocation5 + $0x668] ss:$28 sps:$4 sm:$0xff]   ;;  %v14156_v35 = vld [vmem:[#allocation5 + $0xbb0] ss:$28 sps:$4 sm:$0xff]  }
 0x253   :  { %3461 = vmatpush1.bf16.msra.mxu0 %v14042_v36  ;;  %13113 = vmatpush3.bf16.msra.mxu1 %v14086_v38  ;;  %v14160_v36 = vld [vmem:[#allocation5 + $0xda8] ss:$28 sps:$4 sm:$0xff]   ;;  %v14124_v38 = vld [vmem:[#allocation5 + $0x6dc] ss:$28 sps:$4 sm:$0xff]  }
 0x254   :  { %3471 = vmatprep.subr.bf16.mxu0 %v14049_v37  ;;  %13120 = vmatprep.subr.bf16.mxu1 %v14090_v39  ;;  %v14117_v37 = vld [vmem:[#allocation5 + $0x6a0] ss:$28 sps:$4 sm:$0xff]   ;;  %v14161_v39 = vld [vmem:[#allocation5 + $0xbe8] ss:$28 sps:$4 sm:$0xff]  }
 0x256   :  { %3463 = vmatmul.mubr.bf16.vlgmr.msra.gmra.mrb[4].mxu0 %v16125_v5  ;;  %3667 = vmatmul.mubr.bf16.vlgmr.msra.gmra.mrb[8].mxu1 %v16133_v13  ;;  %v14062_v5 = vld [vmem:[#allocation5 + $0x438] ss:$28 sps:$4 sm:$0xff]  }
 0x257   :  { %3472 = vmatpush1.bf16.msra.mxu0 %v14047_v40  ;;  %13121 = vmatpush3.bf16.msra.mxu1 %v14091_v42  ;;  %v14165_v40 = vld [vmem:[#allocation5 + $0xde0] ss:$28 sps:$4 sm:$0xff]   ;;  %v14129_v42 = vld [vmem:[#allocation5 + $0x714] ss:$28 sps:$4 sm:$0xff]  }
 0x258   :  { %3473 = vmatprep.subr.bf16.mxu0 %v14054_v41  ;;  %13122 = vmatprep.subr.bf16.mxu1 %v14095_v43  ;;  %v14122_v41 = vld [vmem:[#allocation5 + $0x6d8] ss:$28 sps:$4 sm:$0xff]   ;;  %v14166_v43 = vld [vmem:[#allocation5 + $0xc20] ss:$28 sps:$4 sm:$0xff]  }
 0x259   :  { %3503 = vmatprep.mubr.bf16.mxu0 %v16129_v32  ;;  %3706 = vmatprep.mubr.bf16.mxu1 %v16135_v17  ;;  %v14111_v32 = vld [vmem:[#allocation5 + $0x7f8] ss:$28 sps:$4 sm:$0xff]  }
 0x25b   :  { %3474 = vmatpush1.bf16.msra.mxu0 %v14052_v44  ;;  %13123 = vmatpush3.bf16.msra.mxu1 %v14096_v46  ;;  %v14127_v44 = vld [vmem:[#allocation5 + $0x710] ss:$28 sps:$4 sm:$0xff]   ;;  %v14132_v46 = vld [vmem:[#allocation5 + $0x748] ss:$28 sps:$4 sm:$0xff]  }
 0x25c   :  { %3475 = vmatprep.subr.bf16.mxu0 %v14059_v45  ;;  %13124 = vmatprep.subr.bf16.mxu1 %v14100_v47  ;;  %v14134_v45 = vld [vmem:[#allocation5 + $0x74c] ss:$28 sps:$4 sm:$0xff]   ;;  %v14139_v47 = vld [vmem:[#allocation5 + $0x784] ss:$28 sps:$4 sm:$0xff]  }
 0x25f   :  { %3476 = vmatpush1.bf16.msra.mxu0 %v14057_v49  ;;  %13125 = vmatpush3.bf16.msra.mxu1 %v14101_v51  ;;  %v14137_v49 = vld [vmem:[#allocation5 + $0x780] ss:$28 sps:$4 sm:$0xff]   ;;  %v14142_v51 = vld [vmem:[#allocation5 + $0x7b8] ss:$28 sps:$4 sm:$0xff]  }
 0x260   :  { %3477 = vmatprep.subr.bf16.mxu0 %v14064_v50  ;;  %13126 = vmatprep.subr.bf16.mxu1 %v14105_v48  ;;  %v14144_v50 = vld [vmem:[#allocation5 + $0x7bc] ss:$28 sps:$4 sm:$0xff]   ;;  %v14149_v48 = vld [vmem:[#allocation5 + $0x7f4] ss:$28 sps:$4 sm:$0xff]  }
 0x263   :  { %3478 = vmatpush1.bf16.msra.mxu0 %v14062_v5  ;;  %13127 = vmatpush3.bf16.msra.mxu1 %v14106_v53  ;;  %v14147_v5 = vld [vmem:[#allocation5 + $0x7f0] ss:$28 sps:$4 sm:$0xff]   ;;  %v14159_v53 = vld [vmem:[#allocation5 + $0x864] ss:$28 sps:$4 sm:$0xff]  }
 0x264   :  { %3479 = vmatprep.subr.bf16.mxu0 %v14069_v52  ;;  %13128 = vmatprep.subr.bf16.mxu1 %v14110_v54  ;;  %v14154_v52 = vld [vmem:[#allocation5 + $0x82c] ss:$28 sps:$4 sm:$0xff]   ;;  %v14157_v54 = vld [vmem:[#allocation5 + $0x860] ss:$28 sps:$4 sm:$0xff]  }
 0x267   :  { %3480 = vmatpush1.bf16.msra.mxu0 %v14067_v55  ;;  %13129 = vmatpush3.bf16.msra.mxu1 %v14111_v32  ;;  %v14164_v55 = vld [vmem:[#allocation5 + $0x89c] ss:$28 sps:$4 sm:$0xff]   ;;  %v14167_v32 = vld [vmem:[#allocation5 + $0x8d0] ss:$28 sps:$4 sm:$0xff]  }
 0x268   :  { %3481 = vmatprep.subr.bf16.mxu0 %v14074_v56  ;;  %13130 = vmatprep.subr.bf16.mxu1 %v14115_v57  ;;  %v14169_v56 = vld [vmem:[#allocation5 + $0x8d4] ss:$28 sps:$4 sm:$0xff]   ;;  %v14172_v57 = vld [vmem:[#allocation5 + $0x90c] ss:$28 sps:$4 sm:$0xff]  }
 0x26b   :  { %3482 = vmatpush1.bf16.msra.mxu0 %v14072_v58  ;;  %13131 = vmatpush3.bf16.msra.mxu1 %v14116_v59  ;;  %v14170_v58 = vld [vmem:[#allocation5 + $0x908] ss:$28 sps:$4 sm:$0xff]  }
 0x26c   :  { %3483 = vmatprep.subr.bf16.mxu0 %v14079_v60  ;;  %13132 = vmatprep.subr.bf16.mxu1 %v14120_v61  ;;  %v14175_v59 = vld [vmem:[#allocation5 + $0x944] ss:$28 sps:$4 sm:$0xff]   ;;  %v14178_v61 = vld [vmem:[#allocation5 + $0x97c] ss:$28 sps:$4 sm:$0xff]  }
 0x26d   :  { %v14173_v60 = vld [vmem:[#allocation5 + $0x940] ss:$28 sps:$4 sm:$0xff]  }
 0x26f   :  { %3484 = vmatpush1.bf16.msra.mxu0 %v14077_v62  ;;  %13133 = vmatpush3.bf16.msra.mxu1 %v14121_v0  ;;  %v14176_v62 = vld [vmem:[#allocation5 + $0x978] ss:$28 sps:$4 sm:$0xff]   ;;  %v14179_v0 = vld [vmem:[#allocation5 + $0x9b0] ss:$28 sps:$4 sm:$0xff]  }
 0x270   :  { %3485 = vmatprep.subr.bf16.mxu0 %v14084_v63  ;;  %13134 = vmatprep.subr.bf16.mxu1 %v14125_v1  ;;  %v14181_v63 = vld [vmem:[#allocation5 + $0x9b4] ss:$28 sps:$4 sm:$0xff]   ;;  %v14184_v1 = vld [vmem:[#allocation5 + $0x9ec] ss:$28 sps:$4 sm:$0xff]  }
 0x273   :  { %3486 = vmatpush1.bf16.msra.mxu0 %v14082_v2  ;;  %13135 = vmatpush3.bf16.msra.mxu1 %v14126_v4  ;;  %v14182_v2 = vld [vmem:[#allocation5 + $0x9e8] ss:$28 sps:$4 sm:$0xff]   ;;  %v14185_v4 = vld [vmem:[#allocation5 + $0xa20] ss:$28 sps:$4 sm:$0xff]  }
 0x274   :  { %3487 = vmatprep.subr.bf16.mxu0 %v14089_v3  ;;  %13142 = vmatprep.subr.bf16.mxu1 %v14130_v6  ;;  %v14187_v3 = vld [vmem:[#allocation5 + $0xa24] ss:$28 sps:$4 sm:$0xff]   ;;  %v14190_v6 = vld [vmem:[#allocation5 + $0xa5c] ss:$28 sps:$4 sm:$0xff]  }
 0x276   :  { %3707 = vmatmul.mubr.bf16.vlgmr.msra.gmra.mrb[12].mxu1 %v16141_v22 }
 0x277   :  { %3488 = vmatpush1.bf16.msra.mxu0 %v14087_v7  ;;  %13143 = vmatpush3.bf16.msra.mxu1 %v14131_v9  ;;  %v14188_v7 = vld [vmem:[#allocation5 + $0xa58] ss:$28 sps:$4 sm:$0xff]   ;;  %v14191_v9 = vld [vmem:[#allocation5 + $0xa90] ss:$28 sps:$4 sm:$0xff]  }
 0x278   :  { %3489 = vmatprep.subr.bf16.mxu0 %v14094_v8  ;;  %13144 = vmatprep.subr.bf16.mxu1 %v14135_v10  ;;  %v14193_v8 = vld [vmem:[#allocation5 + $0xa94] ss:$28 sps:$4 sm:$0xff]   ;;  %v14196_v10 = vld [vmem:[#allocation5 + $0xacc] ss:$28 sps:$4 sm:$0xff]  }
 0x279   :  { %3746 = vmatprep.mubr.bf16.mxu1 %v16143_v27 }
 0x27b   :  { %3490 = vmatpush1.bf16.msra.mxu0 %v14092_v11  ;;  %13145 = vmatpush3.bf16.msra.mxu1 %v14136_v14  ;;  %v14194_v11 = vld [vmem:[#allocation5 + $0xac8] ss:$28 sps:$4 sm:$0xff]   ;;  %v14197_v14 = vld [vmem:[#allocation5 + $0xb00] ss:$28 sps:$4 sm:$0xff]  }
 0x27c   :  { %3491 = vmatprep.subr.bf16.mxu0 %v14099_v12  ;;  %13146 = vmatprep.subr.bf16.mxu1 %v14140_v15  ;;  %v14199_v12 = vld [vmem:[#allocation5 + $0xb04] ss:$28 sps:$4 sm:$0xff]   ;;  %v14202_v15 = vld [vmem:[#allocation5 + $0xb3c] ss:$28 sps:$4 sm:$0xff]  }
 0x27f   :  { %3492 = vmatpush1.bf16.msra.mxu0 %v14097_v16  ;;  %13147 = vmatpush3.bf16.msra.mxu1 %v14141_v19  ;;  %v763_v16 = vlaneseq  ;;  %v14205_v19 = vld [vmem:[#allocation5 + $0xb74] ss:$28 sps:$4 sm:$0xff]  }
 0x280   :  { %3493 = vmatprep.subr.bf16.mxu0 %v14104_v18  ;;  %13148 = vmatprep.subr.bf16.mxu1 %v14145_v20  ;;  %v14200_v18 = vld [vmem:[#allocation5 + $0xb38] ss:$28 sps:$4 sm:$0xff]  }
 0x281   :  { %v16168_v20 = vshrl.u32 %v763_v16, 7 }
 0x283   :  { %3494 = vmatpush1.bf16.msra.mxu0 %v14102_v21  ;;  %13149 = vmatpush3.bf16.msra.mxu1 %v14146_v24  ;;  %v14203_v21 = vld [vmem:[#allocation5 + $0xb70] ss:$28 sps:$4 sm:$0xff]  }
 0x284   :  { %3495 = vmatprep.subr.bf16.mxu0 %v14109_v23  ;;  %13150 = vmatprep.subr.bf16.mxu1 %v14150_v25  ;;  %v16170_v23 = vld [vmem:[#allocation7] sm:$0xff]  ;;  %v14208_v24 = vld [vmem:[#allocation5 + $0xbac] ss:$28 sps:$4 sm:$0xff]   ;;  %v16179_v25 = vsub.s32 1, %v16168_v20 }
 0x287   :  { %3496 = vmatpush1.bf16.msra.mxu0 %v14107_v26  ;;  %13151 = vmatpush3.bf16.msra.mxu1 %v14151_v29  ;;  %v16182_v26 = vsub.s32 3, %v16168_v20 }
 0x288   :  { %3497 = vmatprep.subr.bf16.mxu0 %v14114_v28  ;;  %13152 = vmatprep.subr.bf16.mxu1 %v14155_v30  ;;  %v14206_v28 = vld [vmem:[#allocation5 + $0xba8] ss:$28 sps:$4 sm:$0xff]  }
 0x28b   :  { %3498 = vmatpush1.bf16.msra.mxu0 %v14112_v31  ;;  %13153 = vmatpush3.bf16.msra.mxu1 %v14156_v35  ;;  %v14211_v31 = vld [vmem:[#allocation5 + $0xbe4] ss:$28 sps:$4 sm:$0xff]   ;;  %v778_v35 = vrot.slane %v16170_v23, %v16182_v26 }
 0x28c   :  { %3499 = vmatprep.subr.bf16.mxu0 %v14119_v34  ;;  %13154 = vmatprep.subr.bf16.mxu1 %v14160_v36  ;;  %v770_v34 = vrot.slane %v16170_v23, %v16179_v25 }
 0x28f   :  { %3500 = vmatpush1.bf16.msra.mxu0 %v14117_v37  ;;  %13155 = vmatpush3.bf16.msra.mxu1 %v14161_v39 }
 0x290   :  { %3501 = vmatprep.subr.bf16.mxu0 %v14124_v38  ;;  %13156 = vmatprep.subr.bf16.mxu1 %v14165_v40  ;;  %v14209_v38 = vld [vmem:[#allocation5 + $0xbe0] ss:$28 sps:$4 sm:$0xff]  }
 0x293   :  { %3502 = vmatpush1.bf16.msra.mxu0 %v14122_v41  ;;  %13157 = vmatpush3.bf16.msra.mxu1 %v14166_v43  ;;  %v14214_v43 = vld [vmem:[#allocation5 + $0xc1c] ss:$28 sps:$4 sm:$0xff]  }
 0x294   :  { %3512 = vmatprep.subr.bf16.mxu0 %v14129_v42 }
 0x296   :  { %3504 = vmatmul.mubr.bf16.vlgmr.msra.gmra.mrb[4].mxu0 %v16133_v13  ;;  %3747 = vmatmul.mubr.bf16.vlgmr.msra.gmra.mrb[16].mxu1 %v16149_v33  ;;  %v14152_v13 = vld [vmem:[#allocation5 + $0x828] ss:$28 sps:$4 sm:$0xff]  }
 0x297   :  { %3513 = vmatpush1.bf16.msra.mxu0 %v14127_v44  ;;  %3544 = vmatprep.mubr.bf16.mxu0 %v16135_v17  ;;  %v14162_v17 = vld [vmem:[#allocation5 + $0x898] ss:$28 sps:$4 sm:$0xff]  }
 0x298   :  { %3514 = vmatprep.subr.bf16.mxu0 %v14134_v45 }
 0x29b   :  { %3515 = vmatpush1.bf16.msra.mxu0 %v14132_v46 }
 0x29c   :  { %3516 = vmatprep.subr.bf16.mxu0 %v14139_v47 }
 0x29f   :  { %3517 = vmatpush1.bf16.msra.mxu0 %v14137_v49 }
 0x2a0   :  { %3518 = vmatprep.subr.bf16.mxu0 %v14144_v50 }
 0x2a3   :  { %3519 = vmatpush1.bf16.msra.mxu0 %v14142_v51 }
 0x2a4   :  { %3520 = vmatprep.subr.bf16.mxu0 %v14149_v48 }
 0x2a7   :  { %3521 = vmatpush1.bf16.msra.mxu0 %v14147_v5 }
 0x2a8   :  { %3522 = vmatprep.subr.bf16.mxu0 %v14154_v52 }
 0x2ab   :  { %3523 = vmatpush1.bf16.msra.mxu0 %v14152_v13 }
 0x2ac   :  { %3524 = vmatprep.subr.bf16.mxu0 %v14159_v53 }
 0x2af   :  { %3525 = vmatpush1.bf16.msra.mxu0 %v14157_v54 }
 0x2b0   :  { %3526 = vmatprep.subr.bf16.mxu0 %v14164_v55 }
 0x2b3   :  { %3527 = vmatpush1.bf16.msra.mxu0 %v14162_v17  ;;  %v14212_v17 = vld [vmem:[#allocation5 + $0xc18] ss:$28 sps:$4 sm:$0xff]  }
 0x2b4   :  { %3528 = vmatprep.subr.bf16.mxu0 %v14169_v56 }
 0x2b7   :  { %3529 = vmatpush1.bf16.msra.mxu0 %v14167_v32 }
 0x2b8   :  { %3530 = vmatprep.subr.bf16.mxu0 %v14172_v57 }
 0x2bb   :  { %3531 = vmatpush1.bf16.msra.mxu0 %v14170_v58 }
 0x2bc   :  { %3532 = vmatprep.subr.bf16.mxu0 %v14175_v59  ;;  %v14217_v59 = vld [vmem:[#allocation5 + $0xc54] ss:$28 sps:$4 sm:$0xff]  }
 0x2bf   :  { %3533 = vmatpush1.bf16.msra.mxu0 %v14173_v60 }
 0x2c0   :  { %3534 = vmatprep.subr.bf16.mxu0 %v14178_v61 }
 0x2c3   :  { %3535 = vmatpush1.bf16.msra.mxu0 %v14176_v62 }
 0x2c4   :  { %3536 = vmatprep.subr.bf16.mxu0 %v14181_v63 }
 0x2c7   :  { %3537 = vmatpush1.bf16.msra.mxu0 %v14179_v0 }
 0x2c8   :  { %3538 = vmatprep.subr.bf16.mxu0 %v14184_v1 }
 0x2cb   :  { %3539 = vmatpush1.bf16.msra.mxu0 %v14182_v2 }
 0x2cc   :  { %3540 = vmatprep.subr.bf16.mxu0 %v14187_v3 }
 0x2cf   :  { %3541 = vmatpush1.bf16.msra.mxu0 %v14185_v4 }
 0x2d0   :  { %3542 = vmatprep.subr.bf16.mxu0 %v14190_v6 }
 0x2d3   :  { %3543 = vmatpush1.bf16.msra.mxu0 %v14188_v7 }
 0x2d4   :  { %3553 = vmatprep.subr.bf16.mxu0 %v14193_v8 }
 0x2d6   :  { %3545 = vmatmul.mubr.bf16.vlgmr.msra.gmra.mrb[4].mxu0 %v16141_v22  ;;  %v16173_v22 = vsub.s32 0, %v16168_v20 }
 0x2d7   :  { %3554 = vmatpush1.bf16.msra.mxu0 %v14191_v9  ;;  %3585 = vmatprep.mubr.bf16.mxu0 %v16143_v27  ;;  %v16176_v27 = vsub.s32 2, %v16168_v20  ;;  %v14215_v9 = vld [vmem:[#allocation5 + $0xc50] ss:$28 sps:$4 sm:$0xff]  }
 0x2d8   :  { %3555 = vmatprep.subr.bf16.mxu0 %v14196_v10  ;;  %v766_v29 = vrot.slane %v16170_v23, %v16173_v22 }
 0x2d9   :  { %v774_v30 = vrot.slane %v16170_v23, %v16176_v27 }
 0x2db   :  { %3556 = vmatpush1.bf16.msra.mxu0 %v14194_v11 }
 0x2dc   :  { %3557 = vmatprep.subr.bf16.mxu0 %v14199_v12 }
 0x2df   :  { %3558 = vmatpush1.bf16.msra.mxu0 %v14197_v14 }
 0x2e0   :  { %3559 = vmatprep.subr.bf16.mxu0 %v14202_v15  ;;  %v14220_v15 = vld [vmem:[#allocation5 + $0xc8c] ss:$28 sps:$4 sm:$0xff]  }
 0x2e3   :  { %3560 = vmatpush1.bf16.msra.mxu0 %v14200_v18 }
 0x2e4   :  { %3561 = vmatprep.subr.bf16.mxu0 %v14205_v19 }
 0x2e7   :  { %3562 = vmatpush1.bf16.msra.mxu0 %v14203_v21 }
 0x2e8   :  { %3563 = vmatprep.subr.bf16.mxu0 %v14208_v24 }
 0x2e9   :  { %v3259_v36 = vpop.f32.mrb[0].mxu0  ;;  %v3423_v37 = vpop.f32.mrb[0].mxu1 }
 0x2ea   :  { %v16192_v39 = vadd.f32 %v3259_v36, %v766_v29  ;;  %v16194_v40 = vadd.f32 %v3423_v37, %v774_v30  ;;  %v3261_v41 = vpop.f32.mrb[1].mxu0  ;;  %v3425_v42 = vpop.f32.mrb[1].mxu1  ;;  %v14218_v37 = vld [vmem:[#allocation5 + $0xc88] ss:$28 sps:$4 sm:$0xff]  }
 0x2eb   :  { %v16196_v44 = vadd.f32 %v3261_v41, %v770_v34  ;;  %v16198_v45 = vadd.f32 %v3425_v42, %v778_v35  ;;  %v3263_v46 = vpop.f32.mrb[2].mxu0  ;;  %v3427_v47 = vpop.f32.mrb[2].mxu1  ;;  %3564 = vmatpush1.bf16.msra.mxu0 %v14206_v28 }
 0x2ec   :  { %v3754_v49 = vrot.slane %v16192_v39, 4  ;;  %v3796_v50 = vmul.f32 %v16192_v39, %v16192_v39  ;;  %v3766_v51 = vrot.slane %v16194_v40, 4  ;;  %v3798_v48 = vmul.f32 %v16194_v40, %v16194_v40  ;;  %v3264_v5 = vpop.f32.mrb[3].mxu0  ;;  %v3428_v52 = vpop.f32.mrb[3].mxu1  ;;  %3565 = vmatprep.subr.bf16.mxu0 %v14211_v31  ;;  %v14223_v46 = vld [vmem:[#allocation5 + $0xcc4] ss:$28 sps:$4 sm:$0xff]  }
 0x2ed   :  { %v3760_v13 = vrot.slane %v16196_v44, 4  ;;  %v3797_v53 = vmul.f32 %v16196_v44, %v16196_v44  ;;  %v3772_v54 = vrot.slane %v16198_v45, 4  ;;  %v3799_v55 = vmul.f32 %v16198_v45, %v16198_v45 }
 0x2ee   :  { %v3755_v56 = vadd.f32 %v16192_v39, %v3754_v49  ;;  %v3803_v32 = vrot.slane %v3796_v50, 4  ;;  %v3767_v57 = vadd.f32 %v16194_v40, %v3766_v51  ;;  %v3815_v58 = vrot.slane %v3798_v48, 4 }
 0x2ef   :  { %v3761_v60 = vadd.f32 %v16196_v44, %v3760_v13  ;;  %v3809_v61 = vrot.slane %v3797_v53, 4  ;;  %v3773_v62 = vadd.f32 %v16198_v45, %v3772_v54  ;;  %v3821_v63 = vrot.slane %v3799_v55, 4  ;;  %3566 = vmatpush1.bf16.msra.mxu0 %v14209_v38 }
 0x2f0   :  { %v3756_v0 = vrot.slane %v3755_v56, 2  ;;  %v3804_v1 = vadd.f32 %v3803_v32, %v3796_v50  ;;  %v3768_v2 = vrot.slane %v3767_v57, 2  ;;  %v3816_v3 = vadd.f32 %v3815_v58, %v3798_v48  ;;  %3567 = vmatprep.subr.bf16.mxu0 %v14214_v43 }
 0x2f1   :  { %v3762_v4 = vrot.slane %v3761_v60, 2  ;;  %v3810_v6 = vadd.f32 %v3809_v61, %v3797_v53  ;;  %v3774_v7 = vrot.slane %v3773_v62, 2  ;;  %v3822_v8 = vadd.f32 %v3821_v63, %v3799_v55 }
 0x2f2   :  { %v3757_v10 = vadd.f32 %v3756_v0, %v3755_v56  ;;  %v3805_v11 = vrot.slane %v3804_v1, 2  ;;  %v3769_v12 = vadd.f32 %v3768_v2, %v3767_v57  ;;  %v3817_v14 = vrot.slane %v3816_v3, 2  ;;  %v14221_v56 = vld [vmem:[#allocation5 + $0xcc0] ss:$28 sps:$4 sm:$0xff]  }
 0x2f3   :  { %v3763_v16 = vadd.f32 %v3762_v4, %v3761_v60  ;;  %v3811_v18 = vrot.slane %v3810_v6, 2  ;;  %v3775_v19 = vadd.f32 %v3774_v7, %v3773_v62  ;;  %v3823_v21 = vrot.slane %v3822_v8, 2  ;;  %3568 = vmatpush1.bf16.msra.mxu0 %v14212_v17  ;;  %v14226_v60 = vld [vmem:[#allocation5 + $0xcfc] ss:$28 sps:$4 sm:$0xff]  }
 0x2f4   :  { %v3758_v24 = vrot.slane %v3757_v10, 1  ;;  %v3806_v28 = vadd.f32 %v3805_v11, %v3804_v1  ;;  %v3770_v29 = vrot.slane %v3769_v12, 1  ;;  %v3818_v30 = vadd.f32 %v3817_v14, %v3816_v3  ;;  %3569 = vmatprep.subr.bf16.mxu0 %v14217_v59 }
 0x2f5   :  { %v3764_v31 = vrot.slane %v3763_v16, 1  ;;  %v3812_v34 = vadd.f32 %v3811_v18, %v3810_v6  ;;  %v3776_v35 = vrot.slane %v3775_v19, 1  ;;  %v3824_v36 = vadd.f32 %v3823_v21, %v3822_v8  ;;  %v14224_v6 = vld [vmem:[#allocation5 + $0xcf8] ss:$28 sps:$4 sm:$0xff]   ;;  %v14227_v18 = vld [vmem:[#allocation5 + $0xd30] ss:$28 sps:$4 sm:$0xff]  }
 0x2f6   :  { %v3759_v38 = vadd.f32 %v3758_v24, %v3757_v10  ;;  %v3807_v41 = vrot.slane %v3806_v28, 1  ;;  %v3771_v42 = vadd.f32 %v3770_v29, %v3769_v12  ;;  %v3819_v43 = vrot.slane %v3818_v30, 1  ;;  %v14235_v29 = vld [vmem:[#allocation5 + $0xda4] ss:$28 sps:$4 sm:$0xff]  }
 0x2f7   :  { %v3765_v47 = vadd.f32 %v3764_v31, %v3763_v16  ;;  %v3813_v49 = vrot.slane %v3812_v34, 1  ;;  %v3777_v50 = vadd.f32 %v3776_v35, %v3775_v19  ;;  %v3825_v51 = vrot.slane %v3824_v36, 1  ;;  %3570 = vmatpush1.bf16.msra.mxu0 %v14215_v9  ;;  %v14229_v9 = vld [vmem:[#allocation5 + $0xd34] ss:$28 sps:$4 sm:$0xff]   ;;  %v14232_v19 = vld [vmem:[#allocation5 + $0xd6c] ss:$28 sps:$4 sm:$0xff]  }
 0x2f8   :  { %v3808_v48 = vadd.f32 %v3807_v41, %v3806_v28  ;;  %v16216_v5 = vmul.f32 0.125, %v3759_v38  ;;  %v3820_v52 = vadd.f32 %v3819_v43, %v3818_v30  ;;  %v16218_v13 = vmul.f32 0.125, %v3771_v42  ;;  %3571 = vmatprep.subr.bf16.mxu0 %v14220_v15  ;;  %v14230_v28 = vld [vmem:[#allocation5 + $0xd68] ss:$28 sps:$4 sm:$0xff]   ;;  %v14233_v31 = vld [vmem:[#allocation5 + $0xda0] ss:$28 sps:$4 sm:$0xff]  }
 0x2f9   :  { %v3814_v53 = vadd.f32 %v3813_v49, %v3812_v34  ;;  %v16220_v54 = vmul.f32 0.125, %v3765_v47  ;;  %v3826_v55 = vadd.f32 %v3825_v51, %v3824_v36  ;;  %v16222_v17 = vmul.f32 0.125, %v3777_v50  ;;  %v14238_v35 = vld [vmem:[#allocation5 + $0xddc] ss:$28 sps:$4 sm:$0xff]  }
 0x2fa   :  { %v3852_v32 = vmul.f32 0.125, %v3808_v48  ;;  %v3859_v57 = vmul.f32 %v16216_v5, %v16216_v5  ;;  %v3854_v58 = vmul.f32 0.125, %v3820_v52  ;;  %v3861_v59 = vmul.f32 %v16218_v13, %v16218_v13  ;;  %v14236_v47 = vld [vmem:[#allocation5 + $0xdd8] ss:$28 sps:$4 sm:$0xff]  }
 0x2fb   :  { %v3853_v61 = vmul.f32 0.125, %v3814_v53  ;;  %v3860_v62 = vmul.f32 %v16220_v54, %v16220_v54  ;;  %v3855_v63 = vmul.f32 0.125, %v3826_v55  ;;  %v3862_v0 = vmul.f32 %v16222_v17, %v16222_v17  ;;  %3572 = vmatpush1.bf16.msra.mxu0 %v14218_v37 }
 0x2fc   :  { %v3866_v1 = vsub.f32 %v3852_v32, %v3859_v57  ;;  %v3868_v2 = vsub.f32 %v3854_v58, %v3861_v59  ;;  %3573 = vmatprep.subr.bf16.mxu0 %v14223_v46  ;;  %v15847_v21 = vmov 1966171168  }
 0x2fd   :  { %v3867_v3 = vsub.f32 %v3853_v61, %v3860_v62  ;;  %v3869_v4 = vsub.f32 %v3855_v63, %v3862_v0  ;;  %v3906_v24 = vunpack.c.l.s4 %v15847_v21  ;;  %v14248_v21 = vld [vmem:[#allocation11 + $0x40] ss:$28 sps:$4 sm:$0xff]  }
 0x2fe   :  { %v3873_v7 = vmax.f32 %v3866_v1, 0.0  ;;  %v3875_v8 = vmax.f32 %v3868_v2, 0.0 }
 0x2ff   :  { %v3874_v10 = vmax.f32 %v3867_v3, 0.0  ;;  %v3876_v11 = vmax.f32 %v3869_v4, 0.0  ;;  %3574 = vmatpush1.bf16.msra.mxu0 %v14221_v56  ;;  %v3907_v30 = vunpack.c.0.s8 %v3906_v24  ;;  %v16245_v56 = vsub.s32 6, %v16168_v20  ;;  %v14253_v24 = vld [vmem:[#allocation11 + $0x74] ss:$28 sps:$4 sm:$0xff]  }
 0x300   :  { %v3881_v12 = vadd.f32 1e-05, %v3873_v7  ;;  %v3883_v14 = vadd.f32 1e-05, %v3875_v8  ;;  %3575 = vmatprep.subr.bf16.mxu0 %v14226_v60 }
 0x301   :  { %v3882_v15 = vadd.f32 1e-05, %v3874_v10  ;;  %v3884_v16 = vadd.f32 1e-05, %v3876_v11  ;;  %v16233_v46 = vsub.s32 %v3907_v30, %v16168_v20  ;;  %v790_v32 = vrot.slane %v16170_v23, %v16245_v56  ;;  %v14241_v23 = vld [vmem:[#allocation11 + $0x4] ss:$28 sps:$4 sm:$0xff]  }
 0x302   :  { %15415 = vrsqrt.f32 %v3881_v12  ;;  %v14244_v12 = vld [vmem:[#allocation11 + $0xc] ss:$28 sps:$4 sm:$0xff]   ;;  %6618 = vmatprep.subr.bf16.mxu1 %v14241_v23  ;;  %v14254_v30 = vld [vmem:[#allocation11 + $0x78] ss:$28 sps:$4 sm:$0xff]  }
 0x303   :  { %15417 = vrsqrt.f32 %v3883_v14  ;;  %3576 = vmatpush1.bf16.msra.mxu0 %v14224_v6  ;;  %v14239_v14 = vld [vmem:[#allocation11] ss:$28 sps:$4 sm:$0xff]   ;;  %v14310_v23 = vld [vmem:[#allocation11 + $0x274] ss:$28 sps:$4 sm:$0xff]  }
 0x304   :  { %15419 = vrsqrt.f32 %v3882_v15  ;;  %3577 = vmatprep.subr.bf16.mxu0 %v14229_v9  ;;  %v14242_v15 = vld [vmem:[#allocation11 + $0x8] ss:$28 sps:$4 sm:$0xff]   ;;  %6619 = vmatpush1.bf16.msra.mxu1 %v14239_v14  ;;  %v14308_v14 = vld [vmem:[#allocation11 + $0x270] ss:$28 sps:$4 sm:$0xff]  }
 0x305   :  { %15421 = vrsqrt.f32 %v3884_v16  ;;  %v14247_v16 = vld [vmem:[#allocation11 + $0x3c] ss:$28 sps:$4 sm:$0xff]  }
 0x306   :  { %6620 = vmatprep.subr.bf16.mxu1 %v14247_v16  ;;  %v14316_v16 = vld [vmem:[#allocation11 + $0x2ac] ss:$28 sps:$4 sm:$0xff]  }
 0x307   :  { %3578 = vmatpush1.bf16.msra.mxu0 %v14227_v18  ;;  %v14250_v18 = vld [vmem:[#allocation11 + $0x44] ss:$28 sps:$4 sm:$0xff]  }
 0x308   :  { %3579 = vmatprep.subr.bf16.mxu0 %v14232_v19  ;;  %v14245_v19 = vld [vmem:[#allocation11 + $0x38] ss:$28 sps:$4 sm:$0xff]  }
 0x309   :  { %v13092_v34 = vpop.f32.mrb[4].mxu1  ;;  %6621 = vmatpush1.bf16.msra.mxu1 %v14245_v19  ;;  %v14314_v19 = vld [vmem:[#allocation11 + $0x2a8] ss:$28 sps:$4 sm:$0xff]  }
 0x30a   :  { %v13093_v36 = vpop.f32.mrb[5].mxu1  ;;  %6622 = vmatprep.subr.bf16.mxu1 %v14253_v24  ;;  %v14317_v24 = vld [vmem:[#allocation11 + $0x2d8] ss:$28 sps:$4 sm:$0xff]  }
 0x30b   :  { %3580 = vmatpush1.bf16.msra.mxu0 %v14230_v28  ;;  %v13094_v37 = vadd.f32 %v13093_v36, %v13092_v34  ;;  %v13095_v38 = vpop.f32.mrb[6].mxu1  ;;  %v14256_v28 = vld [vmem:[#allocation11 + $0x7c] ss:$28 sps:$4 sm:$0xff]   ;;  %v14262_v34 = vld [vmem:[#allocation11 + $0xb4] ss:$28 sps:$4 sm:$0xff]  }
 0x30c   :  { %v15416_v41 = vpop.eup %15415  ;;  %3581 = vmatprep.subr.bf16.mxu0 %v14235_v29  ;;  %v13096_v42 = vpop.f32.mrb[7].mxu1  ;;  %v14251_v29 = vld [vmem:[#allocation11 + $0x70] ss:$28 sps:$4 sm:$0xff]  }
 0x30d   :  { %v15418_v43 = vpop.eup %15417  ;;  %v3629_v57 = vadd.f32 %v13094_v37, %v790_v32  ;;  %6623 = vmatpush1.bf16.msra.mxu1 %v14251_v29  ;;  %v14260_v36 = vld [vmem:[#allocation11 + $0xb0] ss:$28 sps:$4 sm:$0xff]   ;;  %v14265_v37 = vld [vmem:[#allocation11 + $0xe4] ss:$28 sps:$4 sm:$0xff]  }
 0x30e   :  { %v15420_v49 = vpop.eup %15419  ;;  %v14268_v38 = vld [vmem:[#allocation11 + $0xec] ss:$28 sps:$4 sm:$0xff]   ;;  %v14322_v29 = vld [vmem:[#allocation11 + $0x2e4] ss:$28 sps:$4 sm:$0xff]  }
 0x30f   :  { %v15422_v50 = vpop.eup %15421  ;;  %v3902_v51 = vcombine.low %v15416_v41, %v15420_v49  ;;  %3582 = vmatpush1.bf16.msra.mxu0 %v14233_v31  ;;  %v14259_v31 = vld [vmem:[#allocation11 + $0xac] ss:$28 sps:$4 sm:$0xff]   ;;  %v14263_v41 = vld [vmem:[#allocation11 + $0xe0] ss:$28 sps:$4 sm:$0xff]   ;;  %v14269_v49 = vld [vmem:[#allocation11 + $0x118] ss:$28 sps:$4 sm:$0xff]  }
 0x310   :  { %v3903_v48 = vcombine.low %v15418_v43, %v15422_v50  ;;  %3583 = vmatprep.subr.bf16.mxu0 %v14238_v35  ;;  %v14257_v35 = vld [vmem:[#allocation11 + $0xa8] ss:$28 sps:$4 sm:$0xff]   ;;  %6624 = vmatprep.subr.bf16.mxu1 %v14259_v31  ;;  %v14271_v43 = vld [vmem:[#allocation11 + $0x11c] ss:$28 sps:$4 sm:$0xff]   ;;  %v14275_v32 = vld [vmem:[#allocation11 + $0x150] ss:$28 sps:$4 sm:$0xff]  }
 0x311   :  { %v16236_v52 = vrot.slane %v3902_v51, %v16233_v46  ;;  %6625 = vmatpush1.bf16.msra.mxu1 %v14257_v35  ;;  %v14266_v42 = vld [vmem:[#allocation11 + $0xe8] ss:$28 sps:$4 sm:$0xff]   ;;  %v14272_v50 = vld [vmem:[#allocation11 + $0x120] ss:$28 sps:$4 sm:$0xff]   ;;  %v14277_v51 = vld [vmem:[#allocation11 + $0x154] ss:$28 sps:$4 sm:$0xff]  }
 0x312   :  { %v16239_v53 = vrot.slane %v3903_v48, %v16233_v46  ;;  %6626 = vmatprep.subr.bf16.mxu1 %v14265_v37  ;;  %v14280_v48 = vld [vmem:[#allocation11 + $0x15c] ss:$28 sps:$4 sm:$0xff]   ;;  %v14334_v37 = vld [vmem:[#allocation11 + $0x354] ss:$28 sps:$4 sm:$0xff]  }
 0x313   :  { %3584 = vmatpush1.bf16.msra.mxu0 %v14236_v47  ;;  %v14274_v47 = vld [vmem:[#allocation11 + $0x124] ss:$28 sps:$4 sm:$0xff]   ;;  %v14328_v31 = vld [vmem:[#allocation11 + $0x31c] ss:$28 sps:$4 sm:$0xff]  }
 0x314   :  { %v3933_v55 = vcombine.low %v16236_v52, %v16239_v53  ;;  %6782 = vmatprep.subr.bf16.mxu0 %v14244_v12  ;;  %v14305_v12 = vld [vmem:[#allocation11 + $0x268] ss:$28 sps:$4 sm:$0xff]   ;;  %v14326_v35 = vld [vmem:[#allocation11 + $0x318] ss:$28 sps:$4 sm:$0xff]  }
 0x315   :  { %6627 = vmatpush1.bf16.msra.mxu1 %v14263_v41  ;;  %v14332_v41 = vld [vmem:[#allocation11 + $0x350] ss:$28 sps:$4 sm:$0xff]  }
 0x316   :  { %3586 = vmatmul.mubr.bf16.vlgmr.msra.gmra.mrb[4].mxu0 %v16149_v33  ;;  %6628 = vmatprep.subr.bf16.mxu1 %v14271_v43  ;;  %v14340_v43 = vld [vmem:[#allocation11 + $0x38c] ss:$28 sps:$4 sm:$0xff]  }
 0x317   :  { %6783 = vmatpush1.bf16.msra.mxu0 %v14242_v15  ;;  %v14313_v15 = vld [vmem:[#allocation11 + $0x2a4] ss:$28 sps:$4 sm:$0xff]  }
 0x318   :  { %6784 = vmatprep.subr.bf16.mxu0 %v14250_v18  ;;  %v14311_v18 = vld [vmem:[#allocation11 + $0x2a0] ss:$28 sps:$4 sm:$0xff]  }
 0x319   :  { %6629 = vmatpush1.bf16.msra.mxu1 %v14269_v49 }
 0x31a   :  { %6630 = vmatprep.subr.bf16.mxu1 %v14277_v51 }
 0x31b   :  { %6785 = vmatpush1.bf16.msra.mxu0 %v14248_v21  ;;  %v14319_v21 = vld [vmem:[#allocation11 + $0x2dc] ss:$28 sps:$4 sm:$0xff]  }
 0x31c   :  { %6786 = vmatprep.subr.bf16.mxu0 %v14256_v28  ;;  %v14320_v28 = vld [vmem:[#allocation11 + $0x2e0] ss:$28 sps:$4 sm:$0xff]  }
 0x31d   :  { %6631 = vmatpush1.bf16.msra.mxu1 %v14275_v32 }
 0x31f   :  { %6787 = vmatpush1.bf16.msra.mxu0 %v14254_v30  ;;  %v14325_v30 = vld [vmem:[#allocation11 + $0x314] ss:$28 sps:$4 sm:$0xff]  }
 0x320   :  { %6788 = vmatprep.subr.bf16.mxu0 %v14262_v34  ;;  %v14323_v34 = vld [vmem:[#allocation11 + $0x310] ss:$28 sps:$4 sm:$0xff]  }
 0x323   :  { %6789 = vmatpush1.bf16.msra.mxu0 %v14260_v36  ;;  %v14331_v36 = vld [vmem:[#allocation11 + $0x34c] ss:$28 sps:$4 sm:$0xff]  }
 0x324   :  { %6790 = vmatprep.subr.bf16.mxu0 %v14268_v38  ;;  %v14329_v38 = vld [vmem:[#allocation11 + $0x348] ss:$28 sps:$4 sm:$0xff]  }
 0x327   :  { %6791 = vmatpush1.bf16.msra.mxu0 %v14266_v42  ;;  %v14337_v42 = vld [vmem:[#allocation11 + $0x384] ss:$28 sps:$4 sm:$0xff]  }
 0x328   :  { %6792 = vmatprep.subr.bf16.mxu0 %v14274_v47 }
 0x329   :  { %v13114_v58 = vpop.f32.mrb[8].mxu1 }
 0x32a   :  { %v13115_v59 = vpop.f32.mrb[9].mxu1 }
 0x32b   :  { %v13116_v60 = vadd.f32 %v13115_v59, %v13114_v58  ;;  %v13117_v61 = vpop.f32.mrb[10].mxu1  ;;  %6793 = vmatpush1.bf16.msra.mxu0 %v14272_v50  ;;  %v14283_v58 = vld [vmem:[#allocation11 + $0x18c] ss:$28 sps:$4 sm:$0xff]   ;;  %v14286_v59 = vld [vmem:[#allocation11 + $0x194] ss:$28 sps:$4 sm:$0xff]  }
 0x32c   :  { %v13118_v62 = vpop.f32.mrb[11].mxu1  ;;  %6794 = vmatprep.subr.bf16.mxu0 %v14280_v48  ;;  %v14284_v61 = vld [vmem:[#allocation11 + $0x190] ss:$28 sps:$4 sm:$0xff]   ;;  %6632 = vmatprep.subr.bf16.mxu1 %v14283_v58 }
 0x32d   :  { %v3669_v63 = vadd.f32 %v13116_v60, %v3629_v57  ;;  %v14278_v57 = vld [vmem:[#allocation11 + $0x158] ss:$28 sps:$4 sm:$0xff]   ;;  %v14281_v60 = vld [vmem:[#allocation11 + $0x188] ss:$28 sps:$4 sm:$0xff]  }
 0x32e   :  { %6633 = vmatpush1.bf16.msra.mxu1 %v14281_v60  ;;  %v14289_v62 = vld [vmem:[#allocation11 + $0x1c4] ss:$28 sps:$4 sm:$0xff]   ;;  %v16259_v60 = vsub.s32 5, %v16168_v20 }
 0x32f   :  { %6795 = vmatpush1.bf16.msra.mxu0 %v14278_v57  ;;  %6634 = vmatprep.subr.bf16.mxu1 %v14289_v62 }
 0x330   :  { %6796 = vmatprep.subr.bf16.mxu0 %v14286_v59  ;;  %v16256_v59 = vsub.s32 4, %v16168_v20 }
 0x333   :  { %6797 = vmatpush1.bf16.msra.mxu0 %v14284_v61 }
 0x349   :  { %v13136_v0 = vpop.f32.mrb[12].mxu1 }
 0x34a   :  { %v13137_v1 = vpop.f32.mrb[13].mxu1 }
 0x34b   :  { %v13138_v2 = vadd.f32 %v13137_v1, %v13136_v0  ;;  %v13139_v3 = vpop.f32.mrb[14].mxu1  ;;  %v14287_v0 = vld [vmem:[#allocation11 + $0x1c0] ss:$28 sps:$4 sm:$0xff]   ;;  %v14290_v1 = vld [vmem:[#allocation11 + $0x1c8] ss:$28 sps:$4 sm:$0xff]  }
 0x34c   :  { %v13140_v4 = vpop.f32.mrb[15].mxu1  ;;  %6635 = vmatpush1.bf16.msra.mxu1 %v14287_v0  ;;  %v14298_v3 = vld [vmem:[#allocation11 + $0x204] ss:$28 sps:$4 sm:$0xff]  }
 0x34d   :  { %v3709_v6 = vadd.f32 %v13138_v2, %v3669_v63  ;;  %v14292_v63 = vld [vmem:[#allocation11 + $0x1cc] ss:$28 sps:$4 sm:$0xff]   ;;  %v14295_v2 = vld [vmem:[#allocation11 + $0x1fc] ss:$28 sps:$4 sm:$0xff]  }
 0x34e   :  { %6798 = vmatprep.subr.bf16.mxu0 %v14292_v63  ;;  %v14293_v4 = vld [vmem:[#allocation11 + $0x1f8] ss:$28 sps:$4 sm:$0xff]   ;;  %6636 = vmatprep.subr.bf16.mxu1 %v14295_v2  ;;  %v15457_v63 = vld [vmem:[#allocation7] sm:$0xff] }
 0x34f   :  { %6799 = vmatpush1.bf16.msra.mxu0 %v14290_v1  ;;  %v782_v0 = vrot.slane %v15457_v63, %v16256_v59  ;;  %v786_v1 = vrot.slane %v15457_v63, %v16259_v60 }
 0x350   :  { %6800 = vmatprep.subr.bf16.mxu0 %v14298_v3  ;;  %6637 = vmatpush1.bf16.msra.mxu1 %v14293_v4 }
 0x369   :  { %v13158_v33 = vpop.f32.mrb[16].mxu1 }
 0x36a   :  { %v13159_v7 = vpop.f32.mrb[17].mxu1 }
 0x36b   :  { %v13160_v8 = vadd.f32 %v13159_v7, %v13158_v33  ;;  %v13161_v9 = vpop.f32.mrb[18].mxu1  ;;  %v14301_v33 = vld [vmem:[#allocation11 + $0x234] ss:$28 sps:$4 sm:$0xff]   ;;  %v14304_v7 = vld [vmem:[#allocation11 + $0x23c] ss:$28 sps:$4 sm:$0xff]  }
 0x36c   :  { %v13162_v10 = vpop.f32.mrb[19].mxu1  ;;  %v14302_v9 = vld [vmem:[#allocation11 + $0x238] ss:$28 sps:$4 sm:$0xff]   ;;  %6638 = vmatprep.subr.bf16.mxu1 %v14301_v33 }
 0x36d   :  { %v16249_v11 = vadd.f32 %v13160_v8, %v3709_v6  ;;  %v14296_v6 = vld [vmem:[#allocation11 + $0x200] ss:$28 sps:$4 sm:$0xff]   ;;  %v14299_v8 = vld [vmem:[#allocation11 + $0x230] ss:$28 sps:$4 sm:$0xff]  }
 0x36e   :  { %6801 = vmatpush1.bf16.msra.mxu0 %v14296_v6  ;;  %6639 = vmatpush1.bf16.msra.mxu1 %v14299_v8  ;;  %v14307_v10 = vld [vmem:[#allocation11 + $0x26c] ss:$28 sps:$4 sm:$0xff]  }
 0x36f   :  { %6802 = vmatprep.subr.bf16.mxu0 %v14304_v7  ;;  %6640 = vmatprep.subr.bf16.mxu1 %v14307_v10  ;;  %v3790_v47 = vrot.slane %v16249_v11, 4  ;;  %v3802_v49 = vmul.f32 %v16249_v11, %v16249_v11 }
 0x371   :  { %v3791_v50 = vadd.f32 %v3790_v47, %v16249_v11  ;;  %v3839_v51 = vrot.slane %v3802_v49, 4 }
 0x372   :  { %6803 = vmatpush1.bf16.msra.mxu0 %v14302_v9  ;;  %6641 = vmatpush1.bf16.msra.mxu1 %v14305_v12 }
 0x373   :  { %6804 = vmatprep.subr.bf16.mxu0 %v14310_v23  ;;  %6642 = vmatprep.subr.bf16.mxu1 %v14313_v15  ;;  %v3792_v48 = vrot.slane %v3791_v50, 2  ;;  %v3840_v32 = vadd.f32 %v3839_v51, %v3802_v49 }
 0x375   :  { %v3793_v57 = vadd.f32 %v3792_v48, %v3791_v50  ;;  %v3841_v58 = vrot.slane %v3840_v32, 2 }
 0x376   :  { %6805 = vmatpush1.bf16.msra.mxu0 %v14308_v14  ;;  %6643 = vmatpush1.bf16.msra.mxu1 %v14311_v18 }
 0x377   :  { %6806 = vmatprep.subr.bf16.mxu0 %v14316_v16  ;;  %6644 = vmatprep.subr.bf16.mxu1 %v14319_v21  ;;  %v3794_v61 = vrot.slane %v3793_v57, 1  ;;  %v3842_v62 = vadd.f32 %v3841_v58, %v3840_v32 }
 0x379   :  { %v3795_v2 = vadd.f32 %v3794_v61, %v3793_v57  ;;  %v3843_v3 = vrot.slane %v3842_v62, 1 }
 0x37a   :  { %6807 = vmatpush1.bf16.msra.mxu0 %v14314_v19  ;;  %6645 = vmatpush1.bf16.msra.mxu1 %v14317_v24 }
 0x37b   :  { %6808 = vmatprep.subr.bf16.mxu0 %v14322_v29  ;;  %6646 = vmatprep.subr.bf16.mxu1 %v14325_v30  ;;  %v3844_v23 = vadd.f32 %v3843_v3, %v3842_v62  ;;  %v16270_v12 = vmul.f32 0.125, %v3795_v2 }
 0x37d   :  { %v3858_v29 = vmul.f32 0.125, %v3844_v23  ;;  %v3865_v30 = vmul.f32 %v16270_v12, %v16270_v12 }
 0x37e   :  { %6809 = vmatpush1.bf16.msra.mxu0 %v14320_v28  ;;  %6647 = vmatpush1.bf16.msra.mxu1 %v14323_v34 }
 0x37f   :  { %6810 = vmatprep.subr.bf16.mxu0 %v14328_v31  ;;  %6648 = vmatprep.subr.bf16.mxu1 %v14331_v36 }
 0x382   :  { %6811 = vmatpush1.bf16.msra.mxu0 %v14326_v35  ;;  %6649 = vmatpush1.bf16.msra.mxu1 %v14329_v38 }
 0x383   :  { %6812 = vmatprep.subr.bf16.mxu0 %v14334_v37  ;;  %6659 = vmatprep.subr.bf16.mxu1 %v14337_v42 }
 0x386   :  { %6813 = vmatpush1.bf16.msra.mxu0 %v14332_v41 }
 0x387   :  { %6823 = vmatprep.subr.bf16.mxu0 %v14340_v43  ;;  %v3872_v43 = vsub.f32 %v3858_v29, %v3865_v30  ;;  %v3880_v30 = vld [vmem:[#allocation8] sm:$0xff] }
 0x389   :  { %v3879_v61 = vmax.f32 %v3872_v43, 0.0 }
 0x3e9   :  { %v3587_v4 = vpop.f32.mrb[4].mxu0 }
 0x3ea   :  { %v16263_v6 = vadd.f32 %v3587_v4, %v782_v0  ;;  %v3589_v33 = vpop.f32.mrb[5].mxu0 }
 0x3eb   :  { %v16265_v7 = vadd.f32 %v3589_v33, %v786_v1  ;;  %v3591_v8 = vpop.f32.mrb[6].mxu0  ;;  %v3887_v33 = vadd.f32 1e-05, %v3879_v61 }
 0x3ec   :  { %v3778_v9 = vrot.slane %v16263_v6, 4  ;;  %v3800_v20 = vmul.f32 %v16263_v6, %v16263_v6  ;;  %v3592_v10 = vpop.f32.mrb[7].mxu0 }
 0x3ed   :  { %v3784_v14 = vrot.slane %v16265_v7, 4  ;;  %v3801_v15 = vmul.f32 %v16265_v7, %v16265_v7  ;;  %15423 = vrsqrt.f32 %v3887_v33 }
 0x3ee   :  { %v3779_v16 = vadd.f32 %v16263_v6, %v3778_v9  ;;  %v3827_v18 = vrot.slane %v3800_v20, 4 }
 0x3ef   :  { %v3785_v19 = vadd.f32 %v16265_v7, %v3784_v14  ;;  %v3833_v21 = vrot.slane %v3801_v15, 4 }
 0x3f0   :  { %v3780_v24 = vrot.slane %v3779_v16, 2  ;;  %v3828_v28 = vadd.f32 %v3827_v18, %v3800_v20 }
 0x3f1   :  { %v3786_v31 = vrot.slane %v3785_v19, 2  ;;  %v3834_v34 = vadd.f32 %v3833_v21, %v3801_v15 }
 0x3f2   :  { %v3781_v35 = vadd.f32 %v3780_v24, %v3779_v16  ;;  %v3829_v36 = vrot.slane %v3828_v28, 2 }
 0x3f3   :  { %v3787_v37 = vadd.f32 %v3786_v31, %v3785_v19  ;;  %v3835_v38 = vrot.slane %v3834_v34, 2 }
 0x3f4   :  { %v3782_v41 = vrot.slane %v3781_v35, 1  ;;  %v3830_v42 = vadd.f32 %v3829_v36, %v3828_v28  ;;  %v3941_v28 = vrot.slane %v3933_v55, %v16233_v46 }
 0x3f5   :  { %v3788_v47 = vrot.slane %v3787_v37, 1  ;;  %v3836_v49 = vadd.f32 %v3835_v38, %v3834_v34 }
 0x3f6   :  { %v3783_v50 = vadd.f32 %v3782_v41, %v3781_v35  ;;  %v3831_v51 = vrot.slane %v3830_v42, 1 }
 0x3f7   :  { %v3789_v48 = vadd.f32 %v3788_v47, %v3787_v37  ;;  %v3837_v32 = vrot.slane %v3836_v49, 1  ;;  %v15424_v14 = vpop.eup %15423 }
 0x3f8   :  { %v3832_v57 = vadd.f32 %v3831_v51, %v3830_v42  ;;  %v3849_v58 = vmul.f32 0.125, %v3783_v50  ;;  %v3932_v19 = vrot.slane %v15424_v14, %v16233_v46 }
 0x3f9   :  { %v3838_v62 = vadd.f32 %v3837_v32, %v3836_v49  ;;  %v3850_v63 = vmul.f32 0.125, %v3789_v48 }
 0x3fa   :  { %v3856_v0 = vmul.f32 0.125, %v3832_v57  ;;  %v3863_v1 = vmul.f32 %v3849_v58, %v3849_v58 }
 0x3fb   :  { %v3857_v2 = vmul.f32 0.125, %v3838_v62  ;;  %v3864_v3 = vmul.f32 %v3850_v63, %v3850_v63 }
 0x3fc   :  { %v3870_v4 = vsub.f32 %v3856_v0, %v3863_v1  ;;  %v3952_v1 = vld [vmem:[#allocation10] sm:$0xff] }
 0x3fd   :  { %v3871_v8 = vsub.f32 %v3857_v2, %v3864_v3 }
 0x3fe   :  { %v3877_v9 = vmax.f32 %v3870_v4, 0.0 }
 0x3ff   :  { %v3878_v20 = vmax.f32 %v3871_v8, 0.0 }
 0x400   :  { %v3885_v10 = vadd.f32 1e-05, %v3877_v9 }
 0x401   :  { %v3886_v23 = vadd.f32 1e-05, %v3878_v20 }
 0x402   :  { %15425 = vrsqrt.f32 %v3885_v10 }
 0x403   :  { %15427 = vrsqrt.f32 %v3886_v23 }
 0x40c   :  { %v15426_v15 = vpop.eup %15425 }
 0x40d   :  { %v15428_v16 = vpop.eup %15427 }
 0x40e   :  { %v3904_v18 = vcombine.low %v15426_v15, %v15428_v16 }
 0x410   :  { %v3925_v21 = vrot.slane %v3904_v18, %v16233_v46 }
 0x412   :  { %v3934_v24 = vcombine.low %v3925_v21, %v3932_v19 }
 0x414   :  { %v3948_v29 = vrot.slane %v3934_v24, %v16233_v46 }
 0x416   :  { %v3949_v31 = vcombine.low %v3941_v28, %v3948_v29 }
 0x418   :  { %v3951_v34 = vmul.f32 %v3949_v31, %v3880_v30  ;;  %v14335_v31 = vld [vmem:[#allocation11 + $0x380] ss:$28 sps:$4 sm:$0xff]  }
 0x41a   :  { %v3973_v35 = vrot.slane %v3951_v34, %v16256_v59  ;;  %v3977_v36 = vrot.slane %v3951_v34, %v16259_v60  ;;  %v3981_v37 = vrot.slane %v3951_v34, %v16245_v56  ;;  %v3957_v38 = vrot.slane %v3951_v34, %v16173_v22 }
 0x41b   :  { %v3961_v41 = vrot.slane %v3951_v34, %v16179_v25  ;;  %v3965_v42 = vrot.slane %v3951_v34, %v16176_v27  ;;  %v3969_v52 = vrot.slane %v3951_v34, %v16182_v26 }
 0x41c   :  { %v3993_v53 = vmul.f32 %v3973_v35, %v3849_v58  ;;  %v3994_v55 = vmul.f32 %v3977_v36, %v3850_v63  ;;  %v3995_v43 = vmul.f32 %v3981_v37, %v16270_v12  ;;  %v4058_v47 = vmul.f32 %v16265_v7, %v3977_v36  ;;  %v14346_v36 = vld [vmem:[#allocation11 + $0x3c4] ss:$28 sps:$4 sm:$0xff]  }
 0x41d   :  { %v3989_v49 = vmul.f32 %v3957_v38, %v16216_v5  ;;  %v3990_v50 = vmul.f32 %v3961_v41, %v16220_v54  ;;  %v3991_v51 = vmul.f32 %v3965_v42, %v16218_v13  ;;  %v3992_v48 = vmul.f32 %v3969_v52, %v16222_v17 }
 0x41e   :  { %v4005_v32 = vcombine.low %v3993_v53, %v3994_v55  ;;  %v4054_v57 = vmul.f32 %v16196_v44, %v3961_v41  ;;  %v4053_v61 = vmul.f32 %v16192_v39, %v3957_v38  ;;  %v4056_v63 = vmul.f32 %v16198_v45, %v3969_v52  ;;  %v14341_v38 = vld [vmem:[#allocation11 + $0x3b8] ss:$28 sps:$4 sm:$0xff]   ;;  %v14344_v41 = vld [vmem:[#allocation11 + $0x3c0] ss:$28 sps:$4 sm:$0xff]   ;;  %v14347_v53 = vld [vmem:[#allocation11 + $0x3f0] ss:$28 sps:$4 sm:$0xff]  }
 0x41f   :  { %v4003_v62 = vcombine.low %v3989_v49, %v3990_v50  ;;  %v4004_v58 = vcombine.low %v3991_v51, %v3992_v48  ;;  %v4033_v7 = vrot.slane %v3995_v43, %v16233_v46  ;;  %v4057_v5 = vmul.f32 %v16263_v6, %v3973_v35  ;;  %v14343_v35 = vld [vmem:[#allocation11 + $0x3bc] ss:$28 sps:$4 sm:$0xff]   ;;  %v14355_v43 = vld [vmem:[#allocation11 + $0x42c] ss:$28 sps:$4 sm:$0xff]   ;;  %v14361_v51 = vld [vmem:[#allocation11 + $0x464] ss:$28 sps:$4 sm:$0xff]  }
 0x420   :  { %v4026_v12 = vrot.slane %v4005_v32, %v16233_v46  ;;  %v4055_v45 = vmul.f32 %v16194_v40, %v3965_v42  ;;  %v4059_v10 = vmul.f32 %v3981_v37, %v16249_v11  ;;  %v14338_v11 = vld [vmem:[#allocation11 + $0x388] ss:$28 sps:$4 sm:$0xff]   ;;  %v14349_v42 = vld [vmem:[#allocation11 + $0x3f4] ss:$28 sps:$4 sm:$0xff]   ;;  %v14352_v52 = vld [vmem:[#allocation11 + $0x3fc] ss:$28 sps:$4 sm:$0xff]  }
 0x421   :  { %v4012_v54 = vrot.slane %v4003_v62, %v16233_v46  ;;  %v4019_v13 = vrot.slane %v4004_v58, %v16233_v46  ;;  %v14350_v55 = vld [vmem:[#allocation11 + $0x3f8] ss:$28 sps:$4 sm:$0xff]   ;;  %v14353_v49 = vld [vmem:[#allocation11 + $0x428] ss:$28 sps:$4 sm:$0xff]   ;;  %v14356_v50 = vld [vmem:[#allocation11 + $0x430] ss:$28 sps:$4 sm:$0xff]  }
 0x422   :  { %v4035_v17 = vcombine.low %v4026_v12, %v4033_v7  ;;  %v14364_v48 = vld [vmem:[#allocation11 + $0x46c] ss:$28 sps:$4 sm:$0xff]   ;;  %v14359_v32 = vld [vmem:[#allocation11 + $0x460] ss:$28 sps:$4 sm:$0xff]   ;;  %v14365_v58 = vld [vmem:[#allocation11 + $0x498] ss:$28 sps:$4 sm:$0xff]  }
 0x423   :  { %v4034_v0 = vcombine.low %v4012_v54, %v4019_v13  ;;  %v14370_v62 = vld [vmem:[#allocation11 + $0x4a4] ss:$28 sps:$4 sm:$0xff]   ;;  %v14373_v12 = vld [vmem:[#allocation11 + $0x4d4] ss:$28 sps:$4 sm:$0xff]   ;;  %v14376_v7 = vld [vmem:[#allocation11 + $0x4dc] ss:$28 sps:$4 sm:$0xff]  }
 0x424   :  { %v4049_v44 = vrot.slane %v4035_v17, %v16233_v46  ;;  %v14374_v54 = vld [vmem:[#allocation11 + $0x4d8] ss:$28 sps:$4 sm:$0xff]   ;;  %v14379_v13 = vld [vmem:[#allocation11 + $0x50c] ss:$28 sps:$4 sm:$0xff]  }
 0x425   :  { %v4042_v39 = vrot.slane %v4034_v0, %v16233_v46  ;;  %v14382_v17 = vld [vmem:[#allocation11 + $0x514] ss:$28 sps:$4 sm:$0xff]   ;;  %v14377_v0 = vld [vmem:[#allocation11 + $0x508] ss:$28 sps:$4 sm:$0xff]  }
 0x427   :  { %v4050_v2 = vcombine.low %v4042_v39, %v4049_v44  ;;  %v14380_v44 = vld [vmem:[#allocation11 + $0x510] ss:$28 sps:$4 sm:$0xff]   ;;  %v14385_v39 = vld [vmem:[#allocation11 + $0x544] ss:$28 sps:$4 sm:$0xff]  }
 0x429   :  { %v4052_v3 = vsub.f32 %v3952_v1, %v4050_v2  ;;  %v14388_v1 = vld [vmem:[#allocation11 + $0x54c] ss:$28 sps:$4 sm:$0xff]   ;;  %v14383_v2 = vld [vmem:[#allocation11 + $0x540] ss:$28 sps:$4 sm:$0xff]  }
 0x42b   :  { %v4068_v4 = vrot.slane %v4052_v3, %v16179_v25  ;;  %v4064_v33 = vrot.slane %v4052_v3, %v16173_v22  ;;  %v4076_v6 = vrot.slane %v4052_v3, %v16182_v26  ;;  %v4072_v8 = vrot.slane %v4052_v3, %v16176_v27 }
 0x42c   :  { %v4084_v9 = vrot.slane %v4052_v3, %v16259_v60  ;;  %v4080_v20 = vrot.slane %v4052_v3, %v16256_v59  ;;  %v4088_v23 = vrot.slane %v4052_v3, %v16245_v56  ;;  %v14386_v3 = vld [vmem:[#allocation11 + $0x548] ss:$28 sps:$4 sm:$0xff]  }
 0x42d   :  { %v4097_v14 = vadd.f32 %v4068_v4, %v4054_v57  ;;  %v4096_v15 = vadd.f32 %v4064_v33, %v4053_v61  ;;  %v4099_v16 = vadd.f32 %v4076_v6, %v4056_v63  ;;  %v16318_v40 = vadd.f32 %v4072_v8, %v4055_v45  ;;  %v14362_v57 = vld [vmem:[#allocation11 + $0x468] ss:$28 sps:$4 sm:$0xff]   ;;  %v14367_v61 = vld [vmem:[#allocation11 + $0x49c] ss:$28 sps:$4 sm:$0xff]   ;;  %v14397_v8 = vld [vmem:[#allocation11 + $0x5b4] ss:$28 sps:$4 sm:$0xff]  }
 0x42e   :  { %v16320_v18 = vadd.f32 %v4084_v9, %v4058_v47  ;;  %v16322_v19 = vadd.f32 %v4080_v20, %v4057_v5  ;;  %v16324_v21 = vadd.f32 %v4088_v23, %v4059_v10  ;;  %v14358_v47 = vld [vmem:[#allocation11 + $0x434] ss:$28 sps:$4 sm:$0xff]   ;;  %v14368_v63 = vld [vmem:[#allocation11 + $0x4a0] ss:$28 sps:$4 sm:$0xff]   ;;  %v14403_v23 = vld [vmem:[#allocation11 + $0x5ec] ss:$28 sps:$4 sm:$0xff]  }
 0x42f   :  { %v4104_v24 = vmax.f32 %v4097_v14, 0.0  ;;  %v4103_v28 = vmax.f32 %v4096_v15, 0.0  ;;  %v4106_v29 = vmax.f32 %v4099_v16, 0.0  ;;  %v14371_v5 = vld [vmem:[#allocation11 + $0x4d0] ss:$28 sps:$4 sm:$0xff]  }
 0x430   :  { %v14391_v45 = vld [vmem:[#allocation11 + $0x57c] ss:$28 sps:$4 sm:$0xff]   ;;  %v14394_v4 = vld [vmem:[#allocation11 + $0x584] ss:$28 sps:$4 sm:$0xff]   ;;  %v14395_v20 = vld [vmem:[#allocation11 + $0x5b0] ss:$28 sps:$4 sm:$0xff]  }
 0x431   :  { %v16326_v30 = vpack.c.bf16 %v4104_v24, %v4104_v24  ;;  %v16328_v34 = vpack.c.bf16 %v4103_v28, %v4103_v28  ;;  %v16334_v37 = vpack.c.bf16 %v4106_v29, %v4106_v29  ;;  %v14389_v33 = vld [vmem:[#allocation11 + $0x578] ss:$28 sps:$4 sm:$0xff]   ;;  %v14392_v6 = vld [vmem:[#allocation11 + $0x580] ss:$28 sps:$4 sm:$0xff]   ;;  %v14401_v15 = vld [vmem:[#allocation11 + $0x5e8] ss:$28 sps:$4 sm:$0xff]  }
 0x432   :  { %v14400_v9 = vld [vmem:[#allocation11 + $0x5bc] ss:$28 sps:$4 sm:$0xff]   ;;  %v14406_v14 = vld [vmem:[#allocation11 + $0x5f4] ss:$28 sps:$4 sm:$0xff]   ;;  %v14409_v24 = vld [vmem:[#allocation11 + $0x624] ss:$28 sps:$4 sm:$0xff]  }
 0x433   :  { %6650 = vmatprep.mubr.bf16.mxu1 %v16326_v30  ;;  %6814 = vmatprep.mubr.bf16.mxu0 %v16326_v30  ;;  %v14398_v10 = vld [vmem:[#allocation11 + $0x5b8] ss:$28 sps:$4 sm:$0xff]   ;;  %v14404_v16 = vld [vmem:[#allocation11 + $0x5f0] ss:$28 sps:$4 sm:$0xff]   ;;  %v14407_v29 = vld [vmem:[#allocation11 + $0x620] ss:$28 sps:$4 sm:$0xff]  }
 0x434   :  { %6651 = vmatmul.mubr.bf16.vlgmr.msra.gmra.mrb[20].mxu1 %v16328_v34  ;;  %6815 = vmatmul.mubr.bf16.vlgmr.msra.gmra.mrb[8].mxu0 %v16328_v34  ;;  %v14412_v28 = vld [vmem:[#allocation11 + $0x62c] ss:$28 sps:$4 sm:$0xff]  }
 0x435   :  { %6660 = vmatpush1.bf16.msra.mxu1 %v14335_v31  ;;  %6824 = vmatpush1.bf16.msra.mxu0 %v14338_v11  ;;  %v14410_v31 = vld [vmem:[#allocation11 + $0x628] ss:$28 sps:$4 sm:$0xff]   ;;  %v14415_v11 = vld [vmem:[#allocation11 + $0x65c] ss:$28 sps:$4 sm:$0xff]  }
 0x436   :  { %6691 = vmatprep.mubr.bf16.mxu1 %v16334_v37  ;;  %6855 = vmatprep.mubr.bf16.mxu0 %v16334_v37 }
 0x437   :  { %6661 = vmatprep.subr.bf16.mxu1 %v14343_v35  ;;  %6825 = vmatprep.subr.bf16.mxu0 %v14346_v36  ;;  %v14418_v35 = vld [vmem:[#allocation11 + $0x664] ss:$28 sps:$4 sm:$0xff]   ;;  %v14413_v36 = vld [vmem:[#allocation11 + $0x658] ss:$28 sps:$4 sm:$0xff]  }
 0x439   :  { %6662 = vmatpush1.bf16.msra.mxu1 %v14341_v38  ;;  %6826 = vmatpush1.bf16.msra.mxu0 %v14344_v41  ;;  %v14416_v38 = vld [vmem:[#allocation11 + $0x660] ss:$28 sps:$4 sm:$0xff]   ;;  %v14421_v41 = vld [vmem:[#allocation11 + $0x694] ss:$28 sps:$4 sm:$0xff]  }
 0x43a   :  { %6663 = vmatprep.subr.bf16.mxu1 %v14349_v42  ;;  %6827 = vmatprep.subr.bf16.mxu0 %v14352_v52  ;;  %v14424_v42 = vld [vmem:[#allocation11 + $0x69c] ss:$28 sps:$4 sm:$0xff]   ;;  %v14419_v52 = vld [vmem:[#allocation11 + $0x690] ss:$28 sps:$4 sm:$0xff]  }
 0x43d   :  { %6664 = vmatpush1.bf16.msra.mxu1 %v14347_v53  ;;  %6828 = vmatpush1.bf16.msra.mxu0 %v14350_v55  ;;  %v14422_v53 = vld [vmem:[#allocation11 + $0x698] ss:$28 sps:$4 sm:$0xff]   ;;  %v14427_v55 = vld [vmem:[#allocation11 + $0x6cc] ss:$28 sps:$4 sm:$0xff]  }
 0x43e   :  { %6665 = vmatprep.subr.bf16.mxu1 %v14355_v43  ;;  %6829 = vmatprep.subr.bf16.mxu0 %v14358_v47  ;;  %v14430_v43 = vld [vmem:[#allocation11 + $0x6d4] ss:$28 sps:$4 sm:$0xff]   ;;  %v14425_v47 = vld [vmem:[#allocation11 + $0x6c8] ss:$28 sps:$4 sm:$0xff]  }
 0x441   :  { %6666 = vmatpush1.bf16.msra.mxu1 %v14353_v49  ;;  %6830 = vmatpush1.bf16.msra.mxu0 %v14356_v50  ;;  %v14428_v49 = vld [vmem:[#allocation11 + $0x6d0] ss:$28 sps:$4 sm:$0xff]   ;;  %v4105_v50 = vmax.f32 %v16318_v40, 0.0  ;;  %v14437_v40 = vld [vmem:[#allocation11 + $0x738] ss:$28 sps:$4 sm:$0xff]  }
 0x442   :  { %6667 = vmatprep.subr.bf16.mxu1 %v14361_v51  ;;  %6831 = vmatprep.subr.bf16.mxu0 %v14364_v48  ;;  %v14433_v51 = vld [vmem:[#allocation11 + $0x704] ss:$28 sps:$4 sm:$0xff]   ;;  %v14436_v48 = vld [vmem:[#allocation11 + $0x70c] ss:$28 sps:$4 sm:$0xff]  }
 0x445   :  { %6668 = vmatpush1.bf16.msra.mxu1 %v14359_v32  ;;  %6832 = vmatpush1.bf16.msra.mxu0 %v14362_v57  ;;  %v4108_v32 = vmax.f32 %v16320_v18, 0.0  ;;  %v14431_v57 = vld [vmem:[#allocation11 + $0x700] ss:$28 sps:$4 sm:$0xff]  }
 0x446   :  { %6669 = vmatprep.subr.bf16.mxu1 %v14367_v61  ;;  %6833 = vmatprep.subr.bf16.mxu0 %v14370_v62  ;;  %v16340_v61 = vpack.c.bf16 %v4105_v50, %v4105_v50  ;;  %v14434_v62 = vld [vmem:[#allocation11 + $0x708] ss:$28 sps:$4 sm:$0xff]   ;;  %v14440_v18 = vld [vmem:[#allocation11 + $0x740] ss:$28 sps:$4 sm:$0xff]   ;;  %v14500_v50 = vld [vmem:[#allocation11 + $0x970] ss:$28 sps:$4 sm:$0xff]  }
 0x449   :  { %6670 = vmatpush1.bf16.msra.mxu1 %v14365_v58  ;;  %6834 = vmatpush1.bf16.msra.mxu0 %v14368_v63  ;;  %v16342_v58 = vpack.c.bf16 %v4108_v32, %v4108_v32  ;;  %v14439_v63 = vld [vmem:[#allocation11 + $0x73c] ss:$28 sps:$4 sm:$0xff]  }
 0x44a   :  { %6671 = vmatprep.subr.bf16.mxu1 %v14373_v12  ;;  %6835 = vmatprep.subr.bf16.mxu0 %v14376_v7  ;;  %v14442_v12 = vld [vmem:[#allocation11 + $0x744] ss:$28 sps:$4 sm:$0xff]   ;;  %v14445_v7 = vld [vmem:[#allocation11 + $0x774] ss:$28 sps:$4 sm:$0xff]  }
 0x44b   :  { %v14503_v32 = vld [vmem:[#allocation11 + $0x9a0] ss:$28 sps:$4 sm:$0xff]  }
 0x44d   :  { %6672 = vmatpush1.bf16.msra.mxu1 %v14371_v5  ;;  %6836 = vmatpush1.bf16.msra.mxu0 %v14374_v54  ;;  %v14448_v5 = vld [vmem:[#allocation11 + $0x77c] ss:$28 sps:$4 sm:$0xff]   ;;  %v14443_v54 = vld [vmem:[#allocation11 + $0x770] ss:$28 sps:$4 sm:$0xff]  }
 0x44e   :  { %6673 = vmatprep.subr.bf16.mxu1 %v14379_v13  ;;  %6837 = vmatprep.subr.bf16.mxu0 %v14382_v17  ;;  %v14446_v13 = vld [vmem:[#allocation11 + $0x778] ss:$28 sps:$4 sm:$0xff]   ;;  %v14451_v17 = vld [vmem:[#allocation11 + $0x7ac] ss:$28 sps:$4 sm:$0xff]  }
 0x451   :  { %6674 = vmatpush1.bf16.msra.mxu1 %v14377_v0  ;;  %6838 = vmatpush1.bf16.msra.mxu0 %v14380_v44  ;;  %v14454_v0 = vld [vmem:[#allocation11 + $0x7b4] ss:$28 sps:$4 sm:$0xff]   ;;  %v14449_v44 = vld [vmem:[#allocation11 + $0x7a8] ss:$28 sps:$4 sm:$0xff]  }
 0x452   :  { %6675 = vmatprep.subr.bf16.mxu1 %v14385_v39  ;;  %6839 = vmatprep.subr.bf16.mxu0 %v14388_v1  ;;  %v14452_v39 = vld [vmem:[#allocation11 + $0x7b0] ss:$28 sps:$4 sm:$0xff]   ;;  %v14457_v1 = vld [vmem:[#allocation11 + $0x7e4] ss:$28 sps:$4 sm:$0xff]  }
 0x455   :  { %6676 = vmatpush1.bf16.msra.mxu1 %v14383_v2  ;;  %6840 = vmatpush1.bf16.msra.mxu0 %v14386_v3  ;;  %v14460_v2 = vld [vmem:[#allocation11 + $0x7ec] ss:$28 sps:$4 sm:$0xff]   ;;  %v14455_v3 = vld [vmem:[#allocation11 + $0x7e0] ss:$28 sps:$4 sm:$0xff]  }
 0x456   :  { %6677 = vmatprep.subr.bf16.mxu1 %v14391_v45  ;;  %6841 = vmatprep.subr.bf16.mxu0 %v14394_v4  ;;  %v14458_v45 = vld [vmem:[#allocation11 + $0x7e8] ss:$28 sps:$4 sm:$0xff]   ;;  %v14463_v4 = vld [vmem:[#allocation11 + $0x81c] ss:$28 sps:$4 sm:$0xff]  }
 0x459   :  { %6678 = vmatpush1.bf16.msra.mxu1 %v14389_v33  ;;  %6842 = vmatpush1.bf16.msra.mxu0 %v14392_v6  ;;  %v14466_v33 = vld [vmem:[#allocation11 + $0x824] ss:$28 sps:$4 sm:$0xff]   ;;  %v14461_v6 = vld [vmem:[#allocation11 + $0x818] ss:$28 sps:$4 sm:$0xff]  }
 0x45a   :  { %6679 = vmatprep.subr.bf16.mxu1 %v14397_v8  ;;  %6843 = vmatprep.subr.bf16.mxu0 %v14400_v9  ;;  %v14464_v8 = vld [vmem:[#allocation11 + $0x820] ss:$28 sps:$4 sm:$0xff]   ;;  %v14469_v9 = vld [vmem:[#allocation11 + $0x854] ss:$28 sps:$4 sm:$0xff]  }
 0x45d   :  { %6680 = vmatpush1.bf16.msra.mxu1 %v14395_v20  ;;  %6844 = vmatpush1.bf16.msra.mxu0 %v14398_v10  ;;  %v14472_v20 = vld [vmem:[#allocation11 + $0x85c] ss:$28 sps:$4 sm:$0xff]   ;;  %v14467_v10 = vld [vmem:[#allocation11 + $0x850] ss:$28 sps:$4 sm:$0xff]  }
 0x45e   :  { %6681 = vmatprep.subr.bf16.mxu1 %v14403_v23  ;;  %6845 = vmatprep.subr.bf16.mxu0 %v14406_v14  ;;  %v14470_v23 = vld [vmem:[#allocation11 + $0x858] ss:$28 sps:$4 sm:$0xff]   ;;  %v14475_v14 = vld [vmem:[#allocation11 + $0x88c] ss:$28 sps:$4 sm:$0xff]  }
 0x461   :  { %6682 = vmatpush1.bf16.msra.mxu1 %v14401_v15  ;;  %6846 = vmatpush1.bf16.msra.mxu0 %v14404_v16  ;;  %v14478_v15 = vld [vmem:[#allocation11 + $0x894] ss:$28 sps:$4 sm:$0xff]   ;;  %v14473_v16 = vld [vmem:[#allocation11 + $0x888] ss:$28 sps:$4 sm:$0xff]  }
 0x462   :  { %6683 = vmatprep.subr.bf16.mxu1 %v14409_v24  ;;  %6847 = vmatprep.subr.bf16.mxu0 %v14412_v28  ;;  %v14476_v24 = vld [vmem:[#allocation11 + $0x890] ss:$28 sps:$4 sm:$0xff]   ;;  %v14481_v28 = vld [vmem:[#allocation11 + $0x8c4] ss:$28 sps:$4 sm:$0xff]  }
 0x465   :  { %6684 = vmatpush1.bf16.msra.mxu1 %v14407_v29  ;;  %6848 = vmatpush1.bf16.msra.mxu0 %v14410_v31  ;;  %v14484_v29 = vld [vmem:[#allocation11 + $0x8cc] ss:$28 sps:$4 sm:$0xff]   ;;  %v14479_v31 = vld [vmem:[#allocation11 + $0x8c0] ss:$28 sps:$4 sm:$0xff]  }
 0x466   :  { %6685 = vmatprep.subr.bf16.mxu1 %v14415_v11  ;;  %6849 = vmatprep.subr.bf16.mxu0 %v14418_v35  ;;  %v14482_v11 = vld [vmem:[#allocation11 + $0x8c8] ss:$28 sps:$4 sm:$0xff]   ;;  %v14487_v35 = vld [vmem:[#allocation11 + $0x8fc] ss:$28 sps:$4 sm:$0xff]  }
 0x469   :  { %6686 = vmatpush1.bf16.msra.mxu1 %v14413_v36  ;;  %6850 = vmatpush1.bf16.msra.mxu0 %v14416_v38  ;;  %v14490_v36 = vld [vmem:[#allocation11 + $0x904] ss:$28 sps:$4 sm:$0xff]   ;;  %v14485_v38 = vld [vmem:[#allocation11 + $0x8f8] ss:$28 sps:$4 sm:$0xff]  }
 0x46a   :  { %6687 = vmatprep.subr.bf16.mxu1 %v14421_v41  ;;  %6851 = vmatprep.subr.bf16.mxu0 %v14424_v42  ;;  %v14488_v41 = vld [vmem:[#allocation11 + $0x900] ss:$28 sps:$4 sm:$0xff]   ;;  %v14493_v42 = vld [vmem:[#allocation11 + $0x934] ss:$28 sps:$4 sm:$0xff]  }
 0x46d   :  { %6688 = vmatpush1.bf16.msra.mxu1 %v14419_v52  ;;  %6852 = vmatpush1.bf16.msra.mxu0 %v14422_v53  ;;  %v14496_v52 = vld [vmem:[#allocation11 + $0x93c] ss:$28 sps:$4 sm:$0xff]   ;;  %v14491_v53 = vld [vmem:[#allocation11 + $0x930] ss:$28 sps:$4 sm:$0xff]  }
 0x46e   :  { %6689 = vmatprep.subr.bf16.mxu1 %v14427_v55  ;;  %6853 = vmatprep.subr.bf16.mxu0 %v14430_v43  ;;  %v14494_v55 = vld [vmem:[#allocation11 + $0x938] ss:$28 sps:$4 sm:$0xff]   ;;  %v14499_v43 = vld [vmem:[#allocation11 + $0x96c] ss:$28 sps:$4 sm:$0xff]  }
 0x471   :  { %6690 = vmatpush1.bf16.msra.mxu1 %v14425_v47  ;;  %6854 = vmatpush1.bf16.msra.mxu0 %v14428_v49  ;;  %v14502_v47 = vld [vmem:[#allocation11 + $0x974] ss:$28 sps:$4 sm:$0xff]   ;;  %v14497_v49 = vld [vmem:[#allocation11 + $0x968] ss:$28 sps:$4 sm:$0xff]  }
 0x472   :  { %6700 = vmatprep.subr.bf16.mxu1 %v14433_v51  ;;  %6864 = vmatprep.subr.bf16.mxu0 %v14436_v48  ;;  %v14505_v51 = vld [vmem:[#allocation11 + $0x9a4] ss:$28 sps:$4 sm:$0xff]   ;;  %v14508_v48 = vld [vmem:[#allocation11 + $0x9ac] ss:$28 sps:$4 sm:$0xff]  }
 0x474   :  { %6692 = vmatmul.mubr.bf16.vlgmr.msra.gmra.mrb[20].mxu1 %v16340_v61  ;;  %6856 = vmatmul.mubr.bf16.vlgmr.msra.gmra.mrb[8].mxu0 %v16340_v61 }
 0x475   :  { %6701 = vmatpush1.bf16.msra.mxu1 %v14431_v57  ;;  %6732 = vmatprep.mubr.bf16.mxu1 %v16342_v58  ;;  %v14506_v57 = vld [vmem:[#allocation11 + $0x9a8] ss:$28 sps:$4 sm:$0xff]  }
 0x476   :  { %6865 = vmatpush1.bf16.msra.mxu0 %v14434_v62  ;;  %6896 = vmatprep.mubr.bf16.mxu0 %v16342_v58  ;;  %v14511_v62 = vld [vmem:[#allocation11 + $0x9dc] ss:$28 sps:$4 sm:$0xff]  }
 0x477   :  { %6702 = vmatprep.subr.bf16.mxu1 %v14439_v63  ;;  %6866 = vmatprep.subr.bf16.mxu0 %v14442_v12  ;;  %v14514_v63 = vld [vmem:[#allocation11 + $0x9e4] ss:$28 sps:$4 sm:$0xff]   ;;  %v14509_v12 = vld [vmem:[#allocation11 + $0x9d8] ss:$28 sps:$4 sm:$0xff]  }
 0x479   :  { %6703 = vmatpush1.bf16.msra.mxu1 %v14437_v40  ;;  %v14512_v40 = vld [vmem:[#allocation11 + $0x9e0] ss:$28 sps:$4 sm:$0xff]  }
 0x47a   :  { %6867 = vmatpush1.bf16.msra.mxu0 %v14440_v18  ;;  %6704 = vmatprep.subr.bf16.mxu1 %v14445_v7  ;;  %v14517_v18 = vld [vmem:[#allocation11 + $0xa14] ss:$28 sps:$4 sm:$0xff]   ;;  %v14520_v7 = vld [vmem:[#allocation11 + $0xa1c] ss:$28 sps:$4 sm:$0xff]  }
 0x47b   :  { %6868 = vmatprep.subr.bf16.mxu0 %v14448_v5  ;;  %v14515_v5 = vld [vmem:[#allocation11 + $0xa10] ss:$28 sps:$4 sm:$0xff]  }
 0x47d   :  { %6705 = vmatpush1.bf16.msra.mxu1 %v14443_v54  ;;  %v14518_v54 = vld [vmem:[#allocation11 + $0xa18] ss:$28 sps:$4 sm:$0xff]  }
 0x47e   :  { %6869 = vmatpush1.bf16.msra.mxu0 %v14446_v13  ;;  %6706 = vmatprep.subr.bf16.mxu1 %v14451_v17  ;;  %v14523_v13 = vld [vmem:[#allocation11 + $0xa4c] ss:$28 sps:$4 sm:$0xff]   ;;  %v14526_v17 = vld [vmem:[#allocation11 + $0xa54] ss:$28 sps:$4 sm:$0xff]  }
 0x47f   :  { %6870 = vmatprep.subr.bf16.mxu0 %v14454_v0  ;;  %v14521_v0 = vld [vmem:[#allocation11 + $0xa48] ss:$28 sps:$4 sm:$0xff]  }
 0x481   :  { %6707 = vmatpush1.bf16.msra.mxu1 %v14449_v44  ;;  %v14524_v44 = vld [vmem:[#allocation11 + $0xa50] ss:$28 sps:$4 sm:$0xff]  }
 0x482   :  { %6871 = vmatpush1.bf16.msra.mxu0 %v14452_v39  ;;  %6708 = vmatprep.subr.bf16.mxu1 %v14457_v1  ;;  %v4107_v39 = vmax.f32 %v16322_v19, 0.0  ;;  %v14529_v1 = vld [vmem:[#allocation11 + $0xa84] ss:$28 sps:$4 sm:$0xff]  }
 0x483   :  { %6872 = vmatprep.subr.bf16.mxu0 %v14460_v2  ;;  %v14532_v2 = vld [vmem:[#allocation11 + $0xa8c] ss:$28 sps:$4 sm:$0xff]   ;;  %v14536_v19 = vld [vmem:[#allocation11 + $0xac0] ss:$28 sps:$4 sm:$0xff]  }
 0x485   :  { %6709 = vmatpush1.bf16.msra.mxu1 %v14455_v3  ;;  %v14527_v3 = vld [vmem:[#allocation11 + $0xa80] ss:$28 sps:$4 sm:$0xff]  }
 0x486   :  { %6873 = vmatpush1.bf16.msra.mxu0 %v14458_v45  ;;  %6710 = vmatprep.subr.bf16.mxu1 %v14463_v4  ;;  %v16349_v45 = vpack.c.bf16 %v4107_v39, %v4107_v39  ;;  %v14530_v4 = vld [vmem:[#allocation11 + $0xa88] ss:$28 sps:$4 sm:$0xff]   ;;  %v14590_v39 = vld [vmem:[#allocation11 + $0xb8] ss:$28 sps:$4 sm:$0xff]  }
 0x487   :  { %6874 = vmatprep.subr.bf16.mxu0 %v14466_v33  ;;  %v14535_v33 = vld [vmem:[#allocation11 + $0xabc] ss:$28 sps:$4 sm:$0xff]  }
 0x489   :  { %6711 = vmatpush1.bf16.msra.mxu1 %v14461_v6  ;;  %v14538_v6 = vld [vmem:[#allocation11 + $0xac4] ss:$28 sps:$4 sm:$0xff]  }
 0x48a   :  { %6875 = vmatpush1.bf16.msra.mxu0 %v14464_v8  ;;  %6712 = vmatprep.subr.bf16.mxu1 %v14469_v9  ;;  %v14533_v8 = vld [vmem:[#allocation11 + $0xab8] ss:$28 sps:$4 sm:$0xff]  }
 0x48b   :  { %6876 = vmatprep.subr.bf16.mxu0 %v14472_v20  ;;  %v14541_v9 = vld [vmem:[#allocation11 + $0xaf4] ss:$28 sps:$4 sm:$0xff]   ;;  %v14544_v20 = vld [vmem:[#allocation11 + $0xafc] ss:$28 sps:$4 sm:$0xff]  }
 0x48d   :  { %6713 = vmatpush1.bf16.msra.mxu1 %v14467_v10  ;;  %v15848_v10 = vmov 0  }
 0x48e   :  { %6877 = vmatpush1.bf16.msra.mxu0 %v14470_v23  ;;  %6714 = vmatprep.subr.bf16.mxu1 %v14475_v14  ;;  %v14539_v23 = vld [vmem:[#allocation11 + $0xaf0] ss:$28 sps:$4 sm:$0xff]   ;;  %v14542_v14 = vld [vmem:[#allocation11 + $0xaf8] ss:$28 sps:$4 sm:$0xff]  }
 0x48f   :  { %6878 = vmatprep.subr.bf16.mxu0 %v14478_v15  ;;  %v14547_v15 = vld [vmem:[#allocation11 + $0xb2c] ss:$28 sps:$4 sm:$0xff]  }
 0x491   :  { %6715 = vmatpush1.bf16.msra.mxu1 %v14473_v16  ;;  %v14550_v16 = vld [vmem:[#allocation11 + $0xb34] ss:$28 sps:$4 sm:$0xff]  }
 0x492   :  { %6879 = vmatpush1.bf16.msra.mxu0 %v14476_v24  ;;  %6716 = vmatprep.subr.bf16.mxu1 %v14481_v28  ;;  %v14545_v24 = vld [vmem:[#allocation11 + $0xb28] ss:$28 sps:$4 sm:$0xff]   ;;  %v14548_v28 = vld [vmem:[#allocation11 + $0xb30] ss:$28 sps:$4 sm:$0xff]  }
 0x493   :  { %6880 = vmatprep.subr.bf16.mxu0 %v14484_v29  ;;  %v14553_v29 = vld [vmem:[#allocation11 + $0xb64] ss:$28 sps:$4 sm:$0xff]  }
 0x495   :  { %6717 = vmatpush1.bf16.msra.mxu1 %v14479_v31  ;;  %v14556_v31 = vld [vmem:[#allocation11 + $0xb6c] ss:$28 sps:$4 sm:$0xff]  }
 0x496   :  { %6881 = vmatpush1.bf16.msra.mxu0 %v14482_v11  ;;  %6718 = vmatprep.subr.bf16.mxu1 %v14487_v35  ;;  %v14551_v11 = vld [vmem:[#allocation11 + $0xb60] ss:$28 sps:$4 sm:$0xff]   ;;  %v14554_v35 = vld [vmem:[#allocation11 + $0xb68] ss:$28 sps:$4 sm:$0xff]  }
 0x497   :  { %6882 = vmatprep.subr.bf16.mxu0 %v14490_v36  ;;  %v14559_v36 = vld [vmem:[#allocation11 + $0xb9c] ss:$28 sps:$4 sm:$0xff]  }
 0x499   :  { %6719 = vmatpush1.bf16.msra.mxu1 %v14485_v38  ;;  %v14562_v38 = vld [vmem:[#allocation11 + $0xba4] ss:$28 sps:$4 sm:$0xff]  }
 0x49a   :  { %6883 = vmatpush1.bf16.msra.mxu0 %v14488_v41  ;;  %6720 = vmatprep.subr.bf16.mxu1 %v14493_v42  ;;  %v14557_v41 = vld [vmem:[#allocation11 + $0xb98] ss:$28 sps:$4 sm:$0xff]   ;;  %v14560_v42 = vld [vmem:[#allocation11 + $0xba0] ss:$28 sps:$4 sm:$0xff]  }
 0x49b   :  { %6884 = vmatprep.subr.bf16.mxu0 %v14496_v52  ;;  %v14565_v52 = vld [vmem:[#allocation11 + $0xbd4] ss:$28 sps:$4 sm:$0xff]  }
 0x49d   :  { %6721 = vmatpush1.bf16.msra.mxu1 %v14491_v53  ;;  %v14568_v53 = vld [vmem:[#allocation11 + $0xbdc] ss:$28 sps:$4 sm:$0xff]  }
 0x49e   :  { %6885 = vmatpush1.bf16.msra.mxu0 %v14494_v55  ;;  %6722 = vmatprep.subr.bf16.mxu1 %v14499_v43  ;;  %v14563_v55 = vld [vmem:[#allocation11 + $0xbd0] ss:$28 sps:$4 sm:$0xff]   ;;  %v14566_v43 = vld [vmem:[#allocation11 + $0xbd8] ss:$28 sps:$4 sm:$0xff]  }
 0x49f   :  { %6886 = vmatprep.subr.bf16.mxu0 %v14502_v47  ;;  %v14571_v47 = vld [vmem:[#allocation11 + $0xc0c] ss:$28 sps:$4 sm:$0xff]  }
 0x4a1   :  { %6723 = vmatpush1.bf16.msra.mxu1 %v14497_v49  ;;  %v14574_v49 = vld [vmem:[#allocation11 + $0xc14] ss:$28 sps:$4 sm:$0xff]  }
 0x4a2   :  { %6887 = vmatpush1.bf16.msra.mxu0 %v14500_v50  ;;  %6724 = vmatprep.subr.bf16.mxu1 %v14505_v51  ;;  %v14569_v50 = vld [vmem:[#allocation11 + $0xc08] ss:$28 sps:$4 sm:$0xff]   ;;  %v14572_v51 = vld [vmem:[#allocation11 + $0xc10] ss:$28 sps:$4 sm:$0xff]  }
 0x4a3   :  { %6888 = vmatprep.subr.bf16.mxu0 %v14508_v48  ;;  %v4109_v48 = vmax.f32 %v16324_v21, 0.0  ;;  %v14584_v21 = vld [vmem:[#allocation11 + $0x50] ss:$28 sps:$4 sm:$0xff]  }
 0x4a5   :  { %6725 = vmatpush1.bf16.msra.mxu1 %v14503_v32  ;;  %v14577_v32 = vld [vmem:[#allocation11 + $0x14] ss:$28 sps:$4 sm:$0xff]  }
 0x4a6   :  { %6889 = vmatpush1.bf16.msra.mxu0 %v14506_v57  ;;  %6726 = vmatprep.subr.bf16.mxu1 %v14511_v62  ;;  %v14578_v57 = vld [vmem:[#allocation11 + $0x1d8] ss:$28 sps:$4 sm:$0xff]   ;;  %v14575_v62 = vld [vmem:[#allocation11 + $0x10] ss:$28 sps:$4 sm:$0xff]  }
 0x4a7   :  { %6890 = vmatprep.subr.bf16.mxu0 %v14514_v63  ;;  %v16356_v63 = vpack.c.bf16 %v4109_v48, %v4109_v48  ;;  %v14637_v48 = vld [vmem:[#allocation11 + $0x2b4] ss:$28 sps:$4 sm:$0xff]  }
 0x4a9   :  { %6727 = vmatpush1.bf16.msra.mxu1 %v14509_v12  ;;  %v14579_v12 = vld [vmem:[#allocation11 + $0x18] ss:$28 sps:$4 sm:$0xff]  }
 0x4aa   :  { %6891 = vmatpush1.bf16.msra.mxu0 %v14512_v40  ;;  %6728 = vmatprep.subr.bf16.mxu1 %v14517_v18  ;;  %v14582_v40 = vld [vmem:[#allocation11 + $0x4c] ss:$28 sps:$4 sm:$0xff]  }
 0x4ab   :  { %6892 = vmatprep.subr.bf16.mxu0 %v14520_v7  ;;  %v14583_v18 = vld [vmem:[#allocation11 + $0x210] ss:$28 sps:$4 sm:$0xff]   ;;  %v14580_v7 = vld [vmem:[#allocation11 + $0x48] ss:$28 sps:$4 sm:$0xff]  }
 0x4ad   :  { %6729 = vmatpush1.bf16.msra.mxu1 %v14515_v5  ;;  %v14587_v5 = vld [vmem:[#allocation11 + $0x84] ss:$28 sps:$4 sm:$0xff]  }
 0x4ae   :  { %6893 = vmatpush1.bf16.msra.mxu0 %v14518_v54  ;;  %6730 = vmatprep.subr.bf16.mxu1 %v14523_v13  ;;  %v14588_v54 = vld [vmem:[#allocation11 + $0x248] ss:$28 sps:$4 sm:$0xff]   ;;  %v14585_v13 = vld [vmem:[#allocation11 + $0x80] ss:$28 sps:$4 sm:$0xff]  }
 0x4af   :  { %6894 = vmatprep.subr.bf16.mxu0 %v14526_v17  ;;  %v14589_v17 = vld [vmem:[#allocation11 + $0x88] ss:$28 sps:$4 sm:$0xff]  }
 0x4b1   :  { %6731 = vmatpush1.bf16.msra.mxu1 %v14521_v0  ;;  %v14592_v0 = vld [vmem:[#allocation11 + $0xbc] ss:$28 sps:$4 sm:$0xff]  }
 0x4b2   :  { %6895 = vmatpush1.bf16.msra.mxu0 %v14524_v44  ;;  %6741 = vmatprep.subr.bf16.mxu1 %v14529_v1  ;;  %v14593_v44 = vld [vmem:[#allocation11 + $0x280] ss:$28 sps:$4 sm:$0xff]  }
 0x4b3   :  { %6905 = vmatprep.subr.bf16.mxu0 %v14532_v2  ;;  %v14594_v1 = vld [vmem:[#allocation11 + $0xc0] ss:$28 sps:$4 sm:$0xff]   ;;  %v14597_v2 = vld [vmem:[#allocation11 + $0xf4] ss:$28 sps:$4 sm:$0xff]  }
 0x4b4   :  { %6733 = vmatmul.mubr.bf16.vlgmr.msra.gmra.mrb[20].mxu1 %v16349_v45 }
 0x4b5   :  { %6897 = vmatmul.mubr.bf16.vlgmr.msra.gmra.mrb[8].mxu0 %v16349_v45  ;;  %6742 = vmatpush1.bf16.msra.mxu1 %v14527_v3  ;;  %v14598_v3 = vld [vmem:[#allocation11 + $0x2b8] ss:$28 sps:$4 sm:$0xff]  }
 0x4b6   :  { %6906 = vmatpush1.bf16.msra.mxu0 %v14530_v4  ;;  %6743 = vmatprep.subr.bf16.mxu1 %v14535_v33  ;;  %v14599_v4 = vld [vmem:[#allocation11 + $0xf8] ss:$28 sps:$4 sm:$0xff]   ;;  %v14602_v33 = vld [vmem:[#allocation11 + $0x12c] ss:$28 sps:$4 sm:$0xff]  }
 0x4b7   :  { %6907 = vmatprep.subr.bf16.mxu0 %v14538_v6  ;;  %6773 = vmatprep.mubr.bf16.mxu1 %v15848_v10  ;;  %v14603_v6 = vld [vmem:[#allocation11 + $0x2f0] ss:$28 sps:$4 sm:$0xff]  }
 0x4b8   :  { %6937 = vmatprep.mubr.bf16.mxu0 %v15848_v10 }
 0x4b9   :  { %6744 = vmatpush1.bf16.msra.mxu1 %v14533_v8  ;;  %v14600_v8 = vld [vmem:[#allocation11 + $0x128] ss:$28 sps:$4 sm:$0xff]  }
 0x4ba   :  { %6908 = vmatpush1.bf16.msra.mxu0 %v14536_v19  ;;  %6745 = vmatprep.subr.bf16.mxu1 %v14541_v9  ;;  %v14604_v19 = vld [vmem:[#allocation11 + $0x130] ss:$28 sps:$4 sm:$0xff]   ;;  %v14607_v9 = vld [vmem:[#allocation11 + $0x164] ss:$28 sps:$4 sm:$0xff]  }
 0x4bb   :  { %6909 = vmatprep.subr.bf16.mxu0 %v14544_v20  ;;  %v14608_v20 = vld [vmem:[#allocation11 + $0x328] ss:$28 sps:$4 sm:$0xff]  }
 0x4bd   :  { %6746 = vmatpush1.bf16.msra.mxu1 %v14539_v23  ;;  %v14605_v23 = vld [vmem:[#allocation11 + $0x160] ss:$28 sps:$4 sm:$0xff]  }
 0x4be   :  { %6910 = vmatpush1.bf16.msra.mxu0 %v14542_v14  ;;  %6747 = vmatprep.subr.bf16.mxu1 %v14547_v15  ;;  %v14609_v14 = vld [vmem:[#allocation11 + $0x168] ss:$28 sps:$4 sm:$0xff]   ;;  %v14612_v15 = vld [vmem:[#allocation11 + $0x19c] ss:$28 sps:$4 sm:$0xff]  }
 0x4bf   :  { %6911 = vmatprep.subr.bf16.mxu0 %v14550_v16  ;;  %v14613_v16 = vld [vmem:[#allocation11 + $0x360] ss:$28 sps:$4 sm:$0xff]  }
 0x4c1   :  { %6748 = vmatpush1.bf16.msra.mxu1 %v14545_v24  ;;  %v14610_v24 = vld [vmem:[#allocation11 + $0x198] ss:$28 sps:$4 sm:$0xff]  }
 0x4c2   :  { %6912 = vmatpush1.bf16.msra.mxu0 %v14548_v28  ;;  %6749 = vmatprep.subr.bf16.mxu1 %v14553_v29  ;;  %v14614_v28 = vld [vmem:[#allocation11 + $0x1a0] ss:$28 sps:$4 sm:$0xff]   ;;  %v14617_v29 = vld [vmem:[#allocation11 + $0x1d4] ss:$28 sps:$4 sm:$0xff]  }
 0x4c3   :  { %6913 = vmatprep.subr.bf16.mxu0 %v14556_v31  ;;  %v14618_v31 = vld [vmem:[#allocation11 + $0x558] ss:$28 sps:$4 sm:$0xff]  }
 0x4c5   :  { %6750 = vmatpush1.bf16.msra.mxu1 %v14551_v11  ;;  %v14615_v11 = vld [vmem:[#allocation11 + $0x1d0] ss:$28 sps:$4 sm:$0xff]  }
 0x4c6   :  { %6914 = vmatpush1.bf16.msra.mxu0 %v14554_v35  ;;  %6751 = vmatprep.subr.bf16.mxu1 %v14559_v36  ;;  %v14619_v35 = vld [vmem:[#allocation11 + $0x398] ss:$28 sps:$4 sm:$0xff]   ;;  %v14622_v36 = vld [vmem:[#allocation11 + $0x20c] ss:$28 sps:$4 sm:$0xff]  }
 0x4c7   :  { %6915 = vmatprep.subr.bf16.mxu0 %v14562_v38  ;;  %v14623_v38 = vld [vmem:[#allocation11 + $0x590] ss:$28 sps:$4 sm:$0xff]  }
 0x4c9   :  { %6752 = vmatpush1.bf16.msra.mxu1 %v14557_v41  ;;  %v14620_v41 = vld [vmem:[#allocation11 + $0x208] ss:$28 sps:$4 sm:$0xff]  }
 0x4ca   :  { %6916 = vmatpush1.bf16.msra.mxu0 %v14560_v42  ;;  %6753 = vmatprep.subr.bf16.mxu1 %v14565_v52  ;;  %v14624_v42 = vld [vmem:[#allocation11 + $0x3d0] ss:$28 sps:$4 sm:$0xff]   ;;  %v14627_v52 = vld [vmem:[#allocation11 + $0x244] ss:$28 sps:$4 sm:$0xff]  }
 0x4cb   :  { %6917 = vmatprep.subr.bf16.mxu0 %v14568_v53  ;;  %v14628_v53 = vld [vmem:[#allocation11 + $0x5c8] ss:$28 sps:$4 sm:$0xff]  }
 0x4cd   :  { %6754 = vmatpush1.bf16.msra.mxu1 %v14563_v55  ;;  %v14625_v55 = vld [vmem:[#allocation11 + $0x240] ss:$28 sps:$4 sm:$0xff]  }
 0x4ce   :  { %6918 = vmatpush1.bf16.msra.mxu0 %v14566_v43  ;;  %6755 = vmatprep.subr.bf16.mxu1 %v14571_v47  ;;  %v14629_v43 = vld [vmem:[#allocation11 + $0x408] ss:$28 sps:$4 sm:$0xff]   ;;  %v14632_v47 = vld [vmem:[#allocation11 + $0x27c] ss:$28 sps:$4 sm:$0xff]  }
 0x4cf   :  { %6919 = vmatprep.subr.bf16.mxu0 %v14574_v49  ;;  %v14633_v49 = vld [vmem:[#allocation11 + $0x600] ss:$28 sps:$4 sm:$0xff]  }
 0x4d1   :  { %6756 = vmatpush1.bf16.msra.mxu1 %v14569_v50  ;;  %v14630_v50 = vld [vmem:[#allocation11 + $0x278] ss:$28 sps:$4 sm:$0xff]  }
 0x4d2   :  { %6920 = vmatpush1.bf16.msra.mxu0 %v14572_v51  ;;  %6946 = vmatprep.subr.bf16.mxu1 %v14577_v32  ;;  %v14634_v51 = vld [vmem:[#allocation11 + $0x440] ss:$28 sps:$4 sm:$0xff]   ;;  %v14638_v32 = vld [vmem:[#allocation11 + $0x638] ss:$28 sps:$4 sm:$0xff]  }
 0x4d3   :  { %13164 = vmatprep.subr.bf16.mxu0 %v14578_v57  ;;  %v14635_v57 = vld [vmem:[#allocation11 + $0x2b0] ss:$28 sps:$4 sm:$0xff]  }
 0x4d4   :  { %6774 = vmatmul.mubr.bf16.vlgmr.msra.gmra.mrb[20].mxu1 %v16356_v63 }
 0x4d5   :  { %6938 = vmatmul.mubr.bf16.vlgmr.msra.gmra.mrb[8].mxu0 %v16356_v63  ;;  %6947 = vmatpush1.bf16.msra.mxu1 %v14575_v62  ;;  %v14639_v62 = vld [vmem:[#allocation11 + $0x478] ss:$28 sps:$4 sm:$0xff]  }
 0x4d6   :  { %6978 = vmatprep.mubr.bf16.mxu1 %v16326_v30  ;;  %13165 = vmatpush3.bf16.msra.mxu0 %v14579_v12  ;;  %v14642_v12 = vld [vmem:[#allocation11 + $0x2ec] ss:$28 sps:$4 sm:$0xff]  }
 0x4d7   :  { %7142 = vmatprep.mubr.bf16.mxu0 %v16326_v30  ;;  %6948 = vmatprep.subr.bf16.mxu1 %v14582_v40  ;;  %v14595_v30 = vld [vmem:[#allocation11 + $0xf0] ss:$28 sps:$4 sm:$0xff]  }
 0x4d8   :  { %13166 = vmatprep.subr.bf16.mxu0 %v14583_v18  ;;  %v14643_v40 = vld [vmem:[#allocation11 + $0x670] ss:$28 sps:$4 sm:$0xff]   ;;  %v14640_v18 = vld [vmem:[#allocation11 + $0x2e8] ss:$28 sps:$4 sm:$0xff]  }
 0x4d9   :  { %6949 = vmatpush1.bf16.msra.mxu1 %v14580_v7  ;;  %v14644_v7 = vld [vmem:[#allocation11 + $0x4b0] ss:$28 sps:$4 sm:$0xff]  }
 0x4da   :  { %13167 = vmatpush3.bf16.msra.mxu0 %v14584_v21  ;;  %6950 = vmatprep.subr.bf16.mxu1 %v14587_v5  ;;  %v14647_v21 = vld [vmem:[#allocation11 + $0x324] ss:$28 sps:$4 sm:$0xff]  }
 0x4db   :  { %13168 = vmatprep.subr.bf16.mxu0 %v14588_v54  ;;  %v14648_v5 = vld [vmem:[#allocation11 + $0x6a8] ss:$28 sps:$4 sm:$0xff]   ;;  %v14645_v54 = vld [vmem:[#allocation11 + $0x320] ss:$28 sps:$4 sm:$0xff]  }
 0x4dd   :  { %6951 = vmatpush1.bf16.msra.mxu1 %v14585_v13  ;;  %v14649_v13 = vld [vmem:[#allocation11 + $0x4e8] ss:$28 sps:$4 sm:$0xff]  }
 0x4de   :  { %13169 = vmatpush3.bf16.msra.mxu0 %v14589_v17  ;;  %6952 = vmatprep.subr.bf16.mxu1 %v14592_v0  ;;  %v14652_v17 = vld [vmem:[#allocation11 + $0x35c] ss:$28 sps:$4 sm:$0xff]  }
 0x4df   :  { %13170 = vmatprep.subr.bf16.mxu0 %v14593_v44  ;;  %v14653_v0 = vld [vmem:[#allocation11 + $0x6e0] ss:$28 sps:$4 sm:$0xff]   ;;  %v14650_v44 = vld [vmem:[#allocation11 + $0x358] ss:$28 sps:$4 sm:$0xff]  }
 0x4e1   :  { %6953 = vmatpush1.bf16.msra.mxu1 %v14590_v39  ;;  %v14654_v39 = vld [vmem:[#allocation11 + $0x520] ss:$28 sps:$4 sm:$0xff]  }
 0x4e2   :  { %13171 = vmatpush3.bf16.msra.mxu0 %v14594_v1  ;;  %6954 = vmatprep.subr.bf16.mxu1 %v14597_v2  ;;  %v14657_v1 = vld [vmem:[#allocation11 + $0x394] ss:$28 sps:$4 sm:$0xff]  }
 0x4e3   :  { %13172 = vmatprep.subr.bf16.mxu0 %v14598_v3  ;;  %v14658_v2 = vld [vmem:[#allocation11 + $0x8d8] ss:$28 sps:$4 sm:$0xff]   ;;  %v14655_v3 = vld [vmem:[#allocation11 + $0x390] ss:$28 sps:$4 sm:$0xff]  }
 0x4e5   :  { %6955 = vmatpush1.bf16.msra.mxu1 %v14595_v30  ;;  %v14659_v30 = vld [vmem:[#allocation11 + $0x718] ss:$28 sps:$4 sm:$0xff]  }
 0x4e6   :  { %13173 = vmatpush3.bf16.msra.mxu0 %v14599_v4  ;;  %6956 = vmatprep.subr.bf16.mxu1 %v14602_v33  ;;  %v14662_v4 = vld [vmem:[#allocation11 + $0x3cc] ss:$28 sps:$4 sm:$0xff]  }
 0x4e7   :  { %13174 = vmatprep.subr.bf16.mxu0 %v14603_v6  ;;  %v14663_v33 = vld [vmem:[#allocation11 + $0x910] ss:$28 sps:$4 sm:$0xff]   ;;  %v14660_v6 = vld [vmem:[#allocation11 + $0x3c8] ss:$28 sps:$4 sm:$0xff]  }
 0x4e9   :  { %6957 = vmatpush1.bf16.msra.mxu1 %v14600_v8  ;;  %v14664_v8 = vld [vmem:[#allocation11 + $0x750] ss:$28 sps:$4 sm:$0xff]  }
 0x4ea   :  { %13175 = vmatpush3.bf16.msra.mxu0 %v14604_v19  ;;  %6958 = vmatprep.subr.bf16.mxu1 %v14607_v9  ;;  %v14667_v19 = vld [vmem:[#allocation11 + $0x404] ss:$28 sps:$4 sm:$0xff]  }
 0x4eb   :  { %13176 = vmatprep.subr.bf16.mxu0 %v14608_v20  ;;  %v14668_v9 = vld [vmem:[#allocation11 + $0x948] ss:$28 sps:$4 sm:$0xff]   ;;  %v14665_v20 = vld [vmem:[#allocation11 + $0x400] ss:$28 sps:$4 sm:$0xff]  }
 0x4ed   :  { %6959 = vmatpush1.bf16.msra.mxu1 %v14605_v23  ;;  %v14672_v23 = vld [vmem:[#allocation11 + $0x43c] ss:$28 sps:$4 sm:$0xff]  }
 0x4ee   :  { %13177 = vmatpush3.bf16.msra.mxu0 %v14609_v14  ;;  %6960 = vmatprep.subr.bf16.mxu1 %v14612_v15  ;;  %v14673_v14 = vld [vmem:[#allocation11 + $0x980] ss:$28 sps:$4 sm:$0xff]   ;;  %v14670_v15 = vld [vmem:[#allocation11 + $0x438] ss:$28 sps:$4 sm:$0xff]  }
 0x4ef   :  { %13178 = vmatprep.subr.bf16.mxu0 %v14613_v16  ;;  %v14677_v16 = vld [vmem:[#allocation11 + $0x474] ss:$28 sps:$4 sm:$0xff]  }
 0x4f1   :  { %6961 = vmatpush1.bf16.msra.mxu1 %v14610_v24  ;;  %v14678_v24 = vld [vmem:[#allocation11 + $0x9b8] ss:$28 sps:$4 sm:$0xff]  }
 0x4f2   :  { %13179 = vmatpush3.bf16.msra.mxu0 %v14614_v28  ;;  %6962 = vmatprep.subr.bf16.mxu1 %v14617_v29  ;;  %v14675_v28 = vld [vmem:[#allocation11 + $0x470] ss:$28 sps:$4 sm:$0xff]   ;;  %v14679_v29 = vld [vmem:[#allocation11 + $0x7f8] ss:$28 sps:$4 sm:$0xff]  }
 0x4f3   :  { %13186 = vmatprep.subr.bf16.mxu0 %v14618_v31  ;;  %v14682_v31 = vld [vmem:[#allocation11 + $0x4ac] ss:$28 sps:$4 sm:$0xff]  }
 0x4f5   :  { %7143 = vmatmul.mubr.bf16.vlgmr.msra.gmra.mrb[12].mxu0 %v16328_v34  ;;  %6963 = vmatpush1.bf16.msra.mxu1 %v14615_v11  ;;  %v14683_v11 = vld [vmem:[#allocation11 + $0x9f0] ss:$28 sps:$4 sm:$0xff]  }
 0x4f6   :  { %13187 = vmatpush3.bf16.msra.mxu0 %v14619_v35  ;;  %7182 = vmatprep.mubr.bf16.mxu0 %v16334_v37  ;;  %v14680_v35 = vld [vmem:[#allocation11 + $0x4a8] ss:$28 sps:$4 sm:$0xff]  }
 0x4f7   :  { %6964 = vmatprep.subr.bf16.mxu1 %v14622_v36  ;;  %13188 = vmatprep.subr.bf16.mxu0 %v14623_v38  ;;  %v14684_v36 = vld [vmem:[#allocation11 + $0x830] ss:$28 sps:$4 sm:$0xff]   ;;  %v14687_v38 = vld [vmem:[#allocation11 + $0x4e4] ss:$28 sps:$4 sm:$0xff]  }
 0x4f9   :  { %6965 = vmatpush1.bf16.msra.mxu1 %v14620_v41  ;;  %v14688_v41 = vld [vmem:[#allocation11 + $0xa28] ss:$28 sps:$4 sm:$0xff]  }
 0x4fa   :  { %13189 = vmatpush3.bf16.msra.mxu0 %v14624_v42  ;;  %6966 = vmatprep.subr.bf16.mxu1 %v14627_v52  ;;  %v14685_v42 = vld [vmem:[#allocation11 + $0x4e0] ss:$28 sps:$4 sm:$0xff]   ;;  %v14689_v52 = vld [vmem:[#allocation11 + $0x868] ss:$28 sps:$4 sm:$0xff]  }
 0x4fb   :  { %13190 = vmatprep.subr.bf16.mxu0 %v14628_v53  ;;  %v14692_v53 = vld [vmem:[#allocation11 + $0x51c] ss:$28 sps:$4 sm:$0xff]  }
 0x4fd   :  { %6967 = vmatpush1.bf16.msra.mxu1 %v14625_v55  ;;  %v14693_v55 = vld [vmem:[#allocation11 + $0xa60] ss:$28 sps:$4 sm:$0xff]  }
 0x4fe   :  { %13191 = vmatpush3.bf16.msra.mxu0 %v14629_v43  ;;  %6968 = vmatprep.subr.bf16.mxu1 %v14632_v47  ;;  %v14690_v43 = vld [vmem:[#allocation11 + $0x518] ss:$28 sps:$4 sm:$0xff]   ;;  %v14694_v47 = vld [vmem:[#allocation11 + $0x8a0] ss:$28 sps:$4 sm:$0xff]  }
 0x4ff   :  { %13192 = vmatprep.subr.bf16.mxu0 %v14633_v49  ;;  %v14697_v49 = vld [vmem:[#allocation11 + $0x554] ss:$28 sps:$4 sm:$0xff]  }
 0x501   :  { %6969 = vmatpush1.bf16.msra.mxu1 %v14630_v50  ;;  %v14695_v50 = vld [vmem:[#allocation11 + $0x550] ss:$28 sps:$4 sm:$0xff]  }
 0x502   :  { %13193 = vmatpush3.bf16.msra.mxu0 %v14634_v51  ;;  %6970 = vmatprep.subr.bf16.mxu1 %v14637_v48  ;;  %v14698_v51 = vld [vmem:[#allocation11 + $0xa98] ss:$28 sps:$4 sm:$0xff]   ;;  %v14701_v48 = vld [vmem:[#allocation11 + $0x58c] ss:$28 sps:$4 sm:$0xff]  }
 0x503   :  { %13194 = vmatprep.subr.bf16.mxu0 %v14638_v32  ;;  %v15849_v32 = vmov 0.0  }
 0x505   :  { %6971 = vmatpush1.bf16.msra.mxu1 %v14635_v57  ;;  %v14699_v57 = vld [vmem:[#allocation11 + $0x588] ss:$28 sps:$4 sm:$0xff]  }
 0x506   :  { %13195 = vmatpush3.bf16.msra.mxu0 %v14639_v62  ;;  %6972 = vmatprep.subr.bf16.mxu1 %v14642_v12  ;;  %v14702_v62 = vld [vmem:[#allocation11 + $0xad0] ss:$28 sps:$4 sm:$0xff]   ;;  %v14705_v12 = vld [vmem:[#allocation11 + $0x5c4] ss:$28 sps:$4 sm:$0xff]  }
 0x507   :  { %13196 = vmatprep.subr.bf16.mxu0 %v14643_v40  ;;  %v14703_v40 = vld [vmem:[#allocation11 + $0x5c0] ss:$28 sps:$4 sm:$0xff]  }
 0x509   :  { %6973 = vmatpush1.bf16.msra.mxu1 %v14640_v18  ;;  %v14706_v18 = vld [vmem:[#allocation11 + $0xb08] ss:$28 sps:$4 sm:$0xff]  }
 0x50a   :  { %13197 = vmatpush3.bf16.msra.mxu0 %v14644_v7  ;;  %6974 = vmatprep.subr.bf16.mxu1 %v14647_v21  ;;  %v14709_v7 = vld [vmem:[#allocation11 + $0x5fc] ss:$28 sps:$4 sm:$0xff]  }
 0x50b   :  { %13198 = vmatprep.subr.bf16.mxu0 %v14648_v5  ;;  %v14707_v21 = vld [vmem:[#allocation11 + $0x5f8] ss:$28 sps:$4 sm:$0xff]   ;;  %v14710_v5 = vld [vmem:[#allocation11 + $0xb40] ss:$28 sps:$4 sm:$0xff]  }
 0x50d   :  { %6975 = vmatpush1.bf16.msra.mxu1 %v14645_v54  ;;  %v14713_v54 = vld [vmem:[#allocation11 + $0x634] ss:$28 sps:$4 sm:$0xff]  }
 0x50e   :  { %13199 = vmatpush3.bf16.msra.mxu0 %v14649_v13  ;;  %6976 = vmatprep.subr.bf16.mxu1 %v14652_v17  ;;  %v14711_v13 = vld [vmem:[#allocation11 + $0x630] ss:$28 sps:$4 sm:$0xff]   ;;  %v14714_v17 = vld [vmem:[#allocation11 + $0xb78] ss:$28 sps:$4 sm:$0xff]  }
 0x50f   :  { %13200 = vmatprep.subr.bf16.mxu0 %v14653_v0  ;;  %v14717_v0 = vld [vmem:[#allocation11 + $0x66c] ss:$28 sps:$4 sm:$0xff]  }
 0x511   :  { %6977 = vmatpush1.bf16.msra.mxu1 %v14650_v44  ;;  %v14715_v44 = vld [vmem:[#allocation11 + $0x668] ss:$28 sps:$4 sm:$0xff]  }
 0x512   :  { %13201 = vmatpush3.bf16.msra.mxu0 %v14654_v39  ;;  %6987 = vmatprep.subr.bf16.mxu1 %v14657_v1  ;;  %v14718_v39 = vld [vmem:[#allocation11 + $0xbb0] ss:$28 sps:$4 sm:$0xff]   ;;  %v14721_v1 = vld [vmem:[#allocation11 + $0x6a4] ss:$28 sps:$4 sm:$0xff]  }
 0x513   :  { %13208 = vmatprep.subr.bf16.mxu0 %v14658_v2  ;;  %v14719_v2 = vld [vmem:[#allocation11 + $0x6a0] ss:$28 sps:$4 sm:$0xff]  }
 0x514   :  { %6979 = vmatmul.mubr.bf16.vlgmr.msra.gmra.mrb[24].mxu1 %v16328_v34  ;;  %v14669_v34 = vld [vmem:[#allocation11 + $0x788] ss:$28 sps:$4 sm:$0xff]  }
 0x515   :  { %7183 = vmatmul.mubr.bf16.vlgmr.msra.gmra.mrb[16].mxu0 %v16340_v61  ;;  %6988 = vmatpush1.bf16.msra.mxu1 %v14655_v3  ;;  %v14722_v3 = vld [vmem:[#allocation11 + $0xbe8] ss:$28 sps:$4 sm:$0xff]  }
 0x516   :  { %7019 = vmatprep.mubr.bf16.mxu1 %v16334_v37  ;;  %13209 = vmatpush3.bf16.msra.mxu0 %v14659_v30  ;;  %v14674_v37 = vld [vmem:[#allocation11 + $0x7c0] ss:$28 sps:$4 sm:$0xff]  }
 0x517   :  { %7222 = vmatprep.mubr.bf16.mxu0 %v16342_v58  ;;  %6989 = vmatprep.subr.bf16.mxu1 %v14662_v4  ;;  %v14725_v30 = vld [vmem:[#allocation11 + $0x6dc] ss:$28 sps:$4 sm:$0xff]  }
 0x518   :  { %13210 = vmatprep.subr.bf16.mxu0 %v14663_v33  ;;  %v14723_v4 = vld [vmem:[#allocation11 + $0x6d8] ss:$28 sps:$4 sm:$0xff]   ;;  %v14726_v33 = vld [vmem:[#allocation11 + $0xc20] ss:$28 sps:$4 sm:$0xff]  }
 0x519   :  { %6990 = vmatpush1.bf16.msra.mxu1 %v14660_v6  ;;  %v14729_v6 = vld [vmem:[#allocation11 + $0x714] ss:$28 sps:$4 sm:$0xff]  }
 0x51a   :  { %13211 = vmatpush3.bf16.msra.mxu0 %v14664_v8  ;;  %6991 = vmatprep.subr.bf16.mxu1 %v14667_v19  ;;  %v14727_v8 = vld [vmem:[#allocation11 + $0x710] ss:$28 sps:$4 sm:$0xff]  }
 0x51b   :  { %13212 = vmatprep.subr.bf16.mxu0 %v14668_v9  ;;  %v14732_v19 = vld [vmem:[#allocation11 + $0x74c] ss:$28 sps:$4 sm:$0xff]  }
 0x51c   :  { %v14730_v9 = vld [vmem:[#allocation11 + $0x748] ss:$28 sps:$4 sm:$0xff]  }
 0x51d   :  { %6992 = vmatpush1.bf16.msra.mxu1 %v14665_v20  ;;  %v14735_v20 = vld [vmem:[#allocation11 + $0x784] ss:$28 sps:$4 sm:$0xff]  }
 0x51e   :  { %13213 = vmatpush3.bf16.msra.mxu0 %v14669_v34  ;;  %6993 = vmatprep.subr.bf16.mxu1 %v14672_v23  ;;  %v14733_v34 = vld [vmem:[#allocation11 + $0x780] ss:$28 sps:$4 sm:$0xff]  }
 0x51f   :  { %13214 = vmatprep.subr.bf16.mxu0 %v14673_v14  ;;  %v14738_v23 = vld [vmem:[#allocation11 + $0x7bc] ss:$28 sps:$4 sm:$0xff]  }
 0x520   :  { %v14736_v14 = vld [vmem:[#allocation11 + $0x7b8] ss:$28 sps:$4 sm:$0xff]  }
 0x521   :  { %6994 = vmatpush1.bf16.msra.mxu1 %v14670_v15  ;;  %v14741_v15 = vld [vmem:[#allocation11 + $0x7f4] ss:$28 sps:$4 sm:$0xff]  }
 0x522   :  { %13215 = vmatpush3.bf16.msra.mxu0 %v14674_v37  ;;  %6995 = vmatprep.subr.bf16.mxu1 %v14677_v16  ;;  %v14739_v37 = vld [vmem:[#allocation11 + $0x7f0] ss:$28 sps:$4 sm:$0xff]   ;;  %v14742_v16 = vld [vmem:[#allocation11 + $0x828] ss:$28 sps:$4 sm:$0xff]  }
 0x523   :  { %13216 = vmatprep.subr.bf16.mxu0 %v14678_v24  ;;  %v14747_v24 = vld [vmem:[#allocation11 + $0x864] ss:$28 sps:$4 sm:$0xff]  }
 0x525   :  { %6996 = vmatpush1.bf16.msra.mxu1 %v14675_v28  ;;  %v14750_v28 = vld [vmem:[#allocation11 + $0x89c] ss:$28 sps:$4 sm:$0xff]  }
 0x526   :  { %13217 = vmatpush3.bf16.msra.mxu0 %v14679_v29  ;;  %6997 = vmatprep.subr.bf16.mxu1 %v14682_v31  ;;  %v14748_v29 = vld [vmem:[#allocation11 + $0x898] ss:$28 sps:$4 sm:$0xff]  }
 0x527   :  { %13218 = vmatprep.subr.bf16.mxu0 %v14683_v11  ;;  %v14753_v31 = vld [vmem:[#allocation11 + $0x8d4] ss:$28 sps:$4 sm:$0xff]  }
 0x528   :  { %v14751_v11 = vld [vmem:[#allocation11 + $0x8d0] ss:$28 sps:$4 sm:$0xff]  }
 0x529   :  { %6998 = vmatpush1.bf16.msra.mxu1 %v14680_v35  ;;  %v14756_v35 = vld [vmem:[#allocation11 + $0x90c] ss:$28 sps:$4 sm:$0xff]  }
 0x52a   :  { %13219 = vmatpush3.bf16.msra.mxu0 %v14684_v36  ;;  %6999 = vmatprep.subr.bf16.mxu1 %v14687_v38  ;;  %v14754_v36 = vld [vmem:[#allocation11 + $0x908] ss:$28 sps:$4 sm:$0xff]  }
 0x52b   :  { %13220 = vmatprep.subr.bf16.mxu0 %v14688_v41  ;;  %v14759_v38 = vld [vmem:[#allocation11 + $0x944] ss:$28 sps:$4 sm:$0xff]  }
 0x52c   :  { %v14757_v41 = vld [vmem:[#allocation11 + $0x940] ss:$28 sps:$4 sm:$0xff]  }
 0x52d   :  { %7000 = vmatpush1.bf16.msra.mxu1 %v14685_v42  ;;  %v14762_v42 = vld [vmem:[#allocation11 + $0x97c] ss:$28 sps:$4 sm:$0xff]  }
 0x52e   :  { %13221 = vmatpush3.bf16.msra.mxu0 %v14689_v52  ;;  %7001 = vmatprep.subr.bf16.mxu1 %v14692_v53  ;;  %v14760_v52 = vld [vmem:[#allocation11 + $0x978] ss:$28 sps:$4 sm:$0xff]  }
 0x52f   :  { %13222 = vmatprep.subr.bf16.mxu0 %v14693_v55  ;;  %v14765_v53 = vld [vmem:[#allocation11 + $0x9b4] ss:$28 sps:$4 sm:$0xff]  }
 0x530   :  { %v14763_v55 = vld [vmem:[#allocation11 + $0x9b0] ss:$28 sps:$4 sm:$0xff]  }
 0x531   :  { %7002 = vmatpush1.bf16.msra.mxu1 %v14690_v43  ;;  %v14768_v43 = vld [vmem:[#allocation11 + $0x9ec] ss:$28 sps:$4 sm:$0xff]  }
 0x532   :  { %13223 = vmatpush3.bf16.msra.mxu0 %v14694_v47  ;;  %7003 = vmatprep.subr.bf16.mxu1 %v14697_v49  ;;  %v14766_v47 = vld [vmem:[#allocation11 + $0x9e8] ss:$28 sps:$4 sm:$0xff]  }
 0x533   :  { %13389 = vmatprep.subr.bf16.mxu0 %v15849_v32  ;;  %v14771_v49 = vld [vmem:[#allocation11 + $0xa24] ss:$28 sps:$4 sm:$0xff]  }
 0x535   :  { %7223 = vmatmul.mubr.bf16.vlgmr.msra.gmra.mrb[20].mxu0 %v16349_v45  ;;  %7004 = vmatpush1.bf16.msra.mxu1 %v14695_v50  ;;  %v14769_v50 = vld [vmem:[#allocation11 + $0xa20] ss:$28 sps:$4 sm:$0xff]  }
 0x536   :  { %13390 = vmatpush3.bf16.msra.mxu0 %v14698_v51  ;;  %7005 = vmatprep.subr.bf16.mxu1 %v14701_v48  ;;  %v14774_v51 = vld [vmem:[#allocation11 + $0xa5c] ss:$28 sps:$4 sm:$0xff]  }
 0x537   :  { %13391 = vmatprep.subr.bf16.mxu0 %v15849_v32  ;;  %13405 = vmatprep.mubr.msk.bf16.mxu0 %vm15850_vm0, %v15849_v32  ;;  %v14772_v48 = vld [vmem:[#allocation11 + $0xa58] ss:$28 sps:$4 sm:$0xff]  }
 0x539   :  { %7006 = vmatpush1.bf16.msra.mxu1 %v14699_v57  ;;  %v14777_v57 = vld [vmem:[#allocation11 + $0xa94] ss:$28 sps:$4 sm:$0xff]  }
 0x53a   :  { %13392 = vmatpush3.bf16.msra.mxu0 %v14702_v62  ;;  %7007 = vmatprep.subr.bf16.mxu1 %v14705_v12  ;;  %v14775_v62 = vld [vmem:[#allocation11 + $0xa90] ss:$28 sps:$4 sm:$0xff]  }
 0x53b   :  { %13393 = vmatprep.subr.bf16.mxu0 %v15849_v32  ;;  %v14780_v12 = vld [vmem:[#allocation11 + $0xacc] ss:$28 sps:$4 sm:$0xff]  }
 0x53d   :  { %7008 = vmatpush1.bf16.msra.mxu1 %v14703_v40  ;;  %v14778_v40 = vld [vmem:[#allocation11 + $0xac8] ss:$28 sps:$4 sm:$0xff]  }
 0x53e   :  { %13394 = vmatpush3.bf16.msra.mxu0 %v14706_v18  ;;  %7009 = vmatprep.subr.bf16.mxu1 %v14709_v7  ;;  %v14783_v18 = vld [vmem:[#allocation11 + $0xb04] ss:$28 sps:$4 sm:$0xff]  }
 0x53f   :  { %13395 = vmatprep.subr.bf16.mxu0 %v15849_v32  ;;  %v14781_v7 = vld [vmem:[#allocation11 + $0xb00] ss:$28 sps:$4 sm:$0xff]  }
 0x541   :  { %7010 = vmatpush1.bf16.msra.mxu1 %v14707_v21  ;;  %v14786_v21 = vld [vmem:[#allocation11 + $0xb3c] ss:$28 sps:$4 sm:$0xff]  }
 0x542   :  { %13396 = vmatpush3.bf16.msra.mxu0 %v14710_v5  ;;  %7011 = vmatprep.subr.bf16.mxu1 %v14713_v54  ;;  %v14784_v5 = vld [vmem:[#allocation11 + $0xb38] ss:$28 sps:$4 sm:$0xff]  }
 0x543   :  { %13397 = vmatprep.subr.bf16.mxu0 %v15849_v32  ;;  %v14789_v54 = vld [vmem:[#allocation11 + $0xb74] ss:$28 sps:$4 sm:$0xff]  }
 0x545   :  { %7012 = vmatpush1.bf16.msra.mxu1 %v14711_v13  ;;  %v14787_v13 = vld [vmem:[#allocation11 + $0xb70] ss:$28 sps:$4 sm:$0xff]  }
 0x546   :  { %13398 = vmatpush3.bf16.msra.mxu0 %v14714_v17  ;;  %7013 = vmatprep.subr.bf16.mxu1 %v14717_v0  ;;  %v16384_v17 = vld [vmem:[#allocation13] sm:$0xff] }
 0x547   :  { %13399 = vmatprep.subr.bf16.mxu0 %v15849_v32  ;;  %v4570_v0 = vrot.slane %v16384_v17, %v16173_v22 }
 0x549   :  { %7014 = vmatpush1.bf16.msra.mxu1 %v14715_v44  ;;  %v4578_v44 = vrot.slane %v16384_v17, %v16176_v27 }
 0x54a   :  { %13400 = vmatpush3.bf16.msra.mxu0 %v14718_v39  ;;  %7015 = vmatprep.subr.bf16.mxu1 %v14721_v1  ;;  %v4574_v39 = vrot.slane %v16384_v17, %v16179_v25  ;;  %v14790_v1 = vld [vmem:[#allocation11 + $0xba8] ss:$28 sps:$4 sm:$0xff]  }
 0x54b   :  { %13401 = vmatprep.subr.bf16.mxu0 %v15849_v32 }
 0x54d   :  { %7016 = vmatpush1.bf16.msra.mxu1 %v14719_v2  ;;  %v4582_v2 = vrot.slane %v16384_v17, %v16182_v26 }
 0x54e   :  { %13402 = vmatpush3.bf16.msra.mxu0 %v14722_v3  ;;  %7017 = vmatprep.subr.bf16.mxu1 %v14725_v30  ;;  %v14795_v3 = vld [vmem:[#allocation11 + $0xbe4] ss:$28 sps:$4 sm:$0xff]  }
 0x54f   :  { %13403 = vmatprep.subr.bf16.mxu0 %v15849_v32 }
 0x551   :  { %7018 = vmatpush1.bf16.msra.mxu1 %v14723_v4 }
 0x552   :  { %13404 = vmatpush3.bf16.msra.mxu0 %v14726_v33  ;;  %7028 = vmatprep.subr.bf16.mxu1 %v14729_v6 }
 0x554   :  { %7020 = vmatmul.mubr.bf16.vlgmr.msra.gmra.mrb[24].mxu1 %v16340_v61  ;;  %v14744_v61 = vld [vmem:[#allocation11 + $0x82c] ss:$28 sps:$4 sm:$0xff]  }
 0x555   :  { %13406 = vmatmul.mubr.bf16.vlgmr.msra.gmra.mrb[24].mxu0 %v16356_v63  ;;  %7029 = vmatpush1.bf16.msra.mxu1 %v14727_v8 }
 0x556   :  { %7060 = vmatprep.mubr.bf16.mxu1 %v16342_v58  ;;  %7030 = vmatprep.subr.bf16.mxu1 %v14732_v19  ;;  %v14745_v58 = vld [vmem:[#allocation11 + $0x860] ss:$28 sps:$4 sm:$0xff]  }
 0x559   :  { %7031 = vmatpush1.bf16.msra.mxu1 %v14730_v9 }
 0x55a   :  { %7032 = vmatprep.subr.bf16.mxu1 %v14735_v20 }
 0x55d   :  { %7033 = vmatpush1.bf16.msra.mxu1 %v14733_v34  ;;  %v14793_v34 = vld [vmem:[#allocation11 + $0xbe0] ss:$28 sps:$4 sm:$0xff]  }
 0x55e   :  { %7034 = vmatprep.subr.bf16.mxu1 %v14738_v23 }
 0x561   :  { %7035 = vmatpush1.bf16.msra.mxu1 %v14736_v14 }
 0x562   :  { %7036 = vmatprep.subr.bf16.mxu1 %v14741_v15 }
 0x565   :  { %7037 = vmatpush1.bf16.msra.mxu1 %v14739_v37 }
 0x566   :  { %7038 = vmatprep.subr.bf16.mxu1 %v14744_v61 }
 0x569   :  { %7039 = vmatpush1.bf16.msra.mxu1 %v14742_v16  ;;  %v14798_v16 = vld [vmem:[#allocation11 + $0xc1c] ss:$28 sps:$4 sm:$0xff]  }
 0x56a   :  { %7040 = vmatprep.subr.bf16.mxu1 %v14747_v24 }
 0x56d   :  { %7041 = vmatpush1.bf16.msra.mxu1 %v14745_v58 }
 0x56e   :  { %7042 = vmatprep.subr.bf16.mxu1 %v14750_v28 }
 0x571   :  { %7043 = vmatpush1.bf16.msra.mxu1 %v14748_v29 }
 0x572   :  { %7044 = vmatprep.subr.bf16.mxu1 %v14753_v31 }
 0x575   :  { %7045 = vmatpush1.bf16.msra.mxu1 %v14751_v11 }
 0x576   :  { %7046 = vmatprep.subr.bf16.mxu1 %v14756_v35 }
 0x579   :  { %7047 = vmatpush1.bf16.msra.mxu1 %v14754_v36 }
 0x57a   :  { %7048 = vmatprep.subr.bf16.mxu1 %v14759_v38 }
 0x57d   :  { %7049 = vmatpush1.bf16.msra.mxu1 %v14757_v41 }
 0x57e   :  { %7050 = vmatprep.subr.bf16.mxu1 %v14762_v42 }
 0x581   :  { %7051 = vmatpush1.bf16.msra.mxu1 %v14760_v52 }
 0x582   :  { %7052 = vmatprep.subr.bf16.mxu1 %v14765_v53 }
 0x585   :  { %7053 = vmatpush1.bf16.msra.mxu1 %v14763_v55  ;;  %v14796_v55 = vld [vmem:[#allocation11 + $0xc18] ss:$28 sps:$4 sm:$0xff]  }
 0x586   :  { %7054 = vmatprep.subr.bf16.mxu1 %v14768_v43 }
 0x589   :  { %7055 = vmatpush1.bf16.msra.mxu1 %v14766_v47 }
 0x58a   :  { %7056 = vmatprep.subr.bf16.mxu1 %v14771_v49 }
 0x58d   :  { %7057 = vmatpush1.bf16.msra.mxu1 %v14769_v50 }
 0x58e   :  { %7058 = vmatprep.subr.bf16.mxu1 %v14774_v51 }
 0x591   :  { %7059 = vmatpush1.bf16.msra.mxu1 %v14772_v48 }
 0x592   :  { %7069 = vmatprep.subr.bf16.mxu1 %v14777_v57 }
 0x594   :  { %7061 = vmatmul.mubr.bf16.vlgmr.msra.gmra.mrb[24].mxu1 %v16349_v45  ;;  %v14792_v45 = vld [vmem:[#allocation11 + $0xbac] ss:$28 sps:$4 sm:$0xff]  }
 0x595   :  { %7070 = vmatpush1.bf16.msra.mxu1 %v14775_v62  ;;  %7101 = vmatprep.mubr.bf16.mxu1 %v15848_v10 }
 0x596   :  { %7071 = vmatprep.subr.bf16.mxu1 %v14780_v12 }
 0x599   :  { %7072 = vmatpush1.bf16.msra.mxu1 %v14778_v40 }
 0x59a   :  { %7073 = vmatprep.subr.bf16.mxu1 %v14783_v18 }
 0x59d   :  { %7074 = vmatpush1.bf16.msra.mxu1 %v14781_v7 }
 0x59e   :  { %7075 = vmatprep.subr.bf16.mxu1 %v14786_v21 }
 0x5a1   :  { %7076 = vmatpush1.bf16.msra.mxu1 %v14784_v5 }
 0x5a2   :  { %7077 = vmatprep.subr.bf16.mxu1 %v14789_v54 }
 0x5a5   :  { %7078 = vmatpush1.bf16.msra.mxu1 %v14787_v13 }
 0x5a6   :  { %7079 = vmatprep.subr.bf16.mxu1 %v14792_v45 }
 0x5a7   :  { %v6775_v30 = vpop.f32.mrb[20].mxu1 }
 0x5a8   :  { %v16394_v4 = vadd.f32 %v6775_v30, %v4570_v0  ;;  %v6939_v33 = vpop.f32.mrb[8].mxu0  ;;  %v6777_v6 = vpop.f32.mrb[21].mxu1 }
 0x5a9   :  { %v16396_v8 = vadd.f32 %v6939_v33, %v4578_v44  ;;  %v16398_v19 = vadd.f32 %v6777_v6, %v4574_v39  ;;  %v6941_v9 = vpop.f32.mrb[9].mxu0  ;;  %v6779_v20 = vpop.f32.mrb[22].mxu1  ;;  %7080 = vmatpush1.bf16.msra.mxu1 %v14790_v1 }
 0x5aa   :  { %v7270_v23 = vrot.slane %v16394_v4, 4  ;;  %v7312_v14 = vmul.f32 %v16394_v4, %v16394_v4  ;;  %v16403_v15 = vadd.f32 %v6941_v9, %v4582_v2  ;;  %v6943_v37 = vpop.f32.mrb[10].mxu0  ;;  %v6780_v61 = vpop.f32.mrb[23].mxu1  ;;  %7081 = vmatprep.subr.bf16.mxu1 %v14795_v3 }
 0x5ab   :  { %v7282_v24 = vrot.slane %v16396_v8, 4  ;;  %v7314_v58 = vmul.f32 %v16396_v8, %v16396_v8  ;;  %v7276_v28 = vrot.slane %v16398_v19, 4  ;;  %v7313_v29 = vmul.f32 %v16398_v19, %v16398_v19  ;;  %v6944_v31 = vpop.f32.mrb[11].mxu0 }
 0x5ac   :  { %v7271_v11 = vadd.f32 %v16394_v4, %v7270_v23  ;;  %v7319_v35 = vrot.slane %v7312_v14, 4  ;;  %v7288_v36 = vrot.slane %v16403_v15, 4  ;;  %v7315_v38 = vmul.f32 %v16403_v15, %v16403_v15 }
 0x5ad   :  { %v7283_v41 = vadd.f32 %v16396_v8, %v7282_v24  ;;  %v7331_v42 = vrot.slane %v7314_v58, 4  ;;  %v7277_v52 = vadd.f32 %v16398_v19, %v7276_v28  ;;  %v7325_v53 = vrot.slane %v7313_v29, 4  ;;  %7082 = vmatpush1.bf16.msra.mxu1 %v14793_v34 }
 0x5ae   :  { %v7272_v43 = vrot.slane %v7271_v11, 2  ;;  %v7320_v47 = vadd.f32 %v7319_v35, %v7312_v14  ;;  %v7289_v49 = vadd.f32 %v16403_v15, %v7288_v36  ;;  %v7337_v50 = vrot.slane %v7315_v38, 4  ;;  %7083 = vmatprep.subr.bf16.mxu1 %v14798_v16 }
 0x5af   :  { %v7284_v51 = vrot.slane %v7283_v41, 2  ;;  %v7332_v48 = vadd.f32 %v7331_v42, %v7314_v58  ;;  %v7278_v57 = vrot.slane %v7277_v52, 2  ;;  %v7326_v62 = vadd.f32 %v7325_v53, %v7313_v29 }
 0x5b0   :  { %v7273_v12 = vadd.f32 %v7272_v43, %v7271_v11  ;;  %v7321_v40 = vrot.slane %v7320_v47, 2  ;;  %v7290_v18 = vrot.slane %v7289_v49, 2  ;;  %v7338_v7 = vadd.f32 %v7337_v50, %v7315_v38 }
 0x5b1   :  { %v7285_v21 = vadd.f32 %v7284_v51, %v7283_v41  ;;  %v7333_v5 = vrot.slane %v7332_v48, 2  ;;  %v7279_v54 = vadd.f32 %v7278_v57, %v7277_v52  ;;  %v7327_v13 = vrot.slane %v7326_v62, 2  ;;  %7084 = vmatpush1.bf16.msra.mxu1 %v14796_v55 }
 0x5b2   :  { %v7274_v45 = vrot.slane %v7273_v12, 1  ;;  %v7322_v0 = vadd.f32 %v7321_v40, %v7320_v47  ;;  %v7291_v44 = vadd.f32 %v7290_v18, %v7289_v49  ;;  %v7339_v39 = vrot.slane %v7338_v7, 2 }
 0x5b3   :  { %v7286_v1 = vrot.slane %v7285_v21, 1  ;;  %v7334_v2 = vadd.f32 %v7333_v5, %v7332_v48  ;;  %v7280_v3 = vrot.slane %v7279_v54, 1  ;;  %v7328_v30 = vadd.f32 %v7327_v13, %v7326_v62 }
 0x5b4   :  { %v7275_v33 = vadd.f32 %v7274_v45, %v7273_v12  ;;  %v7323_v6 = vrot.slane %v7322_v0, 1  ;;  %v7292_v9 = vrot.slane %v7291_v44, 1  ;;  %v7340_v20 = vadd.f32 %v7339_v39, %v7338_v7  ;;  %7102 = vmatmul.mubr.bf16.vlgmr.msra.gmra.mrb[24].mxu1 %v16356_v63 }
 0x5b5   :  { %v7287_v34 = vadd.f32 %v7286_v1, %v7285_v21  ;;  %v7335_v23 = vrot.slane %v7334_v2, 1  ;;  %v7281_v14 = vadd.f32 %v7280_v3, %v7279_v54  ;;  %v7329_v37 = vrot.slane %v7328_v30, 1 }
 0x5b6   :  { %v7324_v61 = vadd.f32 %v7323_v6, %v7322_v0  ;;  %v16419_v16 = vmul.f32 0.125, %v7275_v33  ;;  %v7293_v24 = vadd.f32 %v7292_v9, %v7291_v44  ;;  %v7341_v58 = vrot.slane %v7340_v20, 1 }
 0x5b7   :  { %v7336_v28 = vadd.f32 %v7335_v23, %v7334_v2  ;;  %v16421_v29 = vmul.f32 0.125, %v7287_v34  ;;  %v7330_v31 = vadd.f32 %v7329_v37, %v7328_v30  ;;  %v16423_v11 = vmul.f32 0.125, %v7281_v14 }
 0x5b8   :  { %v7368_v35 = vmul.f32 0.125, %v7324_v61  ;;  %v7375_v36 = vmul.f32 %v16419_v16, %v16419_v16  ;;  %v7342_v63 = vadd.f32 %v7341_v58, %v7340_v20  ;;  %v16427_v38 = vmul.f32 0.125, %v7293_v24 }
 0x5b9   :  { %v7370_v41 = vmul.f32 0.125, %v7336_v28  ;;  %v7377_v42 = vmul.f32 %v16421_v29, %v16421_v29  ;;  %v7369_v52 = vmul.f32 0.125, %v7330_v31  ;;  %v7376_v53 = vmul.f32 %v16423_v11, %v16423_v11 }
 0x5ba   :  { %v7382_v55 = vsub.f32 %v7368_v35, %v7375_v36  ;;  %v7371_v43 = vmul.f32 0.125, %v7342_v63  ;;  %v7378_v47 = vmul.f32 %v16427_v38, %v16427_v38  ;;  %v4594_v20 = vrot.slane %v16384_v17, %v16245_v56 }
 0x5bb   :  { %v7384_v49 = vsub.f32 %v7370_v41, %v7377_v42  ;;  %v7383_v50 = vsub.f32 %v7369_v52, %v7376_v53  ;;  %v14801_v42 = vld [vmem:[#allocation17 + $0x4] ss:$28 sps:$4 sm:$0xff]   ;;  %v14804_v52 = vld [vmem:[#allocation17 + $0xc] ss:$28 sps:$4 sm:$0xff]  }
 0x5bc   :  { %v7389_v51 = vmax.f32 %v7382_v55, 0.0  ;;  %v7385_v48 = vsub.f32 %v7371_v43, %v7378_v47  ;;  %v14799_v53 = vld [vmem:[#allocation17] ss:$28 sps:$4 sm:$0xff]   ;;  %v14802_v55 = vld [vmem:[#allocation17 + $0x8] ss:$28 sps:$4 sm:$0xff]   ;;  %10134 = vmatprep.subr.bf16.mxu1 %v14801_v42  ;;  %10298 = vmatprep.subr.bf16.mxu0 %v14804_v52 }
 0x5bd   :  { %v7391_v57 = vmax.f32 %v7384_v49, 0.0  ;;  %v7390_v62 = vmax.f32 %v7383_v50, 0.0  ;;  %10135 = vmatpush1.bf16.msra.mxu1 %v14799_v53  ;;  %10299 = vmatpush1.bf16.msra.mxu0 %v14802_v55  ;;  %v14807_v43 = vld [vmem:[#allocation17 + $0x3c] ss:$28 sps:$4 sm:$0xff]   ;;  %v14810_v47 = vld [vmem:[#allocation17 + $0x44] ss:$28 sps:$4 sm:$0xff]  }
 0x5be   :  { %v7397_v12 = vadd.f32 1e-05, %v7389_v51  ;;  %v7392_v40 = vmax.f32 %v7385_v48, 0.0  ;;  %v14805_v49 = vld [vmem:[#allocation17 + $0x38] ss:$28 sps:$4 sm:$0xff]   ;;  %10136 = vmatprep.subr.bf16.mxu1 %v14807_v43  ;;  %10300 = vmatprep.subr.bf16.mxu0 %v14810_v47 }
 0x5bf   :  { %v7399_v18 = vadd.f32 1e-05, %v7391_v57  ;;  %v7398_v7 = vadd.f32 1e-05, %v7390_v62  ;;  %v14808_v50 = vld [vmem:[#allocation17 + $0x40] ss:$28 sps:$4 sm:$0xff]  }
 0x5c0   :  { %15429 = vrsqrt.f32 %v7397_v12  ;;  %v7400_v21 = vadd.f32 1e-05, %v7392_v40  ;;  %v14813_v51 = vld [vmem:[#allocation17 + $0x74] ss:$28 sps:$4 sm:$0xff]   ;;  %v14816_v48 = vld [vmem:[#allocation17 + $0x7c] ss:$28 sps:$4 sm:$0xff]  }
 0x5c1   :  { %15431 = vrsqrt.f32 %v7399_v18  ;;  %10137 = vmatpush1.bf16.msra.mxu1 %v14805_v49  ;;  %10301 = vmatpush1.bf16.msra.mxu0 %v14808_v50  ;;  %v14811_v57 = vld [vmem:[#allocation17 + $0x70] ss:$28 sps:$4 sm:$0xff]   ;;  %v14814_v62 = vld [vmem:[#allocation17 + $0x78] ss:$28 sps:$4 sm:$0xff]   ;;  %v14817_v18 = vld [vmem:[#allocation17 + $0xa8] ss:$28 sps:$4 sm:$0xff]  }
 0x5c2   :  { %15433 = vrsqrt.f32 %v7398_v7  ;;  %10138 = vmatprep.subr.bf16.mxu1 %v14813_v51  ;;  %10302 = vmatprep.subr.bf16.mxu0 %v14816_v48  ;;  %v14819_v12 = vld [vmem:[#allocation17 + $0xac] ss:$28 sps:$4 sm:$0xff]   ;;  %v14822_v40 = vld [vmem:[#allocation17 + $0xb4] ss:$28 sps:$4 sm:$0xff]   ;;  %v14858_v42 = vld [vmem:[#allocation17 + $0x204] ss:$28 sps:$4 sm:$0xff]  }
 0x5c3   :  { %15435 = vrsqrt.f32 %v7400_v21  ;;  %v14820_v7 = vld [vmem:[#allocation17 + $0xb0] ss:$28 sps:$4 sm:$0xff]   ;;  %v14825_v21 = vld [vmem:[#allocation17 + $0xe4] ss:$28 sps:$4 sm:$0xff]   ;;  %v14853_v52 = vld [vmem:[#allocation17 + $0x1f8] ss:$28 sps:$4 sm:$0xff]  }
 0x5c4   :  { %v14856_v53 = vld [vmem:[#allocation17 + $0x200] ss:$28 sps:$4 sm:$0xff]   ;;  %v14861_v55 = vld [vmem:[#allocation17 + $0x234] ss:$28 sps:$4 sm:$0xff]   ;;  %v14867_v50 = vld [vmem:[#allocation17 + $0x26c] ss:$28 sps:$4 sm:$0xff]  }
 0x5c5   :  { %10139 = vmatpush1.bf16.msra.mxu1 %v14811_v57  ;;  %10303 = vmatpush1.bf16.msra.mxu0 %v14814_v62  ;;  %v14864_v43 = vld [vmem:[#allocation17 + $0x23c] ss:$28 sps:$4 sm:$0xff]   ;;  %v14859_v47 = vld [vmem:[#allocation17 + $0x230] ss:$28 sps:$4 sm:$0xff]   ;;  %v14865_v48 = vld [vmem:[#allocation17 + $0x268] ss:$28 sps:$4 sm:$0xff]  }
 0x5c6   :  { %10140 = vmatprep.subr.bf16.mxu1 %v14819_v12  ;;  %10304 = vmatprep.subr.bf16.mxu0 %v14822_v40  ;;  %v14862_v49 = vld [vmem:[#allocation17 + $0x238] ss:$28 sps:$4 sm:$0xff]   ;;  %v14868_v57 = vld [vmem:[#allocation17 + $0x270] ss:$28 sps:$4 sm:$0xff]   ;;  %v14873_v62 = vld [vmem:[#allocation17 + $0x2a4] ss:$28 sps:$4 sm:$0xff]  }
 0x5c7   :  { %v14870_v51 = vld [vmem:[#allocation17 + $0x274] ss:$28 sps:$4 sm:$0xff]   ;;  %v14876_v12 = vld [vmem:[#allocation17 + $0x2ac] ss:$28 sps:$4 sm:$0xff]   ;;  %v14871_v40 = vld [vmem:[#allocation17 + $0x2a0] ss:$28 sps:$4 sm:$0xff]  }
 0x5c8   :  { %v13180_v5 = vpop.f32.mrb[12].mxu0 }
 0x5c9   :  { %v13181_v54 = vpop.f32.mrb[13].mxu0  ;;  %10141 = vmatpush1.bf16.msra.mxu1 %v14817_v18  ;;  %10305 = vmatpush1.bf16.msra.mxu0 %v14820_v7  ;;  %v14874_v18 = vld [vmem:[#allocation17 + $0x2a8] ss:$28 sps:$4 sm:$0xff]   ;;  %v14879_v7 = vld [vmem:[#allocation17 + $0x2dc] ss:$28 sps:$4 sm:$0xff]  }
 0x5ca   :  { %v15430_v13 = vpop.eup %15429  ;;  %v13182_v45 = vadd.f32 %v13181_v54, %v13180_v5  ;;  %v13183_v0 = vpop.f32.mrb[14].mxu0  ;;  %v14828_v5 = vld [vmem:[#allocation17 + $0xec] ss:$28 sps:$4 sm:$0xff]   ;;  %v14823_v54 = vld [vmem:[#allocation17 + $0xe0] ss:$28 sps:$4 sm:$0xff]   ;;  %10142 = vmatprep.subr.bf16.mxu1 %v14825_v21 }
 0x5cb   :  { %v15432_v44 = vpop.eup %15431  ;;  %v13184_v39 = vpop.f32.mrb[15].mxu0  ;;  %10306 = vmatprep.subr.bf16.mxu0 %v14828_v5  ;;  %v14834_v0 = vld [vmem:[#allocation17 + $0x124] ss:$28 sps:$4 sm:$0xff]   ;;  %v14877_v21 = vld [vmem:[#allocation17 + $0x2d8] ss:$28 sps:$4 sm:$0xff]  }
 0x5cc   :  { %v15434_v1 = vpop.eup %15433  ;;  %v7145_v14 = vadd.f32 %v13182_v45, %v4594_v20  ;;  %v14831_v45 = vld [vmem:[#allocation17 + $0x11c] ss:$28 sps:$4 sm:$0xff]  }
 0x5cd   :  { %v15436_v2 = vpop.eup %15435  ;;  %v7418_v3 = vcombine.low %v15430_v13, %v15434_v1  ;;  %v14826_v13 = vld [vmem:[#allocation17 + $0xe8] ss:$28 sps:$4 sm:$0xff]   ;;  %10143 = vmatpush1.bf16.msra.mxu1 %v14823_v54  ;;  %v14832_v39 = vld [vmem:[#allocation17 + $0x120] ss:$28 sps:$4 sm:$0xff]  }
 0x5ce   :  { %v7419_v30 = vcombine.low %v15432_v44, %v15436_v2  ;;  %10307 = vmatpush1.bf16.msra.mxu0 %v14826_v13  ;;  %v14829_v44 = vld [vmem:[#allocation17 + $0x118] ss:$28 sps:$4 sm:$0xff]   ;;  %10144 = vmatprep.subr.bf16.mxu1 %v14831_v45  ;;  %v14880_v5 = vld [vmem:[#allocation17 + $0x2e0] ss:$28 sps:$4 sm:$0xff]  }
 0x5cf   :  { %v16436_v33 = vrot.slane %v7418_v3, %v16233_v46  ;;  %10308 = vmatprep.subr.bf16.mxu0 %v14834_v0  ;;  %v14837_v2 = vld [vmem:[#allocation17 + $0x154] ss:$28 sps:$4 sm:$0xff]   ;;  %v14840_v3 = vld [vmem:[#allocation17 + $0x15c] ss:$28 sps:$4 sm:$0xff]   ;;  %v14882_v54 = vld [vmem:[#allocation17 + $0x2e4] ss:$28 sps:$4 sm:$0xff]  }
 0x5d0   :  { %v16439_v6 = vrot.slane %v7419_v30, %v16233_v46  ;;  %v14885_v13 = vld [vmem:[#allocation17 + $0x314] ss:$28 sps:$4 sm:$0xff]   ;;  %v14888_v45 = vld [vmem:[#allocation17 + $0x31c] ss:$28 sps:$4 sm:$0xff]  }
 0x5d1   :  { %10145 = vmatpush1.bf16.msra.mxu1 %v14829_v44  ;;  %v14883_v0 = vld [vmem:[#allocation17 + $0x310] ss:$28 sps:$4 sm:$0xff]   ;;  %v14886_v44 = vld [vmem:[#allocation17 + $0x318] ss:$28 sps:$4 sm:$0xff]  }
 0x5d2   :  { %v7449_v9 = vcombine.low %v16436_v33, %v16439_v6  ;;  %10309 = vmatpush1.bf16.msra.mxu0 %v14832_v39  ;;  %10146 = vmatprep.subr.bf16.mxu1 %v14837_v2  ;;  %v14891_v39 = vld [vmem:[#allocation17 + $0x34c] ss:$28 sps:$4 sm:$0xff]  }
 0x5d3   :  { %10310 = vmatprep.subr.bf16.mxu0 %v14840_v3  ;;  %v14889_v2 = vld [vmem:[#allocation17 + $0x348] ss:$28 sps:$4 sm:$0xff]   ;;  %v14892_v3 = vld [vmem:[#allocation17 + $0x350] ss:$28 sps:$4 sm:$0xff]  }
 0x5e8   :  { %v13202_v34 = vpop.f32.mrb[16].mxu0 }
 0x5e9   :  { %v13203_v23 = vpop.f32.mrb[17].mxu0 }
 0x5ea   :  { %v13204_v37 = vadd.f32 %v13203_v23, %v13202_v34  ;;  %v13205_v61 = vpop.f32.mrb[18].mxu0  ;;  %v14835_v34 = vld [vmem:[#allocation17 + $0x150] ss:$28 sps:$4 sm:$0xff]   ;;  %v14838_v23 = vld [vmem:[#allocation17 + $0x158] ss:$28 sps:$4 sm:$0xff]  }
 0x5eb   :  { %v13206_v24 = vpop.f32.mrb[19].mxu0  ;;  %10147 = vmatpush1.bf16.msra.mxu1 %v14835_v34  ;;  %10311 = vmatpush1.bf16.msra.mxu0 %v14838_v23  ;;  %v14843_v61 = vld [vmem:[#allocation17 + $0x18c] ss:$28 sps:$4 sm:$0xff]  }
 0x5ec   :  { %v7185_v58 = vadd.f32 %v13204_v37, %v7145_v14  ;;  %v14846_v24 = vld [vmem:[#allocation17 + $0x194] ss:$28 sps:$4 sm:$0xff]   ;;  %10148 = vmatprep.subr.bf16.mxu1 %v14843_v61  ;;  %v14900_v34 = vld [vmem:[#allocation17 + $0x38c] ss:$28 sps:$4 sm:$0xff]  }
 0x5ed   :  { %10312 = vmatprep.subr.bf16.mxu0 %v14846_v24 }
 0x608   :  { %v13224_v28 = vpop.f32.mrb[20].mxu0 }
 0x609   :  { %v13225_v31 = vpop.f32.mrb[21].mxu0 }
 0x60a   :  { %v13226_v35 = vadd.f32 %v13225_v31, %v13224_v28  ;;  %v13227_v36 = vpop.f32.mrb[22].mxu0  ;;  %v14844_v28 = vld [vmem:[#allocation17 + $0x190] ss:$28 sps:$4 sm:$0xff]   ;;  %v14849_v31 = vld [vmem:[#allocation17 + $0x1c4] ss:$28 sps:$4 sm:$0xff]  }
 0x60b   :  { %v13228_v63 = vpop.f32.mrb[23].mxu0  ;;  %10313 = vmatpush1.bf16.msra.mxu0 %v14844_v28  ;;  %v14847_v36 = vld [vmem:[#allocation17 + $0x1c0] ss:$28 sps:$4 sm:$0xff]  }
 0x60c   :  { %v7225_v41 = vadd.f32 %v13226_v35, %v7185_v58  ;;  %v14841_v58 = vld [vmem:[#allocation17 + $0x188] ss:$28 sps:$4 sm:$0xff]  }
 0x60d   :  { %10149 = vmatpush1.bf16.msra.mxu1 %v14841_v58  ;;  %v14852_v35 = vld [vmem:[#allocation17 + $0x1cc] ss:$28 sps:$4 sm:$0xff]  }
 0x60e   :  { %v14850_v63 = vld [vmem:[#allocation17 + $0x1c8] ss:$28 sps:$4 sm:$0xff]   ;;  %10150 = vmatprep.subr.bf16.mxu1 %v14849_v31  ;;  %10314 = vmatprep.subr.bf16.mxu0 %v14852_v35 }
 0x60f   :  { %10315 = vmatpush1.bf16.msra.mxu0 %v14850_v63  ;;  %v4586_v63 = vrot.slane %v16384_v17, %v16256_v59 }
 0x610   :  { %10316 = vmatprep.subr.bf16.mxu0 %v14858_v42 }
 0x611   :  { %10151 = vmatpush1.bf16.msra.mxu1 %v14847_v36 }
 0x613   :  { %10317 = vmatpush1.bf16.msra.mxu0 %v14856_v53 }
 0x614   :  { %10318 = vmatprep.subr.bf16.mxu0 %v14864_v43 }
 0x617   :  { %10319 = vmatpush1.bf16.msra.mxu0 %v14862_v49 }
 0x618   :  { %10320 = vmatprep.subr.bf16.mxu0 %v14870_v51 }
 0x61b   :  { %10321 = vmatpush1.bf16.msra.mxu0 %v14868_v57 }
 0x61c   :  { %10322 = vmatprep.subr.bf16.mxu0 %v14876_v12 }
 0x61f   :  { %10323 = vmatpush1.bf16.msra.mxu0 %v14874_v18 }
 0x620   :  { %10324 = vmatprep.subr.bf16.mxu0 %v14882_v54 }
 0x623   :  { %10325 = vmatpush1.bf16.msra.mxu0 %v14880_v5 }
 0x624   :  { %10326 = vmatprep.subr.bf16.mxu0 %v14888_v45 }
 0x627   :  { %10327 = vmatpush1.bf16.msra.mxu0 %v14886_v44 }
 0x628   :  { %v7264_v1 = vpop.f32.mrb[24].mxu0 }
 0x629   :  { %v16445_v30 = vadd.f32 %v7264_v1, %v7225_v41  ;;  %v13407_v20 = vpop.f32.mrb[25].mxu0  ;;  %v14855_v41 = vld [vmem:[#allocation17 + $0x1fc] ss:$28 sps:$4 sm:$0xff]   ;;  %v14894_v1 = vld [vmem:[#allocation17 + $0x354] ss:$28 sps:$4 sm:$0xff]  }
 0x62a   :  { %v7267_v14 = vpop.f32.mrb[26].mxu0  ;;  %10152 = vmatprep.subr.bf16.mxu1 %v14855_v41  ;;  %10328 = vmatprep.subr.bf16.mxu0 %v14894_v1  ;;  %v14897_v20 = vld [vmem:[#allocation17 + $0x384] ss:$28 sps:$4 sm:$0xff]   ;;  %v4590_v41 = vrot.slane %v16384_v17, %v16259_v60 }
 0x62b   :  { %v13408_v37 = vpop.f32.mrb[27].mxu0  ;;  %10153 = vmatpush1.bf16.msra.mxu1 %v14853_v52  ;;  %10329 = vmatpush1.bf16.msra.mxu0 %v14892_v3  ;;  %v7306_v23 = vrot.slane %v16445_v30, 4  ;;  %v7318_v14 = vmul.f32 %v16445_v30, %v16445_v30 }
 0x62c   :  { %10154 = vmatprep.subr.bf16.mxu1 %v14861_v55  ;;  %10339 = vmatprep.subr.bf16.mxu0 %v14900_v34 }
 0x62d   :  { %v7307_v37 = vadd.f32 %v7306_v23, %v16445_v30  ;;  %v7355_v61 = vrot.slane %v7318_v14, 4 }
 0x62f   :  { %10155 = vmatpush1.bf16.msra.mxu1 %v14859_v47  ;;  %v7308_v24 = vrot.slane %v7307_v37, 2  ;;  %v7356_v58 = vadd.f32 %v7355_v61, %v7318_v14 }
 0x630   :  { %10156 = vmatprep.subr.bf16.mxu1 %v14867_v50 }
 0x631   :  { %v7309_v28 = vadd.f32 %v7308_v24, %v7307_v37  ;;  %v7357_v31 = vrot.slane %v7356_v58, 2 }
 0x633   :  { %10157 = vmatpush1.bf16.msra.mxu1 %v14865_v48  ;;  %v7310_v35 = vrot.slane %v7309_v28, 1  ;;  %v7358_v36 = vadd.f32 %v7357_v31, %v7356_v58 }
 0x634   :  { %10158 = vmatprep.subr.bf16.mxu1 %v14873_v62 }
 0x635   :  { %v7311_v42 = vadd.f32 %v7310_v35, %v7309_v28  ;;  %v7359_v52 = vrot.slane %v7358_v36, 1 }
 0x637   :  { %10159 = vmatpush1.bf16.msra.mxu1 %v14871_v40  ;;  %v7360_v57 = vadd.f32 %v7359_v52, %v7358_v36  ;;  %v16462_v62 = vmul.f32 0.125, %v7311_v42 }
 0x638   :  { %10160 = vmatprep.subr.bf16.mxu1 %v14879_v7 }
 0x639   :  { %v7381_v45 = vmul.f32 %v16462_v62, %v16462_v62 }
 0x63b   :  { %10161 = vmatpush1.bf16.msra.mxu1 %v14877_v21 }
 0x63c   :  { %10162 = vmatprep.subr.bf16.mxu1 %v14885_v13  ;;  %v7374_v13 = vmul.f32 0.125, %v7360_v57 }
 0x63e   :  { %v7388_v23 = vsub.f32 %v7374_v13, %v7381_v45  ;;  %v7457_v45 = vrot.slane %v7449_v9, %v16233_v46 }
 0x63f   :  { %10163 = vmatpush1.bf16.msra.mxu1 %v14883_v0 }
 0x640   :  { %10164 = vmatprep.subr.bf16.mxu1 %v14891_v39  ;;  %v7395_v36 = vmax.f32 %v7388_v23, 0.0 }
 0x643   :  { %10165 = vmatpush1.bf16.msra.mxu1 %v14889_v2 }
 0x644   :  { %10175 = vmatprep.subr.bf16.mxu1 %v14897_v20 }
 0x687   :  { %v7103_v53 = vpop.f32.mrb[24].mxu1 }
 0x688   :  { %v16455_v55 = vadd.f32 %v7103_v53, %v4586_v63  ;;  %v7105_v43 = vpop.f32.mrb[25].mxu1 }
 0x689   :  { %v16457_v47 = vadd.f32 %v7105_v43, %v4590_v41  ;;  %v7107_v49 = vpop.f32.mrb[26].mxu1 }
 0x68a   :  { %v7294_v50 = vrot.slane %v16455_v55, 4  ;;  %v7316_v51 = vmul.f32 %v16455_v55, %v16455_v55  ;;  %v7108_v48 = vpop.f32.mrb[27].mxu1 }
 0x68b   :  { %v7300_v17 = vrot.slane %v16457_v47, 4  ;;  %v7317_v12 = vmul.f32 %v16457_v47, %v16457_v47 }
 0x68c   :  { %v7295_v40 = vadd.f32 %v16455_v55, %v7294_v50  ;;  %v7343_v18 = vrot.slane %v7316_v51, 4  ;;  %v7403_v50 = vadd.f32 1e-05, %v7395_v36 }
 0x68d   :  { %v7301_v7 = vadd.f32 %v16457_v47, %v7300_v17  ;;  %v7349_v21 = vrot.slane %v7317_v12, 4 }
 0x68e   :  { %v7296_v5 = vrot.slane %v7295_v40, 2  ;;  %v7344_v54 = vadd.f32 %v7343_v18, %v7316_v51  ;;  %15437 = vrsqrt.f32 %v7403_v50 }
 0x68f   :  { %v7302_v0 = vrot.slane %v7301_v7, 2  ;;  %v7350_v44 = vadd.f32 %v7349_v21, %v7317_v12 }
 0x690   :  { %v7297_v39 = vadd.f32 %v7296_v5, %v7295_v40  ;;  %v7345_v1 = vrot.slane %v7344_v54, 2 }
 0x691   :  { %v7303_v2 = vadd.f32 %v7302_v0, %v7301_v7  ;;  %v7351_v3 = vrot.slane %v7350_v44, 2 }
 0x692   :  { %v7298_v20 = vrot.slane %v7297_v39, 1  ;;  %v7346_v34 = vadd.f32 %v7345_v1, %v7344_v54 }
 0x693   :  { %v7304_v14 = vrot.slane %v7303_v2, 1  ;;  %v7352_v37 = vadd.f32 %v7351_v3, %v7350_v44  ;;  %v7396_v44 = vld [vmem:[#allocation14] sm:$0xff] }
 0x694   :  { %v7299_v61 = vadd.f32 %v7298_v20, %v7297_v39  ;;  %v7347_v24 = vrot.slane %v7346_v34, 1 }
 0x695   :  { %v7305_v58 = vadd.f32 %v7304_v14, %v7303_v2  ;;  %v7353_v28 = vrot.slane %v7352_v37, 1 }
 0x696   :  { %v7348_v31 = vadd.f32 %v7347_v24, %v7346_v34  ;;  %v7365_v35 = vmul.f32 0.125, %v7299_v61 }
 0x697   :  { %v7354_v63 = vadd.f32 %v7353_v28, %v7352_v37  ;;  %v7366_v41 = vmul.f32 0.125, %v7305_v58 }
 0x698   :  { %v7372_v42 = vmul.f32 0.125, %v7348_v31  ;;  %v7379_v52 = vmul.f32 %v7365_v35, %v7365_v35  ;;  %v15438_v40 = vpop.eup %15437 }
 0x699   :  { %v7373_v53 = vmul.f32 0.125, %v7354_v63  ;;  %v7380_v43 = vmul.f32 %v7366_v41, %v7366_v41  ;;  %v7448_v5 = vrot.slane %v15438_v40, %v16233_v46 }
 0x69a   :  { %v7386_v49 = vsub.f32 %v7372_v42, %v7379_v52 }
 0x69b   :  { %v7387_v51 = vsub.f32 %v7373_v53, %v7380_v43  ;;  %v7468_v43 = vld [vmem:[#allocation16] sm:$0xff] }
 0x69c   :  { %v7393_v48 = vmax.f32 %v7386_v49, 0.0 }
 0x69d   :  { %v7394_v57 = vmax.f32 %v7387_v51, 0.0 }
 0x69e   :  { %v7401_v17 = vadd.f32 1e-05, %v7393_v48 }
 0x69f   :  { %v7402_v12 = vadd.f32 1e-05, %v7394_v57 }
 0x6a0   :  { %15439 = vrsqrt.f32 %v7401_v17 }
 0x6a1   :  { %15441 = vrsqrt.f32 %v7402_v12 }
 0x6aa   :  { %v15440_v18 = vpop.eup %15439 }
 0x6ab   :  { %v15442_v7 = vpop.eup %15441 }
 0x6ac   :  { %v7420_v21 = vcombine.low %v15440_v18, %v15442_v7 }
 0x6ae   :  { %v7441_v54 = vrot.slane %v7420_v21, %v16233_v46 }
 0x6b0   :  { %v7450_v13 = vcombine.low %v7441_v54, %v7448_v5 }
 0x6b2   :  { %v7464_v0 = vrot.slane %v7450_v13, %v16233_v46 }
 0x6b4   :  { %v7465_v39 = vcombine.low %v7457_v45, %v7464_v0 }
 0x6b6   :  { %v7467_v1 = vmul.f32 %v7465_v39, %v7396_v44 }
 0x6b8   :  { %v7489_v2 = vrot.slane %v7467_v1, %v16256_v59  ;;  %v7493_v3 = vrot.slane %v7467_v1, %v16259_v60  ;;  %v7497_v20 = vrot.slane %v7467_v1, %v16245_v56  ;;  %v7473_v34 = vrot.slane %v7467_v1, %v16173_v22 }
 0x6b9   :  { %v7477_v23 = vrot.slane %v7467_v1, %v16179_v25  ;;  %v7481_v14 = vrot.slane %v7467_v1, %v16176_v27  ;;  %v7485_v33 = vrot.slane %v7467_v1, %v16182_v26 }
 0x6ba   :  { %v7509_v6 = vmul.f32 %v7489_v2, %v7365_v35  ;;  %v7510_v9 = vmul.f32 %v7493_v3, %v7366_v41  ;;  %v7511_v37 = vmul.f32 %v7497_v20, %v16462_v62  ;;  %v7574_v61 = vmul.f32 %v16457_v47, %v7493_v3 }
 0x6bb   :  { %v7505_v24 = vmul.f32 %v7473_v34, %v16419_v16  ;;  %v7506_v58 = vmul.f32 %v7477_v23, %v16423_v11  ;;  %v7507_v28 = vmul.f32 %v7481_v14, %v16421_v29  ;;  %v7508_v31 = vmul.f32 %v7485_v33, %v16427_v38 }
 0x6bc   :  { %v7521_v36 = vcombine.low %v7509_v6, %v7510_v9  ;;  %v7570_v63 = vmul.f32 %v16398_v19, %v7477_v23  ;;  %v7569_v42 = vmul.f32 %v16394_v4, %v7473_v34  ;;  %v7572_v41 = vmul.f32 %v16403_v15, %v7485_v33  ;;  %v14906_v34 = vld [vmem:[#allocation17 + $0x3c4] ss:$28 sps:$4 sm:$0xff]   ;;  %v14909_v6 = vld [vmem:[#allocation17 + $0x3f4] ss:$28 sps:$4 sm:$0xff]   ;;  %v14912_v9 = vld [vmem:[#allocation17 + $0x3fc] ss:$28 sps:$4 sm:$0xff]  }
 0x6bd   :  { %v7519_v52 = vcombine.low %v7505_v24, %v7506_v58  ;;  %v7520_v35 = vcombine.low %v7507_v28, %v7508_v31  ;;  %v7549_v47 = vrot.slane %v7511_v37, %v16233_v46  ;;  %v7573_v16 = vmul.f32 %v16455_v55, %v7489_v2  ;;  %v14895_v2 = vld [vmem:[#allocation17 + $0x380] ss:$28 sps:$4 sm:$0xff]   ;;  %v14907_v37 = vld [vmem:[#allocation17 + $0x3f0] ss:$28 sps:$4 sm:$0xff]   ;;  %v14913_v28 = vld [vmem:[#allocation17 + $0x428] ss:$28 sps:$4 sm:$0xff]  }
 0x6be   :  { %v7542_v62 = vrot.slane %v7521_v36, %v16233_v46  ;;  %v7571_v15 = vmul.f32 %v16396_v8, %v7481_v14  ;;  %v7575_v40 = vmul.f32 %v7497_v20, %v16445_v30  ;;  %v14898_v30 = vld [vmem:[#allocation17 + $0x388] ss:$28 sps:$4 sm:$0xff]   ;;  %v14903_v20 = vld [vmem:[#allocation17 + $0x3bc] ss:$28 sps:$4 sm:$0xff]   ;;  %v14918_v58 = vld [vmem:[#allocation17 + $0x434] ss:$28 sps:$4 sm:$0xff]  }
 0x6bf   :  { %v7528_v11 = vrot.slane %v7519_v52, %v16233_v46  ;;  %v7535_v29 = vrot.slane %v7520_v35, %v16233_v46  ;;  %v14901_v14 = vld [vmem:[#allocation17 + $0x3b8] ss:$28 sps:$4 sm:$0xff]   ;;  %v14904_v33 = vld [vmem:[#allocation17 + $0x3c0] ss:$28 sps:$4 sm:$0xff]   ;;  %v14915_v24 = vld [vmem:[#allocation17 + $0x42c] ss:$28 sps:$4 sm:$0xff]  }
 0x6c0   :  { %v7551_v38 = vcombine.low %v7542_v62, %v7549_v47  ;;  %v14916_v31 = vld [vmem:[#allocation17 + $0x430] ss:$28 sps:$4 sm:$0xff]   ;;  %v14921_v36 = vld [vmem:[#allocation17 + $0x464] ss:$28 sps:$4 sm:$0xff]   ;;  %v14927_v35 = vld [vmem:[#allocation17 + $0x49c] ss:$28 sps:$4 sm:$0xff]  }
 0x6c1   :  { %v7550_v53 = vcombine.low %v7528_v11, %v7535_v29  ;;  %v14922_v52 = vld [vmem:[#allocation17 + $0x468] ss:$28 sps:$4 sm:$0xff]   ;;  %v14925_v62 = vld [vmem:[#allocation17 + $0x498] ss:$28 sps:$4 sm:$0xff]   ;;  %v14928_v47 = vld [vmem:[#allocation17 + $0x4a0] ss:$28 sps:$4 sm:$0xff]  }
 0x6c2   :  { %v7565_v19 = vrot.slane %v7551_v38, %v16233_v46  ;;  %v14936_v11 = vld [vmem:[#allocation17 + $0x4dc] ss:$28 sps:$4 sm:$0xff]   ;;  %v14931_v29 = vld [vmem:[#allocation17 + $0x4d0] ss:$28 sps:$4 sm:$0xff]  }
 0x6c3   :  { %v7558_v4 = vrot.slane %v7550_v53, %v16233_v46  ;;  %v14934_v38 = vld [vmem:[#allocation17 + $0x4d8] ss:$28 sps:$4 sm:$0xff]   ;;  %v14939_v53 = vld [vmem:[#allocation17 + $0x50c] ss:$28 sps:$4 sm:$0xff]  }
 0x6c5   :  { %v7566_v49 = vcombine.low %v7558_v4, %v7565_v19  ;;  %v14942_v19 = vld [vmem:[#allocation17 + $0x514] ss:$28 sps:$4 sm:$0xff]   ;;  %v14937_v4 = vld [vmem:[#allocation17 + $0x508] ss:$28 sps:$4 sm:$0xff]  }
 0x6c7   :  { %v7568_v50 = vsub.f32 %v7468_v43, %v7566_v49  ;;  %v14940_v43 = vld [vmem:[#allocation17 + $0x510] ss:$28 sps:$4 sm:$0xff]   ;;  %v14945_v49 = vld [vmem:[#allocation17 + $0x544] ss:$28 sps:$4 sm:$0xff]  }
 0x6c9   :  { %v7584_v51 = vrot.slane %v7568_v50, %v16179_v25  ;;  %v7580_v48 = vrot.slane %v7568_v50, %v16173_v22  ;;  %v7592_v55 = vrot.slane %v7568_v50, %v16182_v26  ;;  %v7588_v57 = vrot.slane %v7568_v50, %v16176_v27 }
 0x6ca   :  { %v7600_v17 = vrot.slane %v7568_v50, %v16259_v60  ;;  %v7596_v12 = vrot.slane %v7568_v50, %v16256_v59  ;;  %v7604_v18 = vrot.slane %v7568_v50, %v16245_v56  ;;  %v14948_v50 = vld [vmem:[#allocation17 + $0x54c] ss:$28 sps:$4 sm:$0xff]  }
 0x6cb   :  { %v7613_v7 = vadd.f32 %v7584_v51, %v7570_v63  ;;  %v7612_v21 = vadd.f32 %v7580_v48, %v7569_v42  ;;  %v7615_v5 = vadd.f32 %v7592_v55, %v7572_v41  ;;  %v16510_v8 = vadd.f32 %v7588_v57, %v7571_v15  ;;  %v14924_v63 = vld [vmem:[#allocation17 + $0x46c] ss:$28 sps:$4 sm:$0xff]   ;;  %v14919_v42 = vld [vmem:[#allocation17 + $0x460] ss:$28 sps:$4 sm:$0xff]   ;;  %v14949_v57 = vld [vmem:[#allocation17 + $0x578] ss:$28 sps:$4 sm:$0xff]  }
 0x6cc   :  { %v16512_v54 = vadd.f32 %v7600_v17, %v7574_v61  ;;  %v16514_v13 = vadd.f32 %v7596_v12, %v7573_v16  ;;  %v16516_v45 = vadd.f32 %v7604_v18, %v7575_v40  ;;  %v14910_v61 = vld [vmem:[#allocation17 + $0x3f8] ss:$28 sps:$4 sm:$0xff]   ;;  %v14930_v41 = vld [vmem:[#allocation17 + $0x4a4] ss:$28 sps:$4 sm:$0xff]   ;;  %v14955_v18 = vld [vmem:[#allocation17 + $0x5b0] ss:$28 sps:$4 sm:$0xff]  }
 0x6cd   :  { %v7620_v0 = vmax.f32 %v7613_v7, 0.0  ;;  %v7619_v44 = vmax.f32 %v7612_v21, 0.0  ;;  %v7622_v39 = vmax.f32 %v7615_v5, 0.0  ;;  %v14933_v16 = vld [vmem:[#allocation17 + $0x4d4] ss:$28 sps:$4 sm:$0xff]  }
 0x6ce   :  { %v14943_v15 = vld [vmem:[#allocation17 + $0x540] ss:$28 sps:$4 sm:$0xff]   ;;  %v14946_v51 = vld [vmem:[#allocation17 + $0x548] ss:$28 sps:$4 sm:$0xff]   ;;  %v14957_v12 = vld [vmem:[#allocation17 + $0x5b4] ss:$28 sps:$4 sm:$0xff]  }
 0x6cf   :  { %v16518_v1 = vpack.c.bf16 %v7620_v0, %v7620_v0  ;;  %v16520_v3 = vpack.c.bf16 %v7619_v44, %v7619_v44  ;;  %v16526_v23 = vpack.c.bf16 %v7622_v39, %v7622_v39  ;;  %v14951_v48 = vld [vmem:[#allocation17 + $0x57c] ss:$28 sps:$4 sm:$0xff]   ;;  %v14954_v55 = vld [vmem:[#allocation17 + $0x584] ss:$28 sps:$4 sm:$0xff]   ;;  %v14963_v21 = vld [vmem:[#allocation17 + $0x5ec] ss:$28 sps:$4 sm:$0xff]  }
 0x6d0   :  { %v14952_v17 = vld [vmem:[#allocation17 + $0x580] ss:$28 sps:$4 sm:$0xff]   ;;  %v14958_v7 = vld [vmem:[#allocation17 + $0x5b8] ss:$28 sps:$4 sm:$0xff]   ;;  %v14961_v0 = vld [vmem:[#allocation17 + $0x5e8] ss:$28 sps:$4 sm:$0xff]  }
 0x6d1   :  { %10166 = vmatprep.mubr.bf16.mxu1 %v16518_v1  ;;  %10330 = vmatprep.mubr.bf16.mxu0 %v16518_v1  ;;  %v14960_v40 = vld [vmem:[#allocation17 + $0x5bc] ss:$28 sps:$4 sm:$0xff]   ;;  %v14966_v5 = vld [vmem:[#allocation17 + $0x5f4] ss:$28 sps:$4 sm:$0xff]   ;;  %v14969_v39 = vld [vmem:[#allocation17 + $0x624] ss:$28 sps:$4 sm:$0xff]  }
 0x6d2   :  { %10167 = vmatmul.mubr.bf16.vlgmr.msra.gmra.mrb[28].mxu1 %v16520_v3  ;;  %10331 = vmatmul.mubr.bf16.vlgmr.msra.gmra.mrb[28].mxu0 %v16520_v3  ;;  %v14964_v44 = vld [vmem:[#allocation17 + $0x5f0] ss:$28 sps:$4 sm:$0xff]  }
 0x6d3   :  { %10176 = vmatpush1.bf16.msra.mxu1 %v14895_v2  ;;  %10340 = vmatpush1.bf16.msra.mxu0 %v14898_v30  ;;  %v14972_v2 = vld [vmem:[#allocation17 + $0x62c] ss:$28 sps:$4 sm:$0xff]   ;;  %v14967_v30 = vld [vmem:[#allocation17 + $0x620] ss:$28 sps:$4 sm:$0xff]  }
 0x6d4   :  { %10207 = vmatprep.mubr.bf16.mxu1 %v16526_v23  ;;  %10371 = vmatprep.mubr.bf16.mxu0 %v16526_v23 }
 0x6d5   :  { %10177 = vmatprep.subr.bf16.mxu1 %v14903_v20  ;;  %10341 = vmatprep.subr.bf16.mxu0 %v14906_v34  ;;  %v14970_v20 = vld [vmem:[#allocation17 + $0x628] ss:$28 sps:$4 sm:$0xff]   ;;  %v14975_v34 = vld [vmem:[#allocation17 + $0x65c] ss:$28 sps:$4 sm:$0xff]  }
 0x6d7   :  { %10178 = vmatpush1.bf16.msra.mxu1 %v14901_v14  ;;  %10342 = vmatpush1.bf16.msra.mxu0 %v14904_v33  ;;  %v14978_v14 = vld [vmem:[#allocation17 + $0x664] ss:$28 sps:$4 sm:$0xff]   ;;  %v14973_v33 = vld [vmem:[#allocation17 + $0x658] ss:$28 sps:$4 sm:$0xff]  }
 0x6d8   :  { %10179 = vmatprep.subr.bf16.mxu1 %v14909_v6  ;;  %10343 = vmatprep.subr.bf16.mxu0 %v14912_v9  ;;  %v14976_v6 = vld [vmem:[#allocation17 + $0x660] ss:$28 sps:$4 sm:$0xff]   ;;  %v14981_v9 = vld [vmem:[#allocation17 + $0x694] ss:$28 sps:$4 sm:$0xff]  }
 0x6db   :  { %10180 = vmatpush1.bf16.msra.mxu1 %v14907_v37  ;;  %10344 = vmatpush1.bf16.msra.mxu0 %v14910_v61  ;;  %v14984_v37 = vld [vmem:[#allocation17 + $0x69c] ss:$28 sps:$4 sm:$0xff]   ;;  %v14979_v61 = vld [vmem:[#allocation17 + $0x690] ss:$28 sps:$4 sm:$0xff]  }
 0x6dc   :  { %10181 = vmatprep.subr.bf16.mxu1 %v14915_v24  ;;  %10345 = vmatprep.subr.bf16.mxu0 %v14918_v58  ;;  %v14982_v24 = vld [vmem:[#allocation17 + $0x698] ss:$28 sps:$4 sm:$0xff]   ;;  %v14987_v58 = vld [vmem:[#allocation17 + $0x6cc] ss:$28 sps:$4 sm:$0xff]  }
 0x6df   :  { %10182 = vmatpush1.bf16.msra.mxu1 %v14913_v28  ;;  %10346 = vmatpush1.bf16.msra.mxu0 %v14916_v31  ;;  %v14990_v28 = vld [vmem:[#allocation17 + $0x6d4] ss:$28 sps:$4 sm:$0xff]   ;;  %v14985_v31 = vld [vmem:[#allocation17 + $0x6c8] ss:$28 sps:$4 sm:$0xff]  }
 0x6e0   :  { %10183 = vmatprep.subr.bf16.mxu1 %v14921_v36  ;;  %10347 = vmatprep.subr.bf16.mxu0 %v14924_v63  ;;  %v14988_v36 = vld [vmem:[#allocation17 + $0x6d0] ss:$28 sps:$4 sm:$0xff]   ;;  %v7621_v63 = vmax.f32 %v16510_v8, 0.0  ;;  %v14997_v8 = vld [vmem:[#allocation17 + $0x738] ss:$28 sps:$4 sm:$0xff]  }
 0x6e3   :  { %10184 = vmatpush1.bf16.msra.mxu1 %v14919_v42  ;;  %10348 = vmatpush1.bf16.msra.mxu0 %v14922_v52  ;;  %v14993_v42 = vld [vmem:[#allocation17 + $0x704] ss:$28 sps:$4 sm:$0xff]   ;;  %v14996_v52 = vld [vmem:[#allocation17 + $0x70c] ss:$28 sps:$4 sm:$0xff]  }
 0x6e4   :  { %10185 = vmatprep.subr.bf16.mxu1 %v14927_v35  ;;  %10349 = vmatprep.subr.bf16.mxu0 %v14930_v41  ;;  %v7624_v35 = vmax.f32 %v16512_v54, 0.0  ;;  %v14991_v41 = vld [vmem:[#allocation17 + $0x700] ss:$28 sps:$4 sm:$0xff]  }
 0x6e5   :  { %v15000_v54 = vld [vmem:[#allocation17 + $0x740] ss:$28 sps:$4 sm:$0xff]  }
 0x6e7   :  { %10186 = vmatpush1.bf16.msra.mxu1 %v14925_v62  ;;  %10350 = vmatpush1.bf16.msra.mxu0 %v14928_v47  ;;  %v16532_v62 = vpack.c.bf16 %v7621_v63, %v7621_v63  ;;  %v14994_v47 = vld [vmem:[#allocation17 + $0x708] ss:$28 sps:$4 sm:$0xff]   ;;  %v15062_v63 = vld [vmem:[#allocation17 + $0x974] ss:$28 sps:$4 sm:$0xff]  }
 0x6e8   :  { %10187 = vmatprep.subr.bf16.mxu1 %v14933_v16  ;;  %10351 = vmatprep.subr.bf16.mxu0 %v14936_v11  ;;  %v16534_v16 = vpack.c.bf16 %v7624_v35, %v7624_v35  ;;  %v14999_v11 = vld [vmem:[#allocation17 + $0x73c] ss:$28 sps:$4 sm:$0xff]   ;;  %v15065_v35 = vld [vmem:[#allocation17 + $0x9a4] ss:$28 sps:$4 sm:$0xff]  }
 0x6eb   :  { %10188 = vmatpush1.bf16.msra.mxu1 %v14931_v29  ;;  %10352 = vmatpush1.bf16.msra.mxu0 %v14934_v38  ;;  %v15002_v29 = vld [vmem:[#allocation17 + $0x744] ss:$28 sps:$4 sm:$0xff]   ;;  %v15005_v38 = vld [vmem:[#allocation17 + $0x774] ss:$28 sps:$4 sm:$0xff]  }
 0x6ec   :  { %10189 = vmatprep.subr.bf16.mxu1 %v14939_v53  ;;  %10353 = vmatprep.subr.bf16.mxu0 %v14942_v19  ;;  %v15008_v53 = vld [vmem:[#allocation17 + $0x77c] ss:$28 sps:$4 sm:$0xff]   ;;  %v15003_v19 = vld [vmem:[#allocation17 + $0x770] ss:$28 sps:$4 sm:$0xff]  }
 0x6ef   :  { %10190 = vmatpush1.bf16.msra.mxu1 %v14937_v4  ;;  %10354 = vmatpush1.bf16.msra.mxu0 %v14940_v43  ;;  %v15006_v4 = vld [vmem:[#allocation17 + $0x778] ss:$28 sps:$4 sm:$0xff]   ;;  %v15011_v43 = vld [vmem:[#allocation17 + $0x7ac] ss:$28 sps:$4 sm:$0xff]  }
 0x6f0   :  { %10191 = vmatprep.subr.bf16.mxu1 %v14945_v49  ;;  %10355 = vmatprep.subr.bf16.mxu0 %v14948_v50  ;;  %v15014_v49 = vld [vmem:[#allocation17 + $0x7b4] ss:$28 sps:$4 sm:$0xff]   ;;  %v15009_v50 = vld [vmem:[#allocation17 + $0x7a8] ss:$28 sps:$4 sm:$0xff]  }
 0x6f3   :  { %10192 = vmatpush1.bf16.msra.mxu1 %v14943_v15  ;;  %10356 = vmatpush1.bf16.msra.mxu0 %v14946_v51  ;;  %v15012_v15 = vld [vmem:[#allocation17 + $0x7b0] ss:$28 sps:$4 sm:$0xff]   ;;  %v15017_v51 = vld [vmem:[#allocation17 + $0x7e4] ss:$28 sps:$4 sm:$0xff]  }
 0x6f4   :  { %10193 = vmatprep.subr.bf16.mxu1 %v14951_v48  ;;  %10357 = vmatprep.subr.bf16.mxu0 %v14954_v55  ;;  %v15020_v48 = vld [vmem:[#allocation17 + $0x7ec] ss:$28 sps:$4 sm:$0xff]   ;;  %v15015_v55 = vld [vmem:[#allocation17 + $0x7e0] ss:$28 sps:$4 sm:$0xff]  }
 0x6f7   :  { %10194 = vmatpush1.bf16.msra.mxu1 %v14949_v57  ;;  %10358 = vmatpush1.bf16.msra.mxu0 %v14952_v17  ;;  %v15018_v57 = vld [vmem:[#allocation17 + $0x7e8] ss:$28 sps:$4 sm:$0xff]   ;;  %v15023_v17 = vld [vmem:[#allocation17 + $0x81c] ss:$28 sps:$4 sm:$0xff]  }
 0x6f8   :  { %10195 = vmatprep.subr.bf16.mxu1 %v14957_v12  ;;  %10359 = vmatprep.subr.bf16.mxu0 %v14960_v40  ;;  %v15026_v12 = vld [vmem:[#allocation17 + $0x824] ss:$28 sps:$4 sm:$0xff]   ;;  %v15021_v40 = vld [vmem:[#allocation17 + $0x818] ss:$28 sps:$4 sm:$0xff]  }
 0x6fb   :  { %10196 = vmatpush1.bf16.msra.mxu1 %v14955_v18  ;;  %10360 = vmatpush1.bf16.msra.mxu0 %v14958_v7  ;;  %v15024_v18 = vld [vmem:[#allocation17 + $0x820] ss:$28 sps:$4 sm:$0xff]   ;;  %v15029_v7 = vld [vmem:[#allocation17 + $0x854] ss:$28 sps:$4 sm:$0xff]  }
 0x6fc   :  { %10197 = vmatprep.subr.bf16.mxu1 %v14963_v21  ;;  %10361 = vmatprep.subr.bf16.mxu0 %v14966_v5  ;;  %v15032_v21 = vld [vmem:[#allocation17 + $0x85c] ss:$28 sps:$4 sm:$0xff]   ;;  %v15027_v5 = vld [vmem:[#allocation17 + $0x850] ss:$28 sps:$4 sm:$0xff]  }
 0x6ff   :  { %10198 = vmatpush1.bf16.msra.mxu1 %v14961_v0  ;;  %10362 = vmatpush1.bf16.msra.mxu0 %v14964_v44  ;;  %v15030_v0 = vld [vmem:[#allocation17 + $0x858] ss:$28 sps:$4 sm:$0xff]   ;;  %v15035_v44 = vld [vmem:[#allocation17 + $0x88c] ss:$28 sps:$4 sm:$0xff]  }
 0x700   :  { %10199 = vmatprep.subr.bf16.mxu1 %v14969_v39  ;;  %10363 = vmatprep.subr.bf16.mxu0 %v14972_v2  ;;  %v15038_v39 = vld [vmem:[#allocation17 + $0x894] ss:$28 sps:$4 sm:$0xff]   ;;  %v15033_v2 = vld [vmem:[#allocation17 + $0x888] ss:$28 sps:$4 sm:$0xff]  }
 0x703   :  { %10200 = vmatpush1.bf16.msra.mxu1 %v14967_v30  ;;  %10364 = vmatpush1.bf16.msra.mxu0 %v14970_v20  ;;  %v15036_v30 = vld [vmem:[#allocation17 + $0x890] ss:$28 sps:$4 sm:$0xff]   ;;  %v15041_v20 = vld [vmem:[#allocation17 + $0x8c4] ss:$28 sps:$4 sm:$0xff]  }
 0x704   :  { %10201 = vmatprep.subr.bf16.mxu1 %v14975_v34  ;;  %10365 = vmatprep.subr.bf16.mxu0 %v14978_v14  ;;  %v15044_v34 = vld [vmem:[#allocation17 + $0x8cc] ss:$28 sps:$4 sm:$0xff]   ;;  %v15039_v14 = vld [vmem:[#allocation17 + $0x8c0] ss:$28 sps:$4 sm:$0xff]  }
 0x707   :  { %10202 = vmatpush1.bf16.msra.mxu1 %v14973_v33  ;;  %10366 = vmatpush1.bf16.msra.mxu0 %v14976_v6  ;;  %v15042_v33 = vld [vmem:[#allocation17 + $0x8c8] ss:$28 sps:$4 sm:$0xff]   ;;  %v15047_v6 = vld [vmem:[#allocation17 + $0x8fc] ss:$28 sps:$4 sm:$0xff]  }
 0x708   :  { %10203 = vmatprep.subr.bf16.mxu1 %v14981_v9  ;;  %10367 = vmatprep.subr.bf16.mxu0 %v14984_v37  ;;  %v15050_v9 = vld [vmem:[#allocation17 + $0x904] ss:$28 sps:$4 sm:$0xff]   ;;  %v15045_v37 = vld [vmem:[#allocation17 + $0x8f8] ss:$28 sps:$4 sm:$0xff]  }
 0x70b   :  { %10204 = vmatpush1.bf16.msra.mxu1 %v14979_v61  ;;  %10368 = vmatpush1.bf16.msra.mxu0 %v14982_v24  ;;  %v15048_v61 = vld [vmem:[#allocation17 + $0x900] ss:$28 sps:$4 sm:$0xff]   ;;  %v15053_v24 = vld [vmem:[#allocation17 + $0x934] ss:$28 sps:$4 sm:$0xff]  }
 0x70c   :  { %10205 = vmatprep.subr.bf16.mxu1 %v14987_v58  ;;  %10369 = vmatprep.subr.bf16.mxu0 %v14990_v28  ;;  %v15056_v58 = vld [vmem:[#allocation17 + $0x93c] ss:$28 sps:$4 sm:$0xff]   ;;  %v15051_v28 = vld [vmem:[#allocation17 + $0x930] ss:$28 sps:$4 sm:$0xff]  }
 0x70f   :  { %10206 = vmatpush1.bf16.msra.mxu1 %v14985_v31  ;;  %10370 = vmatpush1.bf16.msra.mxu0 %v14988_v36  ;;  %v15054_v31 = vld [vmem:[#allocation17 + $0x938] ss:$28 sps:$4 sm:$0xff]   ;;  %v15059_v36 = vld [vmem:[#allocation17 + $0x96c] ss:$28 sps:$4 sm:$0xff]  }
 0x710   :  { %10216 = vmatprep.subr.bf16.mxu1 %v14993_v42  ;;  %10380 = vmatprep.subr.bf16.mxu0 %v14996_v52  ;;  %v15057_v42 = vld [vmem:[#allocation17 + $0x968] ss:$28 sps:$4 sm:$0xff]   ;;  %v15060_v52 = vld [vmem:[#allocation17 + $0x970] ss:$28 sps:$4 sm:$0xff]  }
 0x712   :  { %10208 = vmatmul.mubr.bf16.vlgmr.msra.gmra.mrb[28].mxu1 %v16532_v62  ;;  %10372 = vmatmul.mubr.bf16.vlgmr.msra.gmra.mrb[28].mxu0 %v16532_v62 }
 0x713   :  { %10217 = vmatpush1.bf16.msra.mxu1 %v14991_v41  ;;  %10248 = vmatprep.mubr.bf16.mxu1 %v16534_v16  ;;  %v15068_v41 = vld [vmem:[#allocation17 + $0x9ac] ss:$28 sps:$4 sm:$0xff]  }
 0x714   :  { %10381 = vmatpush1.bf16.msra.mxu0 %v14994_v47  ;;  %10412 = vmatprep.mubr.bf16.mxu0 %v16534_v16  ;;  %v15063_v47 = vld [vmem:[#allocation17 + $0x9a0] ss:$28 sps:$4 sm:$0xff]  }
 0x715   :  { %10218 = vmatprep.subr.bf16.mxu1 %v14999_v11  ;;  %10382 = vmatprep.subr.bf16.mxu0 %v15002_v29  ;;  %v15066_v11 = vld [vmem:[#allocation17 + $0x9a8] ss:$28 sps:$4 sm:$0xff]   ;;  %v15071_v29 = vld [vmem:[#allocation17 + $0x9dc] ss:$28 sps:$4 sm:$0xff]  }
 0x717   :  { %10219 = vmatpush1.bf16.msra.mxu1 %v14997_v8  ;;  %v15074_v8 = vld [vmem:[#allocation17 + $0x9e4] ss:$28 sps:$4 sm:$0xff]  }
 0x718   :  { %10383 = vmatpush1.bf16.msra.mxu0 %v15000_v54  ;;  %10220 = vmatprep.subr.bf16.mxu1 %v15005_v38  ;;  %v15069_v54 = vld [vmem:[#allocation17 + $0x9d8] ss:$28 sps:$4 sm:$0xff]   ;;  %v15072_v38 = vld [vmem:[#allocation17 + $0x9e0] ss:$28 sps:$4 sm:$0xff]  }
 0x719   :  { %10384 = vmatprep.subr.bf16.mxu0 %v15008_v53  ;;  %v15077_v53 = vld [vmem:[#allocation17 + $0xa14] ss:$28 sps:$4 sm:$0xff]  }
 0x71b   :  { %10221 = vmatpush1.bf16.msra.mxu1 %v15003_v19  ;;  %v15080_v19 = vld [vmem:[#allocation17 + $0xa1c] ss:$28 sps:$4 sm:$0xff]  }
 0x71c   :  { %10385 = vmatpush1.bf16.msra.mxu0 %v15006_v4  ;;  %10222 = vmatprep.subr.bf16.mxu1 %v15011_v43  ;;  %v15075_v4 = vld [vmem:[#allocation17 + $0xa10] ss:$28 sps:$4 sm:$0xff]   ;;  %v15078_v43 = vld [vmem:[#allocation17 + $0xa18] ss:$28 sps:$4 sm:$0xff]  }
 0x71d   :  { %10386 = vmatprep.subr.bf16.mxu0 %v15014_v49  ;;  %v15083_v49 = vld [vmem:[#allocation17 + $0xa4c] ss:$28 sps:$4 sm:$0xff]  }
 0x71f   :  { %10223 = vmatpush1.bf16.msra.mxu1 %v15009_v50  ;;  %v15086_v50 = vld [vmem:[#allocation17 + $0xa54] ss:$28 sps:$4 sm:$0xff]  }
 0x720   :  { %10387 = vmatpush1.bf16.msra.mxu0 %v15012_v15  ;;  %10224 = vmatprep.subr.bf16.mxu1 %v15017_v51  ;;  %v15081_v15 = vld [vmem:[#allocation17 + $0xa48] ss:$28 sps:$4 sm:$0xff]   ;;  %v15084_v51 = vld [vmem:[#allocation17 + $0xa50] ss:$28 sps:$4 sm:$0xff]  }
 0x721   :  { %10388 = vmatprep.subr.bf16.mxu0 %v15020_v48  ;;  %v7623_v48 = vmax.f32 %v16514_v13, 0.0  ;;  %v15096_v13 = vld [vmem:[#allocation17 + $0xac0] ss:$28 sps:$4 sm:$0xff]  }
 0x723   :  { %10225 = vmatpush1.bf16.msra.mxu1 %v15015_v55  ;;  %v15089_v55 = vld [vmem:[#allocation17 + $0xa84] ss:$28 sps:$4 sm:$0xff]  }
 0x724   :  { %10389 = vmatpush1.bf16.msra.mxu0 %v15018_v57  ;;  %10226 = vmatprep.subr.bf16.mxu1 %v15023_v17  ;;  %v15092_v57 = vld [vmem:[#allocation17 + $0xa8c] ss:$28 sps:$4 sm:$0xff]   ;;  %v15087_v17 = vld [vmem:[#allocation17 + $0xa80] ss:$28 sps:$4 sm:$0xff]  }
 0x725   :  { %10390 = vmatprep.subr.bf16.mxu0 %v15026_v12  ;;  %v16541_v12 = vpack.c.bf16 %v7623_v48, %v7623_v48  ;;  %v15153_v48 = vld [vmem:[#allocation17 + $0x280] ss:$28 sps:$4 sm:$0xff]  }
 0x727   :  { %10227 = vmatpush1.bf16.msra.mxu1 %v15021_v40  ;;  %v15090_v40 = vld [vmem:[#allocation17 + $0xa88] ss:$28 sps:$4 sm:$0xff]  }
 0x728   :  { %10391 = vmatpush1.bf16.msra.mxu0 %v15024_v18  ;;  %10228 = vmatprep.subr.bf16.mxu1 %v15029_v7  ;;  %v15095_v18 = vld [vmem:[#allocation17 + $0xabc] ss:$28 sps:$4 sm:$0xff]   ;;  %v15098_v7 = vld [vmem:[#allocation17 + $0xac4] ss:$28 sps:$4 sm:$0xff]  }
 0x729   :  { %10392 = vmatprep.subr.bf16.mxu0 %v15032_v21  ;;  %v15093_v21 = vld [vmem:[#allocation17 + $0xab8] ss:$28 sps:$4 sm:$0xff]  }
 0x72b   :  { %10229 = vmatpush1.bf16.msra.mxu1 %v15027_v5  ;;  %v15101_v5 = vld [vmem:[#allocation17 + $0xaf4] ss:$28 sps:$4 sm:$0xff]  }
 0x72c   :  { %10393 = vmatpush1.bf16.msra.mxu0 %v15030_v0  ;;  %10230 = vmatprep.subr.bf16.mxu1 %v15035_v44  ;;  %v15104_v0 = vld [vmem:[#allocation17 + $0xafc] ss:$28 sps:$4 sm:$0xff]   ;;  %v15099_v44 = vld [vmem:[#allocation17 + $0xaf0] ss:$28 sps:$4 sm:$0xff]  }
 0x72d   :  { %10394 = vmatprep.subr.bf16.mxu0 %v15038_v39  ;;  %v15102_v39 = vld [vmem:[#allocation17 + $0xaf8] ss:$28 sps:$4 sm:$0xff]  }
 0x72f   :  { %10231 = vmatpush1.bf16.msra.mxu1 %v15033_v2  ;;  %v15107_v2 = vld [vmem:[#allocation17 + $0xb2c] ss:$28 sps:$4 sm:$0xff]  }
 0x730   :  { %10395 = vmatpush1.bf16.msra.mxu0 %v15036_v30  ;;  %10232 = vmatprep.subr.bf16.mxu1 %v15041_v20  ;;  %v15110_v30 = vld [vmem:[#allocation17 + $0xb34] ss:$28 sps:$4 sm:$0xff]   ;;  %v15105_v20 = vld [vmem:[#allocation17 + $0xb28] ss:$28 sps:$4 sm:$0xff]  }
 0x731   :  { %10396 = vmatprep.subr.bf16.mxu0 %v15044_v34  ;;  %v15108_v34 = vld [vmem:[#allocation17 + $0xb30] ss:$28 sps:$4 sm:$0xff]  }
 0x733   :  { %10233 = vmatpush1.bf16.msra.mxu1 %v15039_v14  ;;  %v15113_v14 = vld [vmem:[#allocation17 + $0xb64] ss:$28 sps:$4 sm:$0xff]  }
 0x734   :  { %10397 = vmatpush1.bf16.msra.mxu0 %v15042_v33  ;;  %10234 = vmatprep.subr.bf16.mxu1 %v15047_v6  ;;  %v15116_v33 = vld [vmem:[#allocation17 + $0xb6c] ss:$28 sps:$4 sm:$0xff]   ;;  %v15111_v6 = vld [vmem:[#allocation17 + $0xb60] ss:$28 sps:$4 sm:$0xff]  }
 0x735   :  { %10398 = vmatprep.subr.bf16.mxu0 %v15050_v9  ;;  %v15114_v9 = vld [vmem:[#allocation17 + $0xb68] ss:$28 sps:$4 sm:$0xff]  }
 0x737   :  { %10235 = vmatpush1.bf16.msra.mxu1 %v15045_v37  ;;  %v15119_v37 = vld [vmem:[#allocation17 + $0xb9c] ss:$28 sps:$4 sm:$0xff]  }
 0x738   :  { %10399 = vmatpush1.bf16.msra.mxu0 %v15048_v61  ;;  %10236 = vmatprep.subr.bf16.mxu1 %v15053_v24  ;;  %v15122_v61 = vld [vmem:[#allocation17 + $0xba4] ss:$28 sps:$4 sm:$0xff]   ;;  %v15117_v24 = vld [vmem:[#allocation17 + $0xb98] ss:$28 sps:$4 sm:$0xff]  }
 0x739   :  { %10400 = vmatprep.subr.bf16.mxu0 %v15056_v58  ;;  %v15120_v58 = vld [vmem:[#allocation17 + $0xba0] ss:$28 sps:$4 sm:$0xff]  }
 0x73b   :  { %10237 = vmatpush1.bf16.msra.mxu1 %v15051_v28  ;;  %v15125_v28 = vld [vmem:[#allocation17 + $0xbd4] ss:$28 sps:$4 sm:$0xff]  }
 0x73c   :  { %10401 = vmatpush1.bf16.msra.mxu0 %v15054_v31  ;;  %10238 = vmatprep.subr.bf16.mxu1 %v15059_v36  ;;  %v15128_v31 = vld [vmem:[#allocation17 + $0xbdc] ss:$28 sps:$4 sm:$0xff]   ;;  %v15123_v36 = vld [vmem:[#allocation17 + $0xbd0] ss:$28 sps:$4 sm:$0xff]  }
 0x73d   :  { %10402 = vmatprep.subr.bf16.mxu0 %v15062_v63  ;;  %v15126_v63 = vld [vmem:[#allocation17 + $0xbd8] ss:$28 sps:$4 sm:$0xff]  }
 0x73f   :  { %10239 = vmatpush1.bf16.msra.mxu1 %v15057_v42  ;;  %v15131_v42 = vld [vmem:[#allocation17 + $0xc0c] ss:$28 sps:$4 sm:$0xff]  }
 0x740   :  { %10403 = vmatpush1.bf16.msra.mxu0 %v15060_v52  ;;  %10240 = vmatprep.subr.bf16.mxu1 %v15065_v35  ;;  %v15134_v52 = vld [vmem:[#allocation17 + $0xc14] ss:$28 sps:$4 sm:$0xff]   ;;  %v15129_v35 = vld [vmem:[#allocation17 + $0xc08] ss:$28 sps:$4 sm:$0xff]  }
 0x741   :  { %10404 = vmatprep.subr.bf16.mxu0 %v15068_v41  ;;  %v15132_v41 = vld [vmem:[#allocation17 + $0xc10] ss:$28 sps:$4 sm:$0xff]  }
 0x743   :  { %10241 = vmatpush1.bf16.msra.mxu1 %v15063_v47  ;;  %v7625_v47 = vmax.f32 %v16516_v45, 0.0  ;;  %v15144_v45 = vld [vmem:[#allocation17 + $0x50] ss:$28 sps:$4 sm:$0xff]  }
 0x744   :  { %10405 = vmatpush1.bf16.msra.mxu0 %v15066_v11  ;;  %10242 = vmatprep.subr.bf16.mxu1 %v15071_v29  ;;  %v15137_v11 = vld [vmem:[#allocation17 + $0x14] ss:$28 sps:$4 sm:$0xff]  }
 0x745   :  { %10406 = vmatprep.subr.bf16.mxu0 %v15074_v8  ;;  %v15138_v29 = vld [vmem:[#allocation17 + $0x1d8] ss:$28 sps:$4 sm:$0xff]   ;;  %v15135_v8 = vld [vmem:[#allocation17 + $0x10] ss:$28 sps:$4 sm:$0xff]  }
 0x747   :  { %10243 = vmatpush1.bf16.msra.mxu1 %v15069_v54  ;;  %v16548_v54 = vpack.c.bf16 %v7625_v47, %v7625_v47  ;;  %v15194_v47 = vld [vmem:[#allocation17 + $0x440] ss:$28 sps:$4 sm:$0xff]  }
 0x748   :  { %10407 = vmatpush1.bf16.msra.mxu0 %v15072_v38  ;;  %10244 = vmatprep.subr.bf16.mxu1 %v15077_v53  ;;  %v15139_v38 = vld [vmem:[#allocation17 + $0x18] ss:$28 sps:$4 sm:$0xff]   ;;  %v15142_v53 = vld [vmem:[#allocation17 + $0x4c] ss:$28 sps:$4 sm:$0xff]  }
 0x749   :  { %10408 = vmatprep.subr.bf16.mxu0 %v15080_v19  ;;  %v15143_v19 = vld [vmem:[#allocation17 + $0x210] ss:$28 sps:$4 sm:$0xff]  }
 0x74b   :  { %10245 = vmatpush1.bf16.msra.mxu1 %v15075_v4  ;;  %v15140_v4 = vld [vmem:[#allocation17 + $0x48] ss:$28 sps:$4 sm:$0xff]  }
 0x74c   :  { %10409 = vmatpush1.bf16.msra.mxu0 %v15078_v43  ;;  %10246 = vmatprep.subr.bf16.mxu1 %v15083_v49  ;;  %v15147_v43 = vld [vmem:[#allocation17 + $0x84] ss:$28 sps:$4 sm:$0xff]  }
 0x74d   :  { %10410 = vmatprep.subr.bf16.mxu0 %v15086_v50  ;;  %v15148_v49 = vld [vmem:[#allocation17 + $0x248] ss:$28 sps:$4 sm:$0xff]   ;;  %v15145_v50 = vld [vmem:[#allocation17 + $0x80] ss:$28 sps:$4 sm:$0xff]  }
 0x74f   :  { %10247 = vmatpush1.bf16.msra.mxu1 %v15081_v15  ;;  %v15149_v15 = vld [vmem:[#allocation17 + $0x88] ss:$28 sps:$4 sm:$0xff]  }
 0x750   :  { %10411 = vmatpush1.bf16.msra.mxu0 %v15084_v51  ;;  %10257 = vmatprep.subr.bf16.mxu1 %v15089_v55  ;;  %v15152_v51 = vld [vmem:[#allocation17 + $0xbc] ss:$28 sps:$4 sm:$0xff]  }
 0x751   :  { %10421 = vmatprep.subr.bf16.mxu0 %v15092_v57  ;;  %v15150_v55 = vld [vmem:[#allocation17 + $0xb8] ss:$28 sps:$4 sm:$0xff]   ;;  %v15154_v57 = vld [vmem:[#allocation17 + $0xc0] ss:$28 sps:$4 sm:$0xff]  }
 0x752   :  { %10249 = vmatmul.mubr.bf16.vlgmr.msra.gmra.mrb[28].mxu1 %v16541_v12 }
 0x753   :  { %10413 = vmatmul.mubr.bf16.vlgmr.msra.gmra.mrb[28].mxu0 %v16541_v12  ;;  %10258 = vmatpush1.bf16.msra.mxu1 %v15087_v17  ;;  %v15157_v17 = vld [vmem:[#allocation17 + $0xf4] ss:$28 sps:$4 sm:$0xff]  }
 0x754   :  { %10422 = vmatpush1.bf16.msra.mxu0 %v15090_v40  ;;  %10259 = vmatprep.subr.bf16.mxu1 %v15095_v18  ;;  %v15158_v40 = vld [vmem:[#allocation17 + $0x2b8] ss:$28 sps:$4 sm:$0xff]  }
 0x755   :  { %10423 = vmatprep.subr.bf16.mxu0 %v15098_v7  ;;  %10289 = vmatprep.mubr.bf16.mxu1 %v15848_v10  ;;  %v15159_v18 = vld [vmem:[#allocation17 + $0xf8] ss:$28 sps:$4 sm:$0xff]   ;;  %v15162_v7 = vld [vmem:[#allocation17 + $0x12c] ss:$28 sps:$4 sm:$0xff]  }
 0x756   :  { %10453 = vmatprep.mubr.bf16.mxu0 %v15848_v10 }
 0x757   :  { %10260 = vmatpush1.bf16.msra.mxu1 %v15093_v21  ;;  %v15163_v21 = vld [vmem:[#allocation17 + $0x2f0] ss:$28 sps:$4 sm:$0xff]  }
 0x758   :  { %10424 = vmatpush1.bf16.msra.mxu0 %v15096_v13  ;;  %10261 = vmatprep.subr.bf16.mxu1 %v15101_v5  ;;  %v15160_v13 = vld [vmem:[#allocation17 + $0x128] ss:$28 sps:$4 sm:$0xff]   ;;  %v15164_v5 = vld [vmem:[#allocation17 + $0x130] ss:$28 sps:$4 sm:$0xff]  }
 0x759   :  { %10425 = vmatprep.subr.bf16.mxu0 %v15104_v0  ;;  %v15167_v0 = vld [vmem:[#allocation17 + $0x164] ss:$28 sps:$4 sm:$0xff]  }
 0x75b   :  { %10262 = vmatpush1.bf16.msra.mxu1 %v15099_v44  ;;  %v15168_v44 = vld [vmem:[#allocation17 + $0x328] ss:$28 sps:$4 sm:$0xff]  }
 0x75c   :  { %10426 = vmatpush1.bf16.msra.mxu0 %v15102_v39  ;;  %10263 = vmatprep.subr.bf16.mxu1 %v15107_v2  ;;  %v15165_v39 = vld [vmem:[#allocation17 + $0x160] ss:$28 sps:$4 sm:$0xff]   ;;  %v15169_v2 = vld [vmem:[#allocation17 + $0x168] ss:$28 sps:$4 sm:$0xff]  }
 0x75d   :  { %10427 = vmatprep.subr.bf16.mxu0 %v15110_v30  ;;  %v15172_v30 = vld [vmem:[#allocation17 + $0x19c] ss:$28 sps:$4 sm:$0xff]  }
 0x75f   :  { %10264 = vmatpush1.bf16.msra.mxu1 %v15105_v20  ;;  %v15173_v20 = vld [vmem:[#allocation17 + $0x360] ss:$28 sps:$4 sm:$0xff]  }
 0x760   :  { %10428 = vmatpush1.bf16.msra.mxu0 %v15108_v34  ;;  %10265 = vmatprep.subr.bf16.mxu1 %v15113_v14  ;;  %v15170_v34 = vld [vmem:[#allocation17 + $0x198] ss:$28 sps:$4 sm:$0xff]   ;;  %v15174_v14 = vld [vmem:[#allocation17 + $0x1a0] ss:$28 sps:$4 sm:$0xff]  }
 0x761   :  { %10429 = vmatprep.subr.bf16.mxu0 %v15116_v33  ;;  %v15177_v33 = vld [vmem:[#allocation17 + $0x1d4] ss:$28 sps:$4 sm:$0xff]  }
 0x763   :  { %10266 = vmatpush1.bf16.msra.mxu1 %v15111_v6  ;;  %v15178_v6 = vld [vmem:[#allocation17 + $0x558] ss:$28 sps:$4 sm:$0xff]  }
 0x764   :  { %10430 = vmatpush1.bf16.msra.mxu0 %v15114_v9  ;;  %10267 = vmatprep.subr.bf16.mxu1 %v15119_v37  ;;  %v15175_v9 = vld [vmem:[#allocation17 + $0x1d0] ss:$28 sps:$4 sm:$0xff]   ;;  %v15179_v37 = vld [vmem:[#allocation17 + $0x398] ss:$28 sps:$4 sm:$0xff]  }
 0x765   :  { %10431 = vmatprep.subr.bf16.mxu0 %v15122_v61  ;;  %v15182_v61 = vld [vmem:[#allocation17 + $0x20c] ss:$28 sps:$4 sm:$0xff]  }
 0x767   :  { %10268 = vmatpush1.bf16.msra.mxu1 %v15117_v24  ;;  %v15183_v24 = vld [vmem:[#allocation17 + $0x590] ss:$28 sps:$4 sm:$0xff]  }
 0x768   :  { %10432 = vmatpush1.bf16.msra.mxu0 %v15120_v58  ;;  %10269 = vmatprep.subr.bf16.mxu1 %v15125_v28  ;;  %v15180_v58 = vld [vmem:[#allocation17 + $0x208] ss:$28 sps:$4 sm:$0xff]   ;;  %v15184_v28 = vld [vmem:[#allocation17 + $0x3d0] ss:$28 sps:$4 sm:$0xff]  }
 0x769   :  { %10433 = vmatprep.subr.bf16.mxu0 %v15128_v31  ;;  %v15187_v31 = vld [vmem:[#allocation17 + $0x244] ss:$28 sps:$4 sm:$0xff]  }
 0x76b   :  { %10270 = vmatpush1.bf16.msra.mxu1 %v15123_v36  ;;  %v15188_v36 = vld [vmem:[#allocation17 + $0x5c8] ss:$28 sps:$4 sm:$0xff]  }
 0x76c   :  { %10434 = vmatpush1.bf16.msra.mxu0 %v15126_v63  ;;  %10271 = vmatprep.subr.bf16.mxu1 %v15131_v42  ;;  %v15185_v63 = vld [vmem:[#allocation17 + $0x240] ss:$28 sps:$4 sm:$0xff]   ;;  %v15189_v42 = vld [vmem:[#allocation17 + $0x408] ss:$28 sps:$4 sm:$0xff]  }
 0x76d   :  { %10435 = vmatprep.subr.bf16.mxu0 %v15134_v52  ;;  %v15192_v52 = vld [vmem:[#allocation17 + $0x27c] ss:$28 sps:$4 sm:$0xff]  }
 0x76f   :  { %10272 = vmatpush1.bf16.msra.mxu1 %v15129_v35  ;;  %v15193_v35 = vld [vmem:[#allocation17 + $0x600] ss:$28 sps:$4 sm:$0xff]  }
 0x770   :  { %10436 = vmatpush1.bf16.msra.mxu0 %v15132_v41  ;;  %10462 = vmatprep.subr.bf16.mxu1 %v15137_v11  ;;  %v15190_v41 = vld [vmem:[#allocation17 + $0x278] ss:$28 sps:$4 sm:$0xff]  }
 0x771   :  { %13239 = vmatprep.subr.bf16.mxu0 %v15138_v29  ;;  %v15197_v11 = vld [vmem:[#allocation17 + $0x2b4] ss:$28 sps:$4 sm:$0xff]  }
 0x772   :  { %10290 = vmatmul.mubr.bf16.vlgmr.msra.gmra.mrb[28].mxu1 %v16548_v54  ;;  %v15198_v29 = vld [vmem:[#allocation17 + $0x638] ss:$28 sps:$4 sm:$0xff]  }
 0x773   :  { %10454 = vmatmul.mubr.bf16.vlgmr.msra.gmra.mrb[28].mxu0 %v16548_v54  ;;  %10463 = vmatpush1.bf16.msra.mxu1 %v15135_v8  ;;  %v15195_v8 = vld [vmem:[#allocation17 + $0x2b0] ss:$28 sps:$4 sm:$0xff]  }
 0x774   :  { %10494 = vmatprep.mubr.bf16.mxu1 %v16518_v1  ;;  %13240 = vmatpush3.bf16.msra.mxu0 %v15139_v38  ;;  %v15199_v38 = vld [vmem:[#allocation17 + $0x478] ss:$28 sps:$4 sm:$0xff]  }
 0x775   :  { %10658 = vmatprep.mubr.bf16.mxu0 %v16518_v1  ;;  %10464 = vmatprep.subr.bf16.mxu1 %v15142_v53  ;;  %v15155_v1 = vld [vmem:[#allocation17 + $0xf0] ss:$28 sps:$4 sm:$0xff]  }
 0x776   :  { %13241 = vmatprep.subr.bf16.mxu0 %v15143_v19  ;;  %v15202_v53 = vld [vmem:[#allocation17 + $0x2ec] ss:$28 sps:$4 sm:$0xff]  }
 0x777   :  { %10465 = vmatpush1.bf16.msra.mxu1 %v15140_v4  ;;  %v15203_v19 = vld [vmem:[#allocation17 + $0x670] ss:$28 sps:$4 sm:$0xff]   ;;  %v15200_v4 = vld [vmem:[#allocation17 + $0x2e8] ss:$28 sps:$4 sm:$0xff]  }
 0x778   :  { %13242 = vmatpush3.bf16.msra.mxu0 %v15144_v45  ;;  %10466 = vmatprep.subr.bf16.mxu1 %v15147_v43  ;;  %v15204_v45 = vld [vmem:[#allocation17 + $0x4b0] ss:$28 sps:$4 sm:$0xff]   ;;  %v15207_v43 = vld [vmem:[#allocation17 + $0x324] ss:$28 sps:$4 sm:$0xff]  }
 0x779   :  { %13243 = vmatprep.subr.bf16.mxu0 %v15148_v49  ;;  %v15208_v49 = vld [vmem:[#allocation17 + $0x6a8] ss:$28 sps:$4 sm:$0xff]  }
 0x77b   :  { %10467 = vmatpush1.bf16.msra.mxu1 %v15145_v50  ;;  %v15205_v50 = vld [vmem:[#allocation17 + $0x320] ss:$28 sps:$4 sm:$0xff]  }
 0x77c   :  { %13244 = vmatpush3.bf16.msra.mxu0 %v15149_v15  ;;  %10468 = vmatprep.subr.bf16.mxu1 %v15152_v51  ;;  %v15209_v15 = vld [vmem:[#allocation17 + $0x4e8] ss:$28 sps:$4 sm:$0xff]   ;;  %v15212_v51 = vld [vmem:[#allocation17 + $0x35c] ss:$28 sps:$4 sm:$0xff]  }
 0x77d   :  { %13245 = vmatprep.subr.bf16.mxu0 %v15153_v48  ;;  %v15213_v48 = vld [vmem:[#allocation17 + $0x6e0] ss:$28 sps:$4 sm:$0xff]  }
 0x77f   :  { %10469 = vmatpush1.bf16.msra.mxu1 %v15150_v55  ;;  %v15210_v55 = vld [vmem:[#allocation17 + $0x358] ss:$28 sps:$4 sm:$0xff]  }
 0x780   :  { %13246 = vmatpush3.bf16.msra.mxu0 %v15154_v57  ;;  %10470 = vmatprep.subr.bf16.mxu1 %v15157_v17  ;;  %v15214_v57 = vld [vmem:[#allocation17 + $0x520] ss:$28 sps:$4 sm:$0xff]   ;;  %v15217_v17 = vld [vmem:[#allocation17 + $0x394] ss:$28 sps:$4 sm:$0xff]  }
 0x781   :  { %13247 = vmatprep.subr.bf16.mxu0 %v15158_v40  ;;  %v15218_v40 = vld [vmem:[#allocation17 + $0x8d8] ss:$28 sps:$4 sm:$0xff]  }
 0x783   :  { %10471 = vmatpush1.bf16.msra.mxu1 %v15155_v1  ;;  %v15215_v1 = vld [vmem:[#allocation17 + $0x390] ss:$28 sps:$4 sm:$0xff]  }
 0x784   :  { %13248 = vmatpush3.bf16.msra.mxu0 %v15159_v18  ;;  %10472 = vmatprep.subr.bf16.mxu1 %v15162_v7  ;;  %v15219_v18 = vld [vmem:[#allocation17 + $0x718] ss:$28 sps:$4 sm:$0xff]   ;;  %v15222_v7 = vld [vmem:[#allocation17 + $0x3cc] ss:$28 sps:$4 sm:$0xff]  }
 0x785   :  { %13249 = vmatprep.subr.bf16.mxu0 %v15163_v21  ;;  %v15223_v21 = vld [vmem:[#allocation17 + $0x910] ss:$28 sps:$4 sm:$0xff]  }
 0x787   :  { %10473 = vmatpush1.bf16.msra.mxu1 %v15160_v13  ;;  %v15220_v13 = vld [vmem:[#allocation17 + $0x3c8] ss:$28 sps:$4 sm:$0xff]  }
 0x788   :  { %13250 = vmatpush3.bf16.msra.mxu0 %v15164_v5  ;;  %10474 = vmatprep.subr.bf16.mxu1 %v15167_v0  ;;  %v15224_v5 = vld [vmem:[#allocation17 + $0x750] ss:$28 sps:$4 sm:$0xff]   ;;  %v15227_v0 = vld [vmem:[#allocation17 + $0x404] ss:$28 sps:$4 sm:$0xff]  }
 0x789   :  { %13251 = vmatprep.subr.bf16.mxu0 %v15168_v44  ;;  %v15228_v44 = vld [vmem:[#allocation17 + $0x948] ss:$28 sps:$4 sm:$0xff]  }
 0x78b   :  { %10475 = vmatpush1.bf16.msra.mxu1 %v15165_v39  ;;  %v15225_v39 = vld [vmem:[#allocation17 + $0x400] ss:$28 sps:$4 sm:$0xff]  }
 0x78c   :  { %13252 = vmatpush3.bf16.msra.mxu0 %v15169_v2  ;;  %10476 = vmatprep.subr.bf16.mxu1 %v15172_v30  ;;  %v15232_v2 = vld [vmem:[#allocation17 + $0x43c] ss:$28 sps:$4 sm:$0xff]  }
 0x78d   :  { %13253 = vmatprep.subr.bf16.mxu0 %v15173_v20  ;;  %v15233_v30 = vld [vmem:[#allocation17 + $0x980] ss:$28 sps:$4 sm:$0xff]   ;;  %v15230_v20 = vld [vmem:[#allocation17 + $0x438] ss:$28 sps:$4 sm:$0xff]  }
 0x78f   :  { %10477 = vmatpush1.bf16.msra.mxu1 %v15170_v34  ;;  %v15237_v34 = vld [vmem:[#allocation17 + $0x474] ss:$28 sps:$4 sm:$0xff]  }
 0x790   :  { %13254 = vmatpush3.bf16.msra.mxu0 %v15174_v14  ;;  %10478 = vmatprep.subr.bf16.mxu1 %v15177_v33  ;;  %v15238_v14 = vld [vmem:[#allocation17 + $0x9b8] ss:$28 sps:$4 sm:$0xff]   ;;  %v15235_v33 = vld [vmem:[#allocation17 + $0x470] ss:$28 sps:$4 sm:$0xff]  }
 0x791   :  { %13261 = vmatprep.subr.bf16.mxu0 %v15178_v6  ;;  %v15239_v6 = vld [vmem:[#allocation17 + $0x7f8] ss:$28 sps:$4 sm:$0xff]  }
 0x793   :  { %10659 = vmatmul.mubr.bf16.vlgmr.msra.gmra.mrb[32].mxu0 %v16520_v3  ;;  %10479 = vmatpush1.bf16.msra.mxu1 %v15175_v9  ;;  %v15242_v9 = vld [vmem:[#allocation17 + $0x4ac] ss:$28 sps:$4 sm:$0xff]  }
 0x794   :  { %13262 = vmatpush3.bf16.msra.mxu0 %v15179_v37  ;;  %10698 = vmatprep.mubr.bf16.mxu0 %v16526_v23  ;;  %v15243_v37 = vld [vmem:[#allocation17 + $0x9f0] ss:$28 sps:$4 sm:$0xff]  }
 0x795   :  { %10480 = vmatprep.subr.bf16.mxu1 %v15182_v61  ;;  %13263 = vmatprep.subr.bf16.mxu0 %v15183_v24  ;;  %v15240_v61 = vld [vmem:[#allocation17 + $0x4a8] ss:$28 sps:$4 sm:$0xff]   ;;  %v15244_v24 = vld [vmem:[#allocation17 + $0x830] ss:$28 sps:$4 sm:$0xff]  }
 0x797   :  { %10481 = vmatpush1.bf16.msra.mxu1 %v15180_v58  ;;  %v15247_v58 = vld [vmem:[#allocation17 + $0x4e4] ss:$28 sps:$4 sm:$0xff]  }
 0x798   :  { %13264 = vmatpush3.bf16.msra.mxu0 %v15184_v28  ;;  %10482 = vmatprep.subr.bf16.mxu1 %v15187_v31  ;;  %v15248_v28 = vld [vmem:[#allocation17 + $0xa28] ss:$28 sps:$4 sm:$0xff]   ;;  %v15245_v31 = vld [vmem:[#allocation17 + $0x4e0] ss:$28 sps:$4 sm:$0xff]  }
 0x799   :  { %13265 = vmatprep.subr.bf16.mxu0 %v15188_v36  ;;  %v15249_v36 = vld [vmem:[#allocation17 + $0x868] ss:$28 sps:$4 sm:$0xff]  }
 0x79b   :  { %10483 = vmatpush1.bf16.msra.mxu1 %v15185_v63  ;;  %v15252_v63 = vld [vmem:[#allocation17 + $0x51c] ss:$28 sps:$4 sm:$0xff]  }
 0x79c   :  { %13266 = vmatpush3.bf16.msra.mxu0 %v15189_v42  ;;  %10484 = vmatprep.subr.bf16.mxu1 %v15192_v52  ;;  %v15253_v42 = vld [vmem:[#allocation17 + $0xa60] ss:$28 sps:$4 sm:$0xff]   ;;  %v15250_v52 = vld [vmem:[#allocation17 + $0x518] ss:$28 sps:$4 sm:$0xff]  }
 0x79d   :  { %13267 = vmatprep.subr.bf16.mxu0 %v15193_v35  ;;  %v15254_v35 = vld [vmem:[#allocation17 + $0x8a0] ss:$28 sps:$4 sm:$0xff]  }
 0x79f   :  { %10485 = vmatpush1.bf16.msra.mxu1 %v15190_v41  ;;  %v15257_v41 = vld [vmem:[#allocation17 + $0x554] ss:$28 sps:$4 sm:$0xff]  }
 0x7a0   :  { %13268 = vmatpush3.bf16.msra.mxu0 %v15194_v47  ;;  %10486 = vmatprep.subr.bf16.mxu1 %v15197_v11  ;;  %v15255_v47 = vld [vmem:[#allocation17 + $0x550] ss:$28 sps:$4 sm:$0xff]   ;;  %v15258_v11 = vld [vmem:[#allocation17 + $0xa98] ss:$28 sps:$4 sm:$0xff]  }
 0x7a1   :  { %13269 = vmatprep.subr.bf16.mxu0 %v15198_v29  ;;  %v15261_v29 = vld [vmem:[#allocation17 + $0x58c] ss:$28 sps:$4 sm:$0xff]  }
 0x7a3   :  { %10487 = vmatpush1.bf16.msra.mxu1 %v15195_v8  ;;  %v15259_v8 = vld [vmem:[#allocation17 + $0x588] ss:$28 sps:$4 sm:$0xff]  }
 0x7a4   :  { %13270 = vmatpush3.bf16.msra.mxu0 %v15199_v38  ;;  %10488 = vmatprep.subr.bf16.mxu1 %v15202_v53  ;;  %v15262_v38 = vld [vmem:[#allocation17 + $0xad0] ss:$28 sps:$4 sm:$0xff]   ;;  %v15265_v53 = vld [vmem:[#allocation17 + $0x5c4] ss:$28 sps:$4 sm:$0xff]  }
 0x7a5   :  { %13271 = vmatprep.subr.bf16.mxu0 %v15203_v19  ;;  %v15263_v19 = vld [vmem:[#allocation17 + $0x5c0] ss:$28 sps:$4 sm:$0xff]  }
 0x7a7   :  { %10489 = vmatpush1.bf16.msra.mxu1 %v15200_v4  ;;  %v15266_v4 = vld [vmem:[#allocation17 + $0xb08] ss:$28 sps:$4 sm:$0xff]  }
 0x7a8   :  { %13272 = vmatpush3.bf16.msra.mxu0 %v15204_v45  ;;  %10490 = vmatprep.subr.bf16.mxu1 %v15207_v43  ;;  %v15269_v45 = vld [vmem:[#allocation17 + $0x5fc] ss:$28 sps:$4 sm:$0xff]  }
 0x7a9   :  { %13273 = vmatprep.subr.bf16.mxu0 %v15208_v49  ;;  %v15267_v43 = vld [vmem:[#allocation17 + $0x5f8] ss:$28 sps:$4 sm:$0xff]   ;;  %v15270_v49 = vld [vmem:[#allocation17 + $0xb40] ss:$28 sps:$4 sm:$0xff]  }
 0x7ab   :  { %10491 = vmatpush1.bf16.msra.mxu1 %v15205_v50  ;;  %v15273_v50 = vld [vmem:[#allocation17 + $0x634] ss:$28 sps:$4 sm:$0xff]  }
 0x7ac   :  { %13274 = vmatpush3.bf16.msra.mxu0 %v15209_v15  ;;  %10492 = vmatprep.subr.bf16.mxu1 %v15212_v51  ;;  %v15271_v15 = vld [vmem:[#allocation17 + $0x630] ss:$28 sps:$4 sm:$0xff]   ;;  %v15274_v51 = vld [vmem:[#allocation17 + $0xb78] ss:$28 sps:$4 sm:$0xff]  }
 0x7ad   :  { %13275 = vmatprep.subr.bf16.mxu0 %v15213_v48  ;;  %v15277_v48 = vld [vmem:[#allocation17 + $0x66c] ss:$28 sps:$4 sm:$0xff]  }
 0x7af   :  { %10493 = vmatpush1.bf16.msra.mxu1 %v15210_v55  ;;  %v15275_v55 = vld [vmem:[#allocation17 + $0x668] ss:$28 sps:$4 sm:$0xff]  }
 0x7b0   :  { %13276 = vmatpush3.bf16.msra.mxu0 %v15214_v57  ;;  %10503 = vmatprep.subr.bf16.mxu1 %v15217_v17  ;;  %v15278_v57 = vld [vmem:[#allocation17 + $0xbb0] ss:$28 sps:$4 sm:$0xff]   ;;  %v15281_v17 = vld [vmem:[#allocation17 + $0x6a4] ss:$28 sps:$4 sm:$0xff]  }
 0x7b1   :  { %13283 = vmatprep.subr.bf16.mxu0 %v15218_v40  ;;  %v15279_v40 = vld [vmem:[#allocation17 + $0x6a0] ss:$28 sps:$4 sm:$0xff]  }
 0x7b2   :  { %10495 = vmatmul.mubr.bf16.vlgmr.msra.gmra.mrb[32].mxu1 %v16520_v3  ;;  %v15229_v3 = vld [vmem:[#allocation17 + $0x788] ss:$28 sps:$4 sm:$0xff]  }
 0x7b3   :  { %10699 = vmatmul.mubr.bf16.vlgmr.msra.gmra.mrb[36].mxu0 %v16532_v62  ;;  %10504 = vmatpush1.bf16.msra.mxu1 %v15215_v1  ;;  %v15282_v1 = vld [vmem:[#allocation17 + $0xbe8] ss:$28 sps:$4 sm:$0xff]  }
 0x7b4   :  { %10535 = vmatprep.mubr.bf16.mxu1 %v16526_v23  ;;  %13284 = vmatpush3.bf16.msra.mxu0 %v15219_v18  ;;  %v15234_v23 = vld [vmem:[#allocation17 + $0x7c0] ss:$28 sps:$4 sm:$0xff]  }
 0x7b5   :  { %10738 = vmatprep.mubr.bf16.mxu0 %v16534_v16  ;;  %10505 = vmatprep.subr.bf16.mxu1 %v15222_v7  ;;  %v15285_v18 = vld [vmem:[#allocation17 + $0x6dc] ss:$28 sps:$4 sm:$0xff]  }
 0x7b6   :  { %13285 = vmatprep.subr.bf16.mxu0 %v15223_v21  ;;  %v15283_v7 = vld [vmem:[#allocation17 + $0x6d8] ss:$28 sps:$4 sm:$0xff]   ;;  %v15286_v21 = vld [vmem:[#allocation17 + $0xc20] ss:$28 sps:$4 sm:$0xff]  }
 0x7b7   :  { %10506 = vmatpush1.bf16.msra.mxu1 %v15220_v13  ;;  %v15289_v13 = vld [vmem:[#allocation17 + $0x714] ss:$28 sps:$4 sm:$0xff]  }
 0x7b8   :  { %13286 = vmatpush3.bf16.msra.mxu0 %v15224_v5  ;;  %10507 = vmatprep.subr.bf16.mxu1 %v15227_v0  ;;  %v15287_v5 = vld [vmem:[#allocation17 + $0x710] ss:$28 sps:$4 sm:$0xff]  }
 0x7b9   :  { %13287 = vmatprep.subr.bf16.mxu0 %v15228_v44  ;;  %v15292_v0 = vld [vmem:[#allocation17 + $0x74c] ss:$28 sps:$4 sm:$0xff]  }
 0x7ba   :  { %v15290_v44 = vld [vmem:[#allocation17 + $0x748] ss:$28 sps:$4 sm:$0xff]  }
 0x7bb   :  { %10508 = vmatpush1.bf16.msra.mxu1 %v15225_v39  ;;  %v15295_v39 = vld [vmem:[#allocation17 + $0x784] ss:$28 sps:$4 sm:$0xff]  }
 0x7bc   :  { %13288 = vmatpush3.bf16.msra.mxu0 %v15229_v3  ;;  %10509 = vmatprep.subr.bf16.mxu1 %v15232_v2  ;;  %v15293_v3 = vld [vmem:[#allocation17 + $0x780] ss:$28 sps:$4 sm:$0xff]  }
 0x7bd   :  { %13289 = vmatprep.subr.bf16.mxu0 %v15233_v30  ;;  %v15298_v2 = vld [vmem:[#allocation17 + $0x7bc] ss:$28 sps:$4 sm:$0xff]  }
 0x7be   :  { %v15296_v30 = vld [vmem:[#allocation17 + $0x7b8] ss:$28 sps:$4 sm:$0xff]  }
 0x7bf   :  { %10510 = vmatpush1.bf16.msra.mxu1 %v15230_v20  ;;  %v15301_v20 = vld [vmem:[#allocation17 + $0x7f4] ss:$28 sps:$4 sm:$0xff]  }
 0x7c0   :  { %13290 = vmatpush3.bf16.msra.mxu0 %v15234_v23  ;;  %10511 = vmatprep.subr.bf16.mxu1 %v15237_v34  ;;  %v15299_v23 = vld [vmem:[#allocation17 + $0x7f0] ss:$28 sps:$4 sm:$0xff]   ;;  %v15302_v34 = vld [vmem:[#allocation17 + $0x828] ss:$28 sps:$4 sm:$0xff]  }
 0x7c1   :  { %13291 = vmatprep.subr.bf16.mxu0 %v15238_v14  ;;  %v15307_v14 = vld [vmem:[#allocation17 + $0x864] ss:$28 sps:$4 sm:$0xff]  }
 0x7c3   :  { %10512 = vmatpush1.bf16.msra.mxu1 %v15235_v33  ;;  %v15310_v33 = vld [vmem:[#allocation17 + $0x89c] ss:$28 sps:$4 sm:$0xff]  }
 0x7c4   :  { %13292 = vmatpush3.bf16.msra.mxu0 %v15239_v6  ;;  %10513 = vmatprep.subr.bf16.mxu1 %v15242_v9  ;;  %v15308_v6 = vld [vmem:[#allocation17 + $0x898] ss:$28 sps:$4 sm:$0xff]  }
 0x7c5   :  { %13293 = vmatprep.subr.bf16.mxu0 %v15243_v37  ;;  %v15313_v9 = vld [vmem:[#allocation17 + $0x8d4] ss:$28 sps:$4 sm:$0xff]  }
 0x7c6   :  { %v15311_v37 = vld [vmem:[#allocation17 + $0x8d0] ss:$28 sps:$4 sm:$0xff]  }
 0x7c7   :  { %10514 = vmatpush1.bf16.msra.mxu1 %v15240_v61  ;;  %v15316_v61 = vld [vmem:[#allocation17 + $0x90c] ss:$28 sps:$4 sm:$0xff]  }
 0x7c8   :  { %13294 = vmatpush3.bf16.msra.mxu0 %v15244_v24  ;;  %10515 = vmatprep.subr.bf16.mxu1 %v15247_v58  ;;  %v15314_v24 = vld [vmem:[#allocation17 + $0x908] ss:$28 sps:$4 sm:$0xff]  }
 0x7c9   :  { %13295 = vmatprep.subr.bf16.mxu0 %v15248_v28  ;;  %v15319_v58 = vld [vmem:[#allocation17 + $0x944] ss:$28 sps:$4 sm:$0xff]  }
 0x7ca   :  { %v15317_v28 = vld [vmem:[#allocation17 + $0x940] ss:$28 sps:$4 sm:$0xff]  }
 0x7cb   :  { %10516 = vmatpush1.bf16.msra.mxu1 %v15245_v31  ;;  %v15322_v31 = vld [vmem:[#allocation17 + $0x97c] ss:$28 sps:$4 sm:$0xff]  }
 0x7cc   :  { %13296 = vmatpush3.bf16.msra.mxu0 %v15249_v36  ;;  %10517 = vmatprep.subr.bf16.mxu1 %v15252_v63  ;;  %v15320_v36 = vld [vmem:[#allocation17 + $0x978] ss:$28 sps:$4 sm:$0xff]  }
 0x7cd   :  { %13297 = vmatprep.subr.bf16.mxu0 %v15253_v42  ;;  %v15325_v63 = vld [vmem:[#allocation17 + $0x9b4] ss:$28 sps:$4 sm:$0xff]  }
 0x7ce   :  { %v15323_v42 = vld [vmem:[#allocation17 + $0x9b0] ss:$28 sps:$4 sm:$0xff]  }
 0x7cf   :  { %10518 = vmatpush1.bf16.msra.mxu1 %v15250_v52  ;;  %v15328_v52 = vld [vmem:[#allocation17 + $0x9ec] ss:$28 sps:$4 sm:$0xff]  }
 0x7d0   :  { %13298 = vmatpush3.bf16.msra.mxu0 %v15254_v35  ;;  %10519 = vmatprep.subr.bf16.mxu1 %v15257_v41  ;;  %v15326_v35 = vld [vmem:[#allocation17 + $0x9e8] ss:$28 sps:$4 sm:$0xff]  }
 0x7d1   :  { %13409 = vmatprep.subr.bf16.mxu0 %v15849_v32  ;;  %v15331_v41 = vld [vmem:[#allocation17 + $0xa24] ss:$28 sps:$4 sm:$0xff]  }
 0x7d3   :  { %10739 = vmatmul.mubr.bf16.vlgmr.msra.gmra.mrb[40].mxu0 %v16541_v12  ;;  %10520 = vmatpush1.bf16.msra.mxu1 %v15255_v47  ;;  %v15329_v47 = vld [vmem:[#allocation17 + $0xa20] ss:$28 sps:$4 sm:$0xff]  }
 0x7d4   :  { %13410 = vmatpush3.bf16.msra.mxu0 %v15258_v11  ;;  %10521 = vmatprep.subr.bf16.mxu1 %v15261_v29  ;;  %v15334_v11 = vld [vmem:[#allocation17 + $0xa5c] ss:$28 sps:$4 sm:$0xff]  }
 0x7d5   :  { %13411 = vmatprep.subr.bf16.mxu0 %v15849_v32  ;;  %13425 = vmatprep.mubr.msk.bf16.mxu0 %vm15850_vm0, %v15849_v32  ;;  %v15332_v29 = vld [vmem:[#allocation17 + $0xa58] ss:$28 sps:$4 sm:$0xff]  }
 0x7d7   :  { %10522 = vmatpush1.bf16.msra.mxu1 %v15259_v8  ;;  %v15337_v8 = vld [vmem:[#allocation17 + $0xa94] ss:$28 sps:$4 sm:$0xff]  }
 0x7d8   :  { %13412 = vmatpush3.bf16.msra.mxu0 %v15262_v38  ;;  %10523 = vmatprep.subr.bf16.mxu1 %v15265_v53  ;;  %v15335_v38 = vld [vmem:[#allocation17 + $0xa90] ss:$28 sps:$4 sm:$0xff]  }
 0x7d9   :  { %13413 = vmatprep.subr.bf16.mxu0 %v15849_v32  ;;  %v15340_v53 = vld [vmem:[#allocation17 + $0xacc] ss:$28 sps:$4 sm:$0xff]  }
 0x7db   :  { %10524 = vmatpush1.bf16.msra.mxu1 %v15263_v19  ;;  %v15338_v19 = vld [vmem:[#allocation17 + $0xac8] ss:$28 sps:$4 sm:$0xff]  }
 0x7dc   :  { %13414 = vmatpush3.bf16.msra.mxu0 %v15266_v4  ;;  %10525 = vmatprep.subr.bf16.mxu1 %v15269_v45  ;;  %v15343_v4 = vld [vmem:[#allocation17 + $0xb04] ss:$28 sps:$4 sm:$0xff]  }
 0x7dd   :  { %13415 = vmatprep.subr.bf16.mxu0 %v15849_v32  ;;  %v15341_v45 = vld [vmem:[#allocation17 + $0xb00] ss:$28 sps:$4 sm:$0xff]  }
 0x7df   :  { %10526 = vmatpush1.bf16.msra.mxu1 %v15267_v43  ;;  %v15346_v43 = vld [vmem:[#allocation17 + $0xb3c] ss:$28 sps:$4 sm:$0xff]  }
 0x7e0   :  { %13416 = vmatpush3.bf16.msra.mxu0 %v15270_v49  ;;  %10527 = vmatprep.subr.bf16.mxu1 %v15273_v50  ;;  %v15344_v49 = vld [vmem:[#allocation17 + $0xb38] ss:$28 sps:$4 sm:$0xff]  }
 0x7e1   :  { %13417 = vmatprep.subr.bf16.mxu0 %v15849_v32  ;;  %v15349_v50 = vld [vmem:[#allocation17 + $0xb74] ss:$28 sps:$4 sm:$0xff]  }
 0x7e3   :  { %10528 = vmatpush1.bf16.msra.mxu1 %v15271_v15  ;;  %v15347_v15 = vld [vmem:[#allocation17 + $0xb70] ss:$28 sps:$4 sm:$0xff]  }
 0x7e4   :  { %13418 = vmatpush3.bf16.msra.mxu0 %v15274_v51  ;;  %10529 = vmatprep.subr.bf16.mxu1 %v15277_v48  ;;  %v16576_v51 = vld [vmem:[#allocation19] sm:$0xff] }
 0x7e5   :  { %13419 = vmatprep.subr.bf16.mxu0 %v15849_v32  ;;  %v8086_v48 = vrot.slane %v16576_v51, %v16173_v22 }
 0x7e7   :  { %10530 = vmatpush1.bf16.msra.mxu1 %v15275_v55  ;;  %v8090_v55 = vrot.slane %v16576_v51, %v16179_v25 }
 0x7e8   :  { %13420 = vmatpush3.bf16.msra.mxu0 %v15278_v57  ;;  %10531 = vmatprep.subr.bf16.mxu1 %v15281_v17  ;;  %v15350_v57 = vld [vmem:[#allocation17 + $0xba8] ss:$28 sps:$4 sm:$0xff]   ;;  %v8098_v17 = vrot.slane %v16576_v51, %v16182_v26 }
 0x7e9   :  { %13421 = vmatprep.subr.bf16.mxu0 %v15849_v32 }
 0x7eb   :  { %10532 = vmatpush1.bf16.msra.mxu1 %v15279_v40  ;;  %v15355_v40 = vld [vmem:[#allocation17 + $0xbe4] ss:$28 sps:$4 sm:$0xff]  }
 0x7ec   :  { %13422 = vmatpush3.bf16.msra.mxu0 %v15282_v1  ;;  %10533 = vmatprep.subr.bf16.mxu1 %v15285_v18 }
 0x7ed   :  { %13423 = vmatprep.subr.bf16.mxu0 %v15849_v32 }
 0x7ef   :  { %10534 = vmatpush1.bf16.msra.mxu1 %v15283_v7 }
 0x7f0   :  { %13424 = vmatpush3.bf16.msra.mxu0 %v15286_v21  ;;  %10544 = vmatprep.subr.bf16.mxu1 %v15289_v13 }
 0x7f2   :  { %10536 = vmatmul.mubr.bf16.vlgmr.msra.gmra.mrb[32].mxu1 %v16532_v62  ;;  %v15304_v62 = vld [vmem:[#allocation17 + $0x82c] ss:$28 sps:$4 sm:$0xff]  }
 0x7f3   :  { %13426 = vmatmul.mubr.bf16.vlgmr.msra.gmra.mrb[44].mxu0 %v16548_v54  ;;  %10545 = vmatpush1.bf16.msra.mxu1 %v15287_v5 }
 0x7f4   :  { %10576 = vmatprep.mubr.bf16.mxu1 %v16534_v16  ;;  %10546 = vmatprep.subr.bf16.mxu1 %v15292_v0  ;;  %v15305_v16 = vld [vmem:[#allocation17 + $0x860] ss:$28 sps:$4 sm:$0xff]  }
 0x7f7   :  { %10547 = vmatpush1.bf16.msra.mxu1 %v15290_v44 }
 0x7f8   :  { %10548 = vmatprep.subr.bf16.mxu1 %v15295_v39  ;;  %v15353_v39 = vld [vmem:[#allocation17 + $0xbe0] ss:$28 sps:$4 sm:$0xff]  }
 0x7fb   :  { %10549 = vmatpush1.bf16.msra.mxu1 %v15293_v3 }
 0x7fc   :  { %10550 = vmatprep.subr.bf16.mxu1 %v15298_v2 }
 0x7ff   :  { %10551 = vmatpush1.bf16.msra.mxu1 %v15296_v30 }
 0x800   :  { %10552 = vmatprep.subr.bf16.mxu1 %v15301_v20 }
 0x803   :  { %10553 = vmatpush1.bf16.msra.mxu1 %v15299_v23 }
 0x804   :  { %10554 = vmatprep.subr.bf16.mxu1 %v15304_v62  ;;  %v15358_v62 = vld [vmem:[#allocation17 + $0xc1c] ss:$28 sps:$4 sm:$0xff]  }
 0x807   :  { %10555 = vmatpush1.bf16.msra.mxu1 %v15302_v34 }
 0x808   :  { %10556 = vmatprep.subr.bf16.mxu1 %v15307_v14 }
 0x80b   :  { %10557 = vmatpush1.bf16.msra.mxu1 %v15305_v16 }
 0x80c   :  { %10558 = vmatprep.subr.bf16.mxu1 %v15310_v33 }
 0x80f   :  { %10559 = vmatpush1.bf16.msra.mxu1 %v15308_v6 }
 0x810   :  { %10560 = vmatprep.subr.bf16.mxu1 %v15313_v9 }
 0x813   :  { %10561 = vmatpush1.bf16.msra.mxu1 %v15311_v37 }
 0x814   :  { %10562 = vmatprep.subr.bf16.mxu1 %v15316_v61 }
 0x817   :  { %10563 = vmatpush1.bf16.msra.mxu1 %v15314_v24 }
 0x818   :  { %10564 = vmatprep.subr.bf16.mxu1 %v15319_v58 }
 0x81b   :  { %10565 = vmatpush1.bf16.msra.mxu1 %v15317_v28 }
 0x81c   :  { %10566 = vmatprep.subr.bf16.mxu1 %v15322_v31 }
 0x81f   :  { %10567 = vmatpush1.bf16.msra.mxu1 %v15320_v36 }
 0x820   :  { %10568 = vmatprep.subr.bf16.mxu1 %v15325_v63  ;;  %v15356_v63 = vld [vmem:[#allocation17 + $0xc18] ss:$28 sps:$4 sm:$0xff]  }
 0x823   :  { %10569 = vmatpush1.bf16.msra.mxu1 %v15323_v42 }
 0x824   :  { %10570 = vmatprep.subr.bf16.mxu1 %v15328_v52 }
 0x827   :  { %10571 = vmatpush1.bf16.msra.mxu1 %v15326_v35 }
 0x828   :  { %10572 = vmatprep.subr.bf16.mxu1 %v15331_v41 }
 0x82b   :  { %10573 = vmatpush1.bf16.msra.mxu1 %v15329_v47 }
 0x82c   :  { %10574 = vmatprep.subr.bf16.mxu1 %v15334_v11 }
 0x82f   :  { %10575 = vmatpush1.bf16.msra.mxu1 %v15332_v29 }
 0x830   :  { %10585 = vmatprep.subr.bf16.mxu1 %v15337_v8 }
 0x832   :  { %10577 = vmatmul.mubr.bf16.vlgmr.msra.gmra.mrb[32].mxu1 %v16541_v12  ;;  %v15352_v12 = vld [vmem:[#allocation17 + $0xbac] ss:$28 sps:$4 sm:$0xff]  }
 0x833   :  { %10586 = vmatpush1.bf16.msra.mxu1 %v15335_v38  ;;  %10617 = vmatprep.mubr.bf16.mxu1 %v15848_v10  ;;  %v8094_v10 = vrot.slane %v16576_v51, %v16176_v27 }
 0x834   :  { %10587 = vmatprep.subr.bf16.mxu1 %v15340_v53 }
 0x837   :  { %10588 = vmatpush1.bf16.msra.mxu1 %v15338_v19 }
 0x838   :  { %10589 = vmatprep.subr.bf16.mxu1 %v15343_v4 }
 0x83b   :  { %10590 = vmatpush1.bf16.msra.mxu1 %v15341_v45 }
 0x83c   :  { %10591 = vmatprep.subr.bf16.mxu1 %v15346_v43 }
 0x83f   :  { %10592 = vmatpush1.bf16.msra.mxu1 %v15344_v49 }
 0x840   :  { %10593 = vmatprep.subr.bf16.mxu1 %v15349_v50 }
 0x843   :  { %10594 = vmatpush1.bf16.msra.mxu1 %v15347_v15 }
 0x844   :  { %10595 = vmatprep.subr.bf16.mxu1 %v15352_v12 }
 0x845   :  { %v10291_v1 = vpop.f32.mrb[28].mxu1 }
 0x846   :  { %v16586_v18 = vadd.f32 %v10291_v1, %v8086_v48  ;;  %v10455_v7 = vpop.f32.mrb[28].mxu0  ;;  %v10293_v21 = vpop.f32.mrb[29].mxu1 }
 0x847   :  { %v16588_v13 = vadd.f32 %v10455_v7, %v8094_v10  ;;  %v16590_v5 = vadd.f32 %v10293_v21, %v8090_v55  ;;  %v10457_v0 = vpop.f32.mrb[29].mxu0  ;;  %v10295_v44 = vpop.f32.mrb[30].mxu1  ;;  %10596 = vmatpush1.bf16.msra.mxu1 %v15350_v57 }
 0x848   :  { %v10786_v3 = vrot.slane %v16586_v18, 4  ;;  %v10828_v2 = vmul.f32 %v16586_v18, %v16586_v18  ;;  %v16595_v30 = vadd.f32 %v10457_v0, %v8098_v17  ;;  %v10459_v20 = vpop.f32.mrb[30].mxu0  ;;  %v10296_v23 = vpop.f32.mrb[31].mxu1  ;;  %10597 = vmatprep.subr.bf16.mxu1 %v15355_v40 }
 0x849   :  { %v10798_v34 = vrot.slane %v16588_v13, 4  ;;  %v10830_v14 = vmul.f32 %v16588_v13, %v16588_v13  ;;  %v10792_v16 = vrot.slane %v16590_v5, 4  ;;  %v10829_v33 = vmul.f32 %v16590_v5, %v16590_v5  ;;  %v10460_v6 = vpop.f32.mrb[31].mxu0 }
 0x84a   :  { %v10787_v9 = vadd.f32 %v16586_v18, %v10786_v3  ;;  %v10835_v37 = vrot.slane %v10828_v2, 4  ;;  %v10804_v61 = vrot.slane %v16595_v30, 4  ;;  %v10831_v24 = vmul.f32 %v16595_v30, %v16595_v30 }
 0x84b   :  { %v10799_v58 = vadd.f32 %v16588_v13, %v10798_v34  ;;  %v10847_v28 = vrot.slane %v10830_v14, 4  ;;  %v10793_v31 = vadd.f32 %v16590_v5, %v10792_v16  ;;  %v10841_v36 = vrot.slane %v10829_v33, 4  ;;  %10598 = vmatpush1.bf16.msra.mxu1 %v15353_v39 }
 0x84c   :  { %v10788_v42 = vrot.slane %v10787_v9, 2  ;;  %v10836_v52 = vadd.f32 %v10835_v37, %v10828_v2  ;;  %v10805_v35 = vadd.f32 %v16595_v30, %v10804_v61  ;;  %v10853_v41 = vrot.slane %v10831_v24, 4  ;;  %10599 = vmatprep.subr.bf16.mxu1 %v15358_v62 }
 0x84d   :  { %v10800_v47 = vrot.slane %v10799_v58, 2  ;;  %v10848_v11 = vadd.f32 %v10847_v28, %v10830_v14  ;;  %v10794_v29 = vrot.slane %v10793_v31, 2  ;;  %v10842_v8 = vadd.f32 %v10841_v36, %v10829_v33 }
 0x84e   :  { %v10789_v38 = vadd.f32 %v10788_v42, %v10787_v9  ;;  %v10837_v53 = vrot.slane %v10836_v52, 2  ;;  %v10806_v19 = vrot.slane %v10805_v35, 2  ;;  %v10854_v4 = vadd.f32 %v10853_v41, %v10831_v24 }
 0x84f   :  { %v10801_v45 = vadd.f32 %v10800_v47, %v10799_v58  ;;  %v10849_v43 = vrot.slane %v10848_v11, 2  ;;  %v10795_v49 = vadd.f32 %v10794_v29, %v10793_v31  ;;  %v10843_v50 = vrot.slane %v10842_v8, 2  ;;  %10600 = vmatpush1.bf16.msra.mxu1 %v15356_v63 }
 0x850   :  { %v10790_v15 = vrot.slane %v10789_v38, 1  ;;  %v10838_v12 = vadd.f32 %v10837_v53, %v10836_v52  ;;  %v10807_v48 = vadd.f32 %v10806_v19, %v10805_v35  ;;  %v10855_v10 = vrot.slane %v10854_v4, 2  ;;  %13429 = vmatprep.subr.bf16.mxu1 %v15849_v32 }
 0x851   :  { %v10802_v55 = vrot.slane %v10801_v45, 1  ;;  %v10850_v57 = vadd.f32 %v10849_v43, %v10848_v11  ;;  %v10796_v17 = vrot.slane %v10795_v49, 1  ;;  %v10844_v40 = vadd.f32 %v10843_v50, %v10842_v8 }
 0x852   :  { %v10791_v1 = vadd.f32 %v10790_v15, %v10789_v38  ;;  %v10839_v7 = vrot.slane %v10838_v12, 1  ;;  %v10808_v21 = vrot.slane %v10807_v48, 1  ;;  %v10856_v0 = vadd.f32 %v10855_v10, %v10854_v4  ;;  %10618 = vmatmul.mubr.bf16.vlgmr.msra.gmra.mrb[32].mxu1 %v16548_v54 }
 0x853   :  { %v10803_v44 = vadd.f32 %v10802_v55, %v10801_v45  ;;  %v10851_v39 = vrot.slane %v10850_v57, 1  ;;  %v10797_v3 = vadd.f32 %v10796_v17, %v10795_v49  ;;  %v10845_v2 = vrot.slane %v10844_v40, 1  ;;  %13445 = vmatprep.mubr.msk.bf16.mxu1 %vm15850_vm0, %v15849_v32 }
 0x854   :  { %v10840_v20 = vadd.f32 %v10839_v7, %v10838_v12  ;;  %v16614_v23 = vmul.f32 0.125, %v10791_v1  ;;  %v10809_v62 = vadd.f32 %v10808_v21, %v10807_v48  ;;  %v10857_v34 = vrot.slane %v10856_v0, 1 }
 0x855   :  { %v10852_v14 = vadd.f32 %v10851_v39, %v10850_v57  ;;  %v16616_v16 = vmul.f32 0.125, %v10803_v44  ;;  %v10846_v33 = vadd.f32 %v10845_v2, %v10844_v40  ;;  %v16618_v6 = vmul.f32 0.125, %v10797_v3 }
 0x856   :  { %v10884_v9 = vmul.f32 0.125, %v10840_v20  ;;  %v10891_v54 = vmul.f32 %v16614_v23, %v16614_v23  ;;  %v10858_v37 = vadd.f32 %v10857_v34, %v10856_v0  ;;  %v16622_v61 = vmul.f32 0.125, %v10809_v62 }
 0x857   :  { %v10886_v24 = vmul.f32 0.125, %v10852_v14  ;;  %v10893_v58 = vmul.f32 %v16616_v16, %v16616_v16  ;;  %v10885_v28 = vmul.f32 0.125, %v10846_v33  ;;  %v10892_v31 = vmul.f32 %v16618_v6, %v16618_v6 }
 0x858   :  { %v10898_v36 = vsub.f32 %v10884_v9, %v10891_v54  ;;  %v10887_v63 = vmul.f32 0.125, %v10858_v37  ;;  %v10894_v42 = vmul.f32 %v16622_v61, %v16622_v61  ;;  %v8110_v21 = vrot.slane %v16576_v51, %v16245_v56 }
 0x859   :  { %v10900_v52 = vsub.f32 %v10886_v24, %v10893_v58  ;;  %v10899_v35 = vsub.f32 %v10885_v28, %v10892_v31 }
 0x85a   :  { %v10905_v41 = vmax.f32 %v10898_v36, 0.0  ;;  %v10901_v47 = vsub.f32 %v10887_v63, %v10894_v42  ;;  %v15359_v63 = vld [vmem:[#allocation23 + $0x40] sm:$0xff]  }
 0x85b   :  { %v10907_v11 = vmax.f32 %v10900_v52, 0.0  ;;  %v10906_v29 = vmax.f32 %v10899_v35, 0.0  ;;  %v15360_v42 = vld [vmem:[#allocation23] sm:$0xff]   ;;  %13314 = vmatprep.subr.bf16.mxu0 %v15359_v63  ;;  %v15362_v35 = vld [vmem:[#allocation23 + $0x48] sm:$0xff]  }
 0x85c   :  { %v10913_v8 = vadd.f32 1e-05, %v10905_v41  ;;  %v10908_v38 = vmax.f32 %v10901_v47, 0.0  ;;  %v15361_v52 = vld [vmem:[#allocation23 + $0x180] sm:$0xff]   ;;  %13315 = vmatpush3.bf16.msra.mxu0 %v15360_v42  ;;  %v15363_v41 = vld [vmem:[#allocation23 + $0x8] sm:$0xff]  }
 0x85d   :  { %v10915_v53 = vadd.f32 1e-05, %v10907_v11  ;;  %v10914_v19 = vadd.f32 1e-05, %v10906_v29  ;;  %13430 = vmatpush3.bf16.msra.mxu1 %v15361_v52  ;;  %v15364_v47 = vld [vmem:[#allocation23 + $0x188] sm:$0xff]   ;;  %13316 = vmatprep.subr.bf16.mxu0 %v15362_v35  ;;  %v15365_v11 = vld [vmem:[#allocation23 + $0x50] sm:$0xff]  }
 0x85e   :  { %15443 = vrsqrt.f32 %v10913_v8  ;;  %v10916_v4 = vadd.f32 1e-05, %v10908_v38  ;;  %13431 = vmatprep.subr.bf16.mxu1 %v15849_v32  ;;  %v15366_v29 = vld [vmem:[#allocation23 + $0x10] sm:$0xff]   ;;  %v15368_v38 = vld [vmem:[#allocation23 + $0x58] sm:$0xff]  }
 0x85f   :  { %15445 = vrsqrt.f32 %v10915_v53  ;;  %v15367_v8 = vld [vmem:[#allocation23 + $0x190] sm:$0xff]   ;;  %v15369_v53 = vld [vmem:[#allocation23 + $0x18] sm:$0xff]  }
 0x860   :  { %15447 = vrsqrt.f32 %v10916_v4  ;;  %13317 = vmatpush3.bf16.msra.mxu0 %v15363_v41  ;;  %v15371_v4 = vld [vmem:[#allocation23 + $0x60] sm:$0xff]  }
 0x861   :  { %15449 = vrsqrt.f32 %v10914_v19  ;;  %13432 = vmatpush3.bf16.msra.mxu1 %v15364_v47  ;;  %13318 = vmatprep.subr.bf16.mxu0 %v15365_v11  ;;  %v15370_v19 = vld [vmem:[#allocation23 + $0x198] sm:$0xff]  }
 0x862   :  { %13433 = vmatprep.subr.bf16.mxu1 %v15849_v32 }
 0x864   :  { %13319 = vmatpush3.bf16.msra.mxu0 %v15366_v29 }
 0x865   :  { %13434 = vmatpush3.bf16.msra.mxu1 %v15367_v8  ;;  %13320 = vmatprep.subr.bf16.mxu0 %v15368_v38 }
 0x866   :  { %v13255_v45 = vpop.f32.mrb[32].mxu0  ;;  %13435 = vmatprep.subr.bf16.mxu1 %v15849_v32 }
 0x867   :  { %v13256_v43 = vpop.f32.mrb[33].mxu0 }
 0x868   :  { %v15444_v49 = vpop.eup %15443  ;;  %v13257_v50 = vadd.f32 %v13256_v43, %v13255_v45  ;;  %v13258_v15 = vpop.f32.mrb[34].mxu0  ;;  %13321 = vmatpush3.bf16.msra.mxu0 %v15369_v53  ;;  %v15372_v45 = vld [vmem:[#allocation23 + $0x20] sm:$0xff]  }
 0x869   :  { %v15446_v12 = vpop.eup %15445  ;;  %v13259_v48 = vpop.f32.mrb[35].mxu0  ;;  %13436 = vmatpush3.bf16.msra.mxu1 %v15370_v19  ;;  %v15373_v43 = vld [vmem:[#allocation23 + $0x1a0] sm:$0xff]   ;;  %13322 = vmatprep.subr.bf16.mxu0 %v15371_v4  ;;  %v15376_v15 = vld [vmem:[#allocation23 + $0x1a8] sm:$0xff]  }
 0x86a   :  { %v15448_v10 = vpop.eup %15447  ;;  %v10661_v39 = vadd.f32 %v13257_v50, %v8110_v21  ;;  %13437 = vmatprep.subr.bf16.mxu1 %v15849_v32  ;;  %v15375_v50 = vld [vmem:[#allocation23 + $0x28] sm:$0xff]   ;;  %v15378_v48 = vld [vmem:[#allocation23 + $0x30] sm:$0xff]   ;;  %v15383_v21 = vld [vmem:[#allocation23 + $0xc0] sm:$0xff]  }
 0x86b   :  { %v15450_v55 = vpop.eup %15449  ;;  %v10935_v57 = vcombine.low %v15446_v12, %v15448_v10  ;;  %v15377_v12 = vld [vmem:[#allocation23 + $0x70] sm:$0xff]  }
 0x86c   :  { %v10934_v17 = vcombine.low %v15444_v49, %v15450_v55  ;;  %v15374_v49 = vld [vmem:[#allocation23 + $0x68] sm:$0xff]   ;;  %13323 = vmatpush3.bf16.msra.mxu0 %v15372_v45  ;;  %v15379_v10 = vld [vmem:[#allocation23 + $0x1b0] sm:$0xff]   ;;  %v15380_v55 = vld [vmem:[#allocation23 + $0x78] sm:$0xff]  }
 0x86d   :  { %v16631_v40 = vrot.slane %v10935_v57, %v16233_v46  ;;  %13438 = vmatpush3.bf16.msra.mxu1 %v15373_v43  ;;  %13324 = vmatprep.subr.bf16.mxu0 %v15374_v49  ;;  %v15381_v57 = vld [vmem:[#allocation23 + $0x38] sm:$0xff]  }
 0x86e   :  { %v16634_v1 = vrot.slane %v10934_v17, %v16233_v46  ;;  %13439 = vmatprep.subr.bf16.mxu1 %v15849_v32  ;;  %v15382_v17 = vld [vmem:[#allocation23 + $0x1b8] sm:$0xff]  }
 0x870   :  { %v10965_v7 = vcombine.low %v16634_v1, %v16631_v40  ;;  %13325 = vmatpush3.bf16.msra.mxu0 %v15375_v50 }
 0x871   :  { %13440 = vmatpush3.bf16.msra.mxu1 %v15376_v15  ;;  %13326 = vmatprep.subr.bf16.mxu0 %v15377_v12 }
 0x872   :  { %13441 = vmatprep.subr.bf16.mxu1 %v15849_v32 }
 0x874   :  { %13327 = vmatpush3.bf16.msra.mxu0 %v15378_v48 }
 0x875   :  { %13442 = vmatpush3.bf16.msra.mxu1 %v15379_v10  ;;  %13328 = vmatprep.subr.bf16.mxu0 %v15380_v55 }
 0x876   :  { %13443 = vmatprep.subr.bf16.mxu1 %v15849_v32  ;;  %v8102_v32 = vrot.slane %v16576_v51, %v16256_v59 }
 0x878   :  { %13329 = vmatpush3.bf16.msra.mxu0 %v15381_v57 }
 0x879   :  { %13444 = vmatpush3.bf16.msra.mxu1 %v15382_v17  ;;  %13336 = vmatprep.subr.bf16.mxu0 %v15383_v21 }
 0x886   :  { %v13277_v0 = vpop.f32.mrb[36].mxu0 }
 0x887   :  { %v13278_v44 = vpop.f32.mrb[37].mxu0 }
 0x888   :  { %v13279_v3 = vadd.f32 %v13278_v44, %v13277_v0  ;;  %v13280_v2 = vpop.f32.mrb[38].mxu0 }
 0x889   :  { %v13281_v20 = vpop.f32.mrb[39].mxu0 }
 0x88a   :  { %v10701_v62 = vadd.f32 %v13279_v3, %v10661_v39 }
 0x8a6   :  { %v13299_v34 = vpop.f32.mrb[40].mxu0 }
 0x8a7   :  { %v13300_v14 = vpop.f32.mrb[41].mxu0 }
 0x8a8   :  { %v13301_v33 = vadd.f32 %v13300_v14, %v13299_v34  ;;  %v13302_v9 = vpop.f32.mrb[42].mxu0 }
 0x8a9   :  { %v13303_v54 = vpop.f32.mrb[43].mxu0  ;;  %v8106_v9 = vrot.slane %v16576_v51, %v16259_v60 }
 0x8aa   :  { %v10741_v37 = vadd.f32 %v13301_v33, %v10701_v62 }
 0x8c6   :  { %v10780_v24 = vpop.f32.mrb[44].mxu0 }
 0x8c7   :  { %v16640_v58 = vadd.f32 %v10780_v24, %v10741_v37  ;;  %v13427_v28 = vpop.f32.mrb[45].mxu0 }
 0x8c8   :  { %v10783_v31 = vpop.f32.mrb[46].mxu0 }
 0x8c9   :  { %v13428_v36 = vpop.f32.mrb[47].mxu0  ;;  %v10822_v0 = vrot.slane %v16640_v58, 4  ;;  %v10834_v44 = vmul.f32 %v16640_v58, %v16640_v58 }
 0x8cb   :  { %v10823_v39 = vadd.f32 %v10822_v0, %v16640_v58  ;;  %v10871_v3 = vrot.slane %v10834_v44, 4 }
 0x8cd   :  { %v10824_v2 = vrot.slane %v10823_v39, 2  ;;  %v10872_v20 = vadd.f32 %v10871_v3, %v10834_v44 }
 0x8cf   :  { %v10825_v62 = vadd.f32 %v10824_v2, %v10823_v39  ;;  %v10873_v34 = vrot.slane %v10872_v20, 2 }
 0x8d1   :  { %v10826_v14 = vrot.slane %v10825_v62, 1  ;;  %v10874_v33 = vadd.f32 %v10873_v34, %v10872_v20 }
 0x8d3   :  { %v10827_v54 = vadd.f32 %v10826_v14, %v10825_v62  ;;  %v10875_v37 = vrot.slane %v10874_v33, 1 }
 0x8d5   :  { %v10876_v41 = vadd.f32 %v10875_v37, %v10874_v33  ;;  %v16664_v47 = vmul.f32 0.125, %v10827_v54 }
 0x8d7   :  { %v10890_v45 = vmul.f32 0.125, %v10876_v41  ;;  %v10897_v43 = vmul.f32 %v16664_v47, %v16664_v47 }
 0x8d9   :  { %v10904_v17 = vsub.f32 %v10890_v45, %v10897_v43  ;;  %v10973_v45 = vrot.slane %v10965_v7, %v16233_v46  ;;  %v10912_v43 = vld [vmem:[#allocation20] sm:$0xff] }
 0x8db   :  { %v10911_v34 = vmax.f32 %v10904_v17, 0.0 }
 0x925   :  { %v10619_v24 = vpop.f32.mrb[32].mxu1 }
 0x926   :  { %v16657_v28 = vadd.f32 %v10619_v24, %v8102_v32  ;;  %v10621_v31 = vpop.f32.mrb[33].mxu1 }
 0x927   :  { %v16659_v36 = vadd.f32 %v10621_v31, %v8106_v9  ;;  %v10623_v63 = vpop.f32.mrb[34].mxu1  ;;  %v10919_v31 = vadd.f32 1e-05, %v10911_v34 }
 0x928   :  { %v10810_v42 = vrot.slane %v16657_v28, 4  ;;  %v10832_v52 = vmul.f32 %v16657_v28, %v16657_v28  ;;  %v10624_v35 = vpop.f32.mrb[35].mxu1 }
 0x929   :  { %v10816_v51 = vrot.slane %v16659_v36, 4  ;;  %v10833_v11 = vmul.f32 %v16659_v36, %v16659_v36  ;;  %15451 = vrsqrt.f32 %v10919_v31 }
 0x92a   :  { %v10811_v29 = vadd.f32 %v16657_v28, %v10810_v42  ;;  %v10859_v8 = vrot.slane %v10832_v52, 4 }
 0x92b   :  { %v10817_v38 = vadd.f32 %v16659_v36, %v10816_v51  ;;  %v10865_v53 = vrot.slane %v10833_v11, 4 }
 0x92c   :  { %v10812_v19 = vrot.slane %v10811_v29, 2  ;;  %v10860_v4 = vadd.f32 %v10859_v8, %v10832_v52 }
 0x92d   :  { %v10818_v49 = vrot.slane %v10817_v38, 2  ;;  %v10866_v50 = vadd.f32 %v10865_v53, %v10833_v11 }
 0x92e   :  { %v10813_v15 = vadd.f32 %v10812_v19, %v10811_v29  ;;  %v10861_v12 = vrot.slane %v10860_v4, 2 }
 0x92f   :  { %v10819_v48 = vadd.f32 %v10818_v49, %v10817_v38  ;;  %v10867_v10 = vrot.slane %v10866_v50, 2 }
 0x930   :  { %v10814_v55 = vrot.slane %v10813_v15, 1  ;;  %v10862_v57 = vadd.f32 %v10861_v12, %v10860_v4 }
 0x931   :  { %v10820_v21 = vrot.slane %v10819_v48, 1  ;;  %v10868_v0 = vadd.f32 %v10867_v10, %v10866_v50 }
 0x932   :  { %v10815_v44 = vadd.f32 %v10814_v55, %v10813_v15  ;;  %v10863_v39 = vrot.slane %v10862_v57, 1 }
 0x933   :  { %v10821_v3 = vadd.f32 %v10820_v21, %v10819_v48  ;;  %v10869_v2 = vrot.slane %v10868_v0, 1  ;;  %v15452_v51 = vpop.eup %15451 }
 0x934   :  { %v10864_v20 = vadd.f32 %v10863_v39, %v10862_v57  ;;  %v10881_v62 = vmul.f32 0.125, %v10815_v44  ;;  %v10964_v38 = vrot.slane %v15452_v51, %v16233_v46 }
 0x935   :  { %v10870_v14 = vadd.f32 %v10869_v2, %v10868_v0  ;;  %v10882_v33 = vmul.f32 0.125, %v10821_v3 }
 0x936   :  { %v10888_v32 = vmul.f32 0.125, %v10864_v20  ;;  %v10895_v9 = vmul.f32 %v10881_v62, %v10881_v62 }
 0x937   :  { %v10889_v54 = vmul.f32 0.125, %v10870_v14  ;;  %v10896_v37 = vmul.f32 %v10882_v33, %v10882_v33 }
 0x938   :  { %v10902_v24 = vsub.f32 %v10888_v32, %v10895_v9 }
 0x939   :  { %v10903_v63 = vsub.f32 %v10889_v54, %v10896_v37  ;;  %v10984_v54 = vld [vmem:[#allocation22] sm:$0xff] }
 0x93a   :  { %v10909_v42 = vmax.f32 %v10902_v24, 0.0 }
 0x93b   :  { %v10910_v52 = vmax.f32 %v10903_v63, 0.0 }
 0x93c   :  { %v10917_v35 = vadd.f32 1e-05, %v10909_v42 }
 0x93d   :  { %v10918_v41 = vadd.f32 1e-05, %v10910_v52 }
 0x93e   :  { %15453 = vrsqrt.f32 %v10917_v35 }
 0x93f   :  { %15455 = vrsqrt.f32 %v10918_v41 }
 0x948   :  { %v15454_v11 = vpop.eup %15453 }
 0x949   :  { %v15456_v29 = vpop.eup %15455 }
 0x94a   :  { %v10936_v8 = vcombine.low %v15454_v11, %v15456_v29 }
 0x94c   :  { %v10957_v53 = vrot.slane %v10936_v8, %v16233_v46 }
 0x94e   :  { %v10966_v19 = vcombine.low %v10957_v53, %v10964_v38 }
 0x950   :  { %v10980_v4 = vrot.slane %v10966_v19, %v16233_v46 }
 0x952   :  { %v10981_v49 = vcombine.low %v10973_v45, %v10980_v4  ;;  %v15385_v4 = vld [vmem:[#allocation23 + $0xc8] sm:$0xff]   ;;  %v15387_v45 = vld [vmem:[#allocation23 + $0xd0] sm:$0xff]  }
 0x954   :  { %v10983_v50 = vmul.f32 %v10981_v49, %v10912_v43  ;;  %v15388_v43 = vld [vmem:[#allocation23 + $0x90] sm:$0xff]   ;;  %v15389_v49 = vld [vmem:[#allocation23 + $0xd8] sm:$0xff]  }
 0x956   :  { %v10989_v15 = vrot.slane %v10983_v50, %v16173_v22  ;;  %v10993_v12 = vrot.slane %v10983_v50, %v16179_v25  ;;  %v10997_v48 = vrot.slane %v10983_v50, %v16176_v27  ;;  %v11001_v10 = vrot.slane %v10983_v50, %v16182_v26 }
 0x957   :  { %v11005_v55 = vrot.slane %v10983_v50, %v16256_v59  ;;  %v11009_v57 = vrot.slane %v10983_v50, %v16259_v60  ;;  %v11013_v17 = vrot.slane %v10983_v50, %v16245_v56  ;;  %v15390_v50 = vld [vmem:[#allocation23 + $0x98] sm:$0xff]  }
 0x958   :  { %v11021_v40 = vmul.f32 %v10989_v15, %v16614_v23  ;;  %v11022_v1 = vmul.f32 %v10993_v12, %v16618_v6  ;;  %v11023_v7 = vmul.f32 %v10997_v48, %v16616_v16  ;;  %v11024_v21 = vmul.f32 %v11001_v10, %v16622_v61 }
 0x959   :  { %v11025_v0 = vmul.f32 %v11005_v55, %v10881_v62  ;;  %v11026_v44 = vmul.f32 %v11009_v57, %v10882_v33  ;;  %v11027_v39 = vmul.f32 %v11013_v17, %v16664_v47  ;;  %v11086_v3 = vmul.f32 %v16590_v5, %v10993_v12  ;;  %v15392_v12 = vld [vmem:[#allocation23 + $0xa0] sm:$0xff]  }
 0x95a   :  { %v11035_v2 = vcombine.low %v11021_v40, %v11022_v1  ;;  %v11036_v20 = vcombine.low %v11023_v7, %v11024_v21  ;;  %v11091_v34 = vmul.f32 %v11013_v17, %v16640_v58  ;;  %v11085_v14 = vmul.f32 %v16586_v18, %v10989_v15  ;;  %v15391_v15 = vld [vmem:[#allocation23 + $0xe0] sm:$0xff]   ;;  %v15397_v17 = vld [vmem:[#allocation23 + $0xf8] sm:$0xff]  }
 0x95b   :  { %v11037_v32 = vcombine.low %v11025_v0, %v11026_v44  ;;  %v11088_v23 = vmul.f32 %v16595_v30, %v11001_v10  ;;  %v11090_v61 = vmul.f32 %v16659_v36, %v11009_v57  ;;  %v11089_v62 = vmul.f32 %v16657_v28, %v11005_v55  ;;  %v15394_v10 = vld [vmem:[#allocation23 + $0xa8] sm:$0xff]   ;;  %v15395_v55 = vld [vmem:[#allocation23 + $0xf0] sm:$0xff]   ;;  %v15398_v40 = vld [vmem:[#allocation23 + $0xb8] sm:$0xff]  }
 0x95c   :  { %v11044_v6 = vrot.slane %v11035_v2, %v16233_v46  ;;  %v11051_v16 = vrot.slane %v11036_v20, %v16233_v46  ;;  %v11065_v5 = vrot.slane %v11027_v39, %v16233_v46  ;;  %v11087_v63 = vmul.f32 %v16588_v13, %v10997_v48  ;;  %v15393_v48 = vld [vmem:[#allocation23 + $0xe8] sm:$0xff]   ;;  %v15396_v57 = vld [vmem:[#allocation23 + $0xb0] sm:$0xff]   ;;  %v15399_v7 = vld [vmem:[#allocation23 + $0x140] sm:$0xff]  }
 0x95d   :  { %v11058_v47 = vrot.slane %v11037_v32, %v16233_v46  ;;  %v15400_v0 = vld [vmem:[#allocation23 + $0x100] sm:$0xff]   ;;  %v15401_v39 = vld [vmem:[#allocation23 + $0x148] sm:$0xff]   ;;  %v15403_v20 = vld [vmem:[#allocation23 + $0x150] sm:$0xff]  }
 0x95e   :  { %v11066_v33 = vcombine.low %v11044_v6, %v11051_v16  ;;  %v15402_v2 = vld [vmem:[#allocation23 + $0x108] sm:$0xff]   ;;  %v15406_v32 = vld [vmem:[#allocation23 + $0x118] sm:$0xff]   ;;  %v15408_v6 = vld [vmem:[#allocation23 + $0x120] sm:$0xff]  }
 0x95f   :  { %v11067_v9 = vcombine.low %v11058_v47, %v11065_v5  ;;  %v15409_v16 = vld [vmem:[#allocation23 + $0x168] sm:$0xff]   ;;  %v15412_v47 = vld [vmem:[#allocation23 + $0x130] sm:$0xff]   ;;  %v15413_v5 = vld [vmem:[#allocation23 + $0x178] sm:$0xff]  }
 0x960   :  { %v11074_v58 = vrot.slane %v11066_v33, %v16233_v46  ;;  %v15414_v33 = vld [vmem:[#allocation23 + $0x138] sm:$0xff]  }
 0x961   :  { %v11081_v18 = vrot.slane %v11067_v9, %v16233_v46 }
 0x963   :  { %v11082_v30 = vcombine.low %v11074_v58, %v11081_v18 }
 0x965   :  { %v11084_v37 = vsub.f32 %v10984_v54, %v11082_v30 }
 0x967   :  { %v11100_v24 = vrot.slane %v11084_v37, %v16179_v25  ;;  %v11120_v31 = vrot.slane %v11084_v37, %v16245_v56  ;;  %v11096_v36 = vrot.slane %v11084_v37, %v16173_v22  ;;  %v11108_v28 = vrot.slane %v11084_v37, %v16182_v26 }
 0x968   :  { %v11104_v42 = vrot.slane %v11084_v37, %v16176_v27  ;;  %v11116_v52 = vrot.slane %v11084_v37, %v16259_v60  ;;  %v11112_v35 = vrot.slane %v11084_v37, %v16256_v59  ;;  %v15384_v27 = vld [vmem:[#allocation23 + $0x80] sm:$0xff]   ;;  %v15386_v60 = vld [vmem:[#allocation23 + $0x88] sm:$0xff]  }
 0x969   :  { %v11129_v46 = vadd.f32 %v11100_v24, %v11086_v3  ;;  %v11134_v41 = vadd.f32 %v11120_v31, %v11091_v34  ;;  %v11128_v51 = vadd.f32 %v11096_v36, %v11085_v14  ;;  %v11131_v11 = vadd.f32 %v11108_v28, %v11088_v23  ;;  %v15404_v34 = vld [vmem:[#allocation23 + $0x110] sm:$0xff]   ;;  %v15405_v14 = vld [vmem:[#allocation23 + $0x158] sm:$0xff]   ;;  %v15407_v23 = vld [vmem:[#allocation23 + $0x160] sm:$0xff]  }
 0x96a   :  { %v11130_v29 = vadd.f32 %v11104_v42, %v11087_v63  ;;  %v11133_v25 = vadd.f32 %v11116_v52, %v11090_v61  ;;  %v16712_v8 = vadd.f32 %v11112_v35, %v11089_v62  ;;  %v15410_v61 = vld [vmem:[#allocation23 + $0x128] sm:$0xff]   ;;  %v15411_v62 = vld [vmem:[#allocation23 + $0x170] sm:$0xff]   ;;  %v13019_v42 = vld [vmem:[#allocation25] ss:$0 sm:$0xff] }
 0x96b   :  { %v11136_v56 = vmax.f32 %v11129_v46, 0.0  ;;  %v11141_v22 = vmax.f32 %v11134_v41, 0.0  ;;  %v11135_v38 = vmax.f32 %v11128_v51, 0.0  ;;  %v11138_v26 = vmax.f32 %v11131_v11, 0.0 }
 0x96c   :  { %v11137_v1 = vmax.f32 %v11130_v29, 0.0  ;;  %v11140_v21 = vmax.f32 %v11133_v25, 0.0  ;;  %v11139_v9 = vmax.f32 %v16712_v8, 0.0 }
 0x96d   :  { %v11143_v53 = vpack.c.bf16 %v11136_v56, %v11136_v56  ;;  %v11148_v13 = vpack.c.bf16 %v11141_v22, %v11141_v22  ;;  %v11142_v19 = vpack.c.bf16 %v11135_v38, %v11135_v38  ;;  %v11145_v59 = vpack.c.bf16 %v11138_v26, %v11138_v26 }
 0x96e   :  { %v11144_v44 = vpack.c.bf16 %v11137_v1, %v11137_v1  ;;  %v11147_v3 = vpack.c.bf16 %v11140_v21, %v11140_v21  ;;  %v11146_v58 = vpack.c.bf16 %v11139_v9, %v11139_v9 }
 0x96f   :  { %11636 = vmatprep.mubr.bf16.mxu0 %v11143_v53  ;;  %13446 = vmatmul.mubr.bf16.vlgmr.msra.gmra.mrb[36].mxu1 %v11148_v13 }
 0x970   :  { %11637 = vmatmul.mubr.bf16.vlgmr.msra.gmra.mrb[48].mxu0 %v11142_v19 }
 0x971   :  { %13337 = vmatpush3.bf16.msra.mxu0 %v15384_v27  ;;  %11676 = vmatprep.mubr.bf16.mxu0 %v11145_v59 }
 0x972   :  { %13338 = vmatprep.subr.bf16.mxu0 %v15385_v4 }
 0x975   :  { %13339 = vmatpush3.bf16.msra.mxu0 %v15386_v60 }
 0x976   :  { %13340 = vmatprep.subr.bf16.mxu0 %v15387_v45 }
 0x979   :  { %13341 = vmatpush3.bf16.msra.mxu0 %v15388_v43 }
 0x97a   :  { %13342 = vmatprep.subr.bf16.mxu0 %v15389_v49 }
 0x97d   :  { %13343 = vmatpush3.bf16.msra.mxu0 %v15390_v50 }
 0x97e   :  { %13344 = vmatprep.subr.bf16.mxu0 %v15391_v15 }
 0x981   :  { %13345 = vmatpush3.bf16.msra.mxu0 %v15392_v12 }
 0x982   :  { %13346 = vmatprep.subr.bf16.mxu0 %v15393_v48 }
 0x985   :  { %13347 = vmatpush3.bf16.msra.mxu0 %v15394_v10 }
 0x986   :  { %13348 = vmatprep.subr.bf16.mxu0 %v15395_v55 }
 0x989   :  { %13349 = vmatpush3.bf16.msra.mxu0 %v15396_v57 }
 0x98a   :  { %13350 = vmatprep.subr.bf16.mxu0 %v15397_v17 }
 0x98d   :  { %13351 = vmatpush3.bf16.msra.mxu0 %v15398_v40 }
 0x98e   :  { %13358 = vmatprep.subr.bf16.mxu0 %v15399_v7 }
 0x990   :  { %11677 = vmatmul.mubr.bf16.vlgmr.msra.gmra.mrb[52].mxu0 %v11144_v44 }
 0x991   :  { %13359 = vmatpush3.bf16.msra.mxu0 %v15400_v0  ;;  %11716 = vmatprep.mubr.bf16.mxu0 %v11147_v3 }
 0x992   :  { %13360 = vmatprep.subr.bf16.mxu0 %v15401_v39 }
 0x995   :  { %13361 = vmatpush3.bf16.msra.mxu0 %v15402_v2 }
 0x996   :  { %13362 = vmatprep.subr.bf16.mxu0 %v15403_v20 }
 0x999   :  { %13363 = vmatpush3.bf16.msra.mxu0 %v15404_v34 }
 0x99a   :  { %13364 = vmatprep.subr.bf16.mxu0 %v15405_v14 }
 0x99d   :  { %13365 = vmatpush3.bf16.msra.mxu0 %v15406_v32 }
 0x99e   :  { %13366 = vmatprep.subr.bf16.mxu0 %v15407_v23 }
 0x9a1   :  { %13367 = vmatpush3.bf16.msra.mxu0 %v15408_v6 }
 0x9a2   :  { %13368 = vmatprep.subr.bf16.mxu0 %v15409_v16 }
 0x9a5   :  { %13369 = vmatpush3.bf16.msra.mxu0 %v15410_v61 }
 0x9a6   :  { %13370 = vmatprep.subr.bf16.mxu0 %v15411_v62 }
 0x9a9   :  { %13371 = vmatpush3.bf16.msra.mxu0 %v15412_v47 }
 0x9aa   :  { %13372 = vmatprep.subr.bf16.mxu0 %v15413_v5 }
 0x9ad   :  { %13373 = vmatpush3.bf16.msra.mxu0 %v15414_v33 }
 0x9b0   :  { %11717 = vmatmul.mubr.bf16.vlgmr.msra.gmra.mrb[56].mxu0 %v11146_v58 }
 0xa42   :  { %v11758_v18 = vpop.f32.mrb[36].mxu1 }
 0xa43   :  { %v13330_v54 = vpop.f32.mrb[48].mxu0  ;;  %v13447_v30 = vpop.f32.mrb[37].mxu1 }
 0xa44   :  { %v13331_v37 = vpop.f32.mrb[49].mxu0  ;;  %v11761_v24 = vpop.f32.mrb[38].mxu1 }
 0xa45   :  { %v13332_v31 = vadd.f32 %v13331_v37, %v13330_v54  ;;  %v13333_v36 = vpop.f32.mrb[50].mxu0  ;;  %v13448_v28 = vpop.f32.mrb[39].mxu1 }
 0xa46   :  { %v13334_v63 = vpop.f32.mrb[51].mxu0 }
 0xa47   :  { %v11639_v46 = vadd.f32 %v13332_v31, %v13019_v42 }
 0xa63   :  { %v13352_v52 = vpop.f32.mrb[52].mxu0 }
 0xa64   :  { %v13353_v35 = vpop.f32.mrb[53].mxu0 }
 0xa65   :  { %v13354_v41 = vadd.f32 %v13353_v35, %v13352_v52  ;;  %v13355_v51 = vpop.f32.mrb[54].mxu0 }
 0xa66   :  { %v13356_v11 = vpop.f32.mrb[55].mxu0 }
 0xa67   :  { %v11679_v29 = vadd.f32 %v13354_v41, %v11639_v46 }
 0xa83   :  { %v13374_v25 = vpop.f32.mrb[56].mxu0 }
 0xa84   :  { %v13375_v8 = vpop.f32.mrb[57].mxu0 }
 0xa85   :  { %v13376_v56 = vadd.f32 %v13375_v8, %v13374_v25  ;;  %v13377_v22 = vpop.f32.mrb[58].mxu0 }
 0xa86   :  { %v13378_v38 = vpop.f32.mrb[59].mxu0 }
 0xa87   :  { %v11719_v26 = vadd.f32 %v13376_v56, %v11679_v29 }
 0xa89   :  { %v11759_v53 = vadd.f32 %v11758_v18, %v11719_v26 }
 0xa8b   :  { %11764 = vst [vmem:[#allocation26] sm:$0xff] %v11759_v53 }
 0xa8c   :  { %15799 = shalt.err (!%p15796_p12)
}
 0xa8d   :  { %s16745_s4 = sld [smem:[#allocation36_spill]] }
 0xa93   :  { %s15800_s26 = scalar_lea.hbm %s16745_s4, 128 }
 0xa94   :  { %p15801_p13 = scmp.ne.s32.totalorder %s16745_s4, %s15800_s26  ;;  %p15804_p0 = scmp.lt.u32.totalorder %s15800_s26, %s16745_s4 }
 0xa96   :  { %p15806_p1 = pnand %p15804_p0, %p15801_p13 }
 0xa98   :  { %15809 = shalt.err (!%p15806_p1)
}
 0xa99   :  { %11774 = dma.vmem_to_hbm [thread:$0]  %s11772_s21, 128, %s16745_s4, [#allocation4]  }
 0xa9a   :  { %15826 = dma.done.wait [#allocation4], 128  }
 0xa9b   :  { %15827 = vsyncadd [#allocation4], 4294967168 }
 0xa9c   :  { %11778 = vsyncpa [#allocation3], 1 }
 0xa9d   :  { %11779 = vsyncpa [#allocation6], 1 }
 0xa9e   :  { %11780 = vsyncpa [#allocation9], 1 }
 0xa9f   :  { %11781 = vsyncpa [#allocation12], 1 }
 0xaa0   :  { %11782 = vsyncpa [#allocation15], 1 }
 0xaa1   :  { %11783 = vsyncpa [#allocation18], 1 }
 0xaa2   :  { %11784 = vsyncpa [#allocation21], 1 }
 0xaa3   :  { %11785 = vsyncpa [#allocation24], 1 }
 0xaa4   :  { %11786 = vsyncpa [#allocation4], 1 }

</bundles_post_ra>
